<compile_context>
chip_gen: v7x
topology: tpu7x:2x2x1
jax: 0.10.0
libtpu: 0.0.40
codegen_flags: <defaults>
</compile_context>

<pallas_src>
import jax
import jax.numpy as jnp
import numpy as np
from jax import lax
from jax.experimental import pallas as pl
from jax.experimental.pallas import tpu as pltpu

# ---------------- configuration (small, ANI-like) ----------------
NUM_SPECIES = 4            # e.g. H, C, N, O
AEV_DIM = 128              # AEV feature size (lane-aligned)
H1, H2, H3 = 128, 64, 32   # hidden widths of the atomic MLP
NUM_ATOMS = 512
TILE_M = 256               # atoms per grid step (>= 2 grid steps -> feeds 2 TCs on v7x)
CELU_ALPHA = 0.1           # ANI uses CELU(alpha=0.1)
INV_ALPHA = 1.0 / CELU_ALPHA


def _celu(v):
    # CELU(x) = max(0,x) + min(0, alpha*(exp(x/alpha)-1))
    # Clamp the exp argument so the discarded branch never produces inf.
    neg = CELU_ALPHA * (jnp.exp(jnp.minimum(v, 0.0) * INV_ALPHA) - 1.0)
    return jnp.where(v > 0, v, neg)


# ---------------- Pallas kernel ----------------
def ani_interaction_kernel(species_ref, aev_ref,
                           w1c_ref, b1c_ref,     # fused layer-1 weights/bias
                           w2_ref, b2_ref,
                           w3_ref, b3_ref,
                           w4v_ref, b4_ref,
                           out_ref):
    x = aev_ref[...]                              # (TILE_M, AEV_DIM) bf16
    spec = species_ref[...]                       # (TILE_M, 1) int32

    # One lane-dense matmul for all species' first layers: N = NUM_SPECIES*H1 = 512.
    h1_cat = jnp.dot(x, w1c_ref[...], preferred_element_type=jnp.float32)
    h1_cat = _celu(h1_cat + b1c_ref[...])         # (TILE_M, NUM_SPECIES*H1) f32

    # Per-atom species one-hot mask, computed once per tile (f32 for the MAC below).
    sp_iota = lax.broadcasted_iota(jnp.int32, (x.shape[0], NUM_SPECIES), 1)
    onehot = (spec == sp_iota).astype(jnp.float32)          # (TILE_M, NUM_SPECIES)

    acc = jnp.zeros((x.shape[0], 1), jnp.float32)

    # Static loop over species for the small layers; select per-atom by mask
    # (dense replacement for index_select / masked scatter).
    for s in range(NUM_SPECIES):
        h1_s = h1_cat[:, s * H1:(s + 1) * H1]     # static 128-aligned lane slice (free)
        h2 = _celu(jnp.dot(h1_s.astype(jnp.bfloat16), w2_ref[s],
                           preferred_element_type=jnp.float32) + b2_ref[s])
        h3 = _celu(jnp.dot(h2.astype(jnp.bfloat16), w3_ref[s],
                           preferred_element_type=jnp.float32) + b3_ref[s])
        # Final Linear(H3 -> 1): VPU multiply + XLU lane-reduce instead of an N=1 matmul.
        e = jnp.sum(h3 * w4v_ref[s], axis=-1, keepdims=True) + b4_ref[s]   # (TILE_M, 1)
        acc = acc + onehot[:, s:s + 1] * e

    out_ref[...] = acc


def ani_interaction(species, aev, params):
    """species: (N,) int32, aev: (N, AEV_DIM) f32 -> per-atom energies (N,) f32."""
    n = species.shape[0]
    assert n % TILE_M == 0
    w1, b1, w2, b2, w3, b3, w4, b4 = params

    species2d = species.reshape(n, 1).astype(jnp.int32)
    aev_bf16 = aev.astype(jnp.bfloat16)

    # Pack layer-1 weights of all species along the output (lane) dim:
    #   W1_cat[k, s*H1 + j] = w1[s, k, j]
    w1_cat = jnp.transpose(w1, (1, 0, 2)).reshape(AEV_DIM, NUM_SPECIES * H1)
    w1_cat = w1_cat.astype(jnp.bfloat16)
    b1_cat = jnp.transpose(b1, (1, 0, 2)).reshape(1, NUM_SPECIES * H1).astype(jnp.float32)

    w2_bf = w2.astype(jnp.bfloat16)
    w3_bf = w3.astype(jnp.bfloat16)
    # Final-layer weight as a (NUM_SPECIES, 1, H3) row vector for the VPU reduce (kept f32).
    w4_vec = jnp.transpose(w4, (0, 2, 1)).astype(jnp.float32)

    full2 = lambda i: (0, 0)
    full3 = lambda i: (0, 0, 0)
    grid = (n // TILE_M,)

    out = pl.pallas_call(
        ani_interaction_kernel,
        out_shape=jax.ShapeDtypeStruct((n, 1), jnp.float32),
        grid_spec=pltpu.PrefetchScalarGridSpec(
            num_scalar_prefetch=0,
            grid=grid,
            in_specs=[
                pl.BlockSpec((TILE_M, 1), lambda i: (i, 0)),              # species
                pl.BlockSpec((TILE_M, AEV_DIM), lambda i: (i, 0)),        # aev (bf16)
                pl.BlockSpec((AEV_DIM, NUM_SPECIES * H1), full2),         # W1_cat (bf16)
                pl.BlockSpec((1, NUM_SPECIES * H1), full2),               # b1_cat
                pl.BlockSpec((NUM_SPECIES, H1, H2), full3),               # W2 (bf16)
                pl.BlockSpec((NUM_SPECIES, 1, H2), full3),                # b2
                pl.BlockSpec((NUM_SPECIES, H2, H3), full3),               # W3 (bf16)
                pl.BlockSpec((NUM_SPECIES, 1, H3), full3),                # b3
                pl.BlockSpec((NUM_SPECIES, 1, H3), full3),                # w4 vector (f32)
                pl.BlockSpec((NUM_SPECIES, 1, 1), full3),                 # b4
            ],
            out_specs=pl.BlockSpec((TILE_M, 1), lambda i: (i, 0)),
        ),
        compiler_params=pltpu.CompilerParams(
            dimension_semantics=("parallel",)),
    )(species2d, aev_bf16, w1_cat, b1_cat, w2_bf, b2, w3_bf, b3, w4_vec, b4)

    return out.reshape(n)  # output.view_as(species)


# ---------------- pure-JAX reference (same bf16-operand / f32-accumulate math) ----------------
def ani_interaction_ref(species, aev, params):
    w1, b1, w2, b2, w3, b3, w4, b4 = params
    x = aev.astype(jnp.bfloat16)
    out = jnp.zeros((aev.shape[0],), jnp.float32)
    for s in range(NUM_SPECIES):
        h = _celu(jnp.dot(x, w1[s].astype(jnp.bfloat16),
                          preferred_element_type=jnp.float32) + b1[s, 0])
        h = _celu(jnp.dot(h.astype(jnp.bfloat16), w2[s].astype(jnp.bfloat16),
                          preferred_element_type=jnp.float32) + b2[s, 0])
        h = _celu(jnp.dot(h.astype(jnp.bfloat16), w3[s].astype(jnp.bfloat16),
                          preferred_element_type=jnp.float32) + b3[s, 0])
        e = jnp.sum(h * w4[s, :, 0], axis=-1) + b4[s, 0, 0]
        out = jnp.where(species == s, e, out)
    return out


# ---------------- deterministic parameter init ----------------
def init_params(key):
    keys = jax.random.split(key, 8)
    scale = lambda fan_in: 1.0 / np.sqrt(fan_in)
    w1 = jax.random.normal(keys[0], (NUM_SPECIES, AEV_DIM, H1), jnp.float32) * scale(AEV_DIM)
    b1 = jax.random.normal(keys[1], (NUM_SPECIES, 1, H1), jnp.float32) * 0.01
    w2 = jax.random.normal(keys[2], (NUM_SPECIES, H1, H2), jnp.float32) * scale(H1)
    b2 = jax.random.normal(keys[3], (NUM_SPECIES, 1, H2), jnp.float32) * 0.01
    w3 = jax.random.normal(keys[4], (NUM_SPECIES, H2, H3), jnp.float32) * scale(H2)
    b3 = jax.random.normal(keys[5], (NUM_SPECIES, 1, H3), jnp.float32) * 0.01
    w4 = jax.random.normal(keys[6], (NUM_SPECIES, H3, 1), jnp.float32) * scale(H3)
    b4 = jax.random.normal(keys[7], (NUM_SPECIES, 1, 1), jnp.float32) * 0.01
    return (w1, b1, w2, b2, w3, b3, w4, b4)


if __name__ == "__main__":
    key = jax.random.PRNGKey(0)
    k_sp, k_aev, k_par = jax.random.split(key, 3)

    species = jax.random.randint(k_sp, (NUM_ATOMS,), 0, NUM_SPECIES, dtype=jnp.int32)
    aev = jax.random.normal(k_aev, (NUM_ATOMS, AEV_DIM), jnp.float32)
    params = init_params(k_par)

    energies = jax.block_until_ready(ani_interaction(species, aev, params))
    ref = jax.block_until_ready(ani_interaction_ref(species, aev, params))

    # bf16 MXU operands with f32 accumulation: only accumulation-order rounding differs
    # between the kernel and the (identically-cast) reference.
    np.testing.assert_allclose(np.asarray(energies), np.asarray(ref), rtol=2e-3, atol=2e-3)
    print("KERNEL_OK")
</pallas_src>

<mosaic_0001>
module attributes {stable_mosaic.version = 11 : i64} {
  func.func @ani_interaction_kernel(%arg0: i32, %arg1: memref<256x1xi32, #tpu.memory_space<vmem>>, %arg2: memref<256x128xbf16, #tpu.memory_space<vmem>>, %arg3: memref<128x512xbf16, #tpu.memory_space<vmem>>, %arg4: memref<1x512xf32, #tpu.memory_space<vmem>>, %arg5: memref<4x128x64xbf16, #tpu.memory_space<vmem>>, %arg6: memref<4x1x64xf32, #tpu.memory_space<vmem>>, %arg7: memref<4x64x32xbf16, #tpu.memory_space<vmem>>, %arg8: memref<4x1x32xf32, #tpu.memory_space<vmem>>, %arg9: memref<4x1x32xf32, #tpu.memory_space<vmem>>, %arg10: memref<4x1x1xf32, #tpu.memory_space<vmem>>, %arg11: memref<256x1xf32, #tpu.memory_space<vmem>>) attributes {dimension_semantics = [#tpu.dimension_semantics<parallel>], iteration_bounds = array<i64: 2>, scalar_prefetch = 0 : i64, scratch_operands = 0 : i64, tpu.core_type = #tpu.core_type<tc>, window_params = [{transform_indices = @transform_0, window_bounds = array<i64: 256, 1>}, {transform_indices = @transform_1, window_bounds = array<i64: 256, 128>}, {pipeline_mode = #tpu.pipeline_mode<synchronous>, transform_indices = @transform_2, window_bounds = array<i64: 128, 512>}, {pipeline_mode = #tpu.pipeline_mode<synchronous>, transform_indices = @transform_3, window_bounds = array<i64: 1, 512>}, {pipeline_mode = #tpu.pipeline_mode<synchronous>, transform_indices = @transform_4, window_bounds = array<i64: 4, 128, 64>}, {pipeline_mode = #tpu.pipeline_mode<synchronous>, transform_indices = @transform_5, window_bounds = array<i64: 4, 1, 64>}, {pipeline_mode = #tpu.pipeline_mode<synchronous>, transform_indices = @transform_6, window_bounds = array<i64: 4, 64, 32>}, {pipeline_mode = #tpu.pipeline_mode<synchronous>, transform_indices = @transform_7, window_bounds = array<i64: 4, 1, 32>}, {pipeline_mode = #tpu.pipeline_mode<synchronous>, transform_indices = @transform_8, window_bounds = array<i64: 4, 1, 32>}, {pipeline_mode = #tpu.pipeline_mode<synchronous>, transform_indices = @transform_9, window_bounds = array<i64: 4, 1, 1>}, {transform_indices = @transform_10, window_bounds = array<i64: 256, 1>}]} {
    %c0 = arith.constant 0 : index
    %c0_0 = arith.constant 0 : index
    %0 = vector.load %arg2[%c0, %c0_0] : memref<256x128xbf16, #tpu.memory_space<vmem>>, vector<256x128xbf16>
    %c0_1 = arith.constant 0 : index
    %c0_2 = arith.constant 0 : index
    %1 = vector.load %arg1[%c0_1, %c0_2] : memref<256x1xi32, #tpu.memory_space<vmem>>, vector<256x1xi32>
    %c0_3 = arith.constant 0 : index
    %c0_4 = arith.constant 0 : index
    %2 = vector.load %arg3[%c0_3, %c0_4] : memref<128x512xbf16, #tpu.memory_space<vmem>>, vector<128x512xbf16>
    %cst = arith.constant dense<0.000000e+00> : vector<256x512xf32>
    %3 = tpu.matmul %0, %2, %cst {dimension_numbers = #tpu.dot_dimension_numbers<[1], [0], [0], [1], [0, 0, 1, 1], [], []>} : vector<256x128xbf16>, vector<128x512xbf16>, vector<256x512xf32> -> vector<256x512xf32>
    %c0_5 = arith.constant 0 : index
    %c0_6 = arith.constant 0 : index
    %4 = vector.load %arg4[%c0_5, %c0_6] : memref<1x512xf32, #tpu.memory_space<vmem>>, vector<1x512xf32>
    %5 = vector.broadcast %4 : vector<1x512xf32> to vector<256x512xf32>
    %6 = arith.addf %3, %5 : vector<256x512xf32>
    %cst_7 = arith.constant 0.000000e+00 : f32
    %7 = vector.broadcast %cst_7 : f32 to vector<256x512xf32>
    %8 = arith.minimumf %6, %7 : vector<256x512xf32>
    %cst_8 = arith.constant 1.000000e+01 : f32
    %9 = vector.broadcast %cst_8 : f32 to vector<256x512xf32>
    %10 = arith.mulf %8, %9 : vector<256x512xf32>
    %11 = math.exp %10 : vector<256x512xf32>
    %cst_9 = arith.constant 1.000000e+00 : f32
    %12 = vector.broadcast %cst_9 : f32 to vector<256x512xf32>
    %13 = arith.subf %11, %12 : vector<256x512xf32>
    %cst_10 = arith.constant 1.000000e-01 : f32
    %14 = vector.broadcast %cst_10 : f32 to vector<256x512xf32>
    %15 = arith.mulf %14, %13 : vector<256x512xf32>
    %cst_11 = arith.constant 0.000000e+00 : f32
    %16 = vector.broadcast %cst_11 : f32 to vector<256x512xf32>
    %17 = arith.cmpf ogt, %6, %16 : vector<256x512xf32>
    %18 = arith.select %17, %6, %15 : vector<256x512xi1>, vector<256x512xf32>
    %19 = tpu.iota {dimensions = array<i32: 1>} : vector<256x4xi32>
    %20 = vector.broadcast %1 : vector<256x1xi32> to vector<256x4xi32>
    %21 = arith.cmpi eq, %20, %19 : vector<256x4xi32>
    %22 = arith.extui %21 : vector<256x4xi1> to vector<256x4xi32>
    %23 = arith.sitofp %22 : vector<256x4xi32> to vector<256x4xf32>
    %cst_12 = arith.constant 0.000000e+00 : f32
    %24 = vector.broadcast %cst_12 : f32 to vector<256x1xf32>
    %25 = vector.extract_strided_slice %18 {offsets = [0, 0], sizes = [256, 128], strides = [1, 1]} : vector<256x512xf32> to vector<256x128xf32>
    %26 = arith.truncf %25 : vector<256x128xf32> to vector<256x128xbf16>
    %c0_13 = arith.constant 0 : index
    %c0_14 = arith.constant 0 : index
    %c0_15 = arith.constant 0 : index
    %27 = vector.load %arg5[%c0_13, %c0_14, %c0_15] : memref<4x128x64xbf16, #tpu.memory_space<vmem>>, vector<1x128x64xbf16>
    %28 = vector.shape_cast %27 : vector<1x128x64xbf16> to vector<128x64xbf16>
    %cst_16 = arith.constant dense<0.000000e+00> : vector<256x64xf32>
    %29 = tpu.matmul %26, %28, %cst_16 {dimension_numbers = #tpu.dot_dimension_numbers<[1], [0], [0], [1], [0, 0, 1, 1], [], []>} : vector<256x128xbf16>, vector<128x64xbf16>, vector<256x64xf32> -> vector<256x64xf32>
    %c0_17 = arith.constant 0 : index
    %c0_18 = arith.constant 0 : index
    %c0_19 = arith.constant 0 : index
    %30 = vector.load %arg6[%c0_17, %c0_18, %c0_19] : memref<4x1x64xf32, #tpu.memory_space<vmem>>, vector<1x1x64xf32>
    %31 = vector.shape_cast %30 : vector<1x1x64xf32> to vector<1x64xf32>
    %32 = vector.broadcast %31 : vector<1x64xf32> to vector<256x64xf32>
    %33 = arith.addf %29, %32 : vector<256x64xf32>
    %cst_20 = arith.constant 0.000000e+00 : f32
    %34 = vector.broadcast %cst_20 : f32 to vector<256x64xf32>
    %35 = arith.minimumf %33, %34 : vector<256x64xf32>
    %cst_21 = arith.constant 1.000000e+01 : f32
    %36 = vector.broadcast %cst_21 : f32 to vector<256x64xf32>
    %37 = arith.mulf %35, %36 : vector<256x64xf32>
    %38 = math.exp %37 : vector<256x64xf32>
    %cst_22 = arith.constant 1.000000e+00 : f32
    %39 = vector.broadcast %cst_22 : f32 to vector<256x64xf32>
    %40 = arith.subf %38, %39 : vector<256x64xf32>
    %cst_23 = arith.constant 1.000000e-01 : f32
    %41 = vector.broadcast %cst_23 : f32 to vector<256x64xf32>
    %42 = arith.mulf %41, %40 : vector<256x64xf32>
    %cst_24 = arith.constant 0.000000e+00 : f32
    %43 = vector.broadcast %cst_24 : f32 to vector<256x64xf32>
    %44 = arith.cmpf ogt, %33, %43 : vector<256x64xf32>
    %45 = arith.select %44, %33, %42 : vector<256x64xi1>, vector<256x64xf32>
    %46 = arith.truncf %45 : vector<256x64xf32> to vector<256x64xbf16>
    %c0_25 = arith.constant 0 : index
    %c0_26 = arith.constant 0 : index
    %c0_27 = arith.constant 0 : index
    %47 = vector.load %arg7[%c0_25, %c0_26, %c0_27] : memref<4x64x32xbf16, #tpu.memory_space<vmem>>, vector<1x64x32xbf16>
    %48 = vector.shape_cast %47 : vector<1x64x32xbf16> to vector<64x32xbf16>
    %cst_28 = arith.constant dense<0.000000e+00> : vector<256x32xf32>
    %49 = tpu.matmul %46, %48, %cst_28 {dimension_numbers = #tpu.dot_dimension_numbers<[1], [0], [0], [1], [0, 0, 1, 1], [], []>} : vector<256x64xbf16>, vector<64x32xbf16>, vector<256x32xf32> -> vector<256x32xf32>
    %c0_29 = arith.constant 0 : index
    %c0_30 = arith.constant 0 : index
    %c0_31 = arith.constant 0 : index
    %50 = vector.load %arg8[%c0_29, %c0_30, %c0_31] : memref<4x1x32xf32, #tpu.memory_space<vmem>>, vector<1x1x32xf32>
    %51 = vector.shape_cast %50 : vector<1x1x32xf32> to vector<1x32xf32>
    %52 = vector.broadcast %51 : vector<1x32xf32> to vector<256x32xf32>
    %53 = arith.addf %49, %52 : vector<256x32xf32>
    %cst_32 = arith.constant 0.000000e+00 : f32
    %54 = vector.broadcast %cst_32 : f32 to vector<256x32xf32>
    %55 = arith.minimumf %53, %54 : vector<256x32xf32>
    %cst_33 = arith.constant 1.000000e+01 : f32
    %56 = vector.broadcast %cst_33 : f32 to vector<256x32xf32>
    %57 = arith.mulf %55, %56 : vector<256x32xf32>
    %58 = math.exp %57 : vector<256x32xf32>
    %cst_34 = arith.constant 1.000000e+00 : f32
    %59 = vector.broadcast %cst_34 : f32 to vector<256x32xf32>
    %60 = arith.subf %58, %59 : vector<256x32xf32>
    %cst_35 = arith.constant 1.000000e-01 : f32
    %61 = vector.broadcast %cst_35 : f32 to vector<256x32xf32>
    %62 = arith.mulf %61, %60 : vector<256x32xf32>
    %cst_36 = arith.constant 0.000000e+00 : f32
    %63 = vector.broadcast %cst_36 : f32 to vector<256x32xf32>
    %64 = arith.cmpf ogt, %53, %63 : vector<256x32xf32>
    %65 = arith.select %64, %53, %62 : vector<256x32xi1>, vector<256x32xf32>
    %c0_37 = arith.constant 0 : index
    %c0_38 = arith.constant 0 : index
    %c0_39 = arith.constant 0 : index
    %66 = vector.load %arg9[%c0_37, %c0_38, %c0_39] : memref<4x1x32xf32, #tpu.memory_space<vmem>>, vector<1x1x32xf32>
    %67 = vector.shape_cast %66 : vector<1x1x32xf32> to vector<1x32xf32>
    %68 = vector.broadcast %67 : vector<1x32xf32> to vector<256x32xf32>
    %69 = arith.mulf %65, %68 : vector<256x32xf32>
    %cst_40 = arith.constant dense<0.000000e+00> : vector<256xf32>
    %70 = vector.multi_reduction <add>, %69, %cst_40 [1] : vector<256x32xf32> to vector<256xf32>
    %71 = vector.shape_cast %70 : vector<256xf32> to vector<256x1xf32>
    %c0_41 = arith.constant 0 : index
    %c0_42 = arith.constant 0 : index
    %c0_43 = arith.constant 0 : index
    %72 = vector.load %arg10[%c0_41, %c0_42, %c0_43] : memref<4x1x1xf32, #tpu.memory_space<vmem>>, vector<1x1x1xf32>
    %73 = vector.shape_cast %72 : vector<1x1x1xf32> to vector<1x1xf32>
    %74 = vector.broadcast %73 : vector<1x1xf32> to vector<256x1xf32>
    %75 = arith.addf %71, %74 : vector<256x1xf32>
    %76 = vector.extract_strided_slice %23 {offsets = [0, 0], sizes = [256, 1], strides = [1, 1]} : vector<256x4xf32> to vector<256x1xf32>
    %77 = arith.mulf %76, %75 : vector<256x1xf32>
    %78 = arith.addf %24, %77 : vector<256x1xf32>
    %79 = vector.extract_strided_slice %18 {offsets = [0, 128], sizes = [256, 128], strides = [1, 1]} : vector<256x512xf32> to vector<256x128xf32>
    %80 = arith.truncf %79 : vector<256x128xf32> to vector<256x128xbf16>
    %c1 = arith.constant 1 : index
    %c0_44 = arith.constant 0 : index
    %c0_45 = arith.constant 0 : index
    %81 = vector.load %arg5[%c1, %c0_44, %c0_45] : memref<4x128x64xbf16, #tpu.memory_space<vmem>>, vector<1x128x64xbf16>
    %82 = vector.shape_cast %81 : vector<1x128x64xbf16> to vector<128x64xbf16>
    %cst_46 = arith.constant dense<0.000000e+00> : vector<256x64xf32>
    %83 = tpu.matmul %80, %82, %cst_46 {dimension_numbers = #tpu.dot_dimension_numbers<[1], [0], [0], [1], [0, 0, 1, 1], [], []>} : vector<256x128xbf16>, vector<128x64xbf16>, vector<256x64xf32> -> vector<256x64xf32>
    %c1_47 = arith.constant 1 : index
    %c0_48 = arith.constant 0 : index
    %c0_49 = arith.constant 0 : index
    %84 = vector.load %arg6[%c1_47, %c0_48, %c0_49] : memref<4x1x64xf32, #tpu.memory_space<vmem>>, vector<1x1x64xf32>
    %85 = vector.shape_cast %84 : vector<1x1x64xf32> to vector<1x64xf32>
    %86 = vector.broadcast %85 : vector<1x64xf32> to vector<256x64xf32>
    %87 = arith.addf %83, %86 : vector<256x64xf32>
    %cst_50 = arith.constant 0.000000e+00 : f32
    %88 = vector.broadcast %cst_50 : f32 to vector<256x64xf32>
    %89 = arith.minimumf %87, %88 : vector<256x64xf32>
    %cst_51 = arith.constant 1.000000e+01 : f32
    %90 = vector.broadcast %cst_51 : f32 to vector<256x64xf32>
    %91 = arith.mulf %89, %90 : vector<256x64xf32>
    %92 = math.exp %91 : vector<256x64xf32>
    %cst_52 = arith.constant 1.000000e+00 : f32
    %93 = vector.broadcast %cst_52 : f32 to vector<256x64xf32>
    %94 = arith.subf %92, %93 : vector<256x64xf32>
    %cst_53 = arith.constant 1.000000e-01 : f32
    %95 = vector.broadcast %cst_53 : f32 to vector<256x64xf32>
    %96 = arith.mulf %95, %94 : vector<256x64xf32>
    %cst_54 = arith.constant 0.000000e+00 : f32
    %97 = vector.broadcast %cst_54 : f32 to vector<256x64xf32>
    %98 = arith.cmpf ogt, %87, %97 : vector<256x64xf32>
    %99 = arith.select %98, %87, %96 : vector<256x64xi1>, vector<256x64xf32>
    %100 = arith.truncf %99 : vector<256x64xf32> to vector<256x64xbf16>
    %c1_55 = arith.constant 1 : index
    %c0_56 = arith.constant 0 : index
    %c0_57 = arith.constant 0 : index
    %101 = vector.load %arg7[%c1_55, %c0_56, %c0_57] : memref<4x64x32xbf16, #tpu.memory_space<vmem>>, vector<1x64x32xbf16>
    %102 = vector.shape_cast %101 : vector<1x64x32xbf16> to vector<64x32xbf16>
    %cst_58 = arith.constant dense<0.000000e+00> : vector<256x32xf32>
    %103 = tpu.matmul %100, %102, %cst_58 {dimension_numbers = #tpu.dot_dimension_numbers<[1], [0], [0], [1], [0, 0, 1, 1], [], []>} : vector<256x64xbf16>, vector<64x32xbf16>, vector<256x32xf32> -> vector<256x32xf32>
    %c1_59 = arith.constant 1 : index
    %c0_60 = arith.constant 0 : index
    %c0_61 = arith.constant 0 : index
    %104 = vector.load %arg8[%c1_59, %c0_60, %c0_61] : memref<4x1x32xf32, #tpu.memory_space<vmem>>, vector<1x1x32xf32>
    %105 = vector.shape_cast %104 : vector<1x1x32xf32> to vector<1x32xf32>
    %106 = vector.broadcast %105 : vector<1x32xf32> to vector<256x32xf32>
    %107 = arith.addf %103, %106 : vector<256x32xf32>
    %cst_62 = arith.constant 0.000000e+00 : f32
    %108 = vector.broadcast %cst_62 : f32 to vector<256x32xf32>
    %109 = arith.minimumf %107, %108 : vector<256x32xf32>
    %cst_63 = arith.constant 1.000000e+01 : f32
    %110 = vector.broadcast %cst_63 : f32 to vector<256x32xf32>
    %111 = arith.mulf %109, %110 : vector<256x32xf32>
    %112 = math.exp %111 : vector<256x32xf32>
    %cst_64 = arith.constant 1.000000e+00 : f32
    %113 = vector.broadcast %cst_64 : f32 to vector<256x32xf32>
    %114 = arith.subf %112, %113 : vector<256x32xf32>
    %cst_65 = arith.constant 1.000000e-01 : f32
    %115 = vector.broadcast %cst_65 : f32 to vector<256x32xf32>
    %116 = arith.mulf %115, %114 : vector<256x32xf32>
    %cst_66 = arith.constant 0.000000e+00 : f32
    %117 = vector.broadcast %cst_66 : f32 to vector<256x32xf32>
    %118 = arith.cmpf ogt, %107, %117 : vector<256x32xf32>
    %119 = arith.select %118, %107, %116 : vector<256x32xi1>, vector<256x32xf32>
    %c1_67 = arith.constant 1 : index
    %c0_68 = arith.constant 0 : index
    %c0_69 = arith.constant 0 : index
    %120 = vector.load %arg9[%c1_67, %c0_68, %c0_69] : memref<4x1x32xf32, #tpu.memory_space<vmem>>, vector<1x1x32xf32>
    %121 = vector.shape_cast %120 : vector<1x1x32xf32> to vector<1x32xf32>
    %122 = vector.broadcast %121 : vector<1x32xf32> to vector<256x32xf32>
    %123 = arith.mulf %119, %122 : vector<256x32xf32>
    %cst_70 = arith.constant dense<0.000000e+00> : vector<256xf32>
    %124 = vector.multi_reduction <add>, %123, %cst_70 [1] : vector<256x32xf32> to vector<256xf32>
    %125 = vector.shape_cast %124 : vector<256xf32> to vector<256x1xf32>
    %c1_71 = arith.constant 1 : index
    %c0_72 = arith.constant 0 : index
    %c0_73 = arith.constant 0 : index
    %126 = vector.load %arg10[%c1_71, %c0_72, %c0_73] : memref<4x1x1xf32, #tpu.memory_space<vmem>>, vector<1x1x1xf32>
    %127 = vector.shape_cast %126 : vector<1x1x1xf32> to vector<1x1xf32>
    %128 = vector.broadcast %127 : vector<1x1xf32> to vector<256x1xf32>
    %129 = arith.addf %125, %128 : vector<256x1xf32>
    %130 = vector.extract_strided_slice %23 {offsets = [0, 1], sizes = [256, 1], strides = [1, 1]} : vector<256x4xf32> to vector<256x1xf32>
    %131 = arith.mulf %130, %129 : vector<256x1xf32>
    %132 = arith.addf %78, %131 : vector<256x1xf32>
    %133 = vector.extract_strided_slice %18 {offsets = [0, 256], sizes = [256, 128], strides = [1, 1]} : vector<256x512xf32> to vector<256x128xf32>
    %134 = arith.truncf %133 : vector<256x128xf32> to vector<256x128xbf16>
    %c2 = arith.constant 2 : index
    %c0_74 = arith.constant 0 : index
    %c0_75 = arith.constant 0 : index
    %135 = vector.load %arg5[%c2, %c0_74, %c0_75] : memref<4x128x64xbf16, #tpu.memory_space<vmem>>, vector<1x128x64xbf16>
    %136 = vector.shape_cast %135 : vector<1x128x64xbf16> to vector<128x64xbf16>
    %cst_76 = arith.constant dense<0.000000e+00> : vector<256x64xf32>
    %137 = tpu.matmul %134, %136, %cst_76 {dimension_numbers = #tpu.dot_dimension_numbers<[1], [0], [0], [1], [0, 0, 1, 1], [], []>} : vector<256x128xbf16>, vector<128x64xbf16>, vector<256x64xf32> -> vector<256x64xf32>
    %c2_77 = arith.constant 2 : index
    %c0_78 = arith.constant 0 : index
    %c0_79 = arith.constant 0 : index
    %138 = vector.load %arg6[%c2_77, %c0_78, %c0_79] : memref<4x1x64xf32, #tpu.memory_space<vmem>>, vector<1x1x64xf32>
    %139 = vector.shape_cast %138 : vector<1x1x64xf32> to vector<1x64xf32>
    %140 = vector.broadcast %139 : vector<1x64xf32> to vector<256x64xf32>
    %141 = arith.addf %137, %140 : vector<256x64xf32>
    %cst_80 = arith.constant 0.000000e+00 : f32
    %142 = vector.broadcast %cst_80 : f32 to vector<256x64xf32>
    %143 = arith.minimumf %141, %142 : vector<256x64xf32>
    %cst_81 = arith.constant 1.000000e+01 : f32
    %144 = vector.broadcast %cst_81 : f32 to vector<256x64xf32>
    %145 = arith.mulf %143, %144 : vector<256x64xf32>
    %146 = math.exp %145 : vector<256x64xf32>
    %cst_82 = arith.constant 1.000000e+00 : f32
    %147 = vector.broadcast %cst_82 : f32 to vector<256x64xf32>
    %148 = arith.subf %146, %147 : vector<256x64xf32>
    %cst_83 = arith.constant 1.000000e-01 : f32
    %149 = vector.broadcast %cst_83 : f32 to vector<256x64xf32>
    %150 = arith.mulf %149, %148 : vector<256x64xf32>
    %cst_84 = arith.constant 0.000000e+00 : f32
    %151 = vector.broadcast %cst_84 : f32 to vector<256x64xf32>
    %152 = arith.cmpf ogt, %141, %151 : vector<256x64xf32>
    %153 = arith.select %152, %141, %150 : vector<256x64xi1>, vector<256x64xf32>
    %154 = arith.truncf %153 : vector<256x64xf32> to vector<256x64xbf16>
    %c2_85 = arith.constant 2 : index
    %c0_86 = arith.constant 0 : index
    %c0_87 = arith.constant 0 : index
    %155 = vector.load %arg7[%c2_85, %c0_86, %c0_87] : memref<4x64x32xbf16, #tpu.memory_space<vmem>>, vector<1x64x32xbf16>
    %156 = vector.shape_cast %155 : vector<1x64x32xbf16> to vector<64x32xbf16>
    %cst_88 = arith.constant dense<0.000000e+00> : vector<256x32xf32>
    %157 = tpu.matmul %154, %156, %cst_88 {dimension_numbers = #tpu.dot_dimension_numbers<[1], [0], [0], [1], [0, 0, 1, 1], [], []>} : vector<256x64xbf16>, vector<64x32xbf16>, vector<256x32xf32> -> vector<256x32xf32>
    %c2_89 = arith.constant 2 : index
    %c0_90 = arith.constant 0 : index
    %c0_91 = arith.constant 0 : index
    %158 = vector.load %arg8[%c2_89, %c0_90, %c0_91] : memref<4x1x32xf32, #tpu.memory_space<vmem>>, vector<1x1x32xf32>
    %159 = vector.shape_cast %158 : vector<1x1x32xf32> to vector<1x32xf32>
    %160 = vector.broadcast %159 : vector<1x32xf32> to vector<256x32xf32>
    %161 = arith.addf %157, %160 : vector<256x32xf32>
    %cst_92 = arith.constant 0.000000e+00 : f32
    %162 = vector.broadcast %cst_92 : f32 to vector<256x32xf32>
    %163 = arith.minimumf %161, %162 : vector<256x32xf32>
    %cst_93 = arith.constant 1.000000e+01 : f32
    %164 = vector.broadcast %cst_93 : f32 to vector<256x32xf32>
    %165 = arith.mulf %163, %164 : vector<256x32xf32>
    %166 = math.exp %165 : vector<256x32xf32>
    %cst_94 = arith.constant 1.000000e+00 : f32
    %167 = vector.broadcast %cst_94 : f32 to vector<256x32xf32>
    %168 = arith.subf %166, %167 : vector<256x32xf32>
    %cst_95 = arith.constant 1.000000e-01 : f32
    %169 = vector.broadcast %cst_95 : f32 to vector<256x32xf32>
    %170 = arith.mulf %169, %168 : vector<256x32xf32>
    %cst_96 = arith.constant 0.000000e+00 : f32
    %171 = vector.broadcast %cst_96 : f32 to vector<256x32xf32>
    %172 = arith.cmpf ogt, %161, %171 : vector<256x32xf32>
    %173 = arith.select %172, %161, %170 : vector<256x32xi1>, vector<256x32xf32>
    %c2_97 = arith.constant 2 : index
    %c0_98 = arith.constant 0 : index
    %c0_99 = arith.constant 0 : index
    %174 = vector.load %arg9[%c2_97, %c0_98, %c0_99] : memref<4x1x32xf32, #tpu.memory_space<vmem>>, vector<1x1x32xf32>
    %175 = vector.shape_cast %174 : vector<1x1x32xf32> to vector<1x32xf32>
    %176 = vector.broadcast %175 : vector<1x32xf32> to vector<256x32xf32>
    %177 = arith.mulf %173, %176 : vector<256x32xf32>
    %cst_100 = arith.constant dense<0.000000e+00> : vector<256xf32>
    %178 = vector.multi_reduction <add>, %177, %cst_100 [1] : vector<256x32xf32> to vector<256xf32>
    %179 = vector.shape_cast %178 : vector<256xf32> to vector<256x1xf32>
    %c2_101 = arith.constant 2 : index
    %c0_102 = arith.constant 0 : index
    %c0_103 = arith.constant 0 : index
    %180 = vector.load %arg10[%c2_101, %c0_102, %c0_103] : memref<4x1x1xf32, #tpu.memory_space<vmem>>, vector<1x1x1xf32>
    %181 = vector.shape_cast %180 : vector<1x1x1xf32> to vector<1x1xf32>
    %182 = vector.broadcast %181 : vector<1x1xf32> to vector<256x1xf32>
    %183 = arith.addf %179, %182 : vector<256x1xf32>
    %184 = vector.extract_strided_slice %23 {offsets = [0, 2], sizes = [256, 1], strides = [1, 1]} : vector<256x4xf32> to vector<256x1xf32>
    %185 = arith.mulf %184, %183 : vector<256x1xf32>
    %186 = arith.addf %132, %185 : vector<256x1xf32>
    %187 = vector.extract_strided_slice %18 {offsets = [0, 384], sizes = [256, 128], strides = [1, 1]} : vector<256x512xf32> to vector<256x128xf32>
    %188 = arith.truncf %187 : vector<256x128xf32> to vector<256x128xbf16>
    %c3 = arith.constant 3 : index
    %c0_104 = arith.constant 0 : index
    %c0_105 = arith.constant 0 : index
    %189 = vector.load %arg5[%c3, %c0_104, %c0_105] : memref<4x128x64xbf16, #tpu.memory_space<vmem>>, vector<1x128x64xbf16>
    %190 = vector.shape_cast %189 : vector<1x128x64xbf16> to vector<128x64xbf16>
    %cst_106 = arith.constant dense<0.000000e+00> : vector<256x64xf32>
    %191 = tpu.matmul %188, %190, %cst_106 {dimension_numbers = #tpu.dot_dimension_numbers<[1], [0], [0], [1], [0, 0, 1, 1], [], []>} : vector<256x128xbf16>, vector<128x64xbf16>, vector<256x64xf32> -> vector<256x64xf32>
    %c3_107 = arith.constant 3 : index
    %c0_108 = arith.constant 0 : index
    %c0_109 = arith.constant 0 : index
    %192 = vector.load %arg6[%c3_107, %c0_108, %c0_109] : memref<4x1x64xf32, #tpu.memory_space<vmem>>, vector<1x1x64xf32>
    %193 = vector.shape_cast %192 : vector<1x1x64xf32> to vector<1x64xf32>
    %194 = vector.broadcast %193 : vector<1x64xf32> to vector<256x64xf32>
    %195 = arith.addf %191, %194 : vector<256x64xf32>
    %cst_110 = arith.constant 0.000000e+00 : f32
    %196 = vector.broadcast %cst_110 : f32 to vector<256x64xf32>
    %197 = arith.minimumf %195, %196 : vector<256x64xf32>
    %cst_111 = arith.constant 1.000000e+01 : f32
    %198 = vector.broadcast %cst_111 : f32 to vector<256x64xf32>
    %199 = arith.mulf %197, %198 : vector<256x64xf32>
    %200 = math.exp %199 : vector<256x64xf32>
    %cst_112 = arith.constant 1.000000e+00 : f32
    %201 = vector.broadcast %cst_112 : f32 to vector<256x64xf32>
    %202 = arith.subf %200, %201 : vector<256x64xf32>
    %cst_113 = arith.constant 1.000000e-01 : f32
    %203 = vector.broadcast %cst_113 : f32 to vector<256x64xf32>
    %204 = arith.mulf %203, %202 : vector<256x64xf32>
    %cst_114 = arith.constant 0.000000e+00 : f32
    %205 = vector.broadcast %cst_114 : f32 to vector<256x64xf32>
    %206 = arith.cmpf ogt, %195, %205 : vector<256x64xf32>
    %207 = arith.select %206, %195, %204 : vector<256x64xi1>, vector<256x64xf32>
    %208 = arith.truncf %207 : vector<256x64xf32> to vector<256x64xbf16>
    %c3_115 = arith.constant 3 : index
    %c0_116 = arith.constant 0 : index
    %c0_117 = arith.constant 0 : index
    %209 = vector.load %arg7[%c3_115, %c0_116, %c0_117] : memref<4x64x32xbf16, #tpu.memory_space<vmem>>, vector<1x64x32xbf16>
    %210 = vector.shape_cast %209 : vector<1x64x32xbf16> to vector<64x32xbf16>
    %cst_118 = arith.constant dense<0.000000e+00> : vector<256x32xf32>
    %211 = tpu.matmul %208, %210, %cst_118 {dimension_numbers = #tpu.dot_dimension_numbers<[1], [0], [0], [1], [0, 0, 1, 1], [], []>} : vector<256x64xbf16>, vector<64x32xbf16>, vector<256x32xf32> -> vector<256x32xf32>
    %c3_119 = arith.constant 3 : index
    %c0_120 = arith.constant 0 : index
    %c0_121 = arith.constant 0 : index
    %212 = vector.load %arg8[%c3_119, %c0_120, %c0_121] : memref<4x1x32xf32, #tpu.memory_space<vmem>>, vector<1x1x32xf32>
    %213 = vector.shape_cast %212 : vector<1x1x32xf32> to vector<1x32xf32>
    %214 = vector.broadcast %213 : vector<1x32xf32> to vector<256x32xf32>
    %215 = arith.addf %211, %214 : vector<256x32xf32>
    %cst_122 = arith.constant 0.000000e+00 : f32
    %216 = vector.broadcast %cst_122 : f32 to vector<256x32xf32>
    %217 = arith.minimumf %215, %216 : vector<256x32xf32>
    %cst_123 = arith.constant 1.000000e+01 : f32
    %218 = vector.broadcast %cst_123 : f32 to vector<256x32xf32>
    %219 = arith.mulf %217, %218 : vector<256x32xf32>
    %220 = math.exp %219 : vector<256x32xf32>
    %cst_124 = arith.constant 1.000000e+00 : f32
    %221 = vector.broadcast %cst_124 : f32 to vector<256x32xf32>
    %222 = arith.subf %220, %221 : vector<256x32xf32>
    %cst_125 = arith.constant 1.000000e-01 : f32
    %223 = vector.broadcast %cst_125 : f32 to vector<256x32xf32>
    %224 = arith.mulf %223, %222 : vector<256x32xf32>
    %cst_126 = arith.constant 0.000000e+00 : f32
    %225 = vector.broadcast %cst_126 : f32 to vector<256x32xf32>
    %226 = arith.cmpf ogt, %215, %225 : vector<256x32xf32>
    %227 = arith.select %226, %215, %224 : vector<256x32xi1>, vector<256x32xf32>
    %c3_127 = arith.constant 3 : index
    %c0_128 = arith.constant 0 : index
    %c0_129 = arith.constant 0 : index
    %228 = vector.load %arg9[%c3_127, %c0_128, %c0_129] : memref<4x1x32xf32, #tpu.memory_space<vmem>>, vector<1x1x32xf32>
    %229 = vector.shape_cast %228 : vector<1x1x32xf32> to vector<1x32xf32>
    %230 = vector.broadcast %229 : vector<1x32xf32> to vector<256x32xf32>
    %231 = arith.mulf %227, %230 : vector<256x32xf32>
    %cst_130 = arith.constant dense<0.000000e+00> : vector<256xf32>
    %232 = vector.multi_reduction <add>, %231, %cst_130 [1] : vector<256x32xf32> to vector<256xf32>
    %233 = vector.shape_cast %232 : vector<256xf32> to vector<256x1xf32>
    %c3_131 = arith.constant 3 : index
    %c0_132 = arith.constant 0 : index
    %c0_133 = arith.constant 0 : index
    %234 = vector.load %arg10[%c3_131, %c0_132, %c0_133] : memref<4x1x1xf32, #tpu.memory_space<vmem>>, vector<1x1x1xf32>
    %235 = vector.shape_cast %234 : vector<1x1x1xf32> to vector<1x1xf32>
    %236 = vector.broadcast %235 : vector<1x1xf32> to vector<256x1xf32>
    %237 = arith.addf %233, %236 : vector<256x1xf32>
    %238 = vector.extract_strided_slice %23 {offsets = [0, 3], sizes = [256, 1], strides = [1, 1]} : vector<256x4xf32> to vector<256x1xf32>
    %239 = arith.mulf %238, %237 : vector<256x1xf32>
    %240 = arith.addf %186, %239 : vector<256x1xf32>
    %c0_134 = arith.constant 0 : index
    %c0_135 = arith.constant 0 : index
    %241 = vector.load %arg11[%c0_134, %c0_135] : memref<256x1xf32, #tpu.memory_space<vmem>>, vector<256x1xf32>
    tpu.vector_store %arg11[%c0_134, %c0_135], %240 {strides = array<i32>} : memref<256x1xf32, #tpu.memory_space<vmem>>, vector<256x1xf32>,
    return
  }
  func.func @transform_0(%arg0: i32) -> (i32, i32) {
    %c0_i32 = arith.constant 0 : i32
    %c0_i32_0 = arith.constant 0 : i32
    return %arg0, %c0_i32 : i32, i32
  }
  func.func @transform_1(%arg0: i32) -> (i32, i32) {
    %c0_i32 = arith.constant 0 : i32
    %c0_i32_0 = arith.constant 0 : i32
    return %arg0, %c0_i32 : i32, i32
  }
  func.func @transform_2(%arg0: i32) -> (i32, i32) {
    %c0_i32 = arith.constant 0 : i32
    %c0_i32_0 = arith.constant 0 : i32
    %c0_i32_1 = arith.constant 0 : i32
    return %c0_i32, %c0_i32_0 : i32, i32
  }
  func.func @transform_3(%arg0: i32) -> (i32, i32) {
    %c0_i32 = arith.constant 0 : i32
    %c0_i32_0 = arith.constant 0 : i32
    %c0_i32_1 = arith.constant 0 : i32
    return %c0_i32, %c0_i32_0 : i32, i32
  }
  func.func @transform_4(%arg0: i32) -> (i32, i32, i32) {
    %c0_i32 = arith.constant 0 : i32
    %c0_i32_0 = arith.constant 0 : i32
    %c0_i32_1 = arith.constant 0 : i32
    %c0_i32_2 = arith.constant 0 : i32
    return %c0_i32, %c0_i32_0, %c0_i32_1 : i32, i32, i32
  }
  func.func @transform_5(%arg0: i32) -> (i32, i32, i32) {
    %c0_i32 = arith.constant 0 : i32
    %c0_i32_0 = arith.constant 0 : i32
    %c0_i32_1 = arith.constant 0 : i32
    %c0_i32_2 = arith.constant 0 : i32
    return %c0_i32, %c0_i32_0, %c0_i32_1 : i32, i32, i32
  }
  func.func @transform_6(%arg0: i32) -> (i32, i32, i32) {
    %c0_i32 = arith.constant 0 : i32
    %c0_i32_0 = arith.constant 0 : i32
    %c0_i32_1 = arith.constant 0 : i32
    %c0_i32_2 = arith.constant 0 : i32
    return %c0_i32, %c0_i32_0, %c0_i32_1 : i32, i32, i32
  }
  func.func @transform_7(%arg0: i32) -> (i32, i32, i32) {
    %c0_i32 = arith.constant 0 : i32
    %c0_i32_0 = arith.constant 0 : i32
    %c0_i32_1 = arith.constant 0 : i32
    %c0_i32_2 = arith.constant 0 : i32
    return %c0_i32, %c0_i32_0, %c0_i32_1 : i32, i32, i32
  }
  func.func @transform_8(%arg0: i32) -> (i32, i32, i32) {
    %c0_i32 = arith.constant 0 : i32
    %c0_i32_0 = arith.constant 0 : i32
    %c0_i32_1 = arith.constant 0 : i32
    %c0_i32_2 = arith.constant 0 : i32
    return %c0_i32, %c0_i32_0, %c0_i32_1 : i32, i32, i32
  }
  func.func @transform_9(%arg0: i32) -> (i32, i32, i32) {
    %c0_i32 = arith.constant 0 : i32
    %c0_i32_0 = arith.constant 0 : i32
    %c0_i32_1 = arith.constant 0 : i32
    %c0_i32_2 = arith.constant 0 : i32
    return %c0_i32, %c0_i32_0, %c0_i32_1 : i32, i32, i32
  }
  func.func @transform_10(%arg0: i32) -> (i32, i32) {
    %c0_i32 = arith.constant 0 : i32
    %c0_i32_0 = arith.constant 0 : i32
    return %arg0, %c0_i32 : i32, i32
  }
}

</mosaic_0001>

<bundles_post_ra>
// kernel: tpu_custom_call.1
= control target key start
LH: loop header
LB: loop body
LE: loop exit
PB: predicated region body
PF: predicated region fallthrough
CT: control target
= control target key end

     0   :  { %s10493_s13 = smov 0   ;;  %s16928_s0 = inlined_call_operand.vmem [shape: s32[512,1], index: 0, kind: input, shape index: {}]   ;;  %s16929_s1 = inlined_call_operand.vmem [shape: bf16[512,128], index: 1, kind: input, shape index: {}]   ;;  %s16930_s2 = inlined_call_operand.vmem [shape: bf16[128,512], index: 2, kind: input, shape index: {}]   ;;  %s16931_s3 = inlined_call_operand.vmem [shape: f32[1,512], index: 3, kind: input, shape index: {}]   ;;  %s16932_s4 = inlined_call_operand.vmem [shape: bf16[4,128,64], index: 4, kind: input, shape index: {}]   ;;  %s16933_s5 = inlined_call_operand.vmem [shape: f32[4,1,64], index: 5, kind: input, shape index: {}]   ;;  %s16934_s6 = inlined_call_operand.vmem [shape: bf16[4,64,32], index: 6, kind: input, shape index: {}]   ;;  %s16935_s7 = inlined_call_operand.vmem [shape: f32[4,1,32], index: 7, kind: input, shape index: {}]   ;;  %s16936_s8 = inlined_call_operand.vmem [shape: f32[4,1,32], index: 8, kind: input, shape index: {}]   ;;  %s16937_s9 = inlined_call_operand.vmem [shape: f32[4,1,1], index: 9, kind: input, shape index: {}]   ;;  %s16938_s10 = inlined_call_operand.vmem [shape: f32[512,1], index: 10, kind: output, shape index: {}]  }
   0x1 LB: > { %s8301_s14 = sadd.s32 4294967295, %s10428_s13   ;;  %p8305_p0 = scmp.ge.s32.totalorder %s10428_s13, 1  ;;  %s10428_s13 = sphi %s10493_s13, %s20_s13  }
   0x2   : > { %p324_p1 = scmp.lt.s32.totalorder %s10428_s13, 3 }
   0x4   : > { %p325_p2 = pnand %p8305_p0, %p324_p1 }
   0x6   : > { %328 = sbr.rel (%p325_p2) target bundleno = 2128 (0x850), region = 60 }
   0xd   : > { %v9536_v0 = vld [vmem:[%s16930_s2 + $0x4] ss:$16 sps:$4 sm:$0xff]   ;;  %s8306_s17 = sshll.u32 %s8301_s14, 5  ;;  %v9538_v1 = vld [vmem:[%s16930_s2] ss:$16 sps:$4 sm:$0xff]   ;;  %v10430_v2 = vmov 0   ;;  %v16939_v57 = vlaneseq }
   0xe   : > { %792 = vmatprep.mubr.bf16.mxu0 %v10430_v2  ;;  %p368_p3 = scmp.lt.s32.totalorder %s8306_s17, 63  ;;  %985 = vmatprep.mubr.bf16.mxu1 %v10430_v2  ;;  %v9539_v3 = vld [vmem:[%s16930_s2 + $0x24] ss:$16 sps:$4 sm:$0xff]   ;;  %v9541_v4 = vld [vmem:[%s16930_s2 + $0x20] ss:$16 sps:$4 sm:$0xff]   ;;  %v9601_v32 = vld [vmem:[%s16932_s4 + $0x8] sm:$0xff]  }
   0xf   : > { %760 = vmatprep.subr.bf16.mxu0 %v9536_v0  ;;  %9535 = vset.pattern.permute.xlu1 %v10430_v2  ;;  %v9542_v5 = vld [vmem:[%s16930_s2 + $0x44] ss:$16 sps:$4 sm:$0xff]   ;;  %v9544_v6 = vld [vmem:[%s16930_s2 + $0x40] ss:$16 sps:$4 sm:$0xff]   ;;  %v9570_v15 = vld [vmem:[%s16930_s2 + $0xc] ss:$16 sps:$4 sm:$0xff]  }
  0x10   : > { %761 = vmatpush1.bf16.msra.mxu0 %v9538_v1  ;;  %s17721_s17 = smov (!%p368_p3, %s8306_s17), 63  ;;  %9534 = vset.pattern.permute.xlu0 %v10430_v2  ;;  %v9545_v7 = vld [vmem:[%s16930_s2 + $0x64] ss:$16 sps:$4 sm:$0xff]   ;;  %v9547_v8 = vld [vmem:[%s16930_s2 + $0x60] ss:$16 sps:$4 sm:$0xff]   ;;  %v9603_v49 = vld [vmem:[%s16932_s4 + $0x18] sm:$0xff]  }
  0x11   : > { %762 = vmatprep.subr.bf16.mxu0 %v9539_v3  ;;  %s8309_s26 = sshll.u32 %s17721_s17, 2  ;;  %v9548_v9 = vld [vmem:[%s16930_s2 + $0x84] ss:$16 sps:$4 sm:$0xff]   ;;  %v9550_v10 = vld [vmem:[%s16930_s2 + $0x80] ss:$16 sps:$4 sm:$0xff]   ;;  %953 = vmatprep.subr.bf16.mxu1 %v9570_v15  ;;  %v9605_v53 = vld [vmem:[%s16932_s4 + $0x28] sm:$0xff]  }
  0x12   : > { %s10532_s14 = scalar_lea.vmem %s16929_s1, %s8309_s26  ;;  %v9551_v11 = vld [vmem:[%s16930_s2 + $0xa4] ss:$16 sps:$4 sm:$0xff]   ;;  %v9553_v12 = vld [vmem:[%s16930_s2 + $0xa0] ss:$16 sps:$4 sm:$0xff]   ;;  %v9572_v16 = vld [vmem:[%s16930_s2 + $0x8] ss:$16 sps:$4 sm:$0xff]  }
  0x13   : > { %v9554_v13 = vld [vmem:[%s16930_s2 + $0xc4] ss:$16 sps:$4 sm:$0xff]   ;;  %v9556_v14 = vld [vmem:[%s16930_s2 + $0xc0] ss:$16 sps:$4 sm:$0xff]   ;;  %v9573_v17 = vld [vmem:[%s16930_s2 + $0x2c] ss:$16 sps:$4 sm:$0xff]   ;;  %954 = vmatpush1.bf16.msra.mxu1 %v9572_v16 }
  0x14   : > { %763 = vmatpush1.bf16.msra.mxu0 %v9541_v4  ;;  %v9557_v18 = vld [vmem:[%s16930_s2 + $0xe4] ss:$16 sps:$4 sm:$0xff]   ;;  %v9575_v19 = vld [vmem:[%s16930_s2 + $0x28] ss:$16 sps:$4 sm:$0xff]   ;;  %955 = vmatprep.subr.bf16.mxu1 %v9573_v17  ;;  %v9577_v20 = vld [vmem:[%s16930_s2 + $0x4c] ss:$16 sps:$4 sm:$0xff]  }
  0x15   : > { %764 = vmatprep.subr.bf16.mxu0 %v9542_v5  ;;  %v9559_v21 = vld [vmem:[%s16930_s2 + $0xe0] ss:$16 sps:$4 sm:$0xff]   ;;  %v9579_v22 = vld [vmem:[%s16930_s2 + $0x48] ss:$16 sps:$4 sm:$0xff]   ;;  %v9580_v23 = vld [vmem:[%s16930_s2 + $0x6c] ss:$16 sps:$4 sm:$0xff]  }
  0x16   : > { %v9560_v24 = vld [vmem:[%s10532_s14] sm:$0xff]   ;;  %v9582_v25 = vld [vmem:[%s16930_s2 + $0x68] ss:$16 sps:$4 sm:$0xff]   ;;  %v9584_v26 = vld [vmem:[%s16930_s2 + $0x8c] ss:$16 sps:$4 sm:$0xff]   ;;  %v10686_v59 = vshrl.u32 %v16939_v57, 7 }
  0x17   : > { %956 = vmatpush1.bf16.msra.mxu1 %v9575_v19  ;;  %v9561_v27 = vld [vmem:[%s10532_s14 + $0x8] sm:$0xff]   ;;  %v9600_v31 = vld [vmem:[%s16932_s4] sm:$0xff]   ;;  %v9602_v34 = vld [vmem:[%s16932_s4 + $0x10] sm:$0xff]   ;;  %s10431_s29 = smov 1   ;;  %s10432_s16 = smov 2  }
  0x18   : > { %765 = vmatpush1.bf16.msra.mxu0 %v9544_v6  ;;  %957 = vmatprep.subr.bf16.mxu1 %v9577_v20  ;;  %v9586_v28 = vld [vmem:[%s16930_s2 + $0x88] ss:$16 sps:$4 sm:$0xff]   ;;  %v9587_v29 = vld [vmem:[%s16930_s2 + $0xac] ss:$16 sps:$4 sm:$0xff]   ;;  %v9562_v37 = vld [vmem:[%s10532_s14 + $0x10] sm:$0xff]   ;;  %v486_v60 = vsub.s32 0, %v10686_v59 }
  0x19   : > { %766 = vmatprep.subr.bf16.mxu0 %v9545_v7  ;;  %v9589_v30 = vld [vmem:[%s16930_s2 + $0xa8] ss:$16 sps:$4 sm:$0xff]   ;;  %v9591_v33 = vld [vmem:[%s16930_s2 + $0xcc] ss:$16 sps:$4 sm:$0xff]   ;;  %v9564_v40 = vld [vmem:[%s10532_s14 + $0x20] sm:$0xff]   ;;  %v490_v6 = vsub.s32 1, %v10686_v59 }
  0x1a   : > { %v9593_v35 = vld [vmem:[%s16930_s2 + $0xc8] ss:$16 sps:$4 sm:$0xff]   ;;  %v9594_v36 = vld [vmem:[%s16930_s2 + $0xec] ss:$16 sps:$4 sm:$0xff]   ;;  %v9566_v42 = vld [vmem:[%s10532_s14 + $0x30] sm:$0xff]   ;;  %s10434_s18 = smov 127  }
  0x1b   : > { %958 = vmatpush1.bf16.msra.mxu1 %v9579_v22  ;;  %v9596_v38 = vld [vmem:[%s16930_s2 + $0xe8] ss:$16 sps:$4 sm:$0xff]   ;;  %v9568_v44 = vld [vmem:[%s10532_s14 + $0x40] sm:$0xff]   ;;  %v9576_v46 = vld [vmem:[%s10532_s14 + $0x50] sm:$0xff]   ;;  %s10435_s21 = smov 3   ;;  %s10436_s22 = smov 126  }
  0x1c   : > { %767 = vmatpush1.bf16.msra.mxu0 %v9547_v8  ;;  %959 = vmatprep.subr.bf16.mxu1 %v9580_v23  ;;  %v9563_v39 = vld [vmem:[%s10532_s14 + $0x18] sm:$0xff]   ;;  %v9565_v41 = vld [vmem:[%s10532_s14 + $0x28] sm:$0xff]   ;;  %v9590_v48 = vld [vmem:[%s10532_s14 + $0x60] sm:$0xff]   ;;  %s10437_s23 = smov 125  }
  0x1d   : > { %768 = vmatprep.subr.bf16.mxu0 %v9548_v9  ;;  %v9567_v43 = vld [vmem:[%s10532_s14 + $0x38] sm:$0xff]   ;;  %v9569_v45 = vld [vmem:[%s10532_s14 + $0x48] sm:$0xff]   ;;  %v9604_v51 = vld [vmem:[%s16932_s4 + $0x20] sm:$0xff]  }
  0x1e   : > { %v9583_v47 = vld [vmem:[%s10532_s14 + $0x58] sm:$0xff]   ;;  %v9597_v50 = vld [vmem:[%s10532_s14 + $0x68] sm:$0xff]   ;;  %v9598_v52 = vld [vmem:[%s10532_s14 + $0x70] sm:$0xff]  }
  0x1f   : > { %960 = vmatpush1.bf16.msra.mxu1 %v9582_v25  ;;  %v9606_v54 = vld [vmem:[%s16932_s4 + $0x30] sm:$0xff]   ;;  %v9599_v55 = vld [vmem:[%s10532_s14 + $0x78] sm:$0xff]   ;;  %v10682_v58 = vld [vmem:[%s16932_s4 + $0x40] sm:$0xff]   ;;  %s8307_s14 = sshll.u32 %s17721_s17, 3 }
  0x20   : > { %769 = vmatpush1.bf16.msra.mxu0 %v9550_v10  ;;  %961 = vmatprep.subr.bf16.mxu1 %v9584_v26  ;;  %v9607_v56 = vld [vmem:[%s16932_s4 + $0x38] sm:$0xff]   ;;  %v10692_v61 = vld [vmem:[%s16931_s3] sm:$0xf]  ;;  %s12914_s15 = scalar_lea.vmem %s16928_s0, %s8307_s14  ;;  %s16686_s28 = scalar_lea.vmem %s16938_s10, %s8307_s14 }
  0x21   : > { %770 = vmatprep.subr.bf16.mxu0 %v9551_v11  ;;  %v10695_v62 = vrot.slane %v10692_v61, %v486_v60  ;;  %v10711_v11 = vrot.slane %v10692_v61, %v490_v6 }
  0x23   : > { %962 = vmatpush1.bf16.msra.mxu1 %v9586_v28 }
  0x24   : > { %771 = vmatpush1.bf16.msra.mxu0 %v9553_v12  ;;  %963 = vmatprep.subr.bf16.mxu1 %v9587_v29 }
  0x25   : > { %772 = vmatprep.subr.bf16.mxu0 %v9554_v13 }
  0x27   : > { %964 = vmatpush1.bf16.msra.mxu1 %v9589_v30 }
  0x28   : > { %773 = vmatpush1.bf16.msra.mxu0 %v9556_v14  ;;  %965 = vmatprep.subr.bf16.mxu1 %v9591_v33 }
  0x29   : > { %774 = vmatprep.subr.bf16.mxu0 %v9557_v18 }
  0x2b   : > { %966 = vmatpush1.bf16.msra.mxu1 %v9593_v35 }
  0x2c   : > { %775 = vmatpush1.bf16.msra.mxu0 %v9559_v21  ;;  %967 = vmatprep.subr.bf16.mxu1 %v9594_v36 }
  0x2d   : > { %9166 = vmatprep.subr.bf16.mxu0 %v9600_v31 }
  0x2f   : > { %793 = vmatmul.mubr.bf16.vlgmr.msra.gmra.mrb[0].mxu0 %v9560_v24  ;;  %968 = vmatpush1.bf16.msra.mxu1 %v9596_v38 }
  0x30   : > { %802 = vmatprep.mubr.bf16.mxu0 %v10430_v2  ;;  %9167 = vmatpush3.bf16.msra.mxu0 %v9600_v31 }
  0x31   : > { %9168 = vmatprep.subr.bf16.mxu0 %v9601_v32 }
  0x32   : > { %986 = vmatmul.mubr.bf16.vlgmr.msra.gmra.mrb[0].mxu1 %v9560_v24 }
  0x33   : > { %995 = vmatprep.mubr.bf16.mxu1 %v10430_v2 }
  0x34   : > { %9169 = vmatpush3.bf16.msra.mxu0 %v9601_v32 }
  0x35   : > { %9170 = vmatprep.subr.bf16.mxu0 %v9602_v34 }
  0x37   : > { %803 = vmatmul.mubr.bf16.gmra.mrb[4].mxu0 %v9561_v27 }
  0x38   : > { %812 = vmatprep.mubr.bf16.mxu0 %v10430_v2  ;;  %9171 = vmatpush3.bf16.msra.mxu0 %v9602_v34 }
  0x39   : > { %9172 = vmatprep.subr.bf16.mxu0 %v9603_v49 }
  0x3a   : > { %996 = vmatmul.mubr.bf16.gmra.mrb[4].mxu1 %v9561_v27 }
  0x3b   : > { %1005 = vmatprep.mubr.bf16.mxu1 %v10430_v2 }
  0x3c   : > { %9173 = vmatpush3.bf16.msra.mxu0 %v9603_v49 }
  0x3d   : > { %9174 = vmatprep.subr.bf16.mxu0 %v9604_v51 }
  0x3f   : > { %813 = vmatmul.mubr.bf16.gmra.mrb[8].mxu0 %v9562_v37 }
  0x40   : > { %822 = vmatprep.mubr.bf16.mxu0 %v10430_v2  ;;  %9175 = vmatpush3.bf16.msra.mxu0 %v9604_v51 }
  0x41   : > { %9176 = vmatprep.subr.bf16.mxu0 %v9605_v53 }
  0x42   : > { %1006 = vmatmul.mubr.bf16.gmra.mrb[8].mxu1 %v9562_v37 }
  0x43   : > { %1015 = vmatprep.mubr.bf16.mxu1 %v10430_v2 }
  0x44   : > { %9177 = vmatpush3.bf16.msra.mxu0 %v9605_v53 }
  0x45   : > { %9178 = vmatprep.subr.bf16.mxu0 %v9606_v54 }
  0x47   : > { %823 = vmatmul.mubr.bf16.gmra.mrb[12].mxu0 %v9563_v39 }
  0x48   : > { %832 = vmatprep.mubr.bf16.mxu0 %v10430_v2  ;;  %9179 = vmatpush3.bf16.msra.mxu0 %v9606_v54 }
  0x49   : > { %9180 = vmatprep.subr.bf16.mxu0 %v9607_v56 }
  0x4a   : > { %1016 = vmatmul.mubr.bf16.gmra.mrb[12].mxu1 %v9563_v39 }
  0x4b   : > { %1025 = vmatprep.mubr.bf16.mxu1 %v10430_v2 }
  0x4c   : > { %9181 = vmatpush3.bf16.msra.mxu0 %v9607_v56 }
  0x4d   : > { %9254 = vmatprep.subr.bf16.mxu0 %v10682_v58 }
  0x4f   : > { %833 = vmatmul.mubr.bf16.gmra.mrb[16].mxu0 %v9564_v40 }
  0x50   : > { %842 = vmatprep.mubr.bf16.mxu0 %v10430_v2 }
  0x52   : > { %1026 = vmatmul.mubr.bf16.gmra.mrb[16].mxu1 %v9564_v40 }
  0x53   : > { %1035 = vmatprep.mubr.bf16.mxu1 %v10430_v2 }
  0x57   : > { %843 = vmatmul.mubr.bf16.gmra.mrb[20].mxu0 %v9565_v41 }
  0x58   : > { %852 = vmatprep.mubr.bf16.mxu0 %v10430_v2 }
  0x5a   : > { %1036 = vmatmul.mubr.bf16.gmra.mrb[20].mxu1 %v9565_v41 }
  0x5b   : > { %1045 = vmatprep.mubr.bf16.mxu1 %v10430_v2 }
  0x5f   : > { %853 = vmatmul.mubr.bf16.gmra.mrb[24].mxu0 %v9566_v42 }
  0x60   : > { %862 = vmatprep.mubr.bf16.mxu0 %v10430_v2 }
  0x62   : > { %1046 = vmatmul.mubr.bf16.gmra.mrb[24].mxu1 %v9566_v42 }
  0x63   : > { %1055 = vmatprep.mubr.bf16.mxu1 %v10430_v2 }
  0x67   : > { %863 = vmatmul.mubr.bf16.gmra.mrb[28].mxu0 %v9567_v43 }
  0x68   : > { %872 = vmatprep.mubr.bf16.mxu0 %v10430_v2 }
  0x6a   : > { %1056 = vmatmul.mubr.bf16.gmra.mrb[28].mxu1 %v9567_v43 }
  0x6b   : > { %1065 = vmatprep.mubr.bf16.mxu1 %v10430_v2 }
  0x6f   : > { %873 = vmatmul.mubr.bf16.gmra.mrb[32].mxu0 %v9568_v44 }
  0x70   : > { %882 = vmatprep.mubr.bf16.mxu0 %v10430_v2 }
  0x72   : > { %1066 = vmatmul.mubr.bf16.gmra.mrb[32].mxu1 %v9568_v44 }
  0x73   : > { %1075 = vmatprep.mubr.bf16.mxu1 %v10430_v2 }
  0x77   : > { %883 = vmatmul.mubr.bf16.gmra.mrb[36].mxu0 %v9569_v45 }
  0x78   : > { %892 = vmatprep.mubr.bf16.mxu0 %v10430_v2 }
  0x7a   : > { %1076 = vmatmul.mubr.bf16.gmra.mrb[36].mxu1 %v9569_v45 }
  0x7b   : > { %1085 = vmatprep.mubr.bf16.mxu1 %v10430_v2 }
  0x7f   : > { %893 = vmatmul.mubr.bf16.gmra.mrb[40].mxu0 %v9576_v46 }
  0x80   : > { %902 = vmatprep.mubr.bf16.mxu0 %v10430_v2 }
  0x82   : > { %1086 = vmatmul.mubr.bf16.gmra.mrb[40].mxu1 %v9576_v46 }
  0x83   : > { %1095 = vmatprep.mubr.bf16.mxu1 %v10430_v2 }
  0x87   : > { %903 = vmatmul.mubr.bf16.gmra.mrb[44].mxu0 %v9583_v47 }
  0x88   : > { %912 = vmatprep.mubr.bf16.mxu0 %v10430_v2 }
  0x8a   : > { %1096 = vmatmul.mubr.bf16.gmra.mrb[44].mxu1 %v9583_v47 }
  0x8b   : > { %1105 = vmatprep.mubr.bf16.mxu1 %v10430_v2 }
  0x8f   : > { %913 = vmatmul.mubr.bf16.gmra.mrb[48].mxu0 %v9590_v48 }
  0x90   : > { %922 = vmatprep.mubr.bf16.mxu0 %v10430_v2 }
  0x92   : > { %1106 = vmatmul.mubr.bf16.gmra.mrb[48].mxu1 %v9590_v48 }
  0x93   : > { %1115 = vmatprep.mubr.bf16.mxu1 %v10430_v2 }
  0x97   : > { %923 = vmatmul.mubr.bf16.gmra.mrb[52].mxu0 %v9597_v50 }
  0x98   : > { %932 = vmatprep.mubr.bf16.mxu0 %v10430_v2 }
  0x9a   : > { %1116 = vmatmul.mubr.bf16.gmra.mrb[52].mxu1 %v9597_v50 }
  0x9b   : > { %1125 = vmatprep.mubr.bf16.mxu1 %v10430_v2 }
  0x9f   : > { %933 = vmatmul.mubr.bf16.gmra.mrb[56].mxu0 %v9598_v52 }
  0xa0   : > { %942 = vmatprep.mubr.bf16.mxu0 %v10430_v2 }
  0xa2   : > { %1126 = vmatmul.mubr.bf16.gmra.mrb[56].mxu1 %v9598_v52 }
  0xa3   : > { %1135 = vmatprep.mubr.bf16.mxu1 %v10430_v2 }
  0xa7   : > { %943 = vmatmul.mubr.bf16.gmra.mrb[60].mxu0 %v9599_v55 }
  0xaa   : > { %1136 = vmatmul.mubr.bf16.gmra.mrb[60].mxu1 %v9599_v55 }
 0x102   : > { %v794_v63 = vpop.f32.mrb[0].mxu0 }
 0x103   : > { %v10698_v0 = vadd.f32 %v794_v63, %v10695_v62  ;;  %v10700_v1 = vpop.f32.mrb[1].mxu0 }
 0x104   : > { %v798_v2 = vpop.f32.mrb[2].mxu0 }
 0x105   : > { %v1146_v3 = vmin.f32 %v10698_v0, 0.0  ;;  %v10704_v4 = vadd.f32 %v798_v2, %v10695_v62  ;;  %v10706_v5 = vpop.f32.mrb[3].mxu0  ;;  %v10741_v43 = vpop.f32.mrb[0].mxu1  ;;  %vm1914_vm0 = vcmp.gt.f32.partialorder %v10698_v0, 0.0 }
 0x106   : > { %v10743_v44 = vpop.f32.mrb[1].mxu1 }
 0x107   : > { %v1274_v7 = vmul.f32 10.0, %v1146_v3  ;;  %v1150_v8 = vmin.f32 %v10704_v4, 0.0  ;;  %v10745_v47 = vpop.f32.mrb[2].mxu1  ;;  %vm1918_vm1 = vcmp.gt.f32.partialorder %v10704_v4, 0.0 }
 0x108   : > { %v10747_v50 = vpop.f32.mrb[3].mxu1 }
 0x109   : > { %v1402_v9 = vmul.f32 1.442695, %v1274_v7  ;;  %v1278_v10 = vmul.f32 10.0, %v1150_v8 }
 0x10a   : > { %v804_v12 = vpop.f32.mrb[4].mxu0 }
 0x10b   : > { %v1410_v13 = vmul.f32 1.442695, %v1278_v10  ;;  %v10714_v14 = vadd.f32 %v804_v12, %v10695_v62  ;;  %v806_v15 = vpop.f32.mrb[5].mxu0  ;;  %9648 = vpow2.f32 %v1402_v9 }
 0x10c   : > { %v10717_v16 = vadd.f32 %v806_v15, %v10711_v11  ;;  %v808_v17 = vpop.f32.mrb[6].mxu0 }
 0x10d   : > { %v1154_v18 = vmin.f32 %v10714_v14, 0.0  ;;  %v10721_v19 = vadd.f32 %v808_v17, %v10695_v62  ;;  %v810_v20 = vpop.f32.mrb[7].mxu0  ;;  %9650 = vpow2.f32 %v1410_v13  ;;  %vm1922_vm2 = vcmp.gt.f32.partialorder %v10714_v14, 0.0  ;;  %v10766_v15 = vpop.f32.mrb[4].mxu1 }
 0x10e   : > { %v1155_v21 = vmin.f32 %v10717_v16, 0.0  ;;  %v10725_v22 = vadd.f32 %v810_v20, %v10711_v11  ;;  %vm1923_vm3 = vcmp.gt.f32.partialorder %v10717_v16, 0.0 }
 0x10f   : > { %v1282_v23 = vmul.f32 10.0, %v1154_v18  ;;  %v1158_v24 = vmin.f32 %v10721_v19, 0.0  ;;  %vm1926_vm4 = vcmp.gt.f32.partialorder %v10721_v19, 0.0 }
 0x110   : > { %v1283_v25 = vmul.f32 10.0, %v1155_v21  ;;  %v1159_v26 = vmin.f32 %v10725_v22, 0.0  ;;  %vm1927_vm5 = vcmp.gt.f32.partialorder %v10725_v22, 0.0 }
 0x111   : > { %v1418_v27 = vmul.f32 1.442695, %v1282_v23  ;;  %v1286_v28 = vmul.f32 10.0, %v1158_v24  ;;  %v10768_v23 = vpop.f32.mrb[5].mxu1 }
 0x112   : > { %v1420_v29 = vmul.f32 1.442695, %v1283_v25  ;;  %v1287_v30 = vmul.f32 10.0, %v1159_v26  ;;  %v814_v31 = vpop.f32.mrb[8].mxu0 }
 0x113   : > { %9652 = vpow2.f32 %v1418_v27  ;;  %v1426_v32 = vmul.f32 1.442695, %v1286_v28  ;;  %v10730_v33 = vadd.f32 %v814_v31, %v10695_v62  ;;  %v10732_v34 = vpop.f32.mrb[9].mxu0 }
 0x114   : > { %9654 = vpow2.f32 %v1420_v29  ;;  %v1428_v35 = vmul.f32 1.442695, %v1287_v30  ;;  %v818_v36 = vpop.f32.mrb[10].mxu0  ;;  %v10770_v30 = vpop.f32.mrb[6].mxu1 }
 0x115   : > { %9656 = vpow2.f32 %v1426_v32  ;;  %v1162_v37 = vmin.f32 %v10730_v33, 0.0  ;;  %v10736_v38 = vadd.f32 %v818_v36, %v10695_v62  ;;  %v10738_v39 = vpop.f32.mrb[11].mxu0  ;;  %v9649_v40 = vpop.eup %9648  ;;  %vm1930_vm6 = vcmp.gt.f32.partialorder %v10730_v33, 0.0 }
 0x116   : > { %9658 = vpow2.f32 %v1428_v35  ;;  %v8360_v48 = vadd.f32 -1.0, %v9649_v40  ;;  %v10774_v36 = vpop.f32.mrb[7].mxu1 }
 0x117   : > { %v1290_v41 = vmul.f32 10.0, %v1162_v37  ;;  %v1166_v42 = vmin.f32 %v10736_v38, 0.0  ;;  %v9651_v45 = vpop.eup %9650  ;;  %vm1934_vm7 = vcmp.gt.f32.partialorder %v10736_v38, 0.0 }
 0x118   : > { %v8364_v54 = vadd.f32 -1.0, %v9651_v45  ;;  %v1786_v8 = vmul.f32 0.1, %v8360_v48 }
 0x119   : > { %v1294_v46 = vmul.f32 10.0, %v1166_v42  ;;  %v1434_v51 = vmul.f32 1.442695, %v1290_v41 }
 0x11a   : > { %v824_v49 = vpop.f32.mrb[12].mxu0  ;;  %v1790_v21 = vmul.f32 0.1, %v8364_v54  ;;  %v2042_v41 = vsel %vm1914_vm0, %v10698_v0, %v1786_v8  ;;  %v10810_v54 = vpop.f32.mrb[8].mxu1 }
 0x11b   : > { %v10750_v52 = vadd.f32 %v824_v49, %v10695_v62  ;;  %v10752_v53 = vpop.f32.mrb[13].mxu0  ;;  %v1442_v60 = vmul.f32 1.442695, %v1294_v46  ;;  %9660 = vpow2.f32 %v1434_v51 }
 0x11c   : > { %v828_v55 = vpop.f32.mrb[14].mxu0 }
 0x11d   : > { %v9653_v56 = vpop.eup %9652  ;;  %v1170_v63 = vmin.f32 %v10750_v52, 0.0  ;;  %v10759_v2 = vadd.f32 %v828_v55, %v10695_v62  ;;  %v10761_v3 = vpop.f32.mrb[15].mxu0  ;;  %9662 = vpow2.f32 %v1442_v60  ;;  %vm1938_vm8 = vcmp.gt.f32.partialorder %v10750_v52, 0.0 }
 0x11e   : > { %v9655_v6 = vpop.eup %9654  ;;  %v8368_v7 = vadd.f32 -1.0, %v9653_v56 }
 0x11f   : > { %v9657_v9 = vpop.eup %9656  ;;  %v8369_v10 = vadd.f32 -1.0, %v9655_v6  ;;  %v1298_v12 = vmul.f32 10.0, %v1170_v63  ;;  %v1174_v13 = vmin.f32 %v10759_v2, 0.0  ;;  %vm1942_vm9 = vcmp.gt.f32.partialorder %v10759_v2, 0.0 }
 0x120   : > { %v9659_v17 = vpop.eup %9658  ;;  %v1794_v18 = vmul.f32 0.1, %v8368_v7  ;;  %v8372_v20 = vadd.f32 -1.0, %v9657_v9 }
 0x121   : > { %v1795_v24 = vmul.f32 0.1, %v8369_v10  ;;  %v8373_v25 = vadd.f32 -1.0, %v9659_v17  ;;  %v1302_v26 = vmul.f32 10.0, %v1174_v13  ;;  %v1450_v28 = vmul.f32 1.442695, %v1298_v12 }
 0x122   : > { %v1798_v27 = vmul.f32 0.1, %v8372_v20  ;;  %v834_v29 = vpop.f32.mrb[16].mxu0  ;;  %v2050_v37 = vsel %vm1922_vm2, %v10714_v14, %v1794_v18  ;;  %v2046_v14 = vsel %vm1918_vm1, %v10704_v4, %v1790_v21  ;;  %v10812_v4 = vpop.f32.mrb[9].mxu1  ;;  %v9610_v12 = vld [vmem:[%s16932_s4 + $0x50] sm:$0xff]  }
 0x123   : > { %v1799_v31 = vmul.f32 0.1, %v8373_v25  ;;  %v1458_v32 = vmul.f32 1.442695, %v1302_v26  ;;  %v10772_v35 = vpop.f32.mrb[17].mxu0  ;;  %v10789_v45 = vsel %vm1923_vm3, %v10717_v16, %v1795_v24  ;;  %9664 = vpow2.f32 %v1450_v28  ;;  %v10815_v60 = vpop.f32.mrb[10].mxu1 }
 0x124   : > { %v2054_v40 = vsel %vm1926_vm4, %v10721_v19, %v1798_v27  ;;  %v838_v42 = vpop.f32.mrb[18].mxu0  ;;  %17115 = vst [vmem:[#allocation2_spill] sm:$0xff] %v10789_v45  ;;  %v2364_v0 = vpack.c.bf16 %v2046_v14, %v2042_v41  ;;  %v10802_v51 = vadd.f32 %v834_v29, %v10695_v62  ;;  %v10819_v7 = vpop.f32.mrb[11].mxu1  ;;  %v9611_v28 = vld [vmem:[%s16932_s4 + $0x58] sm:$0xff]  }
 0x125   : > { %v2365_v46 = vpack.c.bf16 %v2054_v40, %v2050_v37  ;;  %v10792_v48 = vsel %vm1927_vm5, %v10725_v22, %v1799_v31  ;;  %v10797_v19 = vpop.f32.mrb[19].mxu0  ;;  %9666 = vpow2.f32 %v1458_v32  ;;  %v10805_v16 = vadd.f32 %v838_v42, %v10695_v62  ;;  %v9609_v22 = vld [vmem:[%s16932_s4 + $0x48] sm:$0xff]   ;;  %v9661_v55 = vpop.eup %9660 }
 0x126   : > { %17116 = vst [vmem:[#allocation3_spill] sm:$0xff] %v10792_v48  ;;  %9182 = vmatprep.mubr.bf16.mxu0 %v2364_v0  ;;  %v1178_v56 = vmin.f32 %v10802_v51, 0.0  ;;  %v8376_v13 = vadd.f32 -1.0, %v9661_v55  ;;  %v10838_v29 = vpop.f32.mrb[12].mxu1  ;;  %vm1946_vm10 = vcmp.gt.f32.partialorder %v10802_v51, 0.0 }
 0x127   : > { %9183 = vmatmul.mubr.bf16.vlgmr.msra.gmra.mrb[64].mxu0 %v2365_v46  ;;  %v1182_v63 = vmin.f32 %v10805_v16, 0.0  ;;  %v9663_v8 = vpop.eup %9662  ;;  %17117 = vst [vmem:[#allocation4_spill] sm:$0xff] %v10838_v29  ;;  %v10840_v37 = vpop.f32.mrb[13].mxu1  ;;  %vm1950_vm11 = vcmp.gt.f32.partialorder %v10805_v16, 0.0 }
 0x128   : > { %9255 = vmatpush3.bf16.msra.mxu0 %v10682_v58  ;;  %v1306_v9 = vmul.f32 10.0, %v1178_v56  ;;  %v8380_v25 = vadd.f32 -1.0, %v9663_v8  ;;  %v1802_v32 = vmul.f32 0.1, %v8376_v13  ;;  %17118 = vst [vmem:[#allocation5_spill] sm:$0xff] %v10840_v37  ;;  %v10843_v42 = vpop.f32.mrb[14].mxu1 }
 0x129   : > { %9256 = vmatprep.subr.bf16.mxu0 %v9609_v22  ;;  %v1310_v17 = vmul.f32 10.0, %v1182_v63  ;;  %17119 = vst [vmem:[#allocation6_spill] sm:$0xff] %v10843_v42 }
 0x12a   : > { %v844_v6 = vpop.f32.mrb[20].mxu0  ;;  %v1466_v21 = vmul.f32 1.442695, %v1306_v9  ;;  %v1806_v14 = vmul.f32 0.1, %v8380_v25 }
 0x12b   : > { %v10821_v10 = vpop.f32.mrb[21].mxu0  ;;  %v10827_v18 = vadd.f32 %v844_v6, %v10695_v62  ;;  %v1474_v26 = vmul.f32 1.442695, %v1310_v17  ;;  %v9612_v6 = vld [vmem:[%s16932_s4 + $0x60] sm:$0xff]  }
 0x12c   : > { %v848_v20 = vpop.f32.mrb[22].mxu0  ;;  %9257 = vmatpush3.bf16.msra.mxu0 %v9609_v22  ;;  %9668 = vpow2.f32 %v1466_v21  ;;  %v10845_v22 = vpop.f32.mrb[15].mxu1  ;;  %v2062_v13 = vsel %vm1934_vm7, %v10736_v38, %v1806_v14 }
 0x12d   : > { %v10830_v58 = vadd.f32 %v848_v20, %v10695_v62  ;;  %v10832_v24 = vpop.f32.mrb[23].mxu0  ;;  %v1186_v27 = vmin.f32 %v10827_v18, 0.0  ;;  %9258 = vmatprep.subr.bf16.mxu0 %v9610_v12  ;;  %v9665_v31 = vpop.eup %9664  ;;  %9670 = vpow2.f32 %v1474_v26  ;;  %17120 = vst [vmem:[#allocation7_spill] sm:$0xff] %v10845_v22  ;;  %vm1954_vm12 = vcmp.gt.f32.partialorder %v10827_v18, 0.0 }
 0x12e   : > { %v8384_v8 = vadd.f32 -1.0, %v9665_v31  ;;  %v10868_v31 = vpop.f32.mrb[16].mxu1 }
 0x12f   : > { %v9667_v40 = vpop.eup %9666  ;;  %v1190_v41 = vmin.f32 %v10830_v58, 0.0  ;;  %v1314_v46 = vmul.f32 10.0, %v1186_v27  ;;  %17121 = vst [vmem:[#allocation8_spill] sm:$0xff] %v10868_v31  ;;  %vm1958_vm13 = vcmp.gt.f32.partialorder %v10830_v58, 0.0 }
 0x130   : > { %9259 = vmatpush3.bf16.msra.mxu0 %v9610_v12  ;;  %v8388_v9 = vadd.f32 -1.0, %v9667_v40  ;;  %v2058_v12 = vsel %vm1930_vm6, %v10730_v33, %v1802_v32  ;;  %v9613_v33 = vld [vmem:[%s16932_s4 + $0x68] sm:$0xff]   ;;  %v1810_v38 = vmul.f32 0.1, %v8384_v8  ;;  %v10870_v40 = vpop.f32.mrb[17].mxu1 }
 0x131   : > { %v1318_v55 = vmul.f32 10.0, %v1190_v41  ;;  %9260 = vmatprep.subr.bf16.mxu0 %v9611_v28  ;;  %v2366_v20 = vpack.c.bf16 %v2062_v13, %v2058_v12  ;;  %v1482_v25 = vmul.f32 1.442695, %v1314_v46  ;;  %17122 = vst [vmem:[#allocation9_spill] sm:$0xff] %v10870_v40  ;;  %v10873_v14 = vpop.f32.mrb[18].mxu1 }
 0x132   : > { %v854_v0 = vpop.f32.mrb[24].mxu0  ;;  %v1814_v32 = vmul.f32 0.1, %v8388_v9  ;;  %17123 = vst [vmem:[#allocation10_spill] sm:$0xff] %v10873_v14  ;;  %v10875_v12 = vpop.f32.mrb[19].mxu1  ;;  %v9614_v9 = vld [vmem:[%s16932_s4 + $0x70] sm:$0xff]  }
 0x133   : > { %v10850_v56 = vadd.f32 %v854_v0, %v10695_v62  ;;  %v10852_v63 = vpop.f32.mrb[25].mxu0  ;;  %v1490_v27 = vmul.f32 1.442695, %v1318_v55  ;;  %9186 = vmatprep.mubr.bf16.mxu0 %v2366_v20  ;;  %9672 = vpow2.f32 %v1482_v25  ;;  %17124 = vst [vmem:[#allocation11_spill] sm:$0xff] %v10875_v12  ;;  %v2066_v20 = vsel %vm1938_vm8, %v10750_v52, %v1810_v38 }
 0x134   : > { %v858_v17 = vpop.f32.mrb[26].mxu0  ;;  %9261 = vmatpush3.bf16.msra.mxu0 %v9611_v28 }
 0x135   : > { %v10859_v21 = vpop.f32.mrb[27].mxu0  ;;  %v1194_v26 = vmin.f32 %v10850_v56, 0.0  ;;  %v10863_v41 = vadd.f32 %v858_v17, %v10695_v62  ;;  %9262 = vmatprep.subr.bf16.mxu0 %v9612_v6  ;;  %9674 = vpow2.f32 %v1490_v27  ;;  %v10892_v27 = vadd.f32 %v10706_v5, %v10711_v11  ;;  %v9615_v5 = vld [vmem:[%s16932_s4 + $0x78] sm:$0xff]  }
 0x136   : > { %v9669_v28 = vpop.eup %9668  ;;  %vm1962_vm14 = vcmp.gt.f32.partialorder %v10850_v56, 0.0 }
 0x137   : > { %v1198_v46 = vmin.f32 %v10863_v41, 0.0  ;;  %v1322_v0 = vmul.f32 10.0, %v1194_v26  ;;  %v9671_v13 = vpop.eup %9670  ;;  %v10888_v26 = vadd.f32 %v10700_v1, %v10711_v11  ;;  %17126 = vst [vmem:[#allocation13_spill] sm:$0xff] %v10892_v27  ;;  %v8392_v57 = vadd.f32 -1.0, %v9669_v28  ;;  %v10902_v1 = vpop.f32.mrb[20].mxu1 }
 0x138   : > { %9263 = vmatpush3.bf16.msra.mxu0 %v9612_v6  ;;  %v2070_v6 = vsel %vm1942_vm9, %v10759_v2, %v1814_v32  ;;  %v8396_v2 = vadd.f32 -1.0, %v9671_v13  ;;  %17127 = vst [vmem:[#allocation14_spill] sm:$0xff] %v10902_v1  ;;  %v10908_v28 = vpop.f32.mrb[21].mxu1  ;;  %v10927_v1 = vadd.f32 %v10752_v53, %v10711_v11  ;;  %vm1966_vm15 = vcmp.gt.f32.partialorder %v10863_v41, 0.0 }
 0x139   : > { %9264 = vmatprep.subr.bf16.mxu0 %v9613_v33  ;;  %v1326_v17 = vmul.f32 10.0, %v1198_v46  ;;  %17125 = vst [vmem:[#allocation12_spill] sm:$0xff] %v10888_v26  ;;  %v2367_v49 = vpack.c.bf16 %v2070_v6, %v2066_v20  ;;  %v1498_v48 = vmul.f32 1.442695, %v1322_v0  ;;  %17128 = vst [vmem:[#allocation15_spill] sm:$0xff] %v10908_v28  ;;  %v1147_v0 = vmin.f32 %v10888_v26, 0.0 }
 0x13a   : > { %v864_v55 = vpop.f32.mrb[28].mxu0  ;;  %v1818_v13 = vmul.f32 0.1, %v8392_v57  ;;  %v10917_v20 = vadd.f32 %v10732_v34, %v10711_v11  ;;  %17133 = vst [vmem:[#allocation20_spill] sm:$0xff] %v10927_v1 }
 0x13b   : > { %v10879_v8 = vpop.f32.mrb[29].mxu0  ;;  %v10897_v46 = vadd.f32 %v864_v55, %v10695_v62  ;;  %9187 = vmatmul.mubr.bf16.gmra.mrb[68].mxu0 %v2367_v49  ;;  %v1506_v38 = vmul.f32 1.442695, %v1326_v17  ;;  %v1151_v55 = vmin.f32 %v10892_v27, 0.0  ;;  %v10913_v49 = vpop.f32.mrb[22].mxu1  ;;  %v10921_v17 = vadd.f32 %v10738_v39, %v10711_v11 }
 0x13c   : > { %v868_v25 = vpop.f32.mrb[30].mxu0  ;;  %9265 = vmatpush3.bf16.msra.mxu0 %v9613_v33  ;;  %17129 = vst [vmem:[#allocation16_spill] sm:$0xff] %v10913_v49  ;;  %17130 = vst [vmem:[#allocation17_spill] sm:$0xff] %v10917_v20  ;;  %9676 = vpow2.f32 %v1498_v48  ;;  %v10923_v28 = vpop.f32.mrb[23].mxu1  ;;  %v1822_v49 = vmul.f32 0.1, %v8396_v2  ;;  %v2074_v53 = vsel %vm1946_vm10, %v10802_v51, %v1818_v13 }
 0x13d   : > { %v10894_v45 = vpop.f32.mrb[31].mxu0  ;;  %v10900_v52 = vadd.f32 %v868_v25, %v10695_v62  ;;  %9266 = vmatprep.subr.bf16.mxu0 %v9614_v9  ;;  %v1202_v32 = vmin.f32 %v10897_v46, 0.0  ;;  %17131 = vst [vmem:[#allocation18_spill] sm:$0xff] %v10921_v17  ;;  %17132 = vst [vmem:[#allocation19_spill] sm:$0xff] %v10923_v28  ;;  %v9673_v12 = vpop.eup %9672  ;;  %9678 = vpow2.f32 %v1506_v38  ;;  %v1275_v2 = vmul.f32 10.0, %v1147_v0 }
 0x13e   : > { %v2078_v14 = vsel %vm1950_vm11, %v10805_v16, %v1822_v49  ;;  %v1279_v40 = vmul.f32 10.0, %v1151_v55  ;;  %v1163_v26 = vmin.f32 %v10917_v20, 0.0  ;;  %v1167_v38 = vmin.f32 %v10921_v17, 0.0  ;;  %v10944_v31 = vpop.f32.mrb[24].mxu1 }
 0x13f   : > { %v1206_v33 = vmin.f32 %v10900_v52, 0.0  ;;  %v1330_v6 = vmul.f32 10.0, %v1202_v32  ;;  %v9675_v32 = vpop.eup %9674  ;;  %v2368_v27 = vpack.c.bf16 %v2078_v14, %v2074_v53  ;;  %17134 = vst [vmem:[#allocation21_spill] sm:$0xff] %v10944_v31  ;;  %v10951_v14 = vadd.f32 %v10761_v3, %v10711_v11 }
 0x140   : > { %9267 = vmatpush3.bf16.msra.mxu0 %v9614_v9  ;;  %v8404_v51 = vadd.f32 -1.0, %v9675_v32  ;;  %v1404_v55 = vmul.f32 1.442695, %v1275_v2  ;;  %v1412_v13 = vmul.f32 1.442695, %v1279_v40  ;;  %v1291_v32 = vmul.f32 10.0, %v1163_v26 }
 0x141   : > { %v1334_v57 = vmul.f32 10.0, %v1206_v33  ;;  %9268 = vmatprep.subr.bf16.mxu0 %v9615_v5  ;;  %v1514_v39 = vmul.f32 1.442695, %v1330_v6  ;;  %v1171_v6 = vmin.f32 %v10927_v1, 0.0  ;;  %9190 = vmatprep.mubr.bf16.mxu0 %v2368_v27  ;;  %17135 = vst [vmem:[#allocation22_spill] sm:$0xff] %v10951_v14  ;;  %v1175_v20 = vmin.f32 %v10951_v14, 0.0 }
 0x142   : > { %v874_v25 = vpop.f32.mrb[32].mxu0  ;;  %v1830_v17 = vmul.f32 0.1, %v8404_v51  ;;  %v10966_v2 = vpop.f32.mrb[25].mxu1  ;;  %vm1970_vm0 = vcmp.gt.f32.partialorder %v10897_v46, 0.0  ;;  %vm1974_vm1 = vcmp.gt.f32.partialorder %v10900_v52, 0.0 }
 0x143   : > { %v10930_v34 = vpop.f32.mrb[33].mxu0  ;;  %v10934_v48 = vadd.f32 %v874_v25, %v10695_v62  ;;  %v1522_v28 = vmul.f32 1.442695, %v1334_v57  ;;  %v8400_v57 = vadd.f32 -1.0, %v9673_v12  ;;  %9680 = vpow2.f32 %v1514_v39  ;;  %17136 = vst [vmem:[#allocation23_spill] sm:$0xff] %v10966_v2 }
 0x144   : > { %v878_v9 = vpop.f32.mrb[34].mxu0  ;;  %9269 = vmatpush3.bf16.msra.mxu0 %v9615_v5  ;;  %v494_v5 = vsub.s32 2, %v10686_v59  ;;  %v1295_v39 = vmul.f32 10.0, %v1167_v38  ;;  %v1299_v27 = vmul.f32 10.0, %v1171_v6  ;;  %v10970_v6 = vadd.f32 %v10772_v35, %v10711_v11  ;;  %v9616_v35 = vld [vmem:[%s16932_s4 + $0x80] sm:$0xff]  }
 0x145   : > { %v10938_v33 = vpop.f32.mrb[35].mxu0  ;;  %v1210_v25 = vmin.f32 %v10934_v48, 0.0  ;;  %v10947_v16 = vadd.f32 %v878_v9, %v10695_v62  ;;  %9682 = vpow2.f32 %v1522_v28  ;;  %v1826_v3 = vmul.f32 0.1, %v8400_v57  ;;  %9342 = vmatprep.subr.bf16.mxu0 %v9616_v35 }
 0x146   : > { %v9677_v1 = vpop.eup %9676  ;;  %17137 = vst [vmem:[#allocation24_spill] sm:$0xff] %v10970_v6  ;;  %v2086_v57 = vsel %vm1958_vm13, %v10830_v58, %v1830_v17  ;;  %v10991_v58 = vadd.f32 %v10821_v10, %v10711_v11  ;;  %9684 = vpow2.f32 %v1404_v55  ;;  %v1303_v42 = vmul.f32 10.0, %v1175_v20 }
 0x147   : > { %v1214_v49 = vmin.f32 %v10947_v16, 0.0  ;;  %v1338_v53 = vmul.f32 10.0, %v1210_v25  ;;  %v9679_v38 = vpop.eup %9678  ;;  %v2082_v25 = vsel %vm1954_vm12, %v10827_v18, %v1826_v3  ;;  %v10987_v18 = vadd.f32 %v10797_v19, %v10711_v11 }
 0x148   : > { %v2369_v14 = vpack.c.bf16 %v2086_v57, %v2082_v25  ;;  %17141 = vst [vmem:[#allocation28_spill] sm:$0xff] %v10991_v58  ;;  %v1436_v3 = vmul.f32 1.442695, %v1291_v32  ;;  %v10997_v25 = vrot.slane %v10692_v61, %v494_v5  ;;  %9686 = vpow2.f32 %v1412_v13 }
 0x149   : > { %v1342_v31 = vmul.f32 10.0, %v1214_v49  ;;  %v10977_v49 = vpop.f32.mrb[26].mxu1  ;;  %v1530_v0 = vmul.f32 1.442695, %v1338_v53  ;;  %17140 = vst [vmem:[#allocation27_spill] sm:$0xff] %v10987_v18  ;;  %v1179_v37 = vmin.f32 %v10970_v6, 0.0  ;;  %v11008_v13 = vadd.f32 %v10832_v24, %v10711_v11 }
 0x14a   : > { %v884_v12 = vpop.f32.mrb[36].mxu0  ;;  %17138 = vst [vmem:[#allocation25_spill] sm:$0xff] %v10977_v49  ;;  %v10980_v2 = vpop.f32.mrb[27].mxu1  ;;  %9191 = vmatmul.mubr.bf16.gmra.mrb[72].mxu0 %v2369_v14  ;;  %v1444_v19 = vmul.f32 1.442695, %v1295_v39  ;;  %v1183_v14 = vmin.f32 %v10987_v18, 0.0  ;;  %v11020_v24 = vadd.f32 %v10852_v63, %v10711_v11 }
 0x14b   : > { %v10956_v9 = vpop.f32.mrb[37].mxu0  ;;  %v10962_v40 = vadd.f32 %v884_v12, %v10695_v62  ;;  %v8408_v12 = vadd.f32 -1.0, %v9677_v1  ;;  %17139 = vst [vmem:[#allocation26_spill] sm:$0xff] %v10980_v2  ;;  %v1538_v17 = vmul.f32 1.442695, %v1342_v31  ;;  %v10994_v53 = vpop.f32.mrb[28].mxu1  ;;  %9688 = vpow2.f32 %v1530_v0 }
 0x14c   : > { %v888_v28 = vpop.f32.mrb[38].mxu0  ;;  %17142 = vst [vmem:[#allocation29_spill] sm:$0xff] %v10994_v53  ;;  %v10999_v2 = vmul.f32 1.442695, %v1299_v27  ;;  %v1187_v5 = vmin.f32 %v10991_v58, 0.0  ;;  %17143 = vst [vmem:[#allocation30_spill] sm:$0xff] %v11008_v13 }
 0x14d   : > { %v10964_v26 = vpop.f32.mrb[39].mxu0  ;;  %v10975_v51 = vadd.f32 %v888_v28, %v10695_v62  ;;  %v1218_v22 = vmin.f32 %v10962_v40, 0.0  ;;  %v8412_v28 = vadd.f32 -1.0, %v9679_v38  ;;  %v9681_v57 = vpop.eup %9680  ;;  %v1834_v55 = vmul.f32 0.1, %v8408_v12  ;;  %17146 = vst [vmem:[#allocation33_spill] sm:$0xff] %v11020_v24 }
 0x14e   : > { %9690 = vpow2.f32 %v1538_v17  ;;  %v11012_v0 = vpop.f32.mrb[29].mxu1  ;;  %v8416_v39 = vadd.f32 -1.0, %v9681_v57  ;;  %v1460_v57 = vmul.f32 1.442695, %v1303_v42  ;;  %v1311_v53 = vmul.f32 10.0, %v1183_v14 }
 0x14f   : > { %v1222_v1 = vmin.f32 %v10975_v51, 0.0  ;;  %v1346_v10 = vmul.f32 10.0, %v1218_v22  ;;  %v9683_v31 = vpop.eup %9682  ;;  %v1838_v22 = vmul.f32 0.1, %v8412_v28  ;;  %17144 = vst [vmem:[#allocation31_spill] sm:$0xff] %v11012_v0  ;;  %9692 = vpow2.f32 %v1436_v3  ;;  %v11016_v17 = vpop.f32.mrb[30].mxu1 }
 0x150   : > { %v8420_v27 = vadd.f32 -1.0, %v9683_v31  ;;  %17145 = vst [vmem:[#allocation32_spill] sm:$0xff] %v11016_v17  ;;  %v2090_v28 = vsel %vm1962_vm14, %v10850_v56, %v1834_v55  ;;  %v11028_v3 = vpop.f32.mrb[31].mxu1  ;;  %9694 = vpow2.f32 %v1444_v19  ;;  %v1307_v17 = vmul.f32 10.0, %v1179_v37  ;;  %v11039_v19 = vpop.eup %9684 }
 0x151   : > { %v1350_v38 = vmul.f32 10.0, %v1222_v1  ;;  %v1546_v12 = vmul.f32 1.442695, %v1346_v10  ;;  %v11024_v1 = vadd.f32 %v10859_v21, %v10711_v11  ;;  %v2094_v0 = vsel %vm1966_vm15, %v10863_v41, %v1838_v22  ;;  %17148 = vst [vmem:[#allocation35_spill] sm:$0xff] %v11028_v3  ;;  %v11030_v58 = vpop.f32.mrb[32].mxu1 }
 0x152   : > { %v894_v49 = vpop.f32.mrb[40].mxu0  ;;  %v2370_v31 = vpack.c.bf16 %v2094_v0, %v2090_v28  ;;  %17149 = vst [vmem:[#allocation36_spill] sm:$0xff] %v11030_v58  ;;  %v1191_v63 = vmin.f32 %v11008_v13, 0.0  ;;  %v1842_v21 = vmul.f32 0.1, %v8416_v39  ;;  %v1315_v42 = vmul.f32 10.0, %v1187_v5 }
 0x153   : > { %v11002_v32 = vpop.f32.mrb[41].mxu0  ;;  %17147 = vst [vmem:[#allocation34_spill] sm:$0xff] %v11024_v1  ;;  %v1554_v10 = vmul.f32 1.442695, %v1350_v38  ;;  %v11034_v18 = vadd.f32 %v894_v49, %v10695_v62  ;;  %9696 = vpow2.f32 %v1546_v12  ;;  %v1846_v41 = vmul.f32 0.1, %v8420_v27  ;;  %v11049_v38 = vpop.eup %9686 }
 0x154   : > { %v898_v20 = vpop.f32.mrb[42].mxu0  ;;  %9194 = vmatprep.mubr.bf16.mxu0 %v2370_v31  ;;  %v1195_v55 = vmin.f32 %v11020_v24, 0.0  ;;  %v1199_v37 = vmin.f32 %v11024_v1, 0.0  ;;  %v11045_v14 = vadd.f32 %v10879_v8, %v10711_v11  ;;  %v11055_v22 = vadd.f32 %v10894_v45, %v10711_v11  ;;  %v11064_v28 = vpop.f32.mrb[33].mxu1 }
 0x155   : > { %v11014_v35 = vpop.f32.mrb[43].mxu0  ;;  %v11037_v56 = vadd.f32 %v898_v20, %v10695_v62  ;;  %9698 = vpow2.f32 %v1554_v10  ;;  %v9689_v20 = vpop.eup %9688  ;;  %v1468_v0 = vmul.f32 1.442695, %v1307_v17  ;;  %v1226_v8 = vmin.f32 %v11034_v18, 0.0  ;;  %17152 = vst [vmem:[#allocation39_spill] sm:$0xff] %v11064_v28 }
 0x156   : > { %17150 = vst [vmem:[#allocation37_spill] sm:$0xff] %v11045_v14  ;;  %17151 = vst [vmem:[#allocation38_spill] sm:$0xff] %v11055_v22  ;;  %v2098_v39 = vsel %vm1970_vm0, %v10897_v46, %v1842_v21  ;;  %v2102_v27 = vsel %vm1974_vm1, %v10900_v52, %v1846_v41  ;;  %v1476_v58 = vmul.f32 1.442695, %v1311_v53  ;;  %v1319_v3 = vmul.f32 10.0, %v1191_v63  ;;  %v11069_v24 = vpop.f32.mrb[34].mxu1 }
 0x157   : > { %v1230_v45 = vmin.f32 %v11037_v56, 0.0  ;;  %v2371_v10 = vpack.c.bf16 %v2102_v27, %v2098_v39  ;;  %17153 = vst [vmem:[#allocation40_spill] sm:$0xff] %v11069_v24  ;;  %9700 = vpow2.f32 %v10999_v2  ;;  %v1484_v17 = vmul.f32 1.442695, %v1315_v42  ;;  %v11072_v52 = vpop.f32.mrb[35].mxu1 }
 0x158   : > { %v9691_v31 = vpop.eup %9690  ;;  %v1323_v46 = vmul.f32 10.0, %v1195_v55  ;;  %v1327_v21 = vmul.f32 10.0, %v1199_v37  ;;  %17154 = vst [vmem:[#allocation41_spill] sm:$0xff] %v11072_v52  ;;  %9702 = vpow2.f32 %v1460_v57  ;;  %v1203_v53 = vmin.f32 %v11045_v14, 0.0 }
 0x159   : > { %v11074_v41 = vpop.eup %9692  ;;  %v1207_v63 = vmin.f32 %v11055_v22, 0.0  ;;  %v8424_v28 = vadd.f32 -1.0, %v9689_v20  ;;  %9195 = vmatmul.mubr.bf16.gmra.mrb[76].mxu0 %v2371_v10  ;;  %9704 = vpow2.f32 %v1468_v0  ;;  %v11080_v39 = vadd.f32 %v10930_v34, %v10711_v11  ;;  %v11090_v20 = vpop.f32.mrb[36].mxu1 }
 0x15a   : > { %v11047_v49 = vpop.f32.mrb[44].mxu0  ;;  %v8428_v2 = vadd.f32 -1.0, %v9691_v31  ;;  %v1354_v42 = vmul.f32 10.0, %v1226_v8  ;;  %v11082_v55 = vpop.eup %9694  ;;  %9706 = vpow2.f32 %v1476_v58  ;;  %v1492_v37 = vmul.f32 1.442695, %v1319_v3  ;;  %17157 = vst [vmem:[#allocation44_spill] sm:$0xff] %v11090_v20 }
 0x15b   : > { %v11057_v5 = vpop.f32.mrb[45].mxu0  ;;  %17155 = vst [vmem:[#allocation42_spill] sm:$0xff] %v11080_v39  ;;  %v11086_v57 = vadd.f32 %v10938_v33, %v10711_v11  ;;  %v1358_v27 = vmul.f32 10.0, %v1230_v45  ;;  %9708 = vpow2.f32 %v1484_v17  ;;  %v1500_v0 = vmul.f32 1.442695, %v1323_v46 }
 0x15c   : > { %v11062_v12 = vpop.f32.mrb[46].mxu0  ;;  %v1508_v10 = vmul.f32 1.442695, %v1327_v21  ;;  %v11094_v34 = vadd.f32 %v10956_v9, %v10711_v11  ;;  %v1331_v3 = vmul.f32 10.0, %v1203_v53  ;;  %v1335_v31 = vmul.f32 10.0, %v1207_v63 }
 0x15d   : > { %v11067_v1 = vpop.f32.mrb[47].mxu0  ;;  %17156 = vst [vmem:[#allocation43_spill] sm:$0xff] %v11086_v57  ;;  %v9697_v58 = vpop.eup %9696  ;;  %v11100_v33 = vadd.f32 %v10964_v26, %v10711_v11  ;;  %v1850_v45 = vmul.f32 0.1, %v8424_v28  ;;  %vm1978_vm2 = vcmp.gt.f32.partialorder %v10934_v48, 0.0  ;;  %v1211_v17 = vmin.f32 %v11080_v39, 0.0 }
 0x15e   : > { %17158 = vst [vmem:[#allocation45_spill] sm:$0xff] %v11094_v34  ;;  %v1562_v46 = vmul.f32 1.442695, %v1354_v42  ;;  %v1854_v21 = vmul.f32 0.1, %v8428_v2  ;;  %9710 = vpow2.f32 %v1492_v37  ;;  %vm1982_vm3 = vcmp.gt.f32.partialorder %v10947_v16, 0.0 }
 0x15f   : > { %17159 = vst [vmem:[#allocation46_spill] sm:$0xff] %v11100_v33  ;;  %v9699_v9 = vpop.eup %9698  ;;  %v1215_v53 = vmin.f32 %v11086_v57, 0.0  ;;  %v1570_v63 = vmul.f32 1.442695, %v1358_v27  ;;  %v11110_v26 = vpop.f32.mrb[37].mxu1  ;;  %v8432_v28 = vadd.f32 -1.0, %v9697_v58  ;;  %v2106_v14 = vsel %vm1978_vm2, %v10934_v48, %v1850_v45 }
 0x160   : > { %17160 = vst [vmem:[#allocation47_spill] sm:$0xff] %v11110_v26  ;;  %v1219_v22 = vmin.f32 %v11094_v34, 0.0  ;;  %v2110_v39 = vsel %vm1982_vm3, %v10947_v16, %v1854_v21  ;;  %9712 = vpow2.f32 %v1500_v0  ;;  %v1516_v2 = vmul.f32 1.442695, %v1331_v3  ;;  %v11118_v29 = vpop.f32.mrb[38].mxu1 }
 0x161   : > { %v1223_v42 = vmin.f32 %v11100_v33, 0.0  ;;  %v2372_v37 = vpack.c.bf16 %v2110_v39, %v2106_v14  ;;  %v11116_v13 = vpop.eup %9700  ;;  %v1524_v57 = vmul.f32 1.442695, %v1335_v31  ;;  %v1339_v27 = vmul.f32 10.0, %v1211_v17  ;;  %17161 = vst [vmem:[#allocation48_spill] sm:$0xff] %v11118_v29  ;;  %v11134_v45 = vpop.f32.mrb[39].mxu1 }
 0x162   : > { %v11088_v52 = vpop.f32.mrb[48].mxu0  ;;  %v8436_v6 = vadd.f32 -1.0, %v9699_v9  ;;  %9714 = vpow2.f32 %v1562_v46  ;;  %v11120_v58 = vpop.eup %9702  ;;  %v1343_v34 = vmul.f32 10.0, %v1215_v53  ;;  %v11124_v48 = vadd.f32 %v11047_v49, %v10695_v62  ;;  %17162 = vst [vmem:[#allocation49_spill] sm:$0xff] %v11134_v45 }
 0x163   : > { %v11096_v8 = vpop.f32.mrb[49].mxu0  ;;  %9716 = vpow2.f32 %v1570_v63  ;;  %9198 = vmatprep.mubr.bf16.mxu0 %v2372_v37  ;;  %v9705_v14 = vpop.eup %9704  ;;  %v1347_v39 = vmul.f32 10.0, %v1219_v22  ;;  %v11130_v0 = vadd.f32 %v11062_v12, %v10695_v62  ;;  %v1858_v3 = vmul.f32 0.1, %v8432_v28 }
 0x164   : > { %v11102_v24 = vpop.f32.mrb[50].mxu0  ;;  %9718 = vpow2.f32 %v1508_v10  ;;  %v9707_v17 = vpop.eup %9706  ;;  %v1351_v46 = vmul.f32 10.0, %v1223_v42  ;;  %v17163_v49 = vsub.s32 3, %v10686_v59  ;;  %v1532_v12 = vmul.f32 1.442695, %v1339_v27 }
 0x165   : > { %v11108_v20 = vpop.f32.mrb[51].mxu0  ;;  %9720 = vpow2.f32 %v1516_v2  ;;  %v11143_v22 = vpop.f32.mrb[40].mxu1  ;;  %v1862_v53 = vmul.f32 0.1, %v8436_v6  ;;  %v11147_v63 = vadd.f32 %v10741_v43, %v10997_v25  ;;  %v1540_v2 = vmul.f32 1.442695, %v1343_v34 }
 0x166   : > { %v11139_v21 = vrot.slane %v10692_v61, %v17163_v49  ;;  %17164 = vst [vmem:[#allocation50_spill] sm:$0xff] %v11143_v22  ;;  %v9709_v10 = vpop.eup %9708  ;;  %9722 = vpow2.f32 %v1524_v57  ;;  %vm1986_vm4 = vcmp.gt.f32.partialorder %v10962_v40, 0.0  ;;  %vm1990_vm5 = vcmp.gt.f32.partialorder %v10975_v51, 0.0  ;;  %v11164_v22 = vpop.f32.mrb[41].mxu1 }
 0x167   : > { %17165 = vst [vmem:[#allocation51_spill] sm:$0xff] %v11147_v63  ;;  %v1234_v59 = vmin.f32 %v11124_v48, 0.0  ;;  %v1548_v61 = vmul.f32 1.442695, %v1347_v39  ;;  %v1238_v42 = vmin.f32 %v11130_v0, 0.0  ;;  %v2114_v57 = vsel %vm1986_vm4, %v10962_v40, %v1858_v3  ;;  %17167 = vst [vmem:[#allocation53_spill] sm:$0xff] %v11164_v22 }
 0x168   : > { %v2118_v6 = vsel %vm1990_vm5, %v10975_v51, %v1862_v53  ;;  %v9711_v37 = vpop.eup %9710  ;;  %v11158_v43 = vadd.f32 -1.0, %v11039_v19  ;;  %v1556_v27 = vmul.f32 1.442695, %v1351_v46  ;;  %v11162_v34 = vadd.f32 %v11002_v32, %v10711_v11  ;;  %v11177_v19 = vpop.f32.mrb[42].mxu1 }
 0x169   : > { %v2373_v49 = vpack.c.bf16 %v2118_v6, %v2114_v57  ;;  %v11167_v39 = vadd.f32 -1.0, %v11049_v38  ;;  %9724 = vpow2.f32 %v1532_v12  ;;  %v11171_v40 = vadd.f32 %v11014_v35, %v10711_v11  ;;  %17170 = vst [vmem:[#allocation56_spill] sm:$0xff] %v11177_v19 }
 0x16a   : > { %v11126_v16 = vpop.f32.mrb[52].mxu0  ;;  %17166 = vst [vmem:[#allocation52_spill] sm:$0xff] %v11162_v34  ;;  %v11175_v51 = vadd.f32 %v11057_v5, %v10711_v11  ;;  %v9713_v3 = vpop.eup %9712  ;;  %v11180_v32 = vadd.f32 -1.0, %v11074_v41  ;;  %9726 = vpow2.f32 %v1540_v2  ;;  %v1362_v46 = vmul.f32 10.0, %v1234_v59 }
 0x16b   : > { %v11132_v31 = vpop.f32.mrb[53].mxu0  ;;  %17168 = vst [vmem:[#allocation54_spill] sm:$0xff] %v11171_v40  ;;  %9199 = vmatmul.mubr.bf16.gmra.mrb[80].mxu0 %v2373_v49  ;;  %v11186_v35 = vadd.f32 -1.0, %v11082_v55  ;;  %9728 = vpow2.f32 %v1548_v61  ;;  %v1366_v5 = vmul.f32 10.0, %v1238_v42  ;;  %v11190_v57 = vadd.f32 %v11067_v1, %v10711_v11  ;;  %v11204_v61 = vpop.f32.mrb[43].mxu1 }
 0x16c   : > { %v11141_v9 = vpop.f32.mrb[54].mxu0  ;;  %17169 = vst [vmem:[#allocation55_spill] sm:$0xff] %v11175_v51  ;;  %v9715_v53 = vpop.eup %9714  ;;  %v11195_v2 = vadd.f32 -1.0, %v11116_v13  ;;  %9730 = vpow2.f32 %v1556_v27  ;;  %v1227_v59 = vmin.f32 %v11162_v34, 0.0  ;;  %v11200_v49 = vadd.f32 %v11088_v52, %v10695_v62  ;;  %17172 = vst [vmem:[#allocation58_spill] sm:$0xff] %v11204_v61 }
 0x16d   : > { %v11149_v28 = vpop.f32.mrb[55].mxu0  ;;  %17171 = vst [vmem:[#allocation57_spill] sm:$0xff] %v11190_v57  ;;  %v9717_v41 = vpop.eup %9716  ;;  %v11207_v1 = vadd.f32 -1.0, %v11120_v58  ;;  %v11209_v38 = vadd.f32 -1.0, %v9705_v14  ;;  %v1231_v13 = vmin.f32 %v11171_v40, 0.0  ;;  %v1235_v27 = vmin.f32 %v11175_v51, 0.0 }
 0x16e   : > { %v9719_v42 = vpop.eup %9718  ;;  %v11215_v22 = vpop.f32.mrb[44].mxu1  ;;  %v11217_v34 = vadd.f32 -1.0, %v9707_v17  ;;  %v8440_v45 = vadd.f32 -1.0, %v9715_v53  ;;  %v1578_v29 = vmul.f32 1.442695, %v1362_v46  ;;  %v11221_v61 = vadd.f32 %v11096_v8, %v10711_v11 }
 0x16f   : > { %17173 = vst [vmem:[#allocation59_spill] sm:$0xff] %v11209_v38  ;;  %17174 = vst [vmem:[#allocation60_spill] sm:$0xff] %v11215_v22  ;;  %v9721_v52 = vpop.eup %9720  ;;  %v11223_v14 = vadd.f32 -1.0, %v9709_v10  ;;  %v8444_v26 = vadd.f32 -1.0, %v9717_v41  ;;  %v1586_v40 = vmul.f32 1.442695, %v1366_v5  ;;  %v11238_v5 = vadd.f32 %v11102_v24, %v10695_v62 }
 0x170   : > { %17175 = vst [vmem:[#allocation61_spill] sm:$0xff] %v11217_v34  ;;  %17176 = vst [vmem:[#allocation62_spill] sm:$0xff] %v11221_v61  ;;  %v9723_v58 = vpop.eup %9722  ;;  %v1239_v51 = vmin.f32 %v11190_v57, 0.0  ;;  %v11226_v33 = vadd.f32 -1.0, %v9711_v37  ;;  %v11228_v38 = vadd.f32 -1.0, %v9713_v3  ;;  %v1355_v22 = vmul.f32 10.0, %v1227_v59 }
 0x171   : > { %17177 = vst [vmem:[#allocation63_spill] sm:$0xff] %v11223_v14  ;;  %v1242_v17 = vmin.f32 %v11200_v49, 0.0  ;;  %v11231_v53 = vadd.f32 -1.0, %v9719_v42  ;;  %v11233_v46 = vadd.f32 -1.0, %v9721_v52  ;;  %v1359_v8 = vmul.f32 10.0, %v1231_v13 }
 0x172   : > { %v11183_v12 = vpop.f32.mrb[56].mxu0  ;;  %17178 = vst [vmem:[#allocation64_spill] sm:$0xff] %v11226_v33  ;;  %17179 = vst [vmem:[#allocation65_spill] sm:$0xff] %v11228_v38  ;;  %v1363_v34 = vmul.f32 10.0, %v1235_v27  ;;  %9732 = vpow2.f32 %v1578_v29  ;;  %v1243_v10 = vmin.f32 %v11221_v61, 0.0  ;;  %v11242_v59 = vadd.f32 -1.0, %v9723_v58 }
 0x173   : > { %v11192_v6 = vpop.f32.mrb[57].mxu0  ;;  %17180 = vst [vmem:[#allocation66_spill] sm:$0xff] %v11231_v53  ;;  %17181 = vst [vmem:[#allocation67_spill] sm:$0xff] %v11233_v46  ;;  %v1866_v37 = vmul.f32 0.1, %v8440_v45  ;;  %v9725_v3 = vpop.eup %9724  ;;  %9734 = vpow2.f32 %v1586_v40  ;;  %v1367_v42 = vmul.f32 10.0, %v1239_v51  ;;  %v11252_v58 = vadd.f32 %v11108_v20, %v10711_v11 }
 0x174   : > { %v11202_v55 = vpop.f32.mrb[58].mxu0  ;;  %17182 = vst [vmem:[#allocation68_spill] sm:$0xff] %v11242_v59  ;;  %v1870_v57 = vmul.f32 0.1, %v8444_v26  ;;  %v9727_v13 = vpop.eup %9726  ;;  %vm1994_vm6 = vcmp.gt.f32.partialorder %v11034_v18, 0.0  ;;  %vm1998_vm7 = vcmp.gt.f32.partialorder %v11037_v56, 0.0 }
 0x175   : > { %v11213_v19 = vpop.f32.mrb[59].mxu0  ;;  %v1564_v29 = vmul.f32 1.442695, %v1355_v22  ;;  %v1370_v27 = vmul.f32 10.0, %v1242_v17  ;;  %v9729_v45 = vpop.eup %9728  ;;  %v1572_v61 = vmul.f32 1.442695, %v1359_v8  ;;  %v2122_v40 = vsel %vm1994_vm6, %v11034_v18, %v1866_v37 }
 0x176   : > { %17183 = vst [vmem:[#allocation69_spill] sm:$0xff] %v11252_v58  ;;  %v2126_v26 = vsel %vm1998_vm7, %v11037_v56, %v1870_v57  ;;  %v11258_v59 = vpop.f32.mrb[45].mxu1  ;;  %v9731_v22 = vpop.eup %9730  ;;  %v1580_v46 = vmul.f32 1.442695, %v1363_v34  ;;  %v1371_v53 = vmul.f32 10.0, %v1243_v10  ;;  %v1246_v17 = vmin.f32 %v11238_v5, 0.0 }
 0x177   : > { %17184 = vst [vmem:[#allocation70_spill] sm:$0xff] %v11258_v59  ;;  %v2374_v38 = vpack.c.bf16 %v2126_v26, %v2122_v40  ;;  %v11261_v33 = vpop.f32.mrb[46].mxu1  ;;  %v11263_v8 = vadd.f32 -1.0, %v9725_v3  ;;  %v11265_v20 = vadd.f32 -1.0, %v9727_v13  ;;  %v1588_v14 = vmul.f32 1.442695, %v1367_v42 }
 0x178   : > { %17185 = vst [vmem:[#allocation71_spill] sm:$0xff] %v11261_v33  ;;  %v11269_v18 = vadd.f32 %v10766_v15, %v10997_v25  ;;  %v11271_v56 = vpop.f32.mrb[47].mxu1  ;;  %v11273_v57 = vadd.f32 -1.0, %v9729_v45  ;;  %9736 = vpow2.f32 %v1564_v29  ;;  %v1594_v34 = vmul.f32 1.442695, %v1370_v27 }
 0x179   : > { %17186 = vst [vmem:[#allocation72_spill] sm:$0xff] %v11271_v56  ;;  %9202 = vmatprep.mubr.bf16.mxu0 %v2374_v38  ;;  %v11277_v10 = vadd.f32 %v10768_v23, %v11139_v21  ;;  %v11279_v37 = vpop.f32.mrb[48].mxu1  ;;  %v11281_v3 = vadd.f32 -1.0, %v9731_v22  ;;  %9738 = vpow2.f32 %v1572_v61  ;;  %v1247_v42 = vmin.f32 %v11252_v58, 0.0 }
 0x17a   : > { %v11240_v41 = vpop.f32.mrb[60].mxu0  ;;  %17187 = vst [vmem:[#allocation73_spill] sm:$0xff] %v11279_v37  ;;  %v1156_v15 = vmin.f32 %v11269_v18, 0.0  ;;  %9740 = vpow2.f32 %v1580_v46  ;;  %v1596_v13 = vmul.f32 1.442695, %v1371_v53  ;;  %v1374_v45 = vmul.f32 10.0, %v1246_v17 }
 0x17b   : > { %v11244_v52 = vpop.f32.mrb[61].mxu0  ;;  %17188 = vst [vmem:[#allocation74_spill] sm:$0xff] %v11281_v3  ;;  %v1157_v29 = vmin.f32 %v11277_v10, 0.0  ;;  %9742 = vpow2.f32 %v1588_v14  ;;  %v11288_v38 = vadd.f32 %v11126_v16, %v10695_v62  ;;  %v11292_v23 = vadd.f32 %v10743_v44, %v11139_v21  ;;  %v11294_v61 = vpop.f32.mrb[49].mxu1 }
 0x17c   : > { %v11248_v24 = vpop.f32.mrb[62].mxu0  ;;  %v1284_v27 = vmul.f32 10.0, %v1156_v15  ;;  %17190 = vst [vmem:[#allocation76_spill] sm:$0xff] %v11294_v61  ;;  %v9733_v40 = vpop.eup %9732  ;;  %9744 = vpow2.f32 %v1594_v34  ;;  %v11298_v53 = vadd.f32 %v11132_v31, %v10711_v11  ;;  %v11302_v14 = vadd.f32 %v11141_v9, %v10695_v62 }
 0x17d   : > { %v11256_v51 = vpop.f32.mrb[63].mxu0  ;;  %17189 = vst [vmem:[#allocation75_spill] sm:$0xff] %v11292_v23  ;;  %v1285_v46 = vmul.f32 10.0, %v1157_v29  ;;  %v9735_v16 = vpop.eup %9734  ;;  %vm2002_vm8 = vcmp.gt.f32.partialorder %v11124_v48, 0.0  ;;  %vm2006_vm9 = vcmp.gt.f32.partialorder %v11130_v0, 0.0  ;;  %v1375_v44 = vmul.f32 10.0, %v1247_v42 }
 0x17e   : > { %17191 = vst [vmem:[#allocation77_spill] sm:$0xff] %v11298_v53  ;;  %v17192_v26 = vmin.f32 %v11147_v63, 0.0  ;;  %v1422_v17 = vmul.f32 1.442695, %v1284_v27  ;;  %v11310_v34 = vadd.f32 %v10770_v30, %v10997_v25  ;;  %9746 = vpow2.f32 %v1596_v13  ;;  %v11316_v29 = vpop.f32.mrb[50].mxu1 }
 0x17f   : > { %v1602_v31 = vmul.f32 1.442695, %v1374_v45  ;;  %v1424_v15 = vmul.f32 1.442695, %v1285_v46  ;;  %v11314_v9 = vadd.f32 %v10774_v36, %v11139_v21  ;;  %17193 = vst [vmem:[#allocation78_spill] sm:$0xff] %v11316_v29  ;;  %v8448_v61 = vadd.f32 -1.0, %v9733_v40 }
 0x180   : > { %v1276_v22 = vmul.f32 10.0, %v17192_v26  ;;  %v1250_v42 = vmin.f32 %v11288_v38, 0.0  ;;  %9748 = vpow2.f32 %v1422_v17  ;;  %v1160_v26 = vmin.f32 %v11310_v34, 0.0  ;;  %v11320_v27 = vpop.f32.mrb[51].mxu1  ;;  %v9623_v36 = vld [vmem:[%s16934_s6] sm:$0xff]  }
 0x181   : > { %17194 = vst [vmem:[#allocation79_spill] sm:$0xff] %v11320_v27  ;;  %v8452_v63 = vadd.f32 -1.0, %v9735_v16  ;;  %v1251_v30 = vmin.f32 %v11298_v53, 0.0  ;;  %v1149_v13 = vmin.f32 %v11292_v23, 0.0  ;;  %v1254_v45 = vmin.f32 %v11302_v14, 0.0  ;;  %v11328_v46 = vpop.f32.mrb[52].mxu1  ;;  %9214 = vmatprep.subr.bf16.mxu1 %v9623_v36 }
 0x182   : > { %17195 = vst [vmem:[#allocation80_spill] sm:$0xff] %v11328_v46  ;;  %v11332_v40 = vadd.f32 %v11183_v12, %v10695_v62  ;;  %9750 = vpow2.f32 %v1424_v15  ;;  %v1288_v17 = vmul.f32 10.0, %v1160_v26  ;;  %v1161_v16 = vmin.f32 %v11314_v9, 0.0  ;;  %v9737_v27 = vpop.eup %9736  ;;  %9215 = vmatpush3.bf16.msra.mxu1 %v9623_v36 }
 0x183   : > { %9752 = vpow2.f32 %v1602_v31  ;;  %v1604_v29 = vmul.f32 1.442695, %v1375_v44  ;;  %v1406_v23 = vmul.f32 1.442695, %v1276_v22  ;;  %v11337_v37 = vadd.f32 %v11202_v55, %v10695_v62  ;;  %v9739_v53 = vpop.eup %9738  ;;  %v11343_v22 = vpop.f32.mrb[53].mxu1 }
 0x184   : > { %v1378_v56 = vmul.f32 10.0, %v1250_v42  ;;  %v1430_v46 = vmul.f32 1.442695, %v1288_v17  ;;  %v1289_v33 = vmul.f32 10.0, %v1161_v16  ;;  %v1874_v59 = vmul.f32 0.1, %v8448_v61  ;;  %v9741_v12 = vpop.eup %9740 }
 0x185   : > { %v1277_v15 = vmul.f32 10.0, %v1149_v13  ;;  %v1382_v26 = vmul.f32 10.0, %v1254_v45  ;;  %v11341_v58 = vadd.f32 %v10745_v47, %v10997_v25  ;;  %v1878_v44 = vmul.f32 0.1, %v8452_v63  ;;  %v9743_v31 = vpop.eup %9742  ;;  %v11346_v17 = vpop.f32.mrb[54].mxu1 }
 0x186   : > { %v1379_v55 = vmul.f32 10.0, %v1251_v30  ;;  %v1258_v3 = vmin.f32 %v11332_v40, 0.0  ;;  %9754 = vpow2.f32 %v1430_v46  ;;  %v1432_v42 = vmul.f32 1.442695, %v1289_v33  ;;  %17196 = vst [vmem:[#allocation81_spill] sm:$0xff] %v11346_v17  ;;  %v9745_v61 = vpop.eup %9744 }
 0x187   : > { %v11350_v13 = vadd.f32 %v11149_v28, %v10711_v11  ;;  %v1262_v45 = vmin.f32 %v11337_v37, 0.0  ;;  %v2130_v47 = vsel %vm2002_vm8, %v11124_v48, %v1874_v59  ;;  %v2134_v63 = vsel %vm2006_vm9, %v11130_v0, %v1878_v44  ;;  %v11370_v44 = vpop.f32.mrb[55].mxu1 }
 0x188   : > { %v1610_v30 = vmul.f32 1.442695, %v1378_v56  ;;  %v11361_v33 = vadd.f32 %v10747_v50, %v11139_v21  ;;  %9756 = vpow2.f32 %v1432_v42  ;;  %v2375_v36 = vpack.c.bf16 %v2134_v63, %v2130_v47  ;;  %v11363_v46 = vpop.eup %9746 }
 0x189   : > { %v11365_v28 = vadd.f32 -1.0, %v9737_v27  ;;  %9758 = vpow2.f32 %v1604_v29  ;;  %v1618_v16 = vmul.f32 1.442695, %v1382_v26  ;;  %v1152_v17 = vmin.f32 %v11341_v58, 0.0  ;;  %v11373_v27 = vpop.f32.mrb[56].mxu1 }
 0x18a   : > { %17197 = vst [vmem:[#allocation82_spill] sm:$0xff] %v11361_v33  ;;  %v9749_v48 = vpop.eup %9748  ;;  %v11368_v59 = vadd.f32 -1.0, %v9739_v53  ;;  %9760 = vpow2.f32 %v1406_v23  ;;  %v1408_v0 = vmul.f32 1.442695, %v1277_v15  ;;  %v1386_v56 = vmul.f32 10.0, %v1258_v3  ;;  %9203 = vmatmul.mubr.bf16.gmra.mrb[84].mxu0 %v2375_v36  ;;  %17198 = vst [vmem:[#allocation83_spill] sm:$0xff] %v11373_v27 }
 0x18b   : > { %v1612_v50 = vmul.f32 1.442695, %v1379_v55  ;;  %v1255_v42 = vmin.f32 %v11350_v13, 0.0  ;;  %v8370_v47 = vadd.f32 -1.0, %v9749_v48  ;;  %v1390_v63 = vmul.f32 10.0, %v1262_v45  ;;  %v11384_v48 = vpop.f32.mrb[57].mxu1 }
 0x18c   : > { %v9751_v29 = vpop.eup %9750  ;;  %v11375_v26 = vadd.f32 -1.0, %v9741_v12  ;;  %9762 = vpow2.f32 %v1610_v30  ;;  %v1153_v53 = vmin.f32 %v11361_v33, 0.0  ;;  %v11380_v23 = vadd.f32 %v11240_v41, %v10695_v62  ;;  %17199 = vst [vmem:[#allocation84_spill] sm:$0xff] %v11384_v48  ;;  %v11394_v48 = vpop.f32.mrb[58].mxu1 }
 0x18d   : > { %v9753_v3 = vpop.eup %9752  ;;  %v11382_v15 = vadd.f32 -1.0, %v9743_v31  ;;  %9764 = vpow2.f32 %v1618_v16  ;;  %v1280_v55 = vmul.f32 10.0, %v1152_v17  ;;  %v8371_v36 = vadd.f32 -1.0, %v9751_v29  ;;  %17200 = vst [vmem:[#allocation85_spill] sm:$0xff] %v11394_v48 }
 0x18e   : > { %v8456_v45 = vadd.f32 -1.0, %v9745_v61  ;;  %vm2010_vm10 = vcmp.gt.f32.partialorder %v11200_v49, 0.0  ;;  %vm2014_vm11 = vcmp.gt.f32.partialorder %v11238_v5, 0.0  ;;  %9766 = vpow2.f32 %v1408_v0 }
 0x18f   : > { %v1626_v12 = vmul.f32 1.442695, %v1386_v56  ;;  %v11390_v30 = vadd.f32 %v11248_v24, %v10695_v62  ;;  %9768 = vpow2.f32 %v1612_v50  ;;  %v1383_v41 = vmul.f32 10.0, %v1255_v42  ;;  %v11403_v42 = vpop.f32.mrb[59].mxu1 }
 0x190   : > { %v1796_v31 = vmul.f32 0.1, %v8370_v47  ;;  %v1634_v33 = vmul.f32 1.442695, %v1390_v63  ;;  %v9755_v16 = vpop.eup %9754  ;;  %v8460_v17 = vadd.f32 -1.0, %v9753_v3  ;;  %v1281_v29 = vmul.f32 10.0, %v1153_v53 }
 0x191   : > { %vm1924_vm12 = vcmp.gt.f32.partialorder %v11269_v18, 0.0  ;;  %v1266_v61 = vmin.f32 %v11380_v23, 0.0  ;;  %v1414_v27 = vmul.f32 1.442695, %v1280_v55  ;;  %v11398_v0 = vadd.f32 %v11192_v6, %v10711_v11  ;;  %17201 = vst [vmem:[#allocation86_spill] sm:$0xff] %v11403_v42  ;;  %v11408_v3 = vpop.f32.mrb[60].mxu1 }
 0x192   : > { %v1797_v62 = vmul.f32 0.1, %v8371_v36  ;;  %v8374_v24 = vadd.f32 -1.0, %v9755_v16  ;;  %v9757_v56 = vpop.eup %9756  ;;  %9770 = vpow2.f32 %v1626_v12  ;;  %vm1925_vm13 = vcmp.gt.f32.partialorder %v11277_v10, 0.0  ;;  %17203 = vst [vmem:[#allocation88_spill] sm:$0xff] %v11408_v3 }
 0x193   : > { %vm1928_vm14 = vcmp.gt.f32.partialorder %v11310_v34, 0.0  ;;  %v1270_v50 = vmin.f32 %v11390_v30, 0.0  ;;  %v9759_v47 = vpop.eup %9758  ;;  %v11406_v63 = vsel %vm1924_vm12, %v11269_v18, %v1796_v31  ;;  %9772 = vpow2.f32 %v1634_v33 }
 0x194   : > { %17202 = vst [vmem:[#allocation87_spill] sm:$0xff] %v11406_v63  ;;  %v1800_v53 = vmul.f32 0.1, %v8374_v24  ;;  %v8375_v6 = vadd.f32 -1.0, %v9757_v56  ;;  %v9761_v55 = vpop.eup %9760  ;;  %vm1929_vm15 = vcmp.gt.f32.partialorder %v11314_v9, 0.0  ;;  %v1394_v36 = vmul.f32 10.0, %v1266_v61 }
 0x195   : > { %v1882_v12 = vmul.f32 0.1, %v8456_v45  ;;  %v1886_v16 = vmul.f32 0.1, %v8460_v17  ;;  %v11412_v48 = vsel %vm1925_vm13, %v11277_v10, %v1797_v62  ;;  %v11419_v18 = vadd.f32 %v11213_v19, %v10711_v11  ;;  %v11441_v62 = vpop.f32.mrb[61].mxu1 }
 0x196   : > { %17204 = vst [vmem:[#allocation89_spill] sm:$0xff] %v11412_v48  ;;  %v11415_v42 = vsel %vm1928_vm14, %v11310_v34, %v1800_v53  ;;  %v1801_v33 = vmul.f32 0.1, %v8375_v6  ;;  %v9763_v31 = vpop.eup %9762  ;;  %v1620_v24 = vmul.f32 1.442695, %v1383_v41  ;;  %v1259_v56 = vmin.f32 %v11398_v0, 0.0 }
 0x197   : > { %17205 = vst [vmem:[#allocation90_spill] sm:$0xff] %v11415_v42  ;;  %v1398_v45 = vmul.f32 10.0, %v1270_v50  ;;  %v9765_v17 = vpop.eup %9764  ;;  %vm2018_vm0 = vcmp.gt.f32.partialorder %v11288_v38, 0.0  ;;  %vm2022_vm1 = vcmp.gt.f32.partialorder %v11302_v14, 0.0  ;;  %v11433_v19 = vadd.f32 %v10810_v54, %v10997_v25  ;;  %17207 = vst [vmem:[#allocation92_spill] sm:$0xff] %v11441_v62 }
 0x198   : > { %v11429_v10 = vsel %vm1929_vm15, %v11314_v9, %v1801_v33  ;;  %v2138_v34 = vsel %vm2010_vm10, %v11200_v49, %v1882_v12  ;;  %v2142_v41 = vsel %vm2014_vm11, %v11238_v5, %v1886_v16  ;;  %v9767_v50 = vpop.eup %9766  ;;  %v11444_v53 = vadd.f32 -1.0, %v11363_v46  ;;  %v11448_v33 = vpop.f32.mrb[62].mxu1 }
 0x199   : > { %17206 = vst [vmem:[#allocation91_spill] sm:$0xff] %v11429_v10  ;;  %v1642_v6 = vmul.f32 1.442695, %v1394_v36  ;;  %v2376_v54 = vpack.c.bf16 %v2142_v41, %v2138_v34  ;;  %17208 = vst [vmem:[#allocation93_spill] sm:$0xff] %v11448_v33  ;;  %v9769_v61 = vpop.eup %9768  ;;  %v8464_v63 = vadd.f32 -1.0, %v9763_v31  ;;  %v1263_v12 = vmin.f32 %v11419_v18, 0.0 }
 0x19a   : > { %v1416_v49 = vmul.f32 1.442695, %v1281_v29  ;;  %v11453_v5 = vadd.f32 %v11244_v52, %v10711_v11  ;;  %v11455_v16 = vpop.f32.mrb[63].mxu1  ;;  %v8468_v46 = vadd.f32 -1.0, %v9765_v17  ;;  %9774 = vpow2.f32 %v1414_v27  ;;  %v17213_v10 = vld [vmem:[#allocation4_spill] sm:$0xff] }
 0x19b   : > { %17209 = vst [vmem:[#allocation94_spill] sm:$0xff] %v11455_v16  ;;  %v11459_v9 = vadd.f32 %v10812_v4, %v11139_v21  ;;  %v1650_v36 = vmul.f32 1.442695, %v1398_v45  ;;  %9206 = vmatprep.mubr.bf16.mxu0 %v2376_v54  ;;  %9776 = vpow2.f32 %v1620_v24  ;;  %v1387_v34 = vmul.f32 10.0, %v1259_v56  ;;  %v17222_v16 = vld [vmem:[#allocation12_spill] sm:$0xff] }
 0x19c   : > { %v1164_v29 = vmin.f32 %v11433_v19, 0.0  ;;  %v11464_v31 = vadd.f32 %v10815_v60, %v10997_v25  ;;  %v9771_v52 = vpop.eup %9770  ;;  %v11466_v41 = vadd.f32 -1.0, %v9759_v47  ;;  %v11468_v48 = vadd.f32 -1.0, %v9761_v55  ;;  %v9628_v60 = vld [vmem:[%s16934_s6 + $0x8] sm:$0xff]  }
 0x19d   : > { %17210 = vst [vmem:[#allocation95_spill] sm:$0xff] %v11459_v9  ;;  %9778 = vpow2.f32 %v1642_v6  ;;  %v11472_v4 = vadd.f32 %v11256_v51, %v10711_v11  ;;  %v9773_v27 = vpop.eup %9772  ;;  %v1391_v24 = vmul.f32 10.0, %v1263_v12  ;;  %v1267_v56 = vmin.f32 %v11453_v5, 0.0  ;;  %9216 = vmatprep.subr.bf16.mxu1 %v9628_v60 }
 0x19e   : > { %9780 = vpow2.f32 %v1416_v49  ;;  %v1890_v45 = vmul.f32 0.1, %v8464_v63  ;;  %vm2026_vm2 = vcmp.gt.f32.partialorder %v11332_v40, 0.0  ;;  %v1165_v47 = vmin.f32 %v11459_v9, 0.0  ;;  %9217 = vmatpush3.bf16.msra.mxu1 %v9628_v60 }
 0x19f   : > { %9782 = vpow2.f32 %v1650_v36  ;;  %v1894_v55 = vmul.f32 0.1, %v8468_v46  ;;  %v8472_v17 = vadd.f32 -1.0, %v9771_v52  ;;  %v1628_v6 = vmul.f32 1.442695, %v1387_v34 }
 0x1a0   : > { %v1292_v11 = vmul.f32 10.0, %v1164_v29  ;;  %v1168_v51 = vmin.f32 %v11464_v31, 0.0  ;;  %v8476_v54 = vadd.f32 -1.0, %v9773_v27  ;;  %v1271_v49 = vmin.f32 %v11472_v4, 0.0 }
 0x1a1   : > { %v2146_v63 = vsel %vm2018_vm0, %v11288_v38, %v1890_v45  ;;  %v2150_v12 = vsel %vm2022_vm1, %v11302_v14, %v1894_v55  ;;  %v1636_v36 = vmul.f32 1.442695, %v1391_v24  ;;  %v1395_v46 = vmul.f32 10.0, %v1267_v56  ;;  %v17214_v38 = vld [vmem:[#allocation5_spill] sm:$0xff]  ;;  %v17216_v56 = vld [vmem:[#allocation6_spill] sm:$0xff] }
 0x1a2   : > { %v11490_v34 = vadd.f32 %v10819_v7, %v11139_v21  ;;  %v2377_v29 = vpack.c.bf16 %v2150_v12, %v2146_v63  ;;  %v11492_v52 = vadd.f32 -1.0, %v9767_v50  ;;  %v1293_v27 = vmul.f32 10.0, %v1165_v47 }
 0x1a3   : > { %v11496_v9 = vadd.f32 %v17213_v10, %v10997_v25  ;;  %v11500_v45 = vadd.f32 %v17214_v38, %v11139_v21  ;;  %v11502_v14 = vadd.f32 -1.0, %v9769_v61  ;;  %v1296_v24 = vmul.f32 10.0, %v1168_v51 }
 0x1a4   : > { %17211 = vst [vmem:[#allocation96_spill] sm:$0xff] %v11490_v34  ;;  %17212 = vst [vmem:[#allocation97_spill] sm:$0xff] %v11492_v52  ;;  %v11506_v60 = vadd.f32 %v17216_v56, %v10997_v25  ;;  %9207 = vmatmul.mubr.bf16.gmra.mrb[88].mxu0 %v2377_v29  ;;  %v1898_v7 = vmul.f32 0.1, %v8472_v17  ;;  %v11508_v50 = vpop.eup %9774  ;;  %9784 = vpow2.f32 %v1628_v6  ;;  %v1438_v47 = vmul.f32 1.442695, %v1292_v11 }
 0x1a5   : > { %17215 = vst [vmem:[#allocation4_spill] sm:$0xff] %v11500_v45  ;;  %v1399_v55 = vmul.f32 10.0, %v1271_v49  ;;  %v1902_v10 = vmul.f32 0.1, %v8476_v54  ;;  %v11510_v63 = vpop.eup %9776  ;;  %vm2030_vm3 = vcmp.gt.f32.partialorder %v11337_v37, 0.0  ;;  %9786 = vpow2.f32 %v1636_v36  ;;  %v17218_v29 = vld [vmem:[#allocation7_spill] sm:$0xff] }
 0x1a6   : > { %17217 = vst [vmem:[#allocation5_spill] sm:$0xff] %v11506_v60  ;;  %v1644_v61 = vmul.f32 1.442695, %v1395_v46  ;;  %v1169_v51 = vmin.f32 %v11490_v34, 0.0  ;;  %v1440_v38 = vmul.f32 1.442695, %v1293_v27  ;;  %v11518_v6 = vadd.f32 %v17218_v29, %v11139_v21 }
 0x1a7   : > { %v9779_v12 = vpop.eup %9778  ;;  %v1172_v56 = vmin.f32 %v11496_v9, 0.0  ;;  %v1173_v17 = vmin.f32 %v11500_v45, 0.0  ;;  %v1446_v54 = vmul.f32 1.442695, %v1296_v24  ;;  %v1176_v49 = vmin.f32 %v11506_v60, 0.0  ;;  %v17220_v52 = vld [vmem:[#allocation8_spill] sm:$0xff] }
 0x1a8   : > { %17219 = vst [vmem:[#allocation6_spill] sm:$0xff] %v11518_v6  ;;  %v11520_v11 = vpop.eup %9780  ;;  %v2154_v36 = vsel %vm2026_vm2, %v11332_v40, %v1898_v7  ;;  %v2158_v46 = vsel %vm2030_vm3, %v11337_v37, %v1902_v10  ;;  %vm2034_vm4 = vcmp.gt.f32.partialorder %v11380_v23, 0.0  ;;  %9788 = vpow2.f32 %v1438_v47  ;;  %v17223_v24 = vld [vmem:[#allocation13_spill] sm:$0xff] }
 0x1a9   : > { %v9783_v27 = vpop.eup %9782  ;;  %v1652_v45 = vmul.f32 1.442695, %v1399_v55  ;;  %v11530_v29 = vadd.f32 %v17220_v52, %v10997_v25  ;;  %v2378_v34 = vpack.c.bf16 %v2158_v46, %v2154_v36  ;;  %vm1915_vm5 = vcmp.gt.f32.partialorder %v17222_v16, 0.0  ;;  %v17224_v40 = vld [vmem:[#allocation9_spill] sm:$0xff]  ;;  %v17226_v36 = vld [vmem:[#allocation10_spill] sm:$0xff] }
 0x1aa   : > { %vm1919_vm6 = vcmp.gt.f32.partialorder %v17223_v24, 0.0  ;;  %v8480_v33 = vadd.f32 -1.0, %v9779_v12  ;;  %9790 = vpow2.f32 %v1644_v61  ;;  %v1297_v42 = vmul.f32 10.0, %v1169_v51  ;;  %v17228_v51 = vld [vmem:[#allocation11_spill] sm:$0xff] }
 0x1ab   : > { %17221 = vst [vmem:[#allocation7_spill] sm:$0xff] %v11530_v29  ;;  %v11536_v37 = vadd.f32 %v17224_v40, %v11139_v21  ;;  %9792 = vpow2.f32 %v1440_v38  ;;  %v1300_v7 = vmul.f32 10.0, %v1172_v56  ;;  %v1301_v47 = vmul.f32 10.0, %v1173_v17  ;;  %9210 = vmatprep.mubr.bf16.mxu0 %v2378_v34  ;;  %v17230_v34 = vld [vmem:[#allocation14_spill] sm:$0xff] }
 0x1ac   : > { %v1177_v55 = vmin.f32 %v11518_v6, 0.0  ;;  %v8484_v52 = vadd.f32 -1.0, %v9783_v27  ;;  %9794 = vpow2.f32 %v1446_v54  ;;  %v1304_v10 = vmul.f32 10.0, %v1176_v49 }
 0x1ad   : > { %17225 = vst [vmem:[#allocation8_spill] sm:$0xff] %v11536_v37  ;;  %v11541_v46 = vadd.f32 %v17226_v36, %v10997_v25  ;;  %vm2038_vm7 = vcmp.gt.f32.partialorder %v11390_v30, 0.0  ;;  %9796 = vpow2.f32 %v1652_v45  ;;  %v1180_v61 = vmin.f32 %v11530_v29, 0.0  ;;  %v17232_v45 = vld [vmem:[#allocation15_spill] sm:$0xff] }
 0x1ae   : > { %v11547_v12 = vadd.f32 %v17228_v51, %v11139_v21  ;;  %v1448_v38 = vmul.f32 1.442695, %v1297_v42  ;;  %v1181_v56 = vmin.f32 %v11536_v37, 0.0  ;;  %v11552_v17 = vadd.f32 %v17230_v34, %v10997_v25  ;;  %v11554_v49 = vpop.eup %9784  ;;  %v17234_v37 = vld [vmem:[#allocation16_spill] sm:$0xff] }
 0x1af   : > { %17227 = vst [vmem:[#allocation12_spill] sm:$0xff] %v11541_v46  ;;  %v1906_v54 = vmul.f32 0.1, %v8480_v33  ;;  %v1454_v27 = vmul.f32 1.442695, %v1300_v7  ;;  %v1305_v36 = vmul.f32 10.0, %v1177_v55  ;;  %v11558_v6 = vadd.f32 %v17232_v45, %v11139_v21  ;;  %v11560_v62 = vpop.eup %9786 }
 0x1b0   : > { %17229 = vst [vmem:[#allocation13_spill] sm:$0xff] %v11547_v12  ;;  %17231 = vst [vmem:[#allocation9_spill] sm:$0xff] %v11552_v17  ;;  %v1456_v40 = vmul.f32 1.442695, %v1301_v47  ;;  %v1462_v51 = vmul.f32 1.442695, %v1304_v10  ;;  %v11565_v3 = vadd.f32 %v17234_v37, %v10997_v25  ;;  %9798 = vpow2.f32 %v1448_v38 }
 0x1b1   : > { %17233 = vst [vmem:[#allocation10_spill] sm:$0xff] %v11558_v6  ;;  %v1184_v42 = vmin.f32 %v11541_v46, 0.0  ;;  %v1910_v34 = vmul.f32 0.1, %v8484_v52  ;;  %v1308_v33 = vmul.f32 10.0, %v1180_v61  ;;  %v1185_v29 = vmin.f32 %v11547_v12, 0.0 }
 0x1b2   : > { %17235 = vst [vmem:[#allocation11_spill] sm:$0xff] %v11565_v3  ;;  %v1787_v7 = vmul.f32 0.1, %v11158_v43  ;;  %v1791_v47 = vmul.f32 0.1, %v11167_v39  ;;  %v17236_v55 = vld [vmem:[#allocation17_spill] sm:$0xff]  ;;  %v2162_v37 = vsel %vm2034_vm4, %v11380_v23, %v1906_v54  ;;  %v11579_v61 = vpop.eup %9788  ;;  %9800 = vpow2.f32 %v1454_v27 }
 0x1b3   : > { %vm1931_vm8 = vcmp.gt.f32.partialorder %v17236_v55, 0.0  ;;  %v17237_v45 = vld [vmem:[#allocation18_spill] sm:$0xff]  ;;  %v1309_v60 = vmul.f32 10.0, %v1181_v56  ;;  %v1188_v10 = vmin.f32 %v11552_v17, 0.0  ;;  %v2166_v52 = vsel %vm2038_vm7, %v11390_v30, %v1910_v34  ;;  %v17238_v30 = vld [vmem:[#allocation19_spill] sm:$0xff] }
 0x1b4   : > { %vm1935_vm9 = vcmp.gt.f32.partialorder %v17237_v45, 0.0  ;;  %v1189_v43 = vmin.f32 %v11558_v6, 0.0  ;;  %v2379_v39 = vpack.c.bf16 %v2166_v52, %v2162_v37  ;;  %v2043_v12 = vsel %vm1915_vm5, %v17222_v16, %v1787_v7  ;;  %v11588_v17 = vpop.eup %9790  ;;  %v17240_v16 = vld [vmem:[#allocation21_spill] sm:$0xff] }
 0x1b5   : > { %v2047_v56 = vsel %vm1919_vm6, %v17223_v24, %v1791_v47  ;;  %v1312_v23 = vmul.f32 10.0, %v1184_v42  ;;  %v1192_v54 = vmin.f32 %v11565_v3, 0.0  ;;  %v11593_v34 = vadd.f32 %v17238_v30, %v11139_v21  ;;  %v11595_v6 = vpop.eup %9792  ;;  %v17242_v3 = vld [vmem:[#allocation20_spill] sm:$0xff] }
 0x1b6   : > { %v3628_v46 = vpack.c.bf16 %v2047_v56, %v2043_v12  ;;  %v1464_v37 = vmul.f32 1.442695, %v1305_v36  ;;  %v1313_v52 = vmul.f32 10.0, %v1185_v29  ;;  %9211 = vmatmul.mubr.bf16.gmra.mrb[92].mxu0 %v2379_v39  ;;  %v11599_v7 = vadd.f32 %v17240_v16, %v10997_v25  ;;  %v11601_v24 = vpop.eup %9794 }
 0x1b7   : > { %17239 = vst [vmem:[#allocation14_spill] sm:$0xff] %v11593_v34  ;;  %v11604_v42 = vadd.f32 -1.0, %v11508_v50  ;;  %v1470_v47 = vmul.f32 1.442695, %v1308_v33  ;;  %v1316_v30 = vmul.f32 10.0, %v1188_v10  ;;  %v11606_v12 = vpop.eup %9796  ;;  %9802 = vpow2.f32 %v1456_v40  ;;  %v17243_v50 = vld [vmem:[#allocation22_spill] sm:$0xff] }
 0x1b8   : > { %17241 = vst [vmem:[#allocation15_spill] sm:$0xff] %v11599_v7  ;;  %9270 = vmatprep.mubr.bf16.mxu0 %v3628_v46  ;;  %v1472_v38 = vmul.f32 1.442695, %v1309_v60  ;;  %v1317_v36 = vmul.f32 10.0, %v1189_v43  ;;  %v1803_v29 = vmul.f32 0.1, %v11180_v32  ;;  %9804 = vpow2.f32 %v1462_v51 }
 0x1b9   : > { %v1478_v39 = vmul.f32 1.442695, %v1312_v23  ;;  %v1320_v56 = vmul.f32 10.0, %v1192_v54  ;;  %v1193_v16 = vmin.f32 %v11593_v34, 0.0  ;;  %vm1939_vm10 = vcmp.gt.f32.partialorder %v17242_v3, 0.0  ;;  %v17244_v40 = vld [vmem:[#allocation23_spill] sm:$0xff] }
 0x1ba   : > { %vm1943_vm11 = vcmp.gt.f32.partialorder %v17243_v50, 0.0  ;;  %9806 = vpow2.f32 %v1464_v37  ;;  %v1480_v27 = vmul.f32 1.442695, %v1313_v52  ;;  %v1196_v46 = vmin.f32 %v11599_v7, 0.0  ;;  %v17247_v54 = vld [vmem:[#allocation27_spill] sm:$0xff] }
 0x1bb   : > { %v1807_v33 = vmul.f32 0.1, %v11186_v35  ;;  %v11615_v60 = vadd.f32 -1.0, %v11510_v63  ;;  %9808 = vpow2.f32 %v1470_v47  ;;  %v1486_v32 = vmul.f32 1.442695, %v1316_v30  ;;  %v9617_v35 = vld [vmem:[%s16932_s4 + $0x88] sm:$0xff]  }
 0x1bc   : > { %v11619_v51 = vadd.f32 %v17244_v40, %v11139_v21  ;;  %9810 = vpow2.f32 %v1472_v38  ;;  %v1488_v10 = vmul.f32 1.442695, %v1317_v36  ;;  %v2059_v43 = vsel %vm1931_vm8, %v17236_v55, %v1803_v29  ;;  %v17246_v63 = vld [vmem:[#allocation24_spill] sm:$0xff]  ;;  %v17248_v55 = vld [vmem:[#allocation25_spill] sm:$0xff]  ;;  %v17252_v29 = vld [vmem:[#allocation3_spill] sm:$0xff] }
 0x1bd   : > { %v2063_v23 = vsel %vm1935_vm9, %v17237_v45, %v1807_v33  ;;  %vm1947_vm12 = vcmp.gt.f32.partialorder %v17246_v63, 0.0  ;;  %vm1951_vm13 = vcmp.gt.f32.partialorder %v17247_v54, 0.0  ;;  %9812 = vpow2.f32 %v1478_v39  ;;  %v17250_v45 = vld [vmem:[#allocation26_spill] sm:$0xff]  ;;  %v9633_v39 = vld [vmem:[%s16934_s6 + $0x10] sm:$0xff]  }
 0x1be   : > { %17245 = vst [vmem:[#allocation16_spill] sm:$0xff] %v11619_v51  ;;  %v1494_v37 = vmul.f32 1.442695, %v1320_v56  ;;  %v1321_v52 = vmul.f32 10.0, %v1193_v16  ;;  %v3630_v47 = vpack.c.bf16 %v2063_v23, %v2059_v43  ;;  %9814 = vpow2.f32 %v1480_v27  ;;  %v17253_v33 = vld [vmem:[#allocation2_spill] sm:$0xff]  ;;  %v9634_v56 = vld [vmem:[%s16934_s6 + $0x18] sm:$0xff]   ;;  %v9799_v23 = vpop.eup %9798  ;;  %9218 = vmatprep.subr.bf16.mxu1 %v9633_v39 }
 0x1bf   : > { %v1324_v30 = vmul.f32 10.0, %v1196_v46  ;;  %v11634_v38 = vadd.f32 %v17248_v55, %v10997_v25  ;;  %v11638_v36 = vadd.f32 %v17250_v45, %v11139_v21  ;;  %v17254_v40 = vpack.c.bf16 %v17252_v29, %v17253_v33  ;;  %v10416_v43 = vld [vmem:[%s16932_s4 + $0x80] sm:$0xff]   ;;  %9219 = vmatpush3.bf16.msra.mxu1 %v9633_v39 }
 0x1c0   : > { %v11650_v16 = vadd.f32 -1.0, %v11520_v11  ;;  %v11653_v27 = vadd.f32 -1.0, %v11554_v49  ;;  %9816 = vpow2.f32 %v1486_v32  ;;  %v1197_v46 = vmin.f32 %v11619_v51, 0.0  ;;  %v9618_v49 = vld [vmem:[%s16932_s4 + $0x90] sm:$0xff]   ;;  %v9801_v32 = vpop.eup %9800  ;;  %9220 = vmatprep.subr.bf16.mxu1 %v9634_v56  ;;  %v17261_v39 = vld [vmem:[#allocation30_spill] sm:$0xff] }
 0x1c1   : > { %17249 = vst [vmem:[#allocation17_spill] sm:$0xff] %v11634_v38  ;;  %17251 = vst [vmem:[#allocation18_spill] sm:$0xff] %v11638_v36  ;;  %9271 = vmatmul.mubr.bf16.vlgmr.msra.gmra.mrb[96].mxu0 %v17254_v40  ;;  %v11660_v55 = vadd.f32 -1.0, %v11560_v62  ;;  %v11663_v45 = vadd.f32 -1.0, %v11579_v61  ;;  %9818 = vpow2.f32 %v1488_v10  ;;  %v1811_v11 = vmul.f32 0.1, %v11195_v2  ;;  %v9803_v61 = vpop.eup %9802 }
 0x1c2   : > { %17255 = vst [vmem:[#allocation19_spill] sm:$0xff] %v11650_v16  ;;  %9343 = vmatpush3.bf16.msra.mxu0 %v10416_v43  ;;  %9274 = vmatprep.mubr.bf16.mxu0 %v3630_v47  ;;  %v11670_v29 = vadd.f32 -1.0, %v11588_v17  ;;  %9820 = vpow2.f32 %v1494_v37  ;;  %v1496_v47 = vmul.f32 1.442695, %v1321_v52  ;;  %v1815_v62 = vmul.f32 0.1, %v11207_v1  ;;  %v9805_v51 = vpop.eup %9804 }
 0x1c3   : > { %17256 = vst [vmem:[#allocation21_spill] sm:$0xff] %v11663_v45  ;;  %9344 = vmatprep.subr.bf16.mxu0 %v9617_v35  ;;  %v1502_v33 = vmul.f32 1.442695, %v1324_v30  ;;  %v1200_v10 = vmin.f32 %v11634_v38, 0.0  ;;  %v1201_v2 = vmin.f32 %v11638_v36, 0.0  ;;  %v17257_v40 = vld [vmem:[#allocation59_spill] sm:$0xff]  ;;  %v2067_v1 = vsel %vm1939_vm10, %v17242_v3, %v1811_v11  ;;  %9221 = vmatpush3.bf16.msra.mxu1 %v9634_v56 }
 0x1c4   : > { %v1819_v43 = vmul.f32 0.1, %v17257_v40  ;;  %v1325_v34 = vmul.f32 10.0, %v1197_v46  ;;  %v17258_v16 = vld [vmem:[#allocation29_spill] sm:$0xff]  ;;  %v2071_v37 = vsel %vm1943_vm11, %v17243_v50, %v1815_v62  ;;  %v9807_v52 = vpop.eup %9806  ;;  %v17260_v30 = vld [vmem:[#allocation28_spill] sm:$0xff]  ;;  %vm1959_vm15 = vcmp.gt.f32.partialorder %v17261_v39, 0.0 }
 0x1c5   : > { %v11678_v17 = vadd.f32 %v17258_v16, %v10997_v25  ;;  %vm1955_vm14 = vcmp.gt.f32.partialorder %v17260_v30, 0.0  ;;  %v17262_v46 = vld [vmem:[#allocation31_spill] sm:$0xff]  ;;  %v17264_v16 = vld [vmem:[#allocation32_spill] sm:$0xff]  ;;  %v3631_v38 = vpack.c.bf16 %v2071_v37, %v2067_v1  ;;  %v17266_v3 = vld [vmem:[#allocation61_spill] sm:$0xff]  ;;  %v11701_v62 = vadd.f32 -1.0, %v11595_v6 }
 0x1c6   : > { %9345 = vmatpush3.bf16.msra.mxu0 %v9617_v35  ;;  %v11690_v40 = vadd.f32 %v17262_v46, %v11139_v21  ;;  %v11694_v36 = vadd.f32 %v17264_v16, %v10997_v25  ;;  %v1823_v11 = vmul.f32 0.1, %v17266_v3  ;;  %v9619_v50 = vld [vmem:[%s16932_s4 + $0x98] sm:$0xff]   ;;  %v9809_v35 = vpop.eup %9808  ;;  %v11704_v7 = vadd.f32 -1.0, %v11601_v24 }
 0x1c7   : > { %17259 = vst [vmem:[#allocation20_spill] sm:$0xff] %v11678_v17  ;;  %9346 = vmatprep.subr.bf16.mxu0 %v9618_v49  ;;  %17267 = vst [vmem:[#allocation24_spill] sm:$0xff] %v11701_v62  ;;  %v11707_v46 = vadd.f32 -1.0, %v11606_v12  ;;  %9822 = vpow2.f32 %v1496_v47  ;;  %v9811_v1 = vpop.eup %9810  ;;  %v1328_v37 = vmul.f32 10.0, %v1200_v10  ;;  %v1329_v16 = vmul.f32 10.0, %v1201_v2  ;;  %v17269_v24 = vld [vmem:[#allocation33_spill] sm:$0xff] }
 0x1c8   : > { %17263 = vst [vmem:[#allocation22_spill] sm:$0xff] %v11690_v40  ;;  %17265 = vst [vmem:[#allocation23_spill] sm:$0xff] %v11694_v36  ;;  %v2075_v3 = vsel %vm1947_vm12, %v17246_v63, %v1819_v43  ;;  %v2079_v6 = vsel %vm1951_vm13, %v17247_v54, %v1823_v11  ;;  %v9813_v62 = vpop.eup %9812  ;;  %vm1963_vm0 = vcmp.gt.f32.partialorder %v17269_v24, 0.0  ;;  %v11717_v12 = vadd.f32 -1.0, %v9799_v23  ;;  %v9620_v43 = vld [vmem:[%s16932_s4 + $0xa0] sm:$0xff]  }
 0x1c9   : > { %17268 = vst [vmem:[#allocation27_spill] sm:$0xff] %v11704_v7  ;;  %9275 = vmatmul.mubr.bf16.gmra.mrb[100].mxu0 %v3631_v38  ;;  %v17270_v7 = vld [vmem:[#allocation34_spill] sm:$0xff]  ;;  %9824 = vpow2.f32 %v1502_v33  ;;  %v1204_v56 = vmin.f32 %v11678_v17, 0.0  ;;  %v3632_v47 = vpack.c.bf16 %v2079_v6, %v2075_v3  ;;  %v9815_v38 = vpop.eup %9814  ;;  %v11720_v10 = vadd.f32 -1.0, %v9801_v32  ;;  %v17277_v17 = vld [vmem:[#allocation35_spill] sm:$0xff] }
 0x1ca   : > { %vm1967_vm1 = vcmp.gt.f32.partialorder %v17270_v7, 0.0  ;;  %17271 = vst [vmem:[#allocation25_spill] sm:$0xff] %v11717_v12  ;;  %9347 = vmatpush3.bf16.msra.mxu0 %v9618_v49  ;;  %v1504_v63 = vmul.f32 1.442695, %v1325_v34  ;;  %v1205_v2 = vmin.f32 %v11690_v40, 0.0  ;;  %v1208_v54 = vmin.f32 %v11694_v36, 0.0  ;;  %v9817_v23 = vpop.eup %9816 }
 0x1cb   : > { %17272 = vst [vmem:[#allocation26_spill] sm:$0xff] %v11720_v10  ;;  %9348 = vmatprep.subr.bf16.mxu0 %v9619_v50  ;;  %v11727_v11 = vadd.f32 -1.0, %v9803_v61  ;;  %v11729_v33 = vadd.f32 -1.0, %v9805_v51  ;;  %v11731_v3 = vadd.f32 -1.0, %v9807_v52  ;;  %v11733_v49 = vadd.f32 -1.0, %v9809_v35  ;;  %9278 = vmatprep.mubr.bf16.mxu0 %v3632_v47  ;;  %v9819_v34 = vpop.eup %9818  ;;  %v17276_v40 = vld [vmem:[#allocation63_spill] sm:$0xff] }
 0x1cc   : > { %v1510_v32 = vmul.f32 1.442695, %v1328_v37  ;;  %v1512_v6 = vmul.f32 1.442695, %v1329_v16  ;;  %v1827_v12 = vmul.f32 0.1, %v17276_v40  ;;  %v9821_v36 = vpop.eup %9820  ;;  %v11738_v45 = vadd.f32 %v17277_v17, %v11139_v21 }
 0x1cd   : > { %17273 = vst [vmem:[#allocation3_spill] sm:$0xff] %v11727_v11  ;;  %17274 = vst [vmem:[#allocation2_spill] sm:$0xff] %v11731_v3  ;;  %v1332_v10 = vmul.f32 10.0, %v1204_v56  ;;  %v17279_v61 = vld [vmem:[#allocation36_spill] sm:$0xff]  ;;  %v11745_v35 = vadd.f32 -1.0, %v9811_v1  ;;  %9826 = vpow2.f32 %v1504_v63  ;;  %v1333_v37 = vmul.f32 10.0, %v1205_v2 }
 0x1ce   : > { %17275 = vst [vmem:[#allocation59_spill] sm:$0xff] %v11733_v49  ;;  %17278 = vst [vmem:[#allocation29_spill] sm:$0xff] %v11738_v45  ;;  %v11742_v51 = vadd.f32 %v17279_v61, %v10997_v25  ;;  %v17281_v52 = vld [vmem:[#allocation64_spill] sm:$0xff]  ;;  %9349 = vmatpush3.bf16.msra.mxu0 %v9619_v50  ;;  %v1336_v16 = vmul.f32 10.0, %v1208_v54  ;;  %v9621_v40 = vld [vmem:[%s16932_s4 + $0xa8] sm:$0xff]   ;;  %v2083_v47 = vsel %vm1955_vm14, %v17260_v30, %v1827_v12  ;;  %v11763_v61 = vadd.f32 -1.0, %v9813_v62 }
 0x1cf   : > { %v1831_v3 = vmul.f32 0.1, %v17281_v52  ;;  %17282 = vst [vmem:[#allocation30_spill] sm:$0xff] %v11745_v35  ;;  %9350 = vmatprep.subr.bf16.mxu0 %v9620_v43  ;;  %v17283_v17 = vld [vmem:[#allocation39_spill] sm:$0xff]  ;;  %v17285_v1 = vld [vmem:[#allocation65_spill] sm:$0xff]  ;;  %v17287_v54 = vld [vmem:[#allocation38_spill] sm:$0xff]  ;;  %9828 = vpow2.f32 %v1510_v32 }
 0x1d0   : > { %17280 = vst [vmem:[#allocation28_spill] sm:$0xff] %v11742_v51  ;;  %v11752_v56 = vadd.f32 %v17283_v17, %v11139_v21  ;;  %v1835_v63 = vmul.f32 0.1, %v17285_v1  ;;  %v17286_v2 = vld [vmem:[#allocation37_spill] sm:$0xff]  ;;  %vm1975_vm3 = vcmp.gt.f32.partialorder %v17287_v54, 0.0  ;;  %17288 = vst [vmem:[#allocation32_spill] sm:$0xff] %v11763_v61  ;;  %9830 = vpow2.f32 %v1512_v6 }
 0x1d1   : > { %v2087_v50 = vsel %vm1959_vm15, %v17261_v39, %v1831_v3  ;;  %vm1971_vm2 = vcmp.gt.f32.partialorder %v17286_v2, 0.0  ;;  %v17289_v17 = vld [vmem:[#allocation66_spill] sm:$0xff]  ;;  %v9823_v11 = vpop.eup %9822  ;;  %v1518_v49 = vmul.f32 1.442695, %v1332_v10  ;;  %v1209_v30 = vmin.f32 %v11738_v45, 0.0  ;;  %v17291_v3 = vld [vmem:[#allocation43_spill] sm:$0xff] }
 0x1d2   : > { %17284 = vst [vmem:[#allocation31_spill] sm:$0xff] %v11752_v56  ;;  %v3633_v52 = vpack.c.bf16 %v2087_v50, %v2083_v47  ;;  %v1839_v35 = vmul.f32 0.1, %v17289_v17  ;;  %v1212_v12 = vmin.f32 %v11742_v51, 0.0  ;;  %9351 = vmatpush3.bf16.msra.mxu0 %v9620_v43  ;;  %v17290_v39 = vld [vmem:[#allocation42_spill] sm:$0xff]  ;;  %vm1983_vm5 = vcmp.gt.f32.partialorder %v17291_v3, 0.0 }
 0x1d3   : > { %vm1979_vm4 = vcmp.gt.f32.partialorder %v17290_v39, 0.0  ;;  %v1520_v1 = vmul.f32 1.442695, %v1333_v37  ;;  %v17292_v62 = vld [vmem:[#allocation40_spill] sm:$0xff]  ;;  %v2091_v32 = vsel %vm1963_vm0, %v17269_v24, %v1835_v63  ;;  %9352 = vmatprep.subr.bf16.mxu0 %v9621_v40  ;;  %v9825_v6 = vpop.eup %9824  ;;  %v11783_v37 = vadd.f32 -1.0, %v9815_v38  ;;  %v17296_v45 = vld [vmem:[#allocation67_spill] sm:$0xff] }
 0x1d4   : > { %v11772_v61 = vadd.f32 %v17292_v62, %v10997_v25  ;;  %9279 = vmatmul.mubr.bf16.gmra.mrb[104].mxu0 %v3633_v52  ;;  %v2095_v10 = vsel %vm1967_vm1, %v17270_v7, %v1839_v35  ;;  %v9622_v43 = vld [vmem:[%s16932_s4 + $0xb0] sm:$0xff]   ;;  %v1526_v47 = vmul.f32 1.442695, %v1336_v16  ;;  %v1213_v50 = vmin.f32 %v11752_v56, 0.0 }
 0x1d5   : > { %17293 = vst [vmem:[#allocation61_spill] sm:$0xff] %v11783_v37  ;;  %v3634_v52 = vpack.c.bf16 %v2095_v10, %v2091_v32  ;;  %v11786_v17 = vadd.f32 -1.0, %v9817_v23  ;;  %v11788_v62 = vadd.f32 -1.0, %v9819_v34  ;;  %v11790_v24 = vadd.f32 -1.0, %v9821_v36  ;;  %v17297_v23 = vld [vmem:[#allocation41_spill] sm:$0xff]  ;;  %v17303_v32 = vld [vmem:[#allocation47_spill] sm:$0xff] }
 0x1d6   : > { %v11792_v63 = vadd.f32 -1.0, %v9823_v11  ;;  %9832 = vpow2.f32 %v1518_v49  ;;  %v1337_v7 = vmul.f32 10.0, %v1209_v30  ;;  %v1340_v35 = vmul.f32 10.0, %v1212_v12  ;;  %9353 = vmatpush3.bf16.msra.mxu0 %v9621_v40  ;;  %v9624_v36 = vld [vmem:[%s16932_s4 + $0xb8] sm:$0xff]   ;;  %v17299_v49 = vld [vmem:[#allocation44_spill] sm:$0xff] }
 0x1d7   : > { %17294 = vst [vmem:[#allocation33_spill] sm:$0xff] %v11788_v62  ;;  %9282 = vmatprep.mubr.bf16.mxu0 %v3634_v52  ;;  %v1843_v51 = vmul.f32 0.1, %v17296_v45  ;;  %v11795_v38 = vadd.f32 -1.0, %v9825_v6  ;;  %9834 = vpow2.f32 %v1520_v1  ;;  %v1216_v16 = vmin.f32 %v11772_v61, 0.0  ;;  %9354 = vmatprep.subr.bf16.mxu0 %v9622_v43  ;;  %v17301_v40 = vld [vmem:[#allocation68_spill] sm:$0xff]  ;;  %v9827_v12 = vpop.eup %9826 }
 0x1d8   : > { %17295 = vst [vmem:[#allocation34_spill] sm:$0xff] %v11792_v63  ;;  %v11800_v34 = vadd.f32 %v17297_v23, %v11139_v21  ;;  %9836 = vpow2.f32 %v1526_v47  ;;  %v1341_v11 = vmul.f32 10.0, %v1213_v50  ;;  %v11807_v45 = vadd.f32 %v17299_v49, %v10997_v25  ;;  %v17302_v1 = vld [vmem:[#allocation46_spill] sm:$0xff]  ;;  %v17305_v6 = vld [vmem:[#allocation48_spill] sm:$0xff]  ;;  %v17306_v23 = vld [vmem:[#allocation45_spill] sm:$0xff] }
 0x1d9   : > { %v1847_v30 = vmul.f32 0.1, %v17301_v40  ;;  %vm1991_vm6 = vcmp.gt.f32.partialorder %v17302_v1, 0.0  ;;  %v11813_v10 = vadd.f32 %v17303_v32, %v11139_v21  ;;  %v11817_v52 = vadd.f32 %v17305_v6, %v10997_v25  ;;  %v9829_v62 = vpop.eup %9828 }
 0x1da   : > { %17298 = vst [vmem:[#allocation63_spill] sm:$0xff] %v11800_v34  ;;  %17300 = vst [vmem:[#allocation35_spill] sm:$0xff] %v11807_v45  ;;  %v1851_v47 = vmul.f32 0.1, %v11263_v8  ;;  %v1855_v50 = vmul.f32 0.1, %v11265_v20  ;;  %v2099_v40 = vsel %vm1971_vm2, %v17286_v2, %v1843_v51  ;;  %9355 = vmatpush3.bf16.msra.mxu0 %v9622_v43  ;;  %v9831_v51 = vpop.eup %9830 }
 0x1db   : > { %17304 = vst [vmem:[#allocation36_spill] sm:$0xff] %v11813_v10  ;;  %vm1987_vm7 = vcmp.gt.f32.partialorder %v17306_v23, 0.0  ;;  %v1528_v49 = vmul.f32 1.442695, %v1337_v7  ;;  %v1534_v63 = vmul.f32 1.442695, %v1340_v35  ;;  %v2103_v32 = vsel %vm1975_vm3, %v17287_v54, %v1847_v30  ;;  %9356 = vmatprep.subr.bf16.mxu0 %v9624_v36 }
 0x1dc   : > { %v1344_v6 = vmul.f32 10.0, %v1216_v16  ;;  %v1217_v56 = vmin.f32 %v11800_v34, 0.0  ;;  %v17307_v8 = vld [vmem:[#allocation49_spill] sm:$0xff]  ;;  %v3635_v37 = vpack.c.bf16 %v2103_v32, %v2099_v40  ;;  %v11836_v7 = vld [vmem:[%s16932_s4 + $0xc0] sm:$0xff]   ;;  %v1536_v2 = vmul.f32 1.442695, %v1341_v11 }
 0x1dd   : > { %v11831_v20 = vadd.f32 %v17307_v8, %v11139_v21  ;;  %v1220_v54 = vmin.f32 %v11807_v45, 0.0  ;;  %v2107_v43 = vsel %vm1979_vm4, %v17290_v39, %v1851_v47  ;;  %v2111_v35 = vsel %vm1983_vm5, %v17291_v3, %v1855_v50  ;;  %v17309_v16 = vld [vmem:[#allocation52_spill] sm:$0xff]  ;;  %v17310_v30 = vld [vmem:[#allocation54_spill] sm:$0xff]  ;;  %v17314_v3 = vld [vmem:[#allocation53_spill] sm:$0xff] }
 0x1de   : > { %vm1995_vm8 = vcmp.gt.f32.partialorder %v17309_v16, 0.0  ;;  %vm1999_vm9 = vcmp.gt.f32.partialorder %v17310_v30, 0.0  ;;  %v1221_v40 = vmin.f32 %v11813_v10, 0.0  ;;  %v1224_v32 = vmin.f32 %v11817_v52, 0.0  ;;  %9283 = vmatmul.mubr.bf16.gmra.mrb[108].mxu0 %v3635_v37  ;;  %v17311_v8 = vld [vmem:[#allocation50_spill] sm:$0xff] }
 0x1df   : > { %17308 = vst [vmem:[#allocation64_spill] sm:$0xff] %v11831_v20  ;;  %v3636_v11 = vpack.c.bf16 %v2111_v35, %v2107_v43  ;;  %v11851_v34 = vadd.f32 %v17311_v8, %v10997_v25  ;;  %v11853_v45 = vadd.f32 -1.0, %v9827_v12  ;;  %v11855_v39 = vadd.f32 -1.0, %v9829_v62  ;;  %9357 = vmatpush3.bf16.msra.mxu0 %v9624_v36 }
 0x1e0   : > { %9838 = vpow2.f32 %v1528_v49  ;;  %v11859_v47 = vadd.f32 %v17314_v3, %v11139_v21  ;;  %v11861_v50 = vadd.f32 -1.0, %v9831_v51  ;;  %v1345_v10 = vmul.f32 10.0, %v1217_v56  ;;  %9430 = vmatprep.subr.bf16.mxu0 %v11836_v7  ;;  %v9833_v12 = vpop.eup %9832  ;;  %v17317_v49 = vld [vmem:[#allocation74_spill] sm:$0xff] }
 0x1e1   : > { %17312 = vst [vmem:[#allocation39_spill] sm:$0xff] %v11851_v34  ;;  %17313 = vst [vmem:[#allocation65_spill] sm:$0xff] %v11853_v45  ;;  %v1225_v37 = vmin.f32 %v11831_v20, 0.0  ;;  %9286 = vmatprep.mubr.bf16.mxu0 %v3636_v11  ;;  %v1859_v43 = vmul.f32 0.1, %v11273_v57  ;;  %9840 = vpow2.f32 %v1534_v63  ;;  %v1348_v35 = vmul.f32 10.0, %v1220_v54  ;;  %v9835_v45 = vpop.eup %9834 }
 0x1e2   : > { %17315 = vst [vmem:[#allocation37_spill] sm:$0xff] %v11859_v47  ;;  %17316 = vst [vmem:[#allocation38_spill] sm:$0xff] %v11861_v50  ;;  %v1542_v62 = vmul.f32 1.442695, %v1344_v6  ;;  %v1863_v8 = vmul.f32 0.1, %v17317_v49  ;;  %9842 = vpow2.f32 %v1536_v2  ;;  %v9837_v56 = vpop.eup %9836 }
 0x1e3   : > { %v1349_v3 = vmul.f32 10.0, %v1221_v40  ;;  %v1352_v36 = vmul.f32 10.0, %v1224_v32  ;;  %v1228_v51 = vmin.f32 %v11851_v34, 0.0  ;;  %v1229_v20 = vmin.f32 %v11859_v47, 0.0  ;;  %v17318_v11 = vld [vmem:[#allocation56_spill] sm:$0xff]  ;;  %v17320_v49 = vld [vmem:[#allocation55_spill] sm:$0xff] }
 0x1e4   : > { %v11871_v57 = vadd.f32 %v17318_v11, %v10997_v25  ;;  %v2119_v63 = vsel %vm1991_vm6, %v17302_v1, %v1863_v8  ;;  %v1867_v6 = vmul.f32 0.1, %v11365_v28  ;;  %v11877_v54 = vadd.f32 -1.0, %v9833_v12  ;;  %v17321_v47 = vld [vmem:[#allocation57_spill] sm:$0xff]  ;;  %v17322_v50 = vld [vmem:[#allocation58_spill] sm:$0xff] }
 0x1e5   : > { %v1544_v2 = vmul.f32 1.442695, %v1345_v10  ;;  %v1353_v40 = vmul.f32 10.0, %v1225_v37  ;;  %v2115_v32 = vsel %vm1987_vm7, %v17306_v23, %v1859_v43  ;;  %vm2003_vm10 = vcmp.gt.f32.partialorder %v17320_v49, 0.0  ;;  %v17324_v8 = vld [vmem:[#allocation62_spill] sm:$0xff] }
 0x1e6   : > { %17319 = vst [vmem:[#allocation66_spill] sm:$0xff] %v11877_v54  ;;  %vm2007_vm11 = vcmp.gt.f32.partialorder %v17321_v47, 0.0  ;;  %v1550_v11 = vmul.f32 1.442695, %v1348_v35  ;;  %v11886_v34 = vadd.f32 %v17322_v50, %v11139_v21  ;;  %v3637_v1 = vpack.c.bf16 %v2119_v63, %v2115_v32  ;;  %v17325_v54 = vld [vmem:[#allocation69_spill] sm:$0xff]  ;;  %v17328_v32 = vld [vmem:[#allocation70_spill] sm:$0xff] }
 0x1e7   : > { %v1871_v28 = vmul.f32 0.1, %v11368_v59  ;;  %9844 = vpow2.f32 %v1542_v62  ;;  %v1552_v12 = vmul.f32 1.442695, %v1349_v3  ;;  %v1558_v10 = vmul.f32 1.442695, %v1352_v36 }
 0x1e8   : > { %17323 = vst [vmem:[#allocation42_spill] sm:$0xff] %v11886_v34  ;;  %v1356_v37 = vmul.f32 10.0, %v1228_v51  ;;  %vm2011_vm12 = vcmp.gt.f32.partialorder %v17324_v8, 0.0  ;;  %vm2015_vm13 = vcmp.gt.f32.partialorder %v17325_v54, 0.0  ;;  %v1357_v23 = vmul.f32 10.0, %v1229_v20  ;;  %9287 = vmatmul.mubr.bf16.gmra.mrb[112].mxu0 %v3637_v1  ;;  %v17326_v3 = vld [vmem:[#allocation60_spill] sm:$0xff] }
 0x1e9   : > { %v1232_v43 = vmin.f32 %v11871_v57, 0.0  ;;  %v2123_v50 = vsel %vm1995_vm8, %v17309_v16, %v1867_v6  ;;  %v2127_v59 = vsel %vm1999_vm9, %v17310_v30, %v1871_v28  ;;  %9846 = vpow2.f32 %v1544_v2 }
 0x1ea   : > { %v1560_v62 = vmul.f32 1.442695, %v1353_v40  ;;  %v3638_v35 = vpack.c.bf16 %v2127_v59, %v2123_v50  ;;  %v11900_v36 = vadd.f32 %v17326_v3, %v10997_v25  ;;  %v9839_v51 = vpop.eup %9838  ;;  %v11902_v20 = vadd.f32 -1.0, %v9835_v45  ;;  %v17330_v45 = vld [vmem:[#allocation71_spill] sm:$0xff] }
 0x1eb   : > { %9848 = vpow2.f32 %v1550_v11  ;;  %v1233_v63 = vmin.f32 %v11886_v34, 0.0  ;;  %v11907_v16 = vadd.f32 %v17328_v32, %v11139_v21  ;;  %v11909_v6 = vadd.f32 -1.0, %v9837_v56  ;;  %v9841_v40 = vpop.eup %9840  ;;  %v17331_v56 = vld [vmem:[#allocation72_spill] sm:$0xff] }
 0x1ec   : > { %17327 = vst [vmem:[#allocation43_spill] sm:$0xff] %v11902_v20  ;;  %9850 = vpow2.f32 %v1552_v12  ;;  %v1566_v30 = vmul.f32 1.442695, %v1356_v37  ;;  %9290 = vmatprep.mubr.bf16.mxu0 %v3638_v35  ;;  %v1875_v2 = vmul.f32 0.1, %v11375_v26  ;;  %v1360_v28 = vmul.f32 10.0, %v1232_v43  ;;  %v11916_v50 = vpop.eup %9842 }
 0x1ed   : > { %17329 = vst [vmem:[#allocation40_spill] sm:$0xff] %v11907_v16  ;;  %9852 = vpow2.f32 %v1558_v10  ;;  %v1568_v1 = vmul.f32 1.442695, %v1357_v23  ;;  %v11914_v11 = vadd.f32 %v17330_v45, %v10997_v25  ;;  %v1236_v59 = vmin.f32 %v11900_v36, 0.0  ;;  %v17333_v26 = vld [vmem:[#allocation77_spill] sm:$0xff]  ;;  %v17376_v20 = vld [vmem:[#allocation15_spill] sm:$0xff] }
 0x1ee   : > { %9854 = vpow2.f32 %v1560_v62  ;;  %v11921_v12 = vadd.f32 %v17331_v56, %v11139_v21  ;;  %v1879_v37 = vmul.f32 0.1, %v11382_v15  ;;  %vm2019_vm14 = vcmp.gt.f32.partialorder %v17333_v26, 0.0  ;;  %v17334_v35 = vld [vmem:[#allocation73_spill] sm:$0xff] }
 0x1ef   : > { %vm2023_vm15 = vcmp.gt.f32.partialorder %v11350_v13, 0.0  ;;  %v1361_v10 = vmul.f32 10.0, %v1233_v63  ;;  %v1237_v23 = vmin.f32 %v11907_v16, 0.0  ;;  %v1883_v43 = vmul.f32 0.1, %v11444_v53 }
 0x1f0   : > { %17332 = vst [vmem:[#allocation67_spill] sm:$0xff] %v11921_v12  ;;  %v11930_v62 = vadd.f32 %v17334_v35, %v10997_v25  ;;  %9856 = vpow2.f32 %v1566_v30  ;;  %v2131_v3 = vsel %vm2003_vm10, %v17320_v49, %v1875_v2  ;;  %v2135_v15 = vsel %vm2007_vm11, %v17321_v47, %v1879_v37 }
 0x1f1   : > { %v1887_v32 = vmul.f32 0.1, %v11466_v41  ;;  %9858 = vpow2.f32 %v1568_v1  ;;  %v1574_v63 = vmul.f32 1.442695, %v1360_v28  ;;  %v1240_v45 = vmin.f32 %v11914_v11, 0.0  ;;  %v11940_v56 = vpop.eup %9844 }
 0x1f2   : > { %v3639_v53 = vpack.c.bf16 %v2135_v15, %v2131_v3  ;;  %vm2027_vm0 = vcmp.gt.f32.partialorder %v11398_v0, 0.0  ;;  %vm2031_vm1 = vcmp.gt.f32.partialorder %v11419_v18, 0.0  ;;  %v1364_v30 = vmul.f32 10.0, %v1236_v59  ;;  %v17335_v59 = vld [vmem:[#allocation76_spill] sm:$0xff]  ;;  %v17337_v15 = vld [vmem:[#allocation78_spill] sm:$0xff] }
 0x1f3   : > { %v1241_v49 = vmin.f32 %v11921_v12, 0.0  ;;  %v2139_v47 = vsel %vm2011_vm12, %v17324_v8, %v1883_v43  ;;  %v2143_v41 = vsel %vm2015_vm13, %v17325_v54, %v1887_v32  ;;  %v1576_v2 = vmul.f32 1.442695, %v1361_v10  ;;  %v11952_v35 = vpop.eup %9846  ;;  %v17338_v8 = vld [vmem:[#allocation79_spill] sm:$0xff] }
 0x1f4   : > { %v1365_v1 = vmul.f32 10.0, %v1237_v23  ;;  %9291 = vmatmul.mubr.bf16.gmra.mrb[116].mxu0 %v3639_v53  ;;  %v3640_v28 = vpack.c.bf16 %v2143_v41, %v2139_v47  ;;  %v1244_v37 = vmin.f32 %v11930_v62, 0.0  ;;  %v11956_v3 = vadd.f32 %v17335_v59, %v11139_v21 }
 0x1f5   : > { %v11960_v12 = vadd.f32 %v17337_v15, %v10997_v25  ;;  %v11964_v43 = vadd.f32 %v17338_v8, %v11139_v21  ;;  %v1891_v54 = vmul.f32 0.1, %v11502_v14  ;;  %v11967_v10 = vpop.eup %9848  ;;  %v11969_v23 = vadd.f32 -1.0, %v9839_v51 }
 0x1f6   : > { %17336 = vst [vmem:[#allocation41_spill] sm:$0xff] %v11956_v3  ;;  %9860 = vpow2.f32 %v1574_v63  ;;  %v1368_v32 = vmul.f32 10.0, %v1240_v45  ;;  %9294 = vmatprep.mubr.bf16.mxu0 %v3640_v28  ;;  %v1895_v53 = vmul.f32 0.1, %v11615_v60  ;;  %v11972_v47 = vpop.eup %9850  ;;  %v1582_v41 = vmul.f32 1.442695, %v1364_v30 }
 0x1f7   : > { %17339 = vst [vmem:[#allocation44_spill] sm:$0xff] %v11964_v43  ;;  %17340 = vst [vmem:[#allocation68_spill] sm:$0xff] %v11969_v23  ;;  %v1369_v59 = vmul.f32 10.0, %v1241_v49  ;;  %v1245_v15 = vmin.f32 %v11956_v3, 0.0  ;;  %v1248_v8 = vmin.f32 %v11960_v12, 0.0  ;;  %v11976_v16 = vpop.eup %9852  ;;  %v11978_v14 = vadd.f32 -1.0, %v9841_v40 }
 0x1f8   : > { %9862 = vpow2.f32 %v1576_v2  ;;  %v1584_v51 = vmul.f32 1.442695, %v1365_v1  ;;  %v1899_v63 = vmul.f32 0.1, %v11653_v27  ;;  %v11981_v45 = vpop.eup %9854  ;;  %v1372_v28 = vmul.f32 10.0, %v1244_v37  ;;  %v17341_v3 = vld [vmem:[#allocation51_spill] sm:$0xff] }
 0x1f9   : > { %v1249_v60 = vmin.f32 %v11964_v43, 0.0  ;;  %v2147_v30 = vsel %vm2019_vm14, %v17333_v26, %v1891_v54  ;;  %v2151_v49 = vsel %vm2023_vm15, %v11350_v13, %v1895_v53  ;;  %vm1916_vm2 = vcmp.gt.f32.partialorder %v17341_v3, 0.0  ;;  %v17342_v54 = vld [vmem:[#allocation80_spill] sm:$0xff] }
 0x1fa   : > { %vm2035_vm3 = vcmp.gt.f32.partialorder %v11453_v5, 0.0  ;;  %vm2039_vm4 = vcmp.gt.f32.partialorder %v11472_v4, 0.0  ;;  %v1590_v27 = vmul.f32 1.442695, %v1368_v32  ;;  %v1373_v40 = vmul.f32 10.0, %v1245_v15  ;;  %v11994_v37 = vpop.eup %9856 }
 0x1fb   : > { %v3641_v2 = vpack.c.bf16 %v2151_v49, %v2147_v30  ;;  %v1903_v1 = vmul.f32 0.1, %v11660_v55  ;;  %9864 = vpow2.f32 %v1582_v41  ;;  %v1592_v43 = vmul.f32 1.442695, %v1369_v59  ;;  %v12000_v13 = vpop.eup %9858 }
 0x1fc   : > { %v1376_v26 = vmul.f32 10.0, %v1248_v8  ;;  %v11998_v34 = vadd.f32 %v17342_v54, %v10997_v25  ;;  %vm1920_vm5 = vcmp.gt.f32.partialorder %v11341_v58, 0.0  ;;  %9866 = vpow2.f32 %v1584_v51 }
 0x1fd   : > { %9295 = vmatmul.mubr.bf16.gmra.mrb[120].mxu0 %v3641_v2  ;;  %v2155_v32 = vsel %vm2027_vm0, %v11398_v0, %v1899_v63  ;;  %v2159_v55 = vsel %vm2031_vm1, %v11419_v18, %v1903_v1  ;;  %v12011_v53 = vadd.f32 %v11343_v22, %v11139_v21  ;;  %v1598_v41 = vmul.f32 1.442695, %v1372_v28  ;;  %v12018_v63 = vpop.f32.mrb[64].mxu0 }
 0x1fe   : > { %v1377_v59 = vmul.f32 10.0, %v1249_v60  ;;  %v3642_v15 = vpack.c.bf16 %v2159_v55, %v2155_v32  ;;  %v1252_v8 = vmin.f32 %v11998_v34, 0.0  ;;  %v12015_v51 = vadd.f32 -1.0, %v11916_v50  ;;  %v12023_v60 = vpop.f32.mrb[65].mxu0  ;;  %v17345_v50 = vld [vmem:[#allocation81_spill] sm:$0xff] }
 0x1ff   : > { %17343 = vst [vmem:[#allocation46_spill] sm:$0xff] %v12011_v53  ;;  %9868 = vpow2.f32 %v1590_v27  ;;  %v1600_v30 = vmul.f32 1.442695, %v1373_v40  ;;  %v1253_v0 = vmin.f32 %v12011_v53, 0.0  ;;  %v12021_v18 = vadd.f32 -1.0, %v11940_v56  ;;  %v12034_v56 = vpop.f32.mrb[66].mxu0 }
 0x200   : > { %17344 = vst [vmem:[#allocation47_spill] sm:$0xff] %v12015_v51  ;;  %9870 = vpow2.f32 %v1592_v43  ;;  %v1606_v22 = vmul.f32 1.442695, %v1376_v26  ;;  %9298 = vmatprep.mubr.bf16.mxu0 %v3642_v15  ;;  %v1380_v28 = vmul.f32 10.0, %v1252_v8  ;;  %v9861_v49 = vpop.eup %9860  ;;  %v12027_v1 = vadd.f32 %v17345_v50, %v10997_v25  ;;  %v12060_v50 = vld [vmem:[%s16934_s6 + $0x20] sm:$0xff]   ;;  %v17363_v53 = vld [vmem:[#allocation27_spill] sm:$0xff] }
 0x201   : > { %v1381_v2 = vmul.f32 10.0, %v1253_v0  ;;  %v12031_v27 = vadd.f32 %v11370_v44, %v11139_v21  ;;  %v1907_v40 = vmul.f32 0.1, %v11670_v29  ;;  %9872 = vpow2.f32 %v1598_v41  ;;  %v17347_v44 = vld [vmem:[#allocation83_spill] sm:$0xff]  ;;  %v12044_v29 = vpop.f32.mrb[67].mxu0  ;;  %17349 = vst [vmem:[#allocation49_spill] sm:$0xff] %v12060_v50  ;;  %9302 = vmatprep.subr.bf16.mxu1 %v12060_v50 }
 0x202   : > { %v1608_v43 = vmul.f32 1.442695, %v1377_v59  ;;  %v1911_v26 = vmul.f32 0.1, %v11707_v46  ;;  %v1788_v54 = vmul.f32 0.1, %v11468_v48  ;;  %v9863_v32 = vpop.eup %9862  ;;  %9874 = vpow2.f32 %v1600_v30 }
 0x203   : > { %17346 = vst [vmem:[#allocation48_spill] sm:$0xff] %v12031_v27  ;;  %vm1932_vm6 = vcmp.gt.f32.partialorder %v11433_v19, 0.0  ;;  %v1614_v55 = vmul.f32 1.442695, %v1380_v28  ;;  %v1256_v15 = vmin.f32 %v12027_v1, 0.0  ;;  %v12042_v8 = vadd.f32 %v17347_v44, %v10997_v25 }
 0x204   : > { %vm1936_vm7 = vcmp.gt.f32.partialorder %v11464_v31, 0.0  ;;  %v12048_v41 = vadd.f32 -1.0, %v11952_v35  ;;  %9876 = vpow2.f32 %v1606_v22  ;;  %v2163_v48 = vsel %vm2035_vm3, %v11453_v5, %v1907_v40 }
 0x205   : > { %v2167_v46 = vsel %vm2039_vm4, %v11472_v4, %v1911_v26  ;;  %v1616_v59 = vmul.f32 1.442695, %v1381_v2  ;;  %v1384_v30 = vmul.f32 10.0, %v1256_v15  ;;  %v1257_v0 = vmin.f32 %v12031_v27, 0.0  ;;  %v9865_v35 = vpop.eup %9864  ;;  %v17351_v15 = vld [vmem:[#allocation84_spill] sm:$0xff] }
 0x206   : > { %17348 = vst [vmem:[#allocation45_spill] sm:$0xff] %v12048_v41  ;;  %v3643_v28 = vpack.c.bf16 %v2167_v46, %v2163_v48  ;;  %v12063_v22 = vadd.f32 -1.0, %v11967_v10  ;;  %9878 = vpow2.f32 %v1608_v43  ;;  %v1792_v5 = vmul.f32 0.1, %v11604_v42  ;;  %v9867_v2 = vpop.eup %9866 }
 0x207   : > { %v2044_v4 = vsel %vm1916_vm2, %v17341_v3, %v1788_v54  ;;  %v12070_v40 = vadd.f32 -1.0, %v11972_v47  ;;  %9880 = vpow2.f32 %v1614_v55  ;;  %v1260_v26 = vmin.f32 %v12042_v8, 0.0  ;;  %v17353_v3 = vld [vmem:[#allocation85_spill] sm:$0xff]  ;;  %v17355_v47 = vld [vmem:[#allocation86_spill] sm:$0xff] }
 0x208   : > { %9299 = vmatmul.mubr.bf16.gmra.mrb[124].mxu0 %v3643_v28  ;;  %v12075_v44 = vadd.f32 %v17351_v15, %v11139_v21  ;;  %v1622_v10 = vmul.f32 1.442695, %v1384_v30  ;;  %v2048_v42 = vsel %vm1920_vm5, %v11341_v58, %v1792_v5  ;;  %v12083_v43 = vadd.f32 %v17353_v3, %v10997_v25 }
 0x209   : > { %17350 = vst [vmem:[#allocation52_spill] sm:$0xff] %v12070_v40  ;;  %v12087_v54 = vadd.f32 %v17355_v47, %v11139_v21  ;;  %v9869_v55 = vpop.eup %9868  ;;  %9882 = vpow2.f32 %v1616_v59  ;;  %v1385_v48 = vmul.f32 10.0, %v1257_v0  ;;  %v5152_v46 = vpack.c.bf16 %v2048_v42, %v2044_v4  ;;  %v17359_v59 = vld [vmem:[#allocation5_spill] sm:$0xff] }
 0x20a   : > { %17352 = vst [vmem:[#allocation54_spill] sm:$0xff] %v12075_v44  ;;  %17354 = vst [vmem:[#allocation50_spill] sm:$0xff] %v12083_v43  ;;  %v1261_v28 = vmin.f32 %v12075_v44, 0.0  ;;  %v9871_v15 = vpop.eup %9870  ;;  %v12091_v30 = vadd.f32 -1.0, %v11976_v16  ;;  %v12094_v58 = vadd.f32 -1.0, %v11981_v45  ;;  %v12097_v5 = vadd.f32 -1.0, %v11994_v37 }
 0x20b   : > { %17356 = vst [vmem:[#allocation53_spill] sm:$0xff] %v12087_v54  ;;  %v12100_v3 = vadd.f32 -1.0, %v12000_v13  ;;  %vm1940_vm8 = vcmp.gt.f32.partialorder %v11496_v9, 0.0  ;;  %vm1944_vm9 = vcmp.gt.f32.partialorder %v17359_v59, 0.0  ;;  %v12104_v0 = vadd.f32 -1.0, %v9861_v49  ;;  %9358 = vmatprep.mubr.bf16.mxu0 %v5152_v46  ;;  %v9873_v45 = vpop.eup %9872  ;;  %v17361_v13 = vld [vmem:[#allocation21_spill] sm:$0xff] }
 0x20c   : > { %17357 = vst [vmem:[#allocation74_spill] sm:$0xff] %v12094_v58  ;;  %v12106_v4 = vadd.f32 -1.0, %v9863_v32  ;;  %v12108_v42 = vadd.f32 -1.0, %v9865_v35  ;;  %v1264_v16 = vmin.f32 %v12083_v43, 0.0  ;;  %9884 = vpow2.f32 %v1622_v10  ;;  %v9875_v44 = vpop.eup %9874  ;;  %v17362_v58 = vld [vmem:[#allocation7_spill] sm:$0xff]  ;;  %v17364_v35 = vld [vmem:[#allocation88_spill] sm:$0xff] }
 0x20d   : > { %17358 = vst [vmem:[#allocation56_spill] sm:$0xff] %v12100_v3  ;;  %v1388_v37 = vmul.f32 10.0, %v1260_v26  ;;  %v1265_v47 = vmin.f32 %v12087_v54, 0.0  ;;  %v1804_v3 = vmul.f32 0.1, %v17361_v13  ;;  %vm1948_vm10 = vcmp.gt.f32.partialorder %v17362_v58, 0.0 }
 0x20e   : > { %17360 = vst [vmem:[#allocation55_spill] sm:$0xff] %v12106_v4  ;;  %v1624_v27 = vmul.f32 1.442695, %v1385_v48  ;;  %v1389_v49 = vmul.f32 10.0, %v1261_v28  ;;  %v1808_v32 = vmul.f32 0.1, %v17363_v53  ;;  %v12117_v4 = vadd.f32 %v17364_v35, %v10997_v25  ;;  %v9877_v26 = vpop.eup %9876 }
 0x20f   : > { %v9626_v10 = vld [vmem:[%s16932_s4 + $0xc8] sm:$0xff]   ;;  %v1392_v46 = vmul.f32 10.0, %v1264_v16  ;;  %v1393_v54 = vmul.f32 10.0, %v1265_v47  ;;  %v2060_v13 = vsel %vm1932_vm6, %v11433_v19, %v1804_v3  ;;  %v17366_v48 = vld [vmem:[#allocation92_spill] sm:$0xff]  ;;  %v17369_v40 = vld [vmem:[#allocation9_spill] sm:$0xff]  ;;  %v12131_v35 = vadd.f32 -1.0, %v9867_v2 }
 0x210   : > { %17365 = vst [vmem:[#allocation57_spill] sm:$0xff] %v12117_v4  ;;  %v12127_v28 = vadd.f32 %v17366_v48, %v11139_v21  ;;  %v17368_v53 = vld [vmem:[#allocation12_spill] sm:$0xff]  ;;  %vm1956_vm12 = vcmp.gt.f32.partialorder %v17369_v40, 0.0  ;;  %v12133_v41 = vadd.f32 -1.0, %v9869_v55  ;;  %v12135_v51 = vadd.f32 -1.0, %v9871_v15  ;;  %v17372_v16 = vld [vmem:[#allocation90_spill] sm:$0xff]  ;;  %v9879_v3 = vpop.eup %9878 }
 0x211   : > { %vm1952_vm11 = vcmp.gt.f32.partialorder %v17368_v53, 0.0  ;;  %17370 = vst [vmem:[#allocation62_spill] sm:$0xff] %v12131_v35  ;;  %v17373_v47 = vld [vmem:[#allocation87_spill] sm:$0xff]  ;;  %v2064_v19 = vsel %vm1936_vm7, %v11464_v31, %v1808_v32  ;;  %vm1964_vm14 = vcmp.gt.f32.partialorder %v17376_v20, 0.0  ;;  %v1630_v50 = vmul.f32 1.442695, %v1388_v37 }
 0x212   : > { %17367 = vst [vmem:[#allocation58_spill] sm:$0xff] %v12127_v28  ;;  %17371 = vst [vmem:[#allocation69_spill] sm:$0xff] %v12135_v51  ;;  %v17374_v23 = vpack.c.bf16 %v17372_v16, %v17373_v47  ;;  %v17375_v48 = vld [vmem:[#allocation11_spill] sm:$0xff]  ;;  %v5154_v2 = vpack.c.bf16 %v2064_v19, %v2060_v13  ;;  %v1268_v55 = vmin.f32 %v12117_v4, 0.0  ;;  %v17377_v15 = vld [vmem:[#allocation93_spill] sm:$0xff]  ;;  %v12152_v47 = vadd.f32 -1.0, %v9873_v45 }
 0x213   : > { %vm1960_vm13 = vcmp.gt.f32.partialorder %v17375_v48, 0.0  ;;  %v12149_v51 = vadd.f32 %v17377_v15, %v10997_v25  ;;  %v17378_v16 = vld [vmem:[#allocation17_spill] sm:$0xff]  ;;  %v12154_v31 = vadd.f32 -1.0, %v9875_v44  ;;  %v1632_v32 = vmul.f32 1.442695, %v1389_v49  ;;  %v17381_v15 = vld [vmem:[#allocation20_spill] sm:$0xff] }
 0x214   : > { %9359 = vmatmul.mubr.bf16.vlgmr.msra.gmra.mrb[128].mxu0 %v17374_v23  ;;  %v9881_v23 = vpop.eup %9880  ;;  %vm1968_vm15 = vcmp.gt.f32.partialorder %v17378_v16, 0.0  ;;  %17379 = vst [vmem:[#allocation60_spill] sm:$0xff] %v12152_v47  ;;  %v1269_v35 = vmin.f32 %v12127_v28, 0.0  ;;  %9886 = vpow2.f32 %v1624_v27  ;;  %v1638_v37 = vmul.f32 1.442695, %v1392_v46  ;;  %v17382_v44 = vld [vmem:[#allocation94_spill] sm:$0xff] }
 0x215   : > { %9431 = vmatpush3.bf16.msra.mxu0 %v11836_v7  ;;  %17380 = vst [vmem:[#allocation70_spill] sm:$0xff] %v12154_v31  ;;  %v9627_v7 = vld [vmem:[%s16932_s4 + $0xd0] sm:$0xff]   ;;  %v1640_v13 = vmul.f32 1.442695, %v1393_v54  ;;  %9362 = vmatprep.mubr.bf16.mxu0 %v5154_v2  ;;  %v1396_v25 = vmul.f32 10.0, %v1268_v55  ;;  %v9883_v19 = vpop.eup %9882  ;;  %vm1972_vm0 = vcmp.gt.f32.partialorder %v17381_v15, 0.0  ;;  %v12163_v31 = vadd.f32 %v17382_v44, %v11139_v21 }
 0x216   : > { %9432 = vmatprep.subr.bf16.mxu0 %v9626_v10  ;;  %v1397_v45 = vmul.f32 10.0, %v1269_v35  ;;  %v17384_v49 = vld [vmem:[#allocation26_spill] sm:$0xff]  ;;  %v1816_v4 = vmul.f32 0.1, %v11729_v33  ;;  %v17385_v47 = vld [vmem:[#allocation23_spill] sm:$0xff]  ;;  %v17386_v43 = vld [vmem:[#allocation28_spill] sm:$0xff]  ;;  %9888 = vpow2.f32 %v1630_v50  ;;  %v9885_v55 = vpop.eup %9884 }
 0x217   : > { %17383 = vst [vmem:[#allocation71_spill] sm:$0xff] %v12163_v31  ;;  %v1812_v28 = vmul.f32 0.1, %v17384_v49  ;;  %vm1976_vm1 = vcmp.gt.f32.partialorder %v17385_v47, 0.0  ;;  %vm1980_vm2 = vcmp.gt.f32.partialorder %v17386_v43, 0.0  ;;  %v12169_v27 = vadd.f32 -1.0, %v9877_v26 }
 0x218   : > { %v1272_v54 = vmin.f32 %v12149_v51, 0.0  ;;  %v17387_v46 = vld [vmem:[#allocation59_spill] sm:$0xff]  ;;  %vm1984_vm3 = vcmp.gt.f32.partialorder %v11772_v61, 0.0  ;;  %v12174_v21 = vadd.f32 -1.0, %v9879_v3  ;;  %v12176_v2 = vadd.f32 -1.0, %v9881_v23  ;;  %v9629_v26 = vld [vmem:[%s16932_s4 + $0xd8] sm:$0xff]  }
 0x219   : > { %9433 = vmatpush3.bf16.msra.mxu0 %v9626_v10  ;;  %v1820_v35 = vmul.f32 0.1, %v17387_v46  ;;  %9890 = vpow2.f32 %v1632_v32  ;;  %v1273_v33 = vmin.f32 %v12163_v31, 0.0  ;;  %v12182_v50 = vpop.f32.mrb[68].mxu0  ;;  %v12184_v10 = vadd.f32 -1.0, %v9883_v19  ;;  %v17389_v31 = vld [vmem:[#allocation32_spill] sm:$0xff] }
 0x21a   : > { %9434 = vmatprep.subr.bf16.mxu0 %v9627_v7  ;;  %9892 = vpow2.f32 %v1638_v37  ;;  %v2068_v3 = vsel %vm1940_vm8, %v11496_v9, %v1812_v28  ;;  %v2072_v23 = vsel %vm1944_vm9, %v17359_v59, %v1816_v4  ;;  %v12195_v32 = vld [vmem:[%s16933_s5] ss:$0 sm:$0xff]  ;;  %v12197_v44 = vpop.f32.mrb[69].mxu0  ;;  %v1646_v49 = vmul.f32 1.442695, %v1396_v25 }
 0x21b   : > { %17388 = vst [vmem:[#allocation72_spill] sm:$0xff] %v12184_v10  ;;  %9894 = vpow2.f32 %v1640_v13  ;;  %v1648_v19 = vmul.f32 1.442695, %v1397_v45  ;;  %v5155_v46 = vpack.c.bf16 %v2072_v23, %v2068_v3  ;;  %v9630_v37 = vld [vmem:[%s16932_s4 + $0xe0] sm:$0xff]   ;;  %v12202_v9 = vpop.f32.mrb[70].mxu0  ;;  %v1400_v28 = vmul.f32 10.0, %v1272_v54 }
 0x21c   : > { %v1824_v59 = vmul.f32 0.1, %v17389_v31  ;;  %v2076_v4 = vsel %vm1948_vm10, %v17362_v58, %v1820_v35  ;;  %v1828_v10 = vmul.f32 0.1, %v11786_v17  ;;  %v12209_v13 = vpop.f32.mrb[71].mxu0  ;;  %v12211_v25 = vadd.f32 -1.0, %v9885_v55 }
 0x21d   : > { %9435 = vmatpush3.bf16.msra.mxu0 %v9627_v7  ;;  %v1401_v45 = vmul.f32 10.0, %v1273_v33  ;;  %v1832_v3 = vmul.f32 0.1, %v11790_v24  ;;  %v1836_v23 = vmul.f32 0.1, %v11795_v38  ;;  %v12224_v7 = vadd.f32 %v12018_v63, %v12195_v32  ;;  %v17390_v54 = vld [vmem:[#allocation35_spill] sm:$0xff] }
 0x21e   : > { %9363 = vmatmul.mubr.bf16.gmra.mrb[132].mxu0 %v5155_v46  ;;  %9436 = vmatprep.subr.bf16.mxu0 %v9629_v26  ;;  %v2080_v31 = vsel %vm1952_vm11, %v17368_v53, %v1824_v59  ;;  %v2084_v17 = vsel %vm1956_vm12, %v17369_v40, %v1828_v10  ;;  %v1840_v58 = vmul.f32 0.1, %v11855_v39  ;;  %vm1988_vm4 = vcmp.gt.f32.partialorder %v17390_v54, 0.0  ;;  %v9887_v53 = vpop.eup %9886  ;;  %v17391_v33 = vld [vmem:[#allocation66_spill] sm:$0xff]  ;;  %v17392_v10 = vld [vmem:[#allocation39_spill] sm:$0xff] }
 0x21f   : > { %vm1992_vm5 = vcmp.gt.f32.partialorder %v11817_v52, 0.0  ;;  %9896 = vpow2.f32 %v1646_v49  ;;  %v5156_v24 = vpack.c.bf16 %v2080_v31, %v2076_v4  ;;  %v2088_v38 = vsel %vm1960_vm13, %v17375_v48, %v1832_v3 }
 0x220   : > { %v2092_v40 = vsel %vm1964_vm14, %v17376_v20, %v1836_v23  ;;  %v1654_v39 = vmul.f32 1.442695, %v1400_v28  ;;  %v5157_v35 = vpack.c.bf16 %v2088_v38, %v2084_v17  ;;  %v2096_v63 = vsel %vm1968_vm15, %v17378_v16, %v1840_v58  ;;  %v9631_v20 = vld [vmem:[%s16932_s4 + $0xe8] sm:$0xff]   ;;  %v9889_v28 = vpop.eup %9888 }
 0x221   : > { %v1844_v55 = vmul.f32 0.1, %v17391_v33  ;;  %9437 = vmatpush3.bf16.msra.mxu0 %v9629_v26  ;;  %vm1996_vm6 = vcmp.gt.f32.partialorder %v17392_v10, 0.0  ;;  %9898 = vpow2.f32 %v1648_v19  ;;  %9366 = vmatprep.mubr.bf16.mxu0 %v5156_v24  ;;  %v5158_v49 = vpack.c.bf16 %v2096_v63, %v2092_v40  ;;  %v9635_v33 = vld [vmem:[%s16932_s4 + $0xf8] sm:$0xff]  }
 0x222   : > { %v1848_v48 = vmul.f32 0.1, %v11909_v6  ;;  %v1852_v46 = vmul.f32 0.1, %v11978_v14  ;;  %9438 = vmatprep.subr.bf16.mxu0 %v9630_v37  ;;  %vm2000_vm7 = vcmp.gt.f32.partialorder %v11871_v57, 0.0  ;;  %v2614_v6 = vmin.f32 %v12224_v7, 0.0 }
 0x223   : > { %v1656_v16 = vmul.f32 1.442695, %v1401_v45  ;;  %v12248_v26 = vsel %vm1972_vm0, %v17381_v15, %v1844_v55  ;;  %v1856_v19 = vmul.f32 0.1, %v12021_v18  ;;  %v9891_v59 = vpop.eup %9890  ;;  %vm2004_vm8 = vcmp.gt.f32.partialorder %v11900_v36, 0.0 }
 0x224   : > { %vm2008_vm9 = vcmp.gt.f32.partialorder %v11914_v11, 0.0  ;;  %v2104_v14 = vsel %vm1976_vm1, %v17385_v47, %v1848_v48  ;;  %v12260_v4 = vsel %vm1980_vm2, %v17386_v43, %v1852_v46  ;;  %v12264_v15 = vadd.f32 %v12195_v32, %v12023_v60  ;;  %v9893_v45 = vpop.eup %9892 }
 0x225   : > { %v12268_v18 = vadd.f32 %v12034_v56, %v12195_v32  ;;  %vm2012_vm10 = vcmp.gt.f32.partialorder %v11930_v62, 0.0  ;;  %vm2016_vm11 = vcmp.gt.f32.partialorder %v11960_v12, 0.0  ;;  %v5159_v47 = vpack.c.bf16 %v2104_v14, %v12248_v26  ;;  %9439 = vmatpush3.bf16.msra.mxu0 %v9630_v37  ;;  %v9895_v23 = vpop.eup %9894 }
 0x226   : > { %v2112_v43 = vsel %vm1984_vm3, %v11772_v61, %v1856_v19  ;;  %v2646_v3 = vmul.f32 10.0, %v2614_v6  ;;  %v12278_v60 = vadd.f32 %v12195_v32, %v12044_v29  ;;  %v12280_v56 = vadd.f32 -1.0, %v9887_v53  ;;  %9367 = vmatmul.mubr.bf16.gmra.mrb[136].mxu0 %v5157_v35  ;;  %9440 = vmatprep.subr.bf16.mxu0 %v9631_v20  ;;  %v9632_v61 = vld [vmem:[%s16932_s4 + $0xf0] sm:$0xff]  }
 0x227   : > { %9900 = vpow2.f32 %v1654_v39  ;;  %v5160_v31 = vpack.c.bf16 %v2112_v43, %v12260_v4  ;;  %v2612_v17 = vmin.f32 %v12264_v15, 0.0  ;;  %v12287_v58 = vadd.f32 -1.0, %v9889_v28  ;;  %9370 = vmatprep.mubr.bf16.mxu0 %v5158_v49  ;;  %v17393_v4 = vld [vmem:[#allocation50_spill] sm:$0xff] }
 0x228   : > { %9902 = vpow2.f32 %v1656_v16  ;;  %v2680_v29 = vmul.f32 1.442695, %v2646_v3  ;;  %v2615_v37 = vmin.f32 %v12268_v18, 0.0  ;;  %v12290_v24 = vadd.f32 -1.0, %v9891_v59  ;;  %v12322_v59 = vpop.f32.mrb[72].mxu0 }
 0x229   : > { %v12292_v38 = vadd.f32 -1.0, %v9893_v45  ;;  %v2644_v40 = vmul.f32 10.0, %v2612_v17  ;;  %v2613_v53 = vmin.f32 %v12278_v60, 0.0  ;;  %v1860_v35 = vmul.f32 0.1, %v12063_v22  ;;  %9441 = vmatpush3.bf16.msra.mxu0 %v9631_v20  ;;  %v9897_v55 = vpop.eup %9896  ;;  %v12332_v14 = vpop.f32.mrb[73].mxu0 }
 0x22a   : > { %9904 = vpow2.f32 %v2680_v29  ;;  %v2647_v39 = vmul.f32 10.0, %v2615_v37  ;;  %v1864_v63 = vmul.f32 0.1, %v12091_v30  ;;  %vm2020_vm12 = vcmp.gt.f32.partialorder %v11998_v34, 0.0  ;;  %9442 = vmatprep.subr.bf16.mxu0 %v9632_v61  ;;  %v17394_v45 = vld [vmem:[#allocation60_spill] sm:$0xff]  ;;  %v12340_v3 = vpop.f32.mrb[74].mxu0 }
 0x22b   : > { %v12301_v49 = vadd.f32 -1.0, %v9895_v23  ;;  %v2676_v48 = vmul.f32 1.442695, %v2644_v40  ;;  %v2645_v46 = vmul.f32 10.0, %v2613_v53  ;;  %v1868_v28 = vmul.f32 0.1, %v12097_v5  ;;  %v9899_v26 = vpop.eup %9898 }
 0x22c   : > { %vm2024_vm13 = vcmp.gt.f32.partialorder %v12027_v1, 0.0  ;;  %v2682_v22 = vmul.f32 1.442695, %v2647_v39  ;;  %v12308_v30 = vsel %vm1988_vm4, %v17390_v54, %v1860_v35  ;;  %v12313_v20 = vsel %vm1992_vm5, %v11817_v52, %v1864_v63  ;;  %v17395_v29 = vld [vmem:[#allocation57_spill] sm:$0xff] }
 0x22d   : > { %v12317_v16 = vadd.f32 %v12182_v50, %v12195_v32  ;;  %9906 = vpow2.f32 %v2676_v48  ;;  %v2678_v5 = vmul.f32 1.442695, %v2645_v46  ;;  %v5161_v19 = vpack.c.bf16 %v12313_v20, %v12308_v30  ;;  %9443 = vmatpush3.bf16.msra.mxu0 %v9632_v61 }
 0x22e   : > { %v1872_v6 = vmul.f32 0.1, %v12104_v0  ;;  %vm2028_vm14 = vcmp.gt.f32.partialorder %v12042_v8, 0.0  ;;  %9908 = vpow2.f32 %v2682_v22  ;;  %v12328_v52 = vsel %vm1996_vm6, %v17392_v10, %v1868_v28  ;;  %9371 = vmatmul.mubr.bf16.gmra.mrb[140].mxu0 %v5159_v47  ;;  %9444 = vmatprep.subr.bf16.mxu0 %v9635_v33  ;;  %v12355_v47 = vpop.f32.mrb[75].mxu0  ;;  %v17397_v28 = vld [vmem:[#allocation82_spill] sm:$0xff] }
 0x22f   : > { %v1876_v50 = vmul.f32 0.1, %v12108_v42  ;;  %v1880_v54 = vmul.f32 0.1, %v12133_v41  ;;  %vm2032_vm15 = vcmp.gt.f32.partialorder %v17393_v4, 0.0  ;;  %9910 = vpow2.f32 %v2678_v5  ;;  %9374 = vmatprep.mubr.bf16.mxu0 %v5160_v31 }
 0x230   : > { %v2128_v0 = vsel %vm2000_vm7, %v11871_v57, %v1872_v6  ;;  %v1884_v43 = vmul.f32 0.1, %v17394_v45  ;;  %v1888_v10 = vmul.f32 0.1, %v12169_v27  ;;  %vm2806_vm0 = vcmp.gt.f32.partialorder %v12224_v7, 0.0 }
 0x231   : > { %v5162_v41 = vpack.c.bf16 %v2128_v0, %v12328_v52  ;;  %v12347_v42 = vsel %vm2004_vm8, %v11900_v36, %v1876_v50  ;;  %v12352_v57 = vsel %vm2008_vm9, %v11914_v11, %v1880_v54  ;;  %v2618_v27 = vmin.f32 %v12317_v16, 0.0  ;;  %v9901_v23 = vpop.eup %9900  ;;  %9445 = vmatpush3.bf16.msra.mxu0 %v9635_v33 }
 0x232   : > { %v8482_v31 = vadd.f32 -1.0, %v9897_v55  ;;  %v5163_v17 = vpack.c.bf16 %v12352_v57, %v12347_v42  ;;  %v12362_v61 = vsel %vm2012_vm10, %v11930_v62, %v1884_v43  ;;  %v12367_v36 = vsel %vm2016_vm11, %v11960_v12, %v1888_v10  ;;  %v9903_v11 = vpop.eup %9902  ;;  %v17396_v55 = vld [vmem:[#allocation75_spill] sm:$0xff] }
 0x233   : > { %vm2036_vm1 = vcmp.gt.f32.partialorder %v17395_v29, 0.0  ;;  %v5164_v37 = vpack.c.bf16 %v12367_v36, %v12362_v61  ;;  %v2650_v40 = vmul.f32 10.0, %v2618_v27  ;;  %v12374_v53 = vadd.f32 %v12195_v32, %v12197_v44  ;;  %v9637_v61 = vld [vmem:[%s16934_s6 + $0x28] sm:$0xff]   ;;  %v17403_v36 = vld [vmem:[#allocation6_spill] sm:$0xff] }
 0x234   : > { %v12378_v62 = vadd.f32 %v12202_v9, %v12195_v32  ;;  %v12380_v39 = vadd.f32 -1.0, %v9899_v26  ;;  %vm2040_vm2 = vcmp.gt.f32.partialorder %v12149_v51, 0.0  ;;  %vm2804_vm3 = vcmp.gt.f32.partialorder %v12264_v15, 0.0  ;;  %v9905_v63 = vpop.eup %9904 }
 0x235   : > { %v12386_v12 = vadd.f32 %v12195_v32, %v12209_v13  ;;  %v1892_v35 = vmul.f32 0.1, %v12176_v2  ;;  %v1896_v44 = vmul.f32 0.1, %v12211_v25  ;;  %vm1917_vm4 = vcmp.gt.f32.partialorder %v17396_v55, 0.0 }
 0x236   : > { %v8486_v9 = vadd.f32 -1.0, %v9901_v23  ;;  %vm2807_vm5 = vcmp.gt.f32.partialorder %v12268_v18, 0.0  ;;  %v2688_v33 = vmul.f32 1.442695, %v2650_v40  ;;  %v2616_v48 = vmin.f32 %v12374_v53, 0.0  ;;  %9375 = vmatmul.mubr.bf16.gmra.mrb[144].mxu0 %v5161_v19  ;;  %v17398_v40 = vld [vmem:[#allocation95_spill] sm:$0xff] }
 0x237   : > { %v2619_v46 = vmin.f32 %v12378_v62, 0.0  ;;  %vm1921_vm6 = vcmp.gt.f32.partialorder %v17397_v28, 0.0  ;;  %v12395_v22 = vadd.f32 -1.0, %v9903_v11  ;;  %v8531_v13 = vadd.f32 -1.0, %v9905_v63  ;;  %v9907_v5 = vpop.eup %9906  ;;  %9378 = vmatprep.mubr.bf16.mxu0 %v5162_v41 }
 0x238   : > { %vm2805_vm7 = vcmp.gt.f32.partialorder %v12278_v60, 0.0  ;;  %v2617_v2 = vmin.f32 %v12386_v12, 0.0  ;;  %v1900_v25 = vmul.f32 0.1, %v12287_v58  ;;  %9912 = vpow2.f32 %v2688_v33  ;;  %v9909_v58 = vpop.eup %9908 }
 0x239   : > { %v2648_v30 = vmul.f32 10.0, %v2616_v48  ;;  %v2651_v20 = vmul.f32 10.0, %v2619_v46  ;;  %v12403_v26 = vsel %vm2020_vm12, %v11998_v34, %v1892_v35  ;;  %v2774_v6 = vmul.f32 0.1, %v8531_v13  ;;  %v9911_v10 = vpop.eup %9910  ;;  %v12432_v48 = vpop.f32.mrb[76].mxu0  ;;  %v17399_v46 = vld [vmem:[#allocation96_spill] sm:$0xff] }
 0x23a   : > { %v2649_v52 = vmul.f32 10.0, %v2617_v2  ;;  %v12408_v50 = vsel %vm2024_vm13, %v12027_v1, %v1896_v44  ;;  %v1904_v54 = vmul.f32 0.1, %v12292_v38  ;;  %v8529_v0 = vadd.f32 -1.0, %v9907_v5 }
 0x23b   : > { %v2684_v45 = vmul.f32 1.442695, %v2648_v30  ;;  %v2690_v43 = vmul.f32 1.442695, %v2651_v20  ;;  %v5165_v34 = vpack.c.bf16 %v12408_v50, %v12403_v26  ;;  %v2838_v19 = vsel %vm2806_vm0, %v12224_v7, %v2774_v6 }
 0x23c   : > { %v8532_v27 = vadd.f32 -1.0, %v9909_v58  ;;  %v2686_v23 = vmul.f32 1.442695, %v2649_v52  ;;  %v12419_v1 = vsel %vm2028_vm14, %v12042_v8, %v1900_v25  ;;  %v2772_v38 = vmul.f32 0.1, %v8529_v0 }
 0x23d   : > { %v8530_v11 = vadd.f32 -1.0, %v9911_v10  ;;  %9914 = vpow2.f32 %v2684_v45  ;;  %v12424_v41 = vsel %vm2032_vm15, %v17393_v4, %v1904_v54  ;;  %vm1933_vm8 = vcmp.gt.f32.partialorder %v17398_v40, 0.0 }
 0x23e   : > { %v2775_v35 = vmul.f32 0.1, %v8532_v27  ;;  %9916 = vpow2.f32 %v2690_v43  ;;  %v5166_v7 = vpack.c.bf16 %v12424_v41, %v12419_v1  ;;  %v1908_v44 = vmul.f32 0.1, %v8482_v31  ;;  %v17400_v31 = vld [vmem:[#allocation97_spill] sm:$0xff]  ;;  %9379 = vmatmul.mubr.bf16.gmra.mrb[148].mxu0 %v5163_v17  ;;  %v9638_v27 = vld [vmem:[%s16934_s6 + $0x30] sm:$0xff]  }
 0x23f   : > { %v2836_v8 = vsel %vm2804_vm3, %v12264_v15, %v2772_v38  ;;  %v2773_v63 = vmul.f32 0.1, %v8530_v11  ;;  %9918 = vpow2.f32 %v2686_v23  ;;  %v1912_v33 = vmul.f32 0.1, %v8486_v9  ;;  %v12444_v15 = vpop.f32.mrb[77].mxu0  ;;  %9382 = vmatprep.mubr.bf16.mxu0 %v5164_v37  ;;  %v9639_v1 = vld [vmem:[%s16934_s6 + $0x38] sm:$0xff]  }
 0x240   : > { %vm1937_vm9 = vcmp.gt.f32.partialorder %v17399_v46, 0.0  ;;  %v2839_v4 = vsel %vm2807_vm5, %v12268_v18, %v2775_v35  ;;  %v12441_v13 = vsel %vm2036_vm1, %v17395_v29, %v1908_v44  ;;  %vm2923_vm10 = vcmask 523264   ;;  %v17401_v18 = vld [vmem:[#allocation19_spill] sm:$0xff]  ;;  %v12455_v5 = vpop.f32.mrb[78].mxu0  ;;  %v17402_v29 = vld [vmem:[#allocation4_spill] sm:$0xff] }
 0x241   : > { %v1789_v2 = vmul.f32 0.1, %v17400_v31  ;;  %v2869_v25 = vpack.c.bf16 %v2839_v4, %v2838_v19  ;;  %v2837_v9 = vsel %vm2805_vm7, %v12278_v60, %v2773_v63  ;;  %v12452_v30 = vsel %vm2040_vm2, %v12149_v51, %v1912_v33  ;;  %v12472_v54 = vpop.f32.mrb[79].mxu0  ;;  %v17406_v19 = vld [vmem:[#allocation49_spill] sm:$0xff]  ;;  %v17407_v35 = vld [vmem:[#allocation24_spill] sm:$0xff] }
 0x242   : > { %v1793_v20 = vmul.f32 0.1, %v17401_v18  ;;  %vm1941_vm11 = vcmp.gt.f32.partialorder %v17402_v29, 0.0  ;;  %v2868_v6 = vpack.c.bf16 %v2837_v9, %v2836_v8  ;;  %v5167_v52 = vpack.c.bf16 %v12452_v30, %v12441_v13  ;;  %v9913_v58 = vpop.eup %9912  ;;  %v17408_v8 = vld [vmem:[#allocation25_spill] sm:$0xff] }
 0x243   : > { %v12466_v60 = vsel %vm1917_vm4, %v17396_v55, %v1789_v2  ;;  %v12470_v51 = vadd.f32 %v12322_v59, %v12195_v32  ;;  %v12484_v57 = vadd.f32 %v12195_v32, %v12332_v14  ;;  %v12488_v59 = vadd.f32 %v12340_v3, %v12195_v32  ;;  %v17404_v55 = vld [vmem:[#allocation8_spill] sm:$0xff] }
 0x244   : > { %v12480_v42 = vsel %vm1921_vm6, %v17397_v28, %v1793_v20  ;;  %v12492_v17 = vadd.f32 %v12195_v32, %v12355_v47  ;;  %vm1945_vm12 = vcmp.gt.f32.partialorder %v17403_v36, 0.0  ;;  %v8535_v37 = vadd.f32 -1.0, %v9913_v58  ;;  %9222 = vmatprep.mubr.msk.bf16.mxu1 %vm2923_vm10, %v2868_v6  ;;  %v17405_v47 = vld [vmem:[#allocation13_spill] sm:$0xff] }
 0x245   : > { %vm2810_vm13 = vcmp.gt.f32.partialorder %v12317_v16, 0.0  ;;  %v6676_v14 = vpack.c.bf16 %v12480_v42, %v12466_v60  ;;  %v2622_v3 = vmin.f32 %v12470_v51, 0.0  ;;  %vm1949_vm14 = vcmp.gt.f32.partialorder %v17404_v55, 0.0  ;;  %9223 = vmatmul.mubr.msk.bf16.vlgmr.msra.gmra.mrb[64].mxu1 %vm2923_vm10, %v2869_v25 }
 0x246   : > { %vm1953_vm15 = vcmp.gt.f32.partialorder %v17405_v47, 0.0  ;;  %vm2808_vm0 = vcmp.gt.f32.partialorder %v12374_v53, 0.0  ;;  %vm2811_vm1 = vcmp.gt.f32.partialorder %v12378_v62, 0.0  ;;  %v2620_v28 = vmin.f32 %v12484_v57, 0.0  ;;  %9303 = vmatpush3.bf16.msra.mxu1 %v17406_v19  ;;  %9383 = vmatmul.mubr.bf16.gmra.mrb[152].mxu0 %v5165_v34 }
 0x247   : > { %v2623_v0 = vmin.f32 %v12488_v59, 0.0  ;;  %v2778_v45 = vmul.f32 0.1, %v8535_v37  ;;  %vm2809_vm2 = vcmp.gt.f32.partialorder %v12386_v12, 0.0  ;;  %v2654_v43 = vmul.f32 10.0, %v2622_v3  ;;  %v9915_v23 = vpop.eup %9914  ;;  %9304 = vmatprep.subr.bf16.mxu1 %v9637_v61  ;;  %v17409_v37 = vld [vmem:[#allocation10_spill] sm:$0xff]  ;;  %9386 = vmatprep.mubr.bf16.mxu0 %v5166_v7 }
 0x248   : > { %v2621_v10 = vmin.f32 %v12492_v17, 0.0  ;;  %v2652_v38 = vmul.f32 10.0, %v2620_v28  ;;  %v1805_v44 = vmul.f32 0.1, %v17407_v35  ;;  %v1809_v63 = vmul.f32 0.1, %v17408_v8  ;;  %v9917_v33 = vpop.eup %9916 }
 0x249   : > { %v2655_v11 = vmul.f32 10.0, %v2623_v0  ;;  %v2842_v4 = vsel %vm2810_vm13, %v12317_v16, %v2778_v45  ;;  %v8533_v31 = vadd.f32 -1.0, %v9915_v23  ;;  %v2696_v2 = vmul.f32 1.442695, %v2654_v43  ;;  %v9919_v9 = vpop.eup %9918  ;;  %v17410_v0 = vld [vmem:[#allocation14_spill] sm:$0xff]  ;;  %v17411_v43 = vld [vmem:[#allocation3_spill] sm:$0xff] }
 0x24a   : > { %v2653_v25 = vmul.f32 10.0, %v2621_v10  ;;  %v8536_v18 = vadd.f32 -1.0, %v9917_v33  ;;  %v2692_v20 = vmul.f32 1.442695, %v2652_v38  ;;  %v12524_v58 = vsel %vm1933_vm8, %v17398_v40, %v1805_v44  ;;  %9305 = vmatpush3.bf16.msra.mxu1 %v9637_v61  ;;  %v17412_v7 = vld [vmem:[#allocation2_spill] sm:$0xff]  ;;  %v17415_v44 = vld [vmem:[#allocation16_spill] sm:$0xff] }
 0x24b   : > { %v2698_v6 = vmul.f32 1.442695, %v2655_v11  ;;  %vm1957_vm3 = vcmp.gt.f32.partialorder %v17409_v37, 0.0  ;;  %v2776_v3 = vmul.f32 0.1, %v8533_v31  ;;  %v8534_v28 = vadd.f32 -1.0, %v9919_v9  ;;  %9306 = vmatprep.subr.bf16.mxu1 %v9638_v27 }
 0x24c   : > { %9920 = vpow2.f32 %v2696_v2  ;;  %v2694_v16 = vmul.f32 1.442695, %v2653_v25  ;;  %vm1961_vm4 = vcmp.gt.f32.partialorder %v17410_v0, 0.0  ;;  %v2779_v45 = vmul.f32 0.1, %v8536_v18  ;;  %v17413_v23 = vld [vmem:[#allocation30_spill] sm:$0xff] }
 0x24d   : > { %9922 = vpow2.f32 %v2692_v20  ;;  %v12537_v40 = vsel %vm1937_vm9, %v17399_v46, %v1809_v63  ;;  %v1813_v10 = vmul.f32 0.1, %v17411_v43  ;;  %v2840_v26 = vsel %vm2808_vm0, %v12374_v53, %v2776_v3  ;;  %v17414_v11 = vld [vmem:[#allocation61_spill] sm:$0xff]  ;;  %v17416_v63 = vld [vmem:[#allocation18_spill] sm:$0xff]  ;;  %v12599_v31 = vpop.f32.mrb[80].mxu0  ;;  %v17419_v18 = vld [vmem:[#allocation31_spill] sm:$0xff] }
 0x24e   : > { %v2777_v50 = vmul.f32 0.1, %v8534_v28  ;;  %9924 = vpow2.f32 %v2698_v6  ;;  %v6678_v34 = vpack.c.bf16 %v12537_v40, %v12524_v58  ;;  %v2843_v41 = vsel %vm2811_vm1, %v12378_v62, %v2779_v45  ;;  %9307 = vmatpush3.bf16.msra.mxu1 %v9638_v27  ;;  %v17417_v2 = vld [vmem:[#allocation22_spill] sm:$0xff]  ;;  %9387 = vmatmul.mubr.bf16.gmra.mrb[156].mxu0 %v5167_v52  ;;  %v2549_v9 = vpop.f32.mrb[81].mxu0  ;;  %v17420_v52 = vld [vmem:[#allocation33_spill] sm:$0xff] }
 0x24f   : > { %9926 = vpow2.f32 %v2694_v16  ;;  %v1817_v46 = vmul.f32 0.1, %v17412_v7  ;;  %v12555_v53 = vsel %vm1941_vm11, %v17402_v29, %v1813_v10  ;;  %v2871_v61 = vpack.c.bf16 %v2843_v41, %v2842_v4  ;;  %9308 = vmatprep.subr.bf16.mxu1 %v9639_v1  ;;  %9446 = vmatprep.mubr.bf16.mxu0 %v6676_v14  ;;  %v17421_v6 = vld [vmem:[#allocation34_spill] sm:$0xff]  ;;  %v17422_v16 = vld [vmem:[#allocation63_spill] sm:$0xff]  ;;  %v17423_v43 = vld [vmem:[#allocation65_spill] sm:$0xff] }
 0x250   : > { %v2841_v19 = vsel %vm2809_vm2, %v12386_v12, %v2777_v50  ;;  %v1821_v38 = vmul.f32 0.1, %v17413_v23  ;;  %v1825_v35 = vmul.f32 0.1, %v17414_v11  ;;  %vm1965_vm5 = vcmp.gt.f32.partialorder %v17415_v44, 0.0 }
 0x251   : > { %v2870_v62 = vpack.c.bf16 %v2841_v19, %v2840_v26  ;;  %v12566_v8 = vsel %vm1945_vm12, %v17403_v36, %v1817_v46  ;;  %v12570_v29 = vadd.f32 %v12432_v48, %v12195_v32  ;;  %v12574_v12 = vadd.f32 %v12195_v32, %v12444_v15  ;;  %v9201_v26 = vpop.f32.mrb[82].mxu0 }
 0x252   : > { %vm1969_vm6 = vcmp.gt.f32.partialorder %v17416_v63, 0.0  ;;  %v6679_v27 = vpack.c.bf16 %v12566_v8, %v12555_v53  ;;  %v12582_v33 = vsel %vm1949_vm14, %v17404_v55, %v1821_v38  ;;  %v12587_v48 = vsel %vm1953_vm15, %v17405_v47, %v1825_v35  ;;  %v17418_v47 = vld [vmem:[#allocation29_spill] sm:$0xff]  ;;  %9309 = vmatpush3.bf16.msra.mxu1 %v9639_v1  ;;  %v2552_v1 = vpop.f32.mrb[83].mxu0 }
 0x253   : > { %v12591_v15 = vadd.f32 %v12455_v5, %v12195_v32  ;;  %vm2814_vm7 = vcmp.gt.f32.partialorder %v12470_v51, 0.0  ;;  %9226 = vmatprep.mubr.msk.bf16.mxu1 %vm2923_vm10, %v2870_v62  ;;  %v6680_v36 = vpack.c.bf16 %v12587_v48, %v12582_v33  ;;  %v2626_v4 = vmin.f32 %v12570_v29, 0.0 }
 0x254   : > { %v2624_v55 = vmin.f32 %v12574_v12, 0.0  ;;  %vm1973_vm8 = vcmp.gt.f32.partialorder %v17417_v2, 0.0  ;;  %vm1977_vm9 = vcmp.gt.f32.partialorder %v17418_v47, 0.0  ;;  %vm2812_vm11 = vcmp.gt.f32.partialorder %v12484_v57, 0.0  ;;  %9227 = vmatmul.mubr.msk.bf16.gmra.mrb[68].mxu1 %vm2923_vm10, %v2871_v61 }
 0x255   : > { %vm2815_vm12 = vcmp.gt.f32.partialorder %v12488_v59, 0.0  ;;  %v2627_v5 = vmin.f32 %v12591_v15, 0.0  ;;  %v12612_v25 = vadd.f32 %v12195_v32, %v12472_v54  ;;  %vm1981_vm13 = vcmp.gt.f32.partialorder %v17419_v18, 0.0 }
 0x256   : > { %v2658_v13 = vmul.f32 10.0, %v2626_v4  ;;  %v2656_v30 = vmul.f32 10.0, %v2624_v55  ;;  %v1829_v20 = vmul.f32 0.1, %v17420_v52  ;;  %v1833_v3 = vmul.f32 0.1, %v17421_v6  ;;  %v9921_v28 = vpop.eup %9920 }
 0x257   : > { %vm1985_vm14 = vcmp.gt.f32.partialorder %v17422_v16, 0.0  ;;  %vm2813_vm15 = vcmp.gt.f32.partialorder %v12492_v17, 0.0  ;;  %v2659_v54 = vmul.f32 10.0, %v2627_v5  ;;  %v2625_v45 = vmin.f32 %v12612_v25, 0.0  ;;  %v9923_v60 = vpop.eup %9922  ;;  %v17424_v5 = vld [vmem:[#allocation36_spill] sm:$0xff] }
 0x258   : > { %v1837_v10 = vmul.f32 0.1, %v17423_v43  ;;  %v8539_v42 = vadd.f32 -1.0, %v9921_v28  ;;  %v2704_v14 = vmul.f32 1.442695, %v2658_v13  ;;  %v12627_v41 = vsel %vm1957_vm3, %v17409_v37, %v1829_v20  ;;  %v9925_v7 = vpop.eup %9924  ;;  %v17426_v20 = vld [vmem:[#allocation64_spill] sm:$0xff] }
 0x259   : > { %v2700_v50 = vmul.f32 1.442695, %v2656_v30  ;;  %v8537_v46 = vadd.f32 -1.0, %v9923_v60  ;;  %v2706_v61 = vmul.f32 1.442695, %v2659_v54  ;;  %v2657_v19 = vmul.f32 10.0, %v2625_v45  ;;  %v9927_v38 = vpop.eup %9926 }
 0x25a   : > { %v12632_v23 = vsel %vm1961_vm4, %v17410_v0, %v1833_v3  ;;  %v2782_v11 = vmul.f32 0.1, %v8539_v42  ;;  %v8540_v35 = vadd.f32 -1.0, %v9925_v7  ;;  %9928 = vpow2.f32 %v2704_v14  ;;  %v17425_v0 = vld [vmem:[#allocation38_spill] sm:$0xff]  ;;  %v17427_v28 = vld [vmem:[#allocation91_spill] sm:$0xff]  ;;  %v17428_v54 = vld [vmem:[#allocation89_spill] sm:$0xff] }
 0x25b   : > { %v6681_v62 = vpack.c.bf16 %v12632_v23, %v12627_v41  ;;  %v2780_v4 = vmul.f32 0.1, %v8537_v46  ;;  %v8538_v37 = vadd.f32 -1.0, %v9927_v38  ;;  %9930 = vpow2.f32 %v2700_v50  ;;  %v17430_v60 = vld [vmem:[#allocation43_spill] sm:$0xff]  ;;  %v17431_v14 = vld [vmem:[#allocation68_spill] sm:$0xff]  ;;  %v17433_v46 = vld [vmem:[#allocation45_spill] sm:$0xff] }
 0x25c   : > { %v2702_v55 = vmul.f32 1.442695, %v2657_v19  ;;  %vm1989_vm0 = vcmp.gt.f32.partialorder %v17424_v5, 0.0  ;;  %v2846_v13 = vsel %vm2814_vm7, %v12470_v51, %v2782_v11  ;;  %v2783_v30 = vmul.f32 0.1, %v8540_v35  ;;  %v17434_v11 = vld [vmem:[#allocation37_spill] sm:$0xff] }
 0x25d   : > { %9932 = vpow2.f32 %v2706_v61  ;;  %v1841_v52 = vmul.f32 0.1, %v17425_v0  ;;  %vm1993_vm1 = vcmp.gt.f32.partialorder %v17426_v20, 0.0  ;;  %v2844_v6 = vsel %vm2812_vm11, %v12484_v57, %v2780_v4  ;;  %v17435_v35 = vld [vmem:[#allocation42_spill] sm:$0xff] }
 0x25e   : > { %v2781_v3 = vmul.f32 0.1, %v8538_v37  ;;  %v17429_v45 = vpack.c.bf16 %v17427_v28, %v17428_v54  ;;  %9934 = vpow2.f32 %v2702_v55  ;;  %v12651_v51 = vsel %vm1965_vm5, %v17415_v44, %v1837_v10  ;;  %v17432_v10 = vld [vmem:[#allocation47_spill] sm:$0xff]  ;;  %v17440_v28 = vld [vmem:[#allocation44_spill] sm:$0xff]  ;;  %v17441_v54 = vld [vmem:[#allocation46_spill] sm:$0xff] }
 0x25f   : > { %v2847_v43 = vsel %vm2815_vm12, %v12488_v59, %v2783_v30  ;;  %v12662_v57 = vsel %vm1969_vm6, %v17416_v63, %v1841_v52  ;;  %v1845_v42 = vmul.f32 0.1, %v17430_v60  ;;  %v1849_v50 = vmul.f32 0.1, %v17431_v14  ;;  %v17437_v30 = vld [vmem:[#allocation40_spill] sm:$0xff]  ;;  %v17450_v41 = vld [vmem:[#allocation70_spill] sm:$0xff] }
 0x260   : > { %9447 = vmatmul.mubr.bf16.vlgmr.msra.gmra.mrb[160].mxu0 %v17429_v45  ;;  %v2873_v7 = vpack.c.bf16 %v2847_v43, %v2846_v13  ;;  %v2845_v44 = vsel %vm2813_vm15, %v12492_v17, %v2781_v3  ;;  %v6682_v59 = vpack.c.bf16 %v12662_v57, %v12651_v51  ;;  %v1853_v58 = vmul.f32 0.1, %v17432_v10  ;;  %v17436_v13 = vld [vmem:[#allocation52_spill] sm:$0xff]  ;;  %v17439_v3 = vld [vmem:[#allocation41_spill] sm:$0xff]  ;;  %v17443_v10 = vld [vmem:[#allocation74_spill] sm:$0xff] }
 0x261   : > { %9450 = vmatprep.mubr.bf16.mxu0 %v6678_v34  ;;  %v2872_v40 = vpack.c.bf16 %v2845_v44, %v2844_v6  ;;  %v12675_v34 = vsel %vm1973_vm8, %v17417_v2, %v1845_v42  ;;  %v12680_v63 = vsel %vm1977_vm9, %v17418_v47, %v1849_v50  ;;  %v1857_v61 = vmul.f32 0.1, %v17433_v46  ;;  %v12700_v47 = vld [vmem:[%s16934_s6 + $0x40] sm:$0xff]   ;;  %v17442_v14 = vld [vmem:[#allocation48_spill] sm:$0xff] }
 0x262   : > { %v6683_v17 = vpack.c.bf16 %v12680_v63, %v12675_v34  ;;  %v12688_v19 = vsel %vm1981_vm13, %v17419_v18, %v1853_v58  ;;  %v12692_v38 = vadd.f32 %v12599_v31, %v12195_v32  ;;  %v12695_v2 = vadd.f32 %v12195_v32, %v2549_v9  ;;  %9390 = vmatprep.subr.bf16.mxu1 %v12700_v47 }
 0x263   : > { %vm1997_vm2 = vcmp.gt.f32.partialorder %v17434_v11, 0.0  ;;  %vm2818_vm3 = vcmp.gt.f32.partialorder %v12570_v29, 0.0  ;;  %9230 = vmatprep.mubr.msk.bf16.mxu1 %vm2923_vm10, %v2872_v40  ;;  %v12708_v18 = vsel %vm1985_vm14, %v17422_v16, %v1857_v61  ;;  %v12711_v31 = vadd.f32 %v9201_v26, %v12195_v32  ;;  %v17444_v61 = vld [vmem:[#allocation54_spill] sm:$0xff] }
 0x264   : > { %v12714_v9 = vadd.f32 %v12195_v32, %v2552_v1  ;;  %vm2001_vm4 = vcmp.gt.f32.partialorder %v17435_v35, 0.0  ;;  %v6684_v4 = vpack.c.bf16 %v12708_v18, %v12688_v19  ;;  %9231 = vmatmul.mubr.msk.bf16.gmra.mrb[72].mxu1 %vm2923_vm10, %v2873_v7  ;;  %v2630_v37 = vmin.f32 %v12692_v38, 0.0  ;;  %v9929_v26 = vpop.eup %9928  ;;  %v17438_v1 = vld [vmem:[#allocation67_spill] sm:$0xff] }
 0x265   : > { %v2628_v55 = vmin.f32 %v12695_v2, 0.0  ;;  %v1861_v16 = vmul.f32 0.1, %v17436_v13  ;;  %vm2005_vm5 = vcmp.gt.f32.partialorder %v17437_v30, 0.0  ;;  %vm2009_vm6 = vcmp.gt.f32.partialorder %v17438_v1, 0.0  ;;  %v9931_v6 = vpop.eup %9930 }
 0x266   : > { %vm2816_vm7 = vcmp.gt.f32.partialorder %v12574_v12, 0.0  ;;  %vm2819_vm8 = vcmp.gt.f32.partialorder %v12591_v15, 0.0  ;;  %v2631_v0 = vmin.f32 %v12711_v31, 0.0  ;;  %v2629_v52 = vmin.f32 %v12714_v9, 0.0 }
 0x267   : > { %vm2013_vm9 = vcmp.gt.f32.partialorder %v17439_v3, 0.0  ;;  %vm2017_vm11 = vcmp.gt.f32.partialorder %v17440_v28, 0.0  ;;  %vm2021_vm12 = vcmp.gt.f32.partialorder %v17441_v54, 0.0  ;;  %v8543_v45 = vadd.f32 -1.0, %v9929_v26  ;;  %v9933_v42 = vpop.eup %9932 }
 0x268   : > { %9451 = vmatmul.mubr.bf16.gmra.mrb[164].mxu0 %v6679_v27  ;;  %vm2817_vm13 = vcmp.gt.f32.partialorder %v12612_v25, 0.0  ;;  %v2662_v43 = vmul.f32 10.0, %v2630_v37  ;;  %v2660_v60 = vmul.f32 10.0, %v2628_v55  ;;  %v8541_v50 = vadd.f32 -1.0, %v9931_v6  ;;  %v9935_v40 = vpop.eup %9934  ;;  %v17445_v37 = vld [vmem:[#allocation53_spill] sm:$0xff] }
 0x269   : > { %9454 = vmatprep.mubr.bf16.mxu0 %v6680_v36  ;;  %v2663_v7 = vmul.f32 10.0, %v2631_v0  ;;  %v2661_v44 = vmul.f32 10.0, %v2629_v52  ;;  %v1865_v58 = vmul.f32 0.1, %v17443_v10  ;;  %v2786_v53 = vmul.f32 0.1, %v8543_v45 }
 0x26a   : > { %v8544_v8 = vadd.f32 -1.0, %v9933_v42  ;;  %v2712_v27 = vmul.f32 1.442695, %v2662_v43  ;;  %v12745_v46 = vsel %vm1989_vm0, %v17424_v5, %v1861_v16  ;;  %vm2029_vm15 = vcmp.gt.f32.partialorder %v17444_v61, 0.0  ;;  %v17446_v45 = vld [vmem:[#allocation56_spill] sm:$0xff]  ;;  %v17449_v10 = vld [vmem:[#allocation69_spill] sm:$0xff] }
 0x26b   : > { %vm2033_vm14 = vcmp.gt.f32.partialorder %v17445_v37, 0.0  ;;  %v2784_v33 = vmul.f32 0.1, %v8541_v50  ;;  %v8542_v48 = vadd.f32 -1.0, %v9935_v40  ;;  %v2708_v36 = vmul.f32 1.442695, %v2660_v60 }
 0x26c   : > { %v12752_v55 = vsel %vm1993_vm1, %v17426_v20, %v1865_v58  ;;  %v2850_v13 = vsel %vm2818_vm3, %v12570_v29, %v2786_v53  ;;  %v2787_v26 = vmul.f32 0.1, %v8544_v8  ;;  %9936 = vpow2.f32 %v2712_v27  ;;  %v17451_v40 = vld [vmem:[#allocation72_spill] sm:$0xff]  ;;  %v17453_v27 = vld [vmem:[#allocation58_spill] sm:$0xff] }
 0x26d   : > { %v2714_v5 = vmul.f32 1.442695, %v2663_v7  ;;  %v2848_v16 = vsel %vm2816_vm7, %v12574_v12, %v2784_v33  ;;  %v2785_v0 = vmul.f32 0.1, %v8542_v48  ;;  %9938 = vpow2.f32 %v2708_v36  ;;  %v17447_v12 = vld [vmem:[#allocation55_spill] sm:$0xff]  ;;  %v17448_v7 = vld [vmem:[#allocation62_spill] sm:$0xff] }
 0x26e   : > { %v2710_v52 = vmul.f32 1.442695, %v2661_v44  ;;  %v2851_v6 = vsel %vm2819_vm8, %v12591_v15, %v2787_v26  ;;  %v6685_v20 = vpack.c.bf16 %v12752_v55, %v12745_v46  ;;  %v1869_v29 = vmul.f32 0.1, %v17446_v45  ;;  %v17454_v33 = vld [vmem:[#allocation71_spill] sm:$0xff]  ;;  %v9204_v36 = vpop.f32.mrb[84].mxu0 }
 0x26f   : > { %9940 = vpow2.f32 %v2714_v5  ;;  %v2875_v43 = vpack.c.bf16 %v2851_v6, %v2850_v13  ;;  %v2849_v60 = vsel %vm2817_vm13, %v12612_v25, %v2785_v0  ;;  %v1873_v42 = vmul.f32 0.1, %v17447_v12  ;;  %v420_v46 = vld [vmem:[%s12914_s15 + $0x10] sm:$0xff] }
 0x270   : > { %9942 = vpow2.f32 %v2710_v52  ;;  %v2874_v50 = vpack.c.bf16 %v2849_v60, %v2848_v16  ;;  %9455 = vmatmul.mubr.bf16.gmra.mrb[168].mxu0 %v6681_v62  ;;  %v12776_v15 = vsel %vm1997_vm2, %v17434_v11, %v1869_v29  ;;  %v1877_v44 = vmul.f32 0.1, %v17448_v7  ;;  %v2565_v16 = vpop.f32.mrb[85].mxu0  ;;  %2179 = vperm.xlu1 %9535, %v420_v46  }
 0x271   : > { %v1881_v58 = vmul.f32 0.1, %v17449_v10  ;;  %9458 = vmatprep.mubr.bf16.mxu0 %v6682_v59  ;;  %v12786_v25 = vsel %vm2001_vm4, %v17435_v35, %v1873_v42  ;;  %v1885_v23 = vmul.f32 0.1, %v17450_v41  ;;  %v1889_v62 = vmul.f32 0.1, %v12174_v21 }
 0x272   : > { %v1893_v11 = vmul.f32 0.1, %v17451_v40  ;;  %v6686_v53 = vpack.c.bf16 %v12786_v25, %v12776_v15  ;;  %v12796_v8 = vsel %vm2005_vm5, %v17437_v30, %v1877_v44  ;;  %9234 = vmatprep.mubr.msk.bf16.mxu1 %vm2923_vm10, %v2874_v50  ;;  %v1897_v57 = vmul.f32 0.1, %v12280_v56  ;;  %v9205_v6 = vpop.f32.mrb[86].mxu0 }
 0x273   : > { %v12801_v51 = vsel %vm2009_vm6, %v17438_v1, %v1881_v58  ;;  %v12810_v59 = vsel %vm2013_vm9, %v17439_v3, %v1885_v23  ;;  %v12815_v35 = vsel %vm2017_vm11, %v17440_v28, %v1889_v62  ;;  %9235 = vmatmul.mubr.msk.bf16.gmra.mrb[76].mxu1 %vm2923_vm10, %v2875_v43  ;;  %vm17452_vm0 = vcmp.gt.f32.partialorder %v17442_v14, 0.0  ;;  %v2568_v63 = vpop.f32.mrb[87].mxu0 }
 0x274   : > { %v6687_v21 = vpack.c.bf16 %v12801_v51, %v12796_v8  ;;  %v12821_v30 = vsel %vm2021_vm12, %v17441_v54, %v1893_v11  ;;  %v6688_v56 = vpack.c.bf16 %v12815_v35, %v12810_v59  ;;  %v12828_v1 = vsel %vm17452_vm0, %v17442_v14, %v1897_v57  ;;  %v419_v51 = vld [vmem:[%s12914_s15 + $0x8] sm:$0xff]  ;;  %v12935_v35 = vld [vmem:[%s16933_s5] ss:$0 sm:$0xff] }
 0x275   : > { %v1901_v3 = vmul.f32 0.1, %v12290_v24  ;;  %v1905_v28 = vmul.f32 0.1, %v12301_v49  ;;  %vm2037_vm1 = vcmp.gt.f32.partialorder %v17453_v27, 0.0  ;;  %vm2041_vm2 = vcmp.gt.f32.partialorder %v17454_v33, 0.0 }
 0x276   : > { %v6689_v54 = vpack.c.bf16 %v12828_v1, %v12821_v30  ;;  %v9937_v48 = vpop.eup %9936  ;;  %vm2822_vm3 = vcmp.gt.f32.partialorder %v12692_v38, 0.0  ;;  %v1909_v49 = vmul.f32 0.1, %v12380_v39  ;;  %v12849_v5 = vadd.f32 %v9204_v36, %v12195_v32 }
 0x277   : > { %v12840_v14 = vsel %vm2029_vm15, %v17444_v61, %v1901_v3  ;;  %v12845_v24 = vsel %vm2033_vm14, %v17445_v37, %v1905_v28  ;;  %v9939_v13 = vpop.eup %9938  ;;  %v8547_v26 = vadd.f32 -1.0, %v9937_v48  ;;  %v1913_v52 = vmul.f32 0.1, %v12395_v22 }
 0x278   : > { %v6690_v0 = vpack.c.bf16 %v12845_v24, %v12840_v14  ;;  %9459 = vmatmul.mubr.bf16.gmra.mrb[172].mxu0 %v6683_v17  ;;  %v8545_v37 = vadd.f32 -1.0, %v9939_v13  ;;  %vm2820_vm4 = vcmp.gt.f32.partialorder %v12695_v2, 0.0  ;;  %vm2823_vm5 = vcmp.gt.f32.partialorder %v12711_v31, 0.0  ;;  %v9208_v13 = vpop.f32.mrb[88].mxu0 }
 0x279   : > { %v9941_v61 = vpop.eup %9940  ;;  %v12860_v39 = vadd.f32 %v12195_v32, %v2565_v16  ;;  %9462 = vmatprep.mubr.bf16.mxu0 %v6684_v4  ;;  %v2790_v22 = vmul.f32 0.1, %v8547_v26  ;;  %vm2821_vm6 = vcmp.gt.f32.partialorder %v12714_v9, 0.0  ;;  %v2634_v34 = vmin.f32 %v12849_v5, 0.0  ;;  %v423_v26 = vld [vmem:[%s12914_s15 + $0x28] sm:$0xff]  ;;  %v2581_v16 = vpop.f32.mrb[89].mxu0 }
 0x27a   : > { %v9943_v45 = vpop.eup %9942  ;;  %v8548_v29 = vadd.f32 -1.0, %v9941_v61  ;;  %v2788_v17 = vmul.f32 0.1, %v8545_v37  ;;  %v12871_v12 = vsel %vm2037_vm1, %v17453_v27, %v1909_v49  ;;  %v12874_v19 = vadd.f32 %v9205_v6, %v12195_v32  ;;  %v421_v27 = vld [vmem:[%s12914_s15 + $0x18] sm:$0xff]  ;;  %v9209_v1 = vpop.f32.mrb[90].mxu0 }
 0x27b   : > { %v8546_v43 = vadd.f32 -1.0, %v9943_v45  ;;  %v2632_v60 = vmin.f32 %v12860_v39, 0.0  ;;  %v2666_v50 = vmul.f32 10.0, %v2634_v34  ;;  %v12879_v18 = vsel %vm2041_vm2, %v17454_v33, %v1913_v52  ;;  %2182 = vperm.xlu1 %9535, %v421_v27   ;;  %v2584_v45 = vpop.f32.mrb[91].mxu0 }
 0x27c   : > { %v2791_v42 = vmul.f32 0.1, %v8548_v29  ;;  %v2854_v4 = vsel %vm2822_vm3, %v12692_v38, %v2790_v22  ;;  %v12885_v10 = vadd.f32 %v12195_v32, %v2568_v63  ;;  %v2852_v58 = vsel %vm2820_vm4, %v12695_v2, %v2788_v17  ;;  %v425_v29 = vld [vmem:[%s12914_s15 + $0x38] sm:$0xff] }
 0x27d   : > { %v2789_v7 = vmul.f32 0.1, %v8546_v43  ;;  %v2664_v44 = vmul.f32 10.0, %v2632_v60  ;;  %v2720_v23 = vmul.f32 1.442695, %v2666_v50  ;;  %v2635_v62 = vmin.f32 %v12874_v19, 0.0 }
 0x27e   : > { %v2855_v41 = vsel %vm2823_vm5, %v12711_v31, %v2791_v42  ;;  %v2633_v32 = vmin.f32 %v12885_v10, 0.0  ;;  %v6691_v3 = vpack.c.bf16 %v12879_v18, %v12871_v12  ;;  %vm2826_vm7 = vcmp.gt.f32.partialorder %v12849_v5, 0.0  ;;  %v424_v50 = vld [vmem:[%s12914_s15 + $0x30] sm:$0xff] }
 0x27f   : > { %v2877_v40 = vpack.c.bf16 %v2855_v41, %v2854_v4  ;;  %v2853_v38 = vsel %vm2821_vm6, %v12714_v9, %v2789_v7  ;;  %v2716_v11 = vmul.f32 1.442695, %v2664_v44  ;;  %9944 = vpow2.f32 %v2720_v23  ;;  %2188 = vperm.xlu1 %9535, %v423_v26   ;;  %v426_v41 = vld [vmem:[%s12914_s15 + $0x40] sm:$0xff]  ;;  %v429_v23 = vld [vmem:[%s12914_s15 + $0x58] sm:$0xff] }
 0x280   : > { %v2876_v57 = vpack.c.bf16 %v2853_v38, %v2852_v58  ;;  %v2667_v2 = vmul.f32 10.0, %v2635_v62  ;;  %9463 = vmatmul.mubr.bf16.gmra.mrb[176].mxu0 %v6685_v20  ;;  %v2665_v31 = vmul.f32 10.0, %v2633_v32  ;;  %vm2824_vm8 = vcmp.gt.f32.partialorder %v12860_v39, 0.0 }
 0x281   : > { %9946 = vpow2.f32 %v2716_v11  ;;  %9466 = vmatprep.mubr.bf16.mxu0 %v6686_v53  ;;  %v418_v53 = vld [vmem:[%s12914_s15] sm:$0xff]  ;;  %vm2827_vm9 = vcmp.gt.f32.partialorder %v12874_v19, 0.0  ;;  %vm2825_vm11 = vcmp.gt.f32.partialorder %v12885_v10, 0.0  ;;  %v12946_v30 = vadd.f32 %v12935_v35, %v2581_v16 }
 0x282   : > { %v2722_v9 = vmul.f32 1.442695, %v2667_v2  ;;  %9238 = vmatprep.mubr.msk.bf16.mxu1 %vm2923_vm10, %v2876_v57  ;;  %v2718_v28 = vmul.f32 1.442695, %v2665_v31  ;;  %2173 = vperm.xlu0 %9534, %v418_v53   ;;  %v12952_v6 = vadd.f32 %v12935_v35, %v9209_v1  ;;  %v12963_v60 = vadd.f32 %v12935_v35, %v2584_v45  ;;  %v431_v57 = vld [vmem:[%s12914_s15 + $0x68] sm:$0xff]  ;;  %v430_v1 = vld [vmem:[%s12914_s15 + $0x60] sm:$0xff] }
 0x283   : > { %9239 = vmatmul.mubr.msk.bf16.gmra.mrb[80].mxu1 %vm2923_vm10, %v2877_v40  ;;  %v2636_v22 = vmin.f32 %v12946_v30, 0.0  ;;  %2194 = vperm.xlu1 %9535, %v425_v29   ;;  %v428_v40 = vld [vmem:[%s12914_s15 + $0x50] sm:$0xff]  ;;  %vm2828_vm13 = vcmp.gt.f32.partialorder %v12946_v30, 0.0 }
 0x284   : > { %9948 = vpow2.f32 %v2722_v9  ;;  %v2639_v17 = vmin.f32 %v12952_v6, 0.0  ;;  %v2637_v4 = vmin.f32 %v12963_v60, 0.0  ;;  %vm2831_vm14 = vcmp.gt.f32.partialorder %v12952_v6, 0.0  ;;  %v432_v29 = vld [vmem:[%s12914_s15 + $0x70] sm:$0xff] }
 0x285   : > { %9950 = vpow2.f32 %v2718_v28  ;;  %v2668_v43 = vmul.f32 10.0, %v2636_v22  ;;  %vm2829_vm15 = vcmp.gt.f32.partialorder %v12963_v60, 0.0 }
 0x286   : > { %2176 = vperm.xlu0 %9534, %v419_v51   ;;  %v2669_v44 = vmul.f32 10.0, %v2637_v4  ;;  %v12999_v51 = vld [vmem:[%s16933_s5 + $0x1] ss:$0 sm:$0xff] }
 0x288   : > { %9467 = vmatmul.mubr.bf16.gmra.mrb[180].mxu0 %v6687_v21  ;;  %v2726_v58 = vmul.f32 1.442695, %v2669_v44 }
 0x289   : > { %v9945_v55 = vpop.eup %9944  ;;  %9470 = vmatprep.mubr.bf16.mxu0 %v6688_v56  ;;  %v12938_v56 = vadd.f32 %v12935_v35, %v9208_v13  ;;  %v9212_v62 = vpop.f32.mrb[92].mxu0 }
 0x28a   : > { %v8551_v15 = vadd.f32 -1.0, %v9945_v55  ;;  %v12977_v12 = vadd.f32 %v12935_v35, %v9212_v62  ;;  %v2597_v18 = vpop.f32.mrb[93].mxu0 }
 0x28b   : > { %v9947_v20 = vpop.eup %9946  ;;  %v2638_v37 = vmin.f32 %v12938_v56, 0.0  ;;  %v12980_v11 = vadd.f32 %v12935_v35, %v2597_v18  ;;  %v9213_v32 = vpop.f32.mrb[94].mxu0  ;;  %vm2830_vm12 = vcmp.gt.f32.partialorder %v12938_v56, 0.0 }
 0x28c   : > { %v8549_v25 = vadd.f32 -1.0, %v9947_v20  ;;  %v2794_v36 = vmul.f32 0.1, %v8551_v15  ;;  %v12986_v9 = vadd.f32 %v12935_v35, %v9213_v32  ;;  %v2600_v28 = vpop.f32.mrb[95].mxu0  ;;  %vm2834_vm0 = vcmp.gt.f32.partialorder %v12977_v12, 0.0 }
 0x28d   : > { %v2670_v63 = vmul.f32 10.0, %v2638_v37  ;;  %v2640_v20 = vmin.f32 %v12980_v11, 0.0  ;;  %v12991_v15 = vadd.f32 %v12935_v35, %v2600_v28  ;;  %vm2832_vm1 = vcmp.gt.f32.partialorder %v12980_v11, 0.0 }
 0x28e   : > { %v9949_v33 = vpop.eup %9948  ;;  %v2792_v21 = vmul.f32 0.1, %v8549_v25  ;;  %vm2835_vm2 = vcmp.gt.f32.partialorder %v12986_v9, 0.0 }
 0x28f   : > { %v9951_v48 = vpop.eup %9950  ;;  %v8552_v8 = vadd.f32 -1.0, %v9949_v33  ;;  %v2728_v42 = vmul.f32 1.442695, %v2670_v63  ;;  %v2643_v33 = vmin.f32 %v12986_v9, 0.0  ;;  %vm2833_vm3 = vcmp.gt.f32.partialorder %v12991_v15, 0.0 }
 0x290   : > { %v8550_v49 = vadd.f32 -1.0, %v9951_v48  ;;  %9471 = vmatmul.mubr.bf16.gmra.mrb[184].mxu0 %v6689_v54  ;;  %v2858_v54 = vsel %vm2826_vm7, %v12849_v5, %v2794_v36  ;;  %v2856_v14 = vsel %vm2824_vm8, %v12860_v39, %v2792_v21  ;;  %v422_v5 = vld [vmem:[%s12914_s15 + $0x20] sm:$0xff]  ;;  %v2671_v39 = vmul.f32 10.0, %v2639_v17  ;;  %v435_v17 = vld [vmem:[%s12914_s15 + $0x88] sm:$0xff] }
 0x291   : > { %v2795_v59 = vmul.f32 0.1, %v8552_v8  ;;  %9474 = vmatprep.mubr.bf16.mxu0 %v6690_v0  ;;  %2185 = vperm.xlu0 %9534, %v422_v5   ;;  %9952 = vpow2.f32 %v2728_v42  ;;  %v2672_v36 = vmul.f32 10.0, %v2640_v20  ;;  %v2641_v8 = vmin.f32 %v12991_v15, 0.0  ;;  %v437_v20 = vld [vmem:[%s12914_s15 + $0x98] sm:$0xff] }
 0x292   : > { %v2793_v52 = vmul.f32 0.1, %v8550_v49  ;;  %v2730_v7 = vmul.f32 1.442695, %v2671_v39  ;;  %v2675_v26 = vmul.f32 10.0, %v2643_v33  ;;  %v436_v33 = vld [vmem:[%s12914_s15 + $0x90] sm:$0xff] }
 0x293   : > { %v2859_v61 = vsel %vm2827_vm9, %v12874_v19, %v2795_v59  ;;  %v2724_v19 = vmul.f32 1.442695, %v2668_v43  ;;  %v2732_v35 = vmul.f32 1.442695, %v2672_v36  ;;  %v2673_v16 = vmul.f32 10.0, %v2641_v8 }
 0x294   : > { %v2879_v24 = vpack.c.bf16 %v2859_v61, %v2858_v54  ;;  %v2857_v0 = vsel %vm2825_vm11, %v12885_v10, %v2793_v52  ;;  %v427_v10 = vld [vmem:[%s12914_s15 + $0x48] sm:$0xff]  ;;  %v9272_v52 = vpop.f32.mrb[96].mxu0  ;;  %v2738_v37 = vmul.f32 1.442695, %v2675_v26 }
 0x295   : > { %v2878_v34 = vpack.c.bf16 %v2857_v0, %v2856_v14  ;;  %9954 = vpow2.f32 %v2724_v19  ;;  %2191 = vperm.xlu0 %9534, %v424_v50   ;;  %2200 = vperm.xlu1 %9535, %v427_v10   ;;  %v3751_v45 = vpop.f32.mrb[97].mxu0  ;;  %v433_v14 = vld [vmem:[%s12914_s15 + $0x78] sm:$0xff]  ;;  %v2734_v22 = vmul.f32 1.442695, %v2673_v16 }
 0x296   : > { %9956 = vpow2.f32 %v2730_v7  ;;  %v9273_v5 = vpop.f32.mrb[98].mxu0 }
 0x297   : > { %9242 = vmatprep.mubr.msk.bf16.mxu1 %vm2923_vm10, %v2878_v34  ;;  %9958 = vpow2.f32 %v2726_v58  ;;  %v13010_v34 = vadd.f32 %v9272_v52, %v12999_v51  ;;  %v3754_v63 = vpop.f32.mrb[99].mxu0 }
 0x298   : > { %9243 = vmatmul.mubr.msk.bf16.gmra.mrb[84].mxu1 %vm2923_vm10, %v2879_v24  ;;  %9475 = vmatmul.mubr.bf16.gmra.mrb[188].mxu0 %v6691_v3  ;;  %v2642_v3 = vmin.f32 %v12977_v12, 0.0  ;;  %v13026_v39 = vadd.f32 %v12999_v51, %v3754_v63 }
 0x299   : > { %2197 = vperm.xlu0 %9534, %v426_v41   ;;  %2206 = vperm.xlu1 %9535, %v429_v23   ;;  %v3880_v19 = vmin.f32 %v13010_v34, 0.0  ;;  %vm4072_vm4 = vcmp.gt.f32.partialorder %v13010_v34, 0.0 }
 0x29a   : > { %v2674_v27 = vmul.f32 10.0, %v2642_v3  ;;  %v3879_v44 = vmin.f32 %v13026_v39, 0.0  ;;  %vm4071_vm7 = vcmp.gt.f32.partialorder %v13026_v39, 0.0 }
 0x29b   : > { %v9953_v38 = vpop.eup %9952 }
 0x29c   : > { %v8555_v31 = vadd.f32 -1.0, %v9953_v38  ;;  %v2736_v13 = vmul.f32 1.442695, %v2674_v27  ;;  %v3911_v58 = vmul.f32 10.0, %v3879_v44  ;;  %v9276_v41 = vpop.f32.mrb[100].mxu0 }
 0x29d   : > { %2203 = vperm.xlu0 %9534, %v428_v40   ;;  %2212 = vperm.xlu1 %9535, %v431_v57   ;;  %v13035_v40 = vadd.f32 %v9276_v41, %v12999_v51  ;;  %v3767_v18 = vpop.f32.mrb[101].mxu0 }
 0x29e   : > { %v2798_v25 = vmul.f32 0.1, %v8555_v31  ;;  %9960 = vpow2.f32 %v2736_v13  ;;  %v3944_v32 = vmul.f32 1.442695, %v3911_v58  ;;  %v13038_v57 = vadd.f32 %v12999_v51, %v3767_v18  ;;  %v434_v31 = vld [vmem:[%s12914_s15 + $0x80] sm:$0xff] }
 0x29f   : > { %v9955_v2 = vpop.eup %9954  ;;  %9962 = vpow2.f32 %v2732_v35  ;;  %v3884_v28 = vmin.f32 %v13035_v40, 0.0  ;;  %v439_v35 = vld [vmem:[%s12914_s15 + $0xa8] sm:$0xff]  ;;  %vm4076_vm8 = vcmp.gt.f32.partialorder %v13035_v40, 0.0 }
 0x2a0   : > { %v9957_v46 = vpop.eup %9956  ;;  %v8553_v55 = vadd.f32 -1.0, %v9955_v2  ;;  %v2862_v54 = vsel %vm2830_vm12, %v12938_v56, %v2798_v25  ;;  %9964 = vpow2.f32 %v2738_v37  ;;  %v13013_v56 = vadd.f32 %v12999_v51, %v3751_v45  ;;  %v9277_v2 = vpop.f32.mrb[102].mxu0 }
 0x2a1   : > { %v8556_v53 = vadd.f32 -1.0, %v9957_v46  ;;  %v9959_v21 = vpop.eup %9958  ;;  %2209 = vperm.xlu0 %9534, %v430_v1   ;;  %2218 = vperm.xlu1 %9535, %v433_v14   ;;  %9966 = vpow2.f32 %v2734_v22  ;;  %v13044_v46 = vadd.f32 %v9277_v2, %v12999_v51  ;;  %v3882_v27 = vmin.f32 %v13038_v57, 0.0  ;;  %v443_v2 = vld [vmem:[%s12914_s15 + $0xc8] sm:$0xff] }
 0x2a2   : > { %v2796_v48 = vmul.f32 0.1, %v8553_v55  ;;  %v8554_v59 = vadd.f32 -1.0, %v9959_v21  ;;  %v3878_v4 = vmin.f32 %v13013_v56, 0.0  ;;  %v3770_v55 = vpop.f32.mrb[103].mxu0  ;;  %v3916_v8 = vmul.f32 10.0, %v3884_v28 }
 0x2a3   : > { %v2799_v49 = vmul.f32 0.1, %v8556_v53  ;;  %v3885_v21 = vmin.f32 %v13044_v46, 0.0  ;;  %vm4070_vm5 = vcmp.gt.f32.partialorder %v13013_v56, 0.0  ;;  %vm4077_vm9 = vcmp.gt.f32.partialorder %v13044_v46, 0.0 }
 0x2a4   : > { %v2797_v0 = vmul.f32 0.1, %v8554_v59  ;;  %v2860_v43 = vsel %vm2828_vm13, %v12946_v30, %v2796_v48  ;;  %v3912_v30 = vmul.f32 10.0, %v3880_v19  ;;  %v3910_v10 = vmul.f32 10.0, %v3878_v4 }
 0x2a5   : > { %v2863_v61 = vsel %vm2831_vm14, %v12952_v6, %v2799_v49  ;;  %v13016_v6 = vadd.f32 %v9273_v5, %v12999_v51  ;;  %2215 = vperm.xlu0 %9534, %v432_v29   ;;  %2224 = vperm.xlu1 %9535, %v435_v17   ;;  %v3914_v59 = vmul.f32 10.0, %v3882_v27  ;;  %v3954_v1 = vmul.f32 1.442695, %v3916_v8 }
 0x2a6   : > { %v2881_v24 = vpack.c.bf16 %v2863_v61, %v2862_v54  ;;  %v2861_v42 = vsel %vm2829_vm15, %v12963_v60, %v2797_v0  ;;  %v3946_v23 = vmul.f32 1.442695, %v3912_v30  ;;  %v3942_v62 = vmul.f32 1.442695, %v3910_v10  ;;  %v440_v10 = vld [vmem:[%s12914_s15 + $0xb0] sm:$0xff] }
 0x2a7   : > { %v2880_v50 = vpack.c.bf16 %v2861_v42, %v2860_v43  ;;  %v3881_v7 = vmin.f32 %v13016_v6, 0.0  ;;  %v3917_v54 = vmul.f32 10.0, %v3885_v21  ;;  %v3950_v37 = vmul.f32 1.442695, %v3914_v59  ;;  %v9280_v29 = vpop.f32.mrb[104].mxu0  ;;  %v438_v42 = vld [vmem:[%s12914_s15 + $0xa0] sm:$0xff] }
 0x2a8   : > { %v9961_v3 = vpop.eup %9960  ;;  %9968 = vpow2.f32 %v3946_v23  ;;  %v13062_v5 = vadd.f32 %v12999_v51, %v3770_v55  ;;  %v3783_v43 = vpop.f32.mrb[105].mxu0  ;;  %vm4073_vm6 = vcmp.gt.f32.partialorder %v13016_v6, 0.0  ;;  %v445_v59 = vld [vmem:[%s12914_s15 + $0xd8] sm:$0xff]  ;;  %vm4074_vm11 = vcmp.gt.f32.partialorder %v13038_v57, 0.0 }
 0x2a9   : > { %9246 = vmatprep.mubr.msk.bf16.mxu1 %vm2923_vm10, %v2880_v50  ;;  %v3913_v60 = vmul.f32 10.0, %v3881_v7  ;;  %2221 = vperm.xlu0 %9534, %v434_v31   ;;  %v9963_v25 = vpop.eup %9962  ;;  %v8559_v53 = vadd.f32 -1.0, %v9961_v3  ;;  %9970 = vpow2.f32 %v3942_v62  ;;  %v441_v50 = vld [vmem:[%s12914_s15 + $0xb8] sm:$0xff]  ;;  %v9281_v4 = vpop.f32.mrb[106].mxu0 }
 0x2aa   : > { %9247 = vmatmul.mubr.msk.bf16.gmra.mrb[88].mxu1 %vm2923_vm10, %v2881_v24  ;;  %2230 = vperm.xlu1 %9535, %v437_v20   ;;  %v9965_v48 = vpop.eup %9964  ;;  %v8557_v36 = vadd.f32 -1.0, %v9963_v25  ;;  %v3956_v24 = vmul.f32 1.442695, %v3917_v54  ;;  %v13077_v44 = vadd.f32 %v9281_v4, %v12999_v51  ;;  %v3786_v30 = vpop.f32.mrb[107].mxu0  ;;  %v447_v4 = vld [vmem:[%s12914_s15 + $0xe8] sm:$0xff]  ;;  %vm4075_vm12 = vcmp.gt.f32.partialorder %v13062_v5, 0.0 }
 0x2ab   : > { %v3948_v38 = vmul.f32 1.442695, %v3913_v60  ;;  %v9967_v49 = vpop.eup %9966  ;;  %v2802_v13 = vmul.f32 0.1, %v8559_v53  ;;  %v8560_v26 = vadd.f32 -1.0, %v9965_v48 }
 0x2ac   : > { %v2800_v16 = vmul.f32 0.1, %v8557_v36  ;;  %v8558_v52 = vadd.f32 -1.0, %v9967_v49  ;;  %vm4081_vm14 = vcmp.gt.f32.partialorder %v13077_v44, 0.0 }
 0x2ad   : > { %9972 = vpow2.f32 %v3948_v38  ;;  %2227 = vperm.xlu0 %9534, %v436_v33   ;;  %v2803_v61 = vmul.f32 0.1, %v8560_v26  ;;  %v2866_v45 = vsel %vm2834_vm0, %v12977_v12, %v2802_v13  ;;  %v13066_v12 = vadd.f32 %v9280_v29, %v12999_v51  ;;  %v442_v26 = vld [vmem:[%s12914_s15 + $0xc0] sm:$0xff] }
 0x2ae   : > { %9974 = vpow2.f32 %v3944_v32  ;;  %2236 = vperm.xlu1 %9535, %v439_v35   ;;  %v2801_v14 = vmul.f32 0.1, %v8558_v52  ;;  %v2864_v0 = vsel %vm2832_vm1, %v12980_v11, %v2800_v16  ;;  %v3883_v11 = vmin.f32 %v13062_v5, 0.0 }
 0x2af   : > { %9976 = vpow2.f32 %v3954_v1  ;;  %v2867_v22 = vsel %vm2835_vm2, %v12986_v9, %v2803_v61  ;;  %v13072_v9 = vadd.f32 %v12999_v51, %v3783_v43  ;;  %v3889_v32 = vmin.f32 %v13077_v44, 0.0 }
 0x2b0   : > { %9978 = vpow2.f32 %v3950_v37  ;;  %v2883_v63 = vpack.c.bf16 %v2867_v22, %v2866_v45  ;;  %v2865_v17 = vsel %vm2833_vm3, %v12991_v15, %v2801_v14  ;;  %v3888_v15 = vmin.f32 %v13066_v12, 0.0  ;;  %v444_v14 = vld [vmem:[%s12914_s15 + $0xd0] sm:$0xff] }
 0x2b1   : > { %9980 = vpow2.f32 %v3956_v24  ;;  %v2882_v19 = vpack.c.bf16 %v2865_v17, %v2864_v0  ;;  %2233 = vperm.xlu0 %9534, %v438_v42   ;;  %v3915_v41 = vmul.f32 10.0, %v3883_v11  ;;  %v3886_v23 = vmin.f32 %v13072_v9, 0.0  ;;  %v9284_v54 = vpop.f32.mrb[108].mxu0 }
 0x2b2   : > { %2242 = vperm.xlu1 %9535, %v441_v50   ;;  %v9969_v7 = vpop.eup %9968  ;;  %v3920_v38 = vmul.f32 10.0, %v3888_v15  ;;  %v3921_v33 = vmul.f32 10.0, %v3889_v32  ;;  %v13097_v1 = vadd.f32 %v12999_v51, %v3786_v30  ;;  %v13108_v17 = vadd.f32 %v9284_v54, %v12999_v51 }
 0x2b3   : > { %v9971_v60 = vpop.eup %9970  ;;  %v8644_v58 = vadd.f32 -1.0, %v9969_v7  ;;  %9250 = vmatprep.mubr.msk.bf16.mxu1 %vm2923_vm10, %v2882_v19  ;;  %v3952_v55 = vmul.f32 1.442695, %v3915_v41  ;;  %v3918_v20 = vmul.f32 10.0, %v3886_v23  ;;  %vm4080_vm13 = vcmp.gt.f32.partialorder %v13066_v12, 0.0 }
 0x2b4   : > { %v8642_v18 = vadd.f32 -1.0, %v9971_v60  ;;  %9251 = vmatmul.mubr.msk.bf16.gmra.mrb[92].mxu1 %vm2923_vm10, %v2883_v63  ;;  %v3962_v27 = vmul.f32 1.442695, %v3920_v38  ;;  %v3964_v13 = vmul.f32 1.442695, %v3921_v33  ;;  %v3887_v29 = vmin.f32 %v13097_v1, 0.0 }
 0x2b5   : > { %v4040_v3 = vmul.f32 0.1, %v8644_v58  ;;  %2239 = vperm.xlu0 %9534, %v440_v10   ;;  %9982 = vpow2.f32 %v3952_v55  ;;  %v3958_v36 = vmul.f32 1.442695, %v3918_v20  ;;  %v3892_v7 = vmin.f32 %v13108_v17, 0.0  ;;  %v9643_v55 = vld [vmem:[%s16934_s6 + $0x58] sm:$0xff]  }
 0x2b6   : > { %2248 = vperm.xlu1 %9535, %v443_v2   ;;  %v4038_v25 = vmul.f32 0.1, %v8642_v18  ;;  %9984 = vpow2.f32 %v3962_v27  ;;  %v3919_v19 = vmul.f32 10.0, %v3887_v29  ;;  %vm4078_vm15 = vcmp.gt.f32.partialorder %v13072_v9, 0.0 }
 0x2b7   : > { %v9973_v62 = vpop.eup %9972  ;;  %v4104_v21 = vsel %vm4072_vm4, %v13010_v34, %v4040_v3  ;;  %9986 = vpow2.f32 %v3958_v36  ;;  %v3924_v23 = vmul.f32 10.0, %v3892_v7  ;;  %vm4079_vm0 = vcmp.gt.f32.partialorder %v13097_v1, 0.0 }
 0x2b8   : > { %v9975_v31 = vpop.eup %9974  ;;  %v8645_v28 = vadd.f32 -1.0, %v9973_v62  ;;  %v4102_v61 = vsel %vm4070_vm5, %v13013_v56, %v4038_v25  ;;  %9988 = vpow2.f32 %v3964_v13  ;;  %v3960_v60 = vmul.f32 1.442695, %v3919_v19  ;;  %v449_v13 = vld [vmem:[%s12914_s15 + $0xf8] sm:$0xff] }
 0x2b9   : > { %v8643_v53 = vadd.f32 -1.0, %v9975_v31  ;;  %v9977_v8 = vpop.eup %9976  ;;  %2245 = vperm.xlu0 %9534, %v442_v26   ;;  %v3970_v31 = vmul.f32 1.442695, %v3924_v23  ;;  %vm4084_vm1 = vcmp.gt.f32.partialorder %v13108_v17, 0.0 }
 0x2ba   : > { %v4041_v48 = vmul.f32 0.1, %v8645_v28  ;;  %v9979_v35 = vpop.eup %9978  ;;  %v8648_v52 = vadd.f32 -1.0, %v9977_v8  ;;  %2254 = vperm.xlu1 %9535, %v445_v59   ;;  %9990 = vpow2.f32 %v3960_v60 }
 0x2bb   : > { %v4039_v49 = vmul.f32 0.1, %v8643_v53  ;;  %v9981_v34 = vpop.eup %9980  ;;  %v8646_v42 = vadd.f32 -1.0, %v9979_v35  ;;  %9992 = vpow2.f32 %v3970_v31 }
 0x2bc   : > { %v4105_v16 = vsel %vm4073_vm6, %v13016_v6, %v4041_v48  ;;  %v3799_v6 = vpop.f32.mrb[109].mxu0  ;;  %v4044_v0 = vmul.f32 0.1, %v8648_v52  ;;  %v8649_v22 = vadd.f32 -1.0, %v9981_v34 }
 0x2bd   : > { %v4135_v37 = vpack.c.bf16 %v4105_v16, %v4104_v21  ;;  %v4103_v45 = vsel %vm4071_vm7, %v13026_v39, %v4039_v49  ;;  %v9285_v63 = vpop.f32.mrb[110].mxu0  ;;  %v13111_v56 = vadd.f32 %v12999_v51, %v3799_v6  ;;  %v9641_v39 = vld [vmem:[%s16934_s6 + $0x48] sm:$0xff]   ;;  %2251 = vperm.xlu0 %9534, %v444_v14   ;;  %v446_v49 = vld [vmem:[%s12914_s15 + $0xe0] sm:$0xff] }
 0x2be   : > { %v4134_v24 = vpack.c.bf16 %v4103_v45, %v4102_v61  ;;  %v3802_v43 = vpop.f32.mrb[111].mxu0  ;;  %v4045_v50 = vmul.f32 0.1, %v8649_v22  ;;  %v13117_v11 = vadd.f32 %v9285_v63, %v12999_v51  ;;  %2260 = vperm.xlu1 %9535, %v447_v4   ;;  %v13127_v30 = vsel %vm4076_vm8, %v13035_v40, %v4044_v0  ;;  %v9642_v40 = vld [vmem:[%s16934_s6 + $0x50] sm:$0xff]  }
 0x2bf   : > { %v3890_v15 = vmin.f32 %v13111_v56, 0.0  ;;  %v9983_v18 = vpop.eup %9982  ;;  %v13141_v32 = vadd.f32 %v12999_v51, %v3802_v43  ;;  %v9288_v28 = vpop.f32.mrb[112].mxu0  ;;  %v448_v61 = vld [vmem:[%s12914_s15 + $0xf0] sm:$0xff]  ;;  %vm4082_vm2 = vcmp.gt.f32.partialorder %v13111_v56, 0.0 }
 0x2c0   : > { %9310 = vmatprep.mubr.msk.bf16.mxu1 %vm2923_vm10, %v4134_v24  ;;  %v13130_v10 = vsel %vm4077_vm9, %v13044_v46, %v4045_v50  ;;  %v3893_v58 = vmin.f32 %v13117_v11, 0.0  ;;  %v4042_v46 = vmul.f32 0.1, %v8646_v42  ;;  %v8647_v2 = vadd.f32 -1.0, %v9983_v18  ;;  %v3815_v33 = vpop.f32.mrb[113].mxu0 }
 0x2c1   : > { %9311 = vmatmul.mubr.msk.bf16.vlgmr.msra.gmra.mrb[96].mxu1 %vm2923_vm10, %v4135_v37  ;;  %v4137_v41 = vpack.c.bf16 %v13130_v10, %v13127_v30  ;;  %v3922_v62 = vmul.f32 10.0, %v3890_v15  ;;  %v3891_v27 = vmin.f32 %v13141_v32, 0.0  ;;  %v13150_v8 = vadd.f32 %v9288_v28, %v12999_v51  ;;  %v9289_v21 = vpop.f32.mrb[114].mxu0  ;;  %2257 = vperm.xlu0 %9534, %v446_v49  }
 0x2c2   : > { %9391 = vmatpush3.bf16.msra.mxu1 %v12700_v47  ;;  %v3925_v38 = vmul.f32 10.0, %v3893_v58  ;;  %v9985_v47 = vpop.eup %9984  ;;  %v4043_v36 = vmul.f32 0.1, %v8647_v2  ;;  %v3818_v16 = vpop.f32.mrb[115].mxu0  ;;  %2266 = vperm.xlu1 %9535, %v449_v13   ;;  %v4106_v52 = vsel %vm4074_vm11, %v13038_v57, %v4042_v46  ;;  %v13169_v0 = vadd.f32 %v12999_v51, %v3815_v33 }
 0x2c3   : > { %9392 = vmatprep.subr.bf16.mxu1 %v9641_v39  ;;  %v3966_v3 = vmul.f32 1.442695, %v3922_v62  ;;  %v9987_v20 = vpop.eup %9986  ;;  %v8652_v25 = vadd.f32 -1.0, %v9985_v47  ;;  %v3923_v35 = vmul.f32 10.0, %v3891_v27  ;;  %v3896_v34 = vmin.f32 %v13150_v8, 0.0 }
 0x2c4   : > { %v3972_v53 = vmul.f32 1.442695, %v3925_v38  ;;  %v9989_v48 = vpop.eup %9988  ;;  %v4107_v54 = vsel %vm4075_vm12, %v13062_v5, %v4043_v36  ;;  %v8650_v57 = vadd.f32 -1.0, %v9987_v20  ;;  %v13174_v5 = vld [vmem:[%s16934_s6 + $0x60] sm:$0xff]   ;;  %v13178_v29 = vadd.f32 %v9289_v21, %v12999_v51 }
 0x2c5   : > { %v4048_v26 = vmul.f32 0.1, %v8652_v25  ;;  %v8653_v59 = vadd.f32 -1.0, %v9989_v48  ;;  %9994 = vpow2.f32 %v3966_v3  ;;  %v4136_v37 = vpack.c.bf16 %v4107_v54, %v4106_v52  ;;  %2263 = vperm.xlu0 %9534, %v448_v61  }
 0x2c6   : > { %9393 = vmatpush3.bf16.msra.mxu1 %v9641_v39  ;;  %9996 = vpow2.f32 %v3972_v53  ;;  %v3968_v6 = vmul.f32 1.442695, %v3923_v35  ;;  %v3928_v24 = vmul.f32 10.0, %v3896_v34  ;;  %v3894_v39 = vmin.f32 %v13169_v0, 0.0 }
 0x2c7   : > { %9394 = vmatprep.subr.bf16.mxu1 %v9642_v40  ;;  %v4049_v45 = vmul.f32 0.1, %v8653_v59  ;;  %v13166_v14 = vsel %vm4080_vm13, %v13066_v12, %v4048_v26  ;;  %v13181_v12 = vadd.f32 %v12999_v51, %v3818_v16  ;;  %9314 = vmatprep.mubr.msk.bf16.mxu1 %vm2923_vm10, %v4136_v37  ;;  %v3897_v42 = vmin.f32 %v13178_v29, 0.0  ;;  %v9292_v15 = vpop.f32.mrb[116].mxu0 }
 0x2c8   : > { %9998 = vpow2.f32 %v3968_v6  ;;  %v3978_v43 = vmul.f32 1.442695, %v3928_v24  ;;  %v4046_v19 = vmul.f32 0.1, %v8650_v57  ;;  %v3926_v7 = vmul.f32 10.0, %v3894_v39  ;;  %v3831_v58 = vpop.f32.mrb[117].mxu0 }
 0x2c9   : > { %v4113_v22 = vsel %vm4081_vm14, %v13077_v44, %v4049_v45  ;;  %9315 = vmatmul.mubr.msk.bf16.gmra.mrb[100].mxu1 %vm2923_vm10, %v4137_v41  ;;  %v9991_v44 = vpop.eup %9990  ;;  %v3895_v50 = vmin.f32 %v13181_v12, 0.0  ;;  %v3929_v30 = vmul.f32 10.0, %v3897_v42  ;;  %v13196_v60 = vadd.f32 %v9292_v15, %v12999_v51  ;;  %v9293_v18 = vpop.f32.mrb[118].mxu0 }
 0x2ca   : > { %9395 = vmatpush3.bf16.msra.mxu1 %v9642_v40  ;;  %v4139_v63 = vpack.c.bf16 %v4113_v22, %v13166_v14  ;;  %v8651_v4 = vadd.f32 -1.0, %v9991_v44  ;;  %10000 = vpow2.f32 %v3978_v43  ;;  %v9993_v41 = vpop.eup %9992  ;;  %v3974_v62 = vmul.f32 1.442695, %v3926_v7  ;;  %v3834_v25 = vpop.f32.mrb[119].mxu0 }
 0x2cb   : > { %9396 = vmatprep.subr.bf16.mxu1 %v9643_v55  ;;  %v3927_v10 = vmul.f32 10.0, %v3895_v50  ;;  %v13200_v40 = vadd.f32 %v12999_v51, %v3831_v58  ;;  %v8656_v38 = vadd.f32 -1.0, %v9993_v41  ;;  %v3980_v47 = vmul.f32 1.442695, %v3929_v30 }
 0x2cc   : > { %v4047_v23 = vmul.f32 0.1, %v8651_v4  ;;  %v3900_v31 = vmin.f32 %v13196_v60, 0.0  ;;  %v4110_v28 = vsel %vm4078_vm15, %v13072_v9, %v4046_v19  ;;  %10002 = vpow2.f32 %v3974_v62 }
 0x2cd   : > { %v3976_v2 = vmul.f32 1.442695, %v3927_v10  ;;  %v4052_v27 = vmul.f32 0.1, %v8656_v38  ;;  %10004 = vpow2.f32 %v3980_v47  ;;  %v3898_v36 = vmin.f32 %v13200_v40, 0.0 }
 0x2ce   : > { %9397 = vmatpush3.bf16.msra.mxu1 %v9643_v55  ;;  %v4111_v55 = vsel %vm4079_vm0, %v13097_v1, %v4047_v23  ;;  %v3932_v48 = vmul.f32 10.0, %v3900_v31  ;;  %vm4085_vm3 = vcmp.gt.f32.partialorder %v13117_v11, 0.0  ;;  %v13213_v1 = vadd.f32 %v9293_v18, %v12999_v51 }
 0x2cf   : > { %9478 = vmatprep.subr.bf16.mxu1 %v13174_v5  ;;  %v9995_v46 = vpop.eup %9994  ;;  %v4138_v53 = vpack.c.bf16 %v4111_v55, %v4110_v28  ;;  %10006 = vpow2.f32 %v3976_v2  ;;  %vm4083_vm4 = vcmp.gt.f32.partialorder %v13141_v32, 0.0  ;;  %v3930_v59 = vmul.f32 10.0, %v3898_v36 }
 0x2d0   : > { %v9997_v3 = vpop.eup %9996  ;;  %v8654_v20 = vadd.f32 -1.0, %v9995_v46  ;;  %v3986_v26 = vmul.f32 1.442695, %v3932_v48  ;;  %v9296_v35 = vpop.f32.mrb[120].mxu0  ;;  %v4116_v16 = vsel %vm4084_vm1, %v13108_v17, %v4052_v27  ;;  %v3901_v54 = vmin.f32 %v13213_v1, 0.0 }
 0x2d1   : > { %v8657_v33 = vadd.f32 -1.0, %v9997_v3  ;;  %9318 = vmatprep.mubr.msk.bf16.mxu1 %vm2923_vm10, %v4138_v53  ;;  %v13224_v34 = vadd.f32 %v12999_v51, %v3834_v25  ;;  %v3847_v61 = vpop.f32.mrb[121].mxu0  ;;  %v3982_v14 = vmul.f32 1.442695, %v3930_v59  ;;  %v13234_v39 = vadd.f32 %v9296_v35, %v12999_v51 }
 0x2d2   : > { %v9999_v21 = vpop.eup %9998  ;;  %v4050_v49 = vmul.f32 0.1, %v8654_v20  ;;  %9319 = vmatmul.mubr.msk.bf16.gmra.mrb[104].mxu1 %vm2923_vm10, %v4139_v63  ;;  %10008 = vpow2.f32 %v3986_v26  ;;  %v9297_v57 = vpop.f32.mrb[122].mxu0  ;;  %v3933_v17 = vmul.f32 10.0, %v3901_v54  ;;  %v13237_v44 = vadd.f32 %v12999_v51, %v3847_v61 }
 0x2d3   : > { %v4053_v9 = vmul.f32 0.1, %v8657_v33  ;;  %v8655_v13 = vadd.f32 -1.0, %v9999_v21  ;;  %v3850_v63 = vpop.f32.mrb[123].mxu0  ;;  %10010 = vpow2.f32 %v3982_v14  ;;  %vm4088_vm5 = vcmp.gt.f32.partialorder %v13150_v8, 0.0 }
 0x2d4   : > { %v10001_v37 = vpop.eup %10000  ;;  %v4114_v24 = vsel %vm4082_vm2, %v13111_v56, %v4050_v49  ;;  %v3988_v56 = vmul.f32 1.442695, %v3933_v17  ;;  %vm4086_vm6 = vcmp.gt.f32.partialorder %v13169_v0, 0.0  ;;  %vm4089_vm7 = vcmp.gt.f32.partialorder %v13178_v29, 0.0 }
 0x2d5   : > { %v4117_v52 = vsel %vm4085_vm3, %v13117_v11, %v4053_v9  ;;  %v4051_v6 = vmul.f32 0.1, %v8655_v13  ;;  %v8660_v22 = vadd.f32 -1.0, %v10001_v37  ;;  %v3899_v11 = vmin.f32 %v13224_v34, 0.0 }
 0x2d6   : > { %v4141_v45 = vpack.c.bf16 %v4117_v52, %v4116_v16  ;;  %v10003_v19 = vpop.eup %10002  ;;  %v3904_v4 = vmin.f32 %v13234_v39, 0.0  ;;  %10012 = vpow2.f32 %v3988_v56  ;;  %v13246_v18 = vadd.f32 %v9297_v57, %v12999_v51 }
 0x2d7   : > { %v4115_v43 = vsel %vm4083_vm4, %v13141_v32, %v4051_v6  ;;  %v3931_v50 = vmul.f32 10.0, %v3899_v11  ;;  %v3902_v32 = vmin.f32 %v13237_v44, 0.0  ;;  %v10005_v7 = vpop.eup %10004  ;;  %v4056_v15 = vmul.f32 0.1, %v8660_v22  ;;  %v13286_v11 = vld [vmem:[%s16933_s5 + $0x2] ss:$0 sm:$0xff] }
 0x2d8   : > { %v4140_v42 = vpack.c.bf16 %v4115_v43, %v4114_v24  ;;  %v8658_v30 = vadd.f32 -1.0, %v10003_v19  ;;  %v8661_v41 = vadd.f32 -1.0, %v10005_v7  ;;  %v3936_v23 = vmul.f32 10.0, %v3904_v4 }
 0x2d9   : > { %v3984_v10 = vmul.f32 1.442695, %v3931_v50  ;;  %v10007_v58 = vpop.eup %10006  ;;  %v3934_v62 = vmul.f32 10.0, %v3902_v32  ;;  %v13250_v47 = vadd.f32 %v12999_v51, %v3850_v63  ;;  %v4120_v28 = vsel %vm4088_vm5, %v13150_v8, %v4056_v15 }
 0x2da   : > { %9322 = vmatprep.mubr.msk.bf16.mxu1 %vm2923_vm10, %v4140_v42  ;;  %v4054_v46 = vmul.f32 0.1, %v8658_v30  ;;  %v8659_v38 = vadd.f32 -1.0, %v10007_v58  ;;  %v4057_v2 = vmul.f32 0.1, %v8661_v41  ;;  %vm4087_vm8 = vcmp.gt.f32.partialorder %v13181_v12, 0.0 }
 0x2db   : > { %9323 = vmatmul.mubr.msk.bf16.gmra.mrb[108].mxu1 %vm2923_vm10, %v4141_v45  ;;  %10014 = vpow2.f32 %v3984_v10  ;;  %v3994_v31 = vmul.f32 1.442695, %v3936_v23  ;;  %v3990_v3 = vmul.f32 1.442695, %v3934_v62  ;;  %v3905_v20 = vmin.f32 %v13246_v18, 0.0  ;;  %v9300_v25 = vpop.f32.mrb[124].mxu0 }
 0x2dc   : > { %v4055_v55 = vmul.f32 0.1, %v8659_v38  ;;  %v10009_v53 = vpop.eup %10008  ;;  %v4118_v27 = vsel %vm4086_vm6, %v13169_v0, %v4054_v46  ;;  %v4121_v33 = vsel %vm4089_vm7, %v13178_v29, %v4057_v2  ;;  %v3903_v48 = vmin.f32 %v13250_v47, 0.0  ;;  %v3863_v36 = vpop.f32.mrb[125].mxu0 }
 0x2dd   : > { %10016 = vpow2.f32 %v3994_v31  ;;  %v4143_v8 = vpack.c.bf16 %v4121_v33, %v4120_v28  ;;  %v8664_v49 = vadd.f32 -1.0, %v10009_v53  ;;  %v9301_v9 = vpop.f32.mrb[126].mxu0  ;;  %v10011_v13 = vpop.eup %10010  ;;  %v3937_v59 = vmul.f32 10.0, %v3905_v20 }
 0x2de   : > { %v4119_v21 = vsel %vm4087_vm8, %v13181_v12, %v4055_v55  ;;  %10018 = vpow2.f32 %v3990_v3  ;;  %v3935_v35 = vmul.f32 10.0, %v3903_v48  ;;  %v13266_v0 = vadd.f32 %v9300_v25, %v12999_v51  ;;  %v3866_v16 = vpop.f32.mrb[127].mxu0 }
 0x2df   : > { %v4142_v26 = vpack.c.bf16 %v4119_v21, %v4118_v27  ;;  %v4060_v52 = vmul.f32 0.1, %v8664_v49  ;;  %v8662_v29 = vadd.f32 -1.0, %v10011_v13  ;;  %v13269_v54 = vadd.f32 %v12999_v51, %v3863_v36 }
 0x2e0   : > { %v13272_v61 = vadd.f32 %v9301_v9, %v12999_v51  ;;  %vm4092_vm9 = vcmp.gt.f32.partialorder %v13196_v60, 0.0  ;;  %v3996_v12 = vmul.f32 1.442695, %v3937_v59  ;;  %v3992_v37 = vmul.f32 1.442695, %v3935_v35  ;;  %v10013_v6 = vpop.eup %10012 }
 0x2e1   : > { %v3908_v45 = vmin.f32 %v13266_v0, 0.0  ;;  %9326 = vmatprep.mubr.msk.bf16.mxu1 %vm2923_vm10, %v4142_v26  ;;  %vm4090_vm11 = vcmp.gt.f32.partialorder %v13200_v40, 0.0  ;;  %vm4093_vm12 = vcmp.gt.f32.partialorder %v13213_v1, 0.0  ;;  %vm4091_vm13 = vcmp.gt.f32.partialorder %v13224_v34, 0.0 }
 0x2e2   : > { %v3906_v14 = vmin.f32 %v13269_v54, 0.0  ;;  %v8665_v57 = vadd.f32 -1.0, %v10013_v6  ;;  %10020 = vpow2.f32 %v3996_v12  ;;  %v3909_v22 = vmin.f32 %v13272_v61, 0.0 }
 0x2e3   : > { %9327 = vmatmul.mubr.msk.bf16.gmra.mrb[112].mxu1 %vm2923_vm10, %v4143_v8  ;;  %v3940_v24 = vmul.f32 10.0, %v3908_v45  ;;  %v4124_v43 = vsel %vm4092_vm9, %v13196_v60, %v4060_v52  ;;  %v4058_v42 = vmul.f32 0.1, %v8662_v29  ;;  %10022 = vpow2.f32 %v3992_v37 }
 0x2e4   : > { %v3938_v56 = vmul.f32 10.0, %v3906_v14  ;;  %v4061_v19 = vmul.f32 0.1, %v8665_v57  ;;  %v3941_v7 = vmul.f32 10.0, %v3909_v22  ;;  %v13292_v30 = vadd.f32 %v12999_v51, %v3866_v16 }
 0x2e5   : > { %v10015_v63 = vpop.eup %10014  ;;  %v4002_v32 = vmul.f32 1.442695, %v3940_v24  ;;  %v4122_v28 = vsel %vm4090_vm11, %v13200_v40, %v4058_v42  ;;  %vm4096_vm14 = vcmp.gt.f32.partialorder %v13234_v39, 0.0  ;;  %vm4094_vm15 = vcmp.gt.f32.partialorder %v13237_v44, 0.0 }
 0x2e6   : > { %v8663_v4 = vadd.f32 -1.0, %v10015_v63  ;;  %v3998_v15 = vmul.f32 1.442695, %v3938_v56  ;;  %v4125_v23 = vsel %vm4093_vm12, %v13213_v1, %v4061_v19  ;;  %v4004_v46 = vmul.f32 1.442695, %v3941_v7 }
 0x2e7   : > { %v9360_v17 = vpop.f32.mrb[128].mxu0  ;;  %v10017_v60 = vpop.eup %10016  ;;  %10024 = vpow2.f32 %v4002_v32  ;;  %v4145_v31 = vpack.c.bf16 %v4125_v23, %v4124_v43  ;;  %v3907_v3 = vmin.f32 %v13292_v30, 0.0  ;;  %vm4097_vm0 = vcmp.gt.f32.partialorder %v13246_v18, 0.0 }
 0x2e8   : > { %v5275_v50 = vpop.f32.mrb[129].mxu0  ;;  %v13295_v10 = vadd.f32 %v9360_v17, %v13286_v11  ;;  %v4059_v62 = vmul.f32 0.1, %v8663_v4  ;;  %v10019_v2 = vpop.eup %10018  ;;  %v8668_v51 = vadd.f32 -1.0, %v10017_v60  ;;  %10026 = vpow2.f32 %v3998_v15 }
 0x2e9   : > { %v13298_v58 = vadd.f32 %v13286_v11, %v5275_v50  ;;  %v9361_v41 = vpop.f32.mrb[130].mxu0  ;;  %v8666_v20 = vadd.f32 -1.0, %v10019_v2  ;;  %10028 = vpow2.f32 %v4004_v46  ;;  %v3939_v25 = vmul.f32 10.0, %v3907_v3 }
 0x2ea   : > { %v5278_v38 = vpop.f32.mrb[131].mxu0  ;;  %v4123_v55 = vsel %vm4091_vm13, %v13224_v34, %v4059_v62  ;;  %v5404_v53 = vmin.f32 %v13295_v10, 0.0  ;;  %v4064_v27 = vmul.f32 0.1, %v8668_v51  ;;  %v13315_v8 = vadd.f32 %v9361_v41, %v13286_v11 }
 0x2eb   : > { %v4144_v1 = vpack.c.bf16 %v4123_v55, %v4122_v28  ;;  %v5402_v33 = vmin.f32 %v13298_v58, 0.0  ;;  %v4062_v48 = vmul.f32 0.1, %v8666_v20  ;;  %v4000_v36 = vmul.f32 1.442695, %v3939_v25 }
 0x2ec   : > { %v5436_v40 = vmul.f32 10.0, %v5404_v53  ;;  %v10021_v34 = vpop.eup %10020  ;;  %vm4095_vm1 = vcmp.gt.f32.partialorder %v13250_v47, 0.0  ;;  %v13321_v49 = vadd.f32 %v13286_v11, %v5278_v38  ;;  %v5405_v35 = vmin.f32 %v13315_v8, 0.0 }
 0x2ed   : > { %9330 = vmatprep.mubr.msk.bf16.mxu1 %vm2923_vm10, %v4144_v1  ;;  %v5434_v21 = vmul.f32 10.0, %v5402_v33  ;;  %v10023_v13 = vpop.eup %10022  ;;  %v8669_v26 = vadd.f32 -1.0, %v10021_v34  ;;  %10030 = vpow2.f32 %v4000_v36  ;;  %v4128_v52 = vsel %vm4096_vm14, %v13234_v39, %v4064_v27 }
 0x2ee   : > { %9331 = vmatmul.mubr.msk.bf16.gmra.mrb[116].mxu1 %vm2923_vm10, %v4145_v31  ;;  %v5470_v59 = vmul.f32 1.442695, %v5436_v40  ;;  %v8667_v29 = vadd.f32 -1.0, %v10023_v13  ;;  %v5403_v37 = vmin.f32 %v13321_v49, 0.0  ;;  %v4126_v6 = vsel %vm4094_vm15, %v13237_v44, %v4062_v48 }
 0x2ef   : > { %v5466_v12 = vmul.f32 1.442695, %v5434_v21  ;;  %v4065_v14 = vmul.f32 0.1, %v8669_v26  ;;  %v5437_v57 = vmul.f32 10.0, %v5405_v35  ;;  %vm4100_vm2 = vcmp.gt.f32.partialorder %v13266_v0, 0.0 }
 0x2f0   : > { %10032 = vpow2.f32 %v5470_v59  ;;  %v4063_v17 = vmul.f32 0.1, %v8667_v29  ;;  %v5435_v63 = vmul.f32 10.0, %v5403_v37  ;;  %vm4098_vm3 = vcmp.gt.f32.partialorder %v13269_v54, 0.0 }
 0x2f1   : > { %v9364_v9 = vpop.f32.mrb[132].mxu0  ;;  %v10025_v22 = vpop.eup %10024  ;;  %10034 = vpow2.f32 %v5466_v12  ;;  %v4129_v42 = vsel %vm4097_vm0, %v13246_v18, %v4065_v14  ;;  %v5472_v50 = vmul.f32 1.442695, %v5437_v57  ;;  %vm4101_vm4 = vcmp.gt.f32.partialorder %v13272_v61, 0.0 }
 0x2f2   : > { %v5291_v16 = vpop.f32.mrb[133].mxu0  ;;  %v13333_v43 = vadd.f32 %v9364_v9, %v13286_v11  ;;  %v10027_v39 = vpop.eup %10026  ;;  %v8672_v56 = vadd.f32 -1.0, %v10025_v22  ;;  %v4147_v4 = vpack.c.bf16 %v4129_v42, %v4128_v52  ;;  %v4127_v32 = vsel %vm4095_vm1, %v13250_v47, %v4063_v17 }
 0x2f3   : > { %v9365_v45 = vpop.f32.mrb[134].mxu0  ;;  %v13339_v44 = vadd.f32 %v13286_v11, %v5291_v16  ;;  %v10029_v19 = vpop.eup %10028  ;;  %v8670_v7 = vadd.f32 -1.0, %v10027_v39  ;;  %v5468_v15 = vmul.f32 1.442695, %v5435_v63  ;;  %v4146_v41 = vpack.c.bf16 %v4127_v32, %v4126_v6 }
 0x2f4   : > { %v5294_v24 = vpop.f32.mrb[135].mxu0  ;;  %v4068_v60 = vmul.f32 0.1, %v8672_v56  ;;  %v8673_v23 = vadd.f32 -1.0, %v10029_v19  ;;  %10036 = vpow2.f32 %v5472_v50  ;;  %v5408_v18 = vmin.f32 %v13333_v43, 0.0 }
 0x2f5   : > { %10038 = vpow2.f32 %v5468_v15  ;;  %vm4099_vm5 = vcmp.gt.f32.partialorder %v13292_v30, 0.0  ;;  %v5406_v47 = vmin.f32 %v13339_v44, 0.0  ;;  %9334 = vmatprep.mubr.msk.bf16.mxu1 %vm2923_vm10, %v4146_v41  ;;  %v4066_v2 = vmul.f32 0.1, %v8670_v7 }
 0x2f6   : > { %v4069_v46 = vmul.f32 0.1, %v8673_v23  ;;  %v5440_v31 = vmul.f32 10.0, %v5408_v18  ;;  %v13352_v51 = vadd.f32 %v9365_v45, %v13286_v11  ;;  %v13355_v3 = vadd.f32 %v13286_v11, %v5294_v24  ;;  %9335 = vmatmul.mubr.msk.bf16.gmra.mrb[120].mxu1 %vm2923_vm10, %v4147_v4 }
 0x2f7   : > { %v10031_v55 = vpop.eup %10030  ;;  %v4132_v20 = vsel %vm4100_vm2, %v13266_v0, %v4068_v60  ;;  %v5438_v25 = vmul.f32 10.0, %v5406_v47  ;;  %vm5596_vm6 = vcmp.gt.f32.partialorder %v13295_v10, 0.0  ;;  %v4130_v29 = vsel %vm4098_vm3, %v13269_v54, %v4066_v2 }
 0x2f8   : > { %v4133_v1 = vsel %vm4101_vm4, %v13272_v61, %v4069_v46  ;;  %v8671_v48 = vadd.f32 -1.0, %v10031_v55  ;;  %v5478_v36 = vmul.f32 1.442695, %v5440_v31  ;;  %v5409_v40 = vmin.f32 %v13352_v51, 0.0 }
 0x2f9   : > { %v9368_v62 = vpop.f32.mrb[136].mxu0  ;;  %v4149_v33 = vpack.c.bf16 %v4133_v1, %v4132_v20  ;;  %v5474_v21 = vmul.f32 1.442695, %v5438_v25  ;;  %v5407_v9 = vmin.f32 %v13355_v3, 0.0  ;;  %vm5594_vm7 = vcmp.gt.f32.partialorder %v13298_v58, 0.0 }
 0x2fa   : > { %v5307_v38 = vpop.f32.mrb[137].mxu0  ;;  %v13363_v53 = vadd.f32 %v9368_v62, %v13286_v11  ;;  %v10033_v34 = vpop.eup %10032  ;;  %v4067_v13 = vmul.f32 0.1, %v8671_v48  ;;  %10040 = vpow2.f32 %v5478_v36  ;;  %v5441_v59 = vmul.f32 10.0, %v5409_v40 }
 0x2fb   : > { %v9369_v28 = vpop.f32.mrb[138].mxu0  ;;  %v13369_v0 = vadd.f32 %v13286_v11, %v5307_v38  ;;  %v10035_v61 = vpop.eup %10034  ;;  %v8768_v26 = vadd.f32 -1.0, %v10033_v34  ;;  %10042 = vpow2.f32 %v5474_v21  ;;  %v5439_v16 = vmul.f32 10.0, %v5407_v9  ;;  %v9645_v21 = vld [vmem:[%s16934_s6 + $0x68] sm:$0xff]  }
 0x2fc   : > { %v5310_v27 = vpop.f32.mrb[139].mxu0  ;;  %v8766_v35 = vadd.f32 -1.0, %v10035_v61  ;;  %v5412_v52 = vmin.f32 %v13363_v53, 0.0  ;;  %v4131_v12 = vsel %vm4099_vm5, %v13292_v30, %v4067_v13  ;;  %v5480_v37 = vmul.f32 1.442695, %v5441_v59 }
 0x2fd   : > { %v4148_v14 = vpack.c.bf16 %v4131_v12, %v4130_v29  ;;  %vm5597_vm8 = vcmp.gt.f32.partialorder %v13315_v8, 0.0  ;;  %v5476_v57 = vmul.f32 1.442695, %v5439_v16  ;;  %v5564_v63 = vmul.f32 0.1, %v8768_v26 }
 0x2fe   : > { %v10037_v6 = vpop.eup %10036  ;;  %v5444_v24 = vmul.f32 10.0, %v5412_v52  ;;  %10044 = vpow2.f32 %v5480_v37  ;;  %v5410_v54 = vmin.f32 %v13369_v0, 0.0  ;;  %v5562_v56 = vmul.f32 0.1, %v8766_v35 }
 0x2ff   : > { %v10039_v17 = vpop.eup %10038  ;;  %v8769_v39 = vadd.f32 -1.0, %v10037_v6  ;;  %10046 = vpow2.f32 %v5476_v57  ;;  %9338 = vmatprep.mubr.msk.bf16.mxu1 %vm2923_vm10, %v4148_v14  ;;  %vm5595_vm9 = vcmp.gt.f32.partialorder %v13321_v49, 0.0  ;;  %v13386_v7 = vadd.f32 %v9369_v28, %v13286_v11  ;;  %v9646_v14 = vld [vmem:[%s16934_s6 + $0x70] sm:$0xff]  }
 0x300   : > { %v8767_v30 = vadd.f32 -1.0, %v10039_v17  ;;  %v5486_v50 = vmul.f32 1.442695, %v5444_v24  ;;  %v5442_v32 = vmul.f32 10.0, %v5410_v54  ;;  %9339 = vmatmul.mubr.msk.bf16.gmra.mrb[124].mxu1 %vm2923_vm10, %v4149_v33  ;;  %v13390_v41 = vadd.f32 %v13286_v11, %v5310_v27 }
 0x301   : > { %v9372_v45 = vpop.f32.mrb[140].mxu0  ;;  %v5565_v4 = vmul.f32 0.1, %v8769_v39  ;;  %v5628_v23 = vsel %vm5596_vm6, %v13295_v10, %v5564_v63  ;;  %v5413_v46 = vmin.f32 %v13386_v7, 0.0  ;;  %v5626_v47 = vsel %vm5594_vm7, %v13298_v58, %v5562_v56 }
 0x302   : > { %v5323_v22 = vpop.f32.mrb[141].mxu0  ;;  %v5563_v15 = vmul.f32 0.1, %v8767_v30  ;;  %10048 = vpow2.f32 %v5486_v50  ;;  %v13393_v60 = vadd.f32 %v9372_v45, %v13286_v11  ;;  %v5482_v62 = vmul.f32 1.442695, %v5442_v32 }
 0x303   : > { %v9373_v42 = vpop.f32.mrb[142].mxu0  ;;  %v5629_v18 = vsel %vm5597_vm8, %v13315_v8, %v5565_v4  ;;  %v5411_v31 = vmin.f32 %v13390_v41, 0.0  ;;  %v5445_v10 = vmul.f32 10.0, %v5413_v46  ;;  %v13409_v33 = vadd.f32 %v13286_v11, %v5323_v22 }
 0x304   : > { %v13382_v19 = vpop.f32.mrb[143].mxu0  ;;  %v5659_v38 = vpack.c.bf16 %v5629_v18, %v5628_v23  ;;  %v5627_v2 = vsel %vm5595_vm9, %v13321_v49, %v5563_v15  ;;  %v10041_v28 = vpop.eup %10040  ;;  %10050 = vpow2.f32 %v5482_v62  ;;  %v5416_v20 = vmin.f32 %v13393_v60, 0.0 }
 0x305   : > { %v5658_v55 = vpack.c.bf16 %v5627_v2, %v5626_v47  ;;  %v10043_v8 = vpop.eup %10042  ;;  %v8772_v25 = vadd.f32 -1.0, %v10041_v28  ;;  %v5443_v27 = vmul.f32 10.0, %v5411_v31  ;;  %v5488_v36 = vmul.f32 1.442695, %v5445_v10 }
 0x306   : > { %v8770_v58 = vadd.f32 -1.0, %v10043_v8  ;;  %v5448_v49 = vmul.f32 10.0, %v5416_v20  ;;  %v13414_v40 = vadd.f32 %v9373_v42, %v13286_v11  ;;  %vm5600_vm11 = vcmp.gt.f32.partialorder %v13333_v43, 0.0 }
 0x307   : > { %9398 = vmatprep.mubr.msk.bf16.mxu1 %vm2923_vm10, %v5658_v55  ;;  %vm5598_vm12 = vcmp.gt.f32.partialorder %v13339_v44, 0.0  ;;  %v5484_v9 = vmul.f32 1.442695, %v5443_v27  ;;  %v5414_v61 = vmin.f32 %v13409_v33, 0.0  ;;  %v5568_v26 = vmul.f32 0.1, %v8772_v25 }
 0x308   : > { %v10045_v13 = vpop.eup %10044  ;;  %10052 = vpow2.f32 %v5488_v36  ;;  %v5494_v59 = vmul.f32 1.442695, %v5448_v49  ;;  %v5417_v35 = vmin.f32 %v13414_v40, 0.0  ;;  %9399 = vmatmul.mubr.msk.bf16.vlgmr.msra.gmra.mrb[128].mxu1 %vm2923_vm10, %v5659_v38  ;;  %vm5601_vm13 = vcmp.gt.f32.partialorder %v13352_v51, 0.0 }
 0x309   : > { %v9376_v1 = vpop.f32.mrb[144].mxu0  ;;  %v10047_v52 = vpop.eup %10046  ;;  %v8773_v29 = vadd.f32 -1.0, %v10045_v13  ;;  %10054 = vpow2.f32 %v5484_v9  ;;  %v5446_v12 = vmul.f32 10.0, %v5414_v61  ;;  %9479 = vmatpush3.bf16.msra.mxu1 %v13174_v5  ;;  %v5566_v37 = vmul.f32 0.1, %v8770_v58 }
 0x30a   : > { %v13411_v48 = vpop.f32.mrb[145].mxu0  ;;  %v8771_v45 = vadd.f32 -1.0, %v10047_v52  ;;  %10056 = vpow2.f32 %v5494_v59  ;;  %v5449_v6 = vmul.f32 10.0, %v5417_v35  ;;  %9480 = vmatprep.subr.bf16.mxu1 %v9645_v21  ;;  %vm5599_vm14 = vcmp.gt.f32.partialorder %v13355_v3, 0.0 }
 0x30b   : > { %v9377_v34 = vpop.f32.mrb[146].mxu0  ;;  %v5569_v24 = vmul.f32 0.1, %v8773_v29  ;;  %v5490_v22 = vmul.f32 1.442695, %v5446_v12  ;;  %v13433_v17 = vadd.f32 %v13286_v11, %v13382_v19  ;;  %v5632_v5 = vsel %vm5600_vm11, %v13333_v43, %v5568_v26 }
 0x30c   : > { %v5342_v16 = vpop.f32.mrb[147].mxu0  ;;  %v10049_v57 = vpop.eup %10048  ;;  %v5567_v63 = vmul.f32 0.1, %v8771_v45  ;;  %v5496_v39 = vmul.f32 1.442695, %v5449_v6  ;;  %v13439_v54 = vadd.f32 %v9376_v1, %v13286_v11  ;;  %v5630_v43 = vsel %vm5598_vm12, %v13339_v44, %v5566_v37 }
 0x30d   : > { %v5633_v56 = vsel %vm5601_vm13, %v13352_v51, %v5569_v24  ;;  %v8776_v30 = vadd.f32 -1.0, %v10049_v57  ;;  %10058 = vpow2.f32 %v5490_v22  ;;  %v5415_v50 = vmin.f32 %v13433_v17, 0.0  ;;  %9481 = vmatpush3.bf16.msra.mxu1 %v9645_v21  ;;  %v9647_v51 = vld [vmem:[%s16934_s6 + $0x78] sm:$0xff]  }
 0x30e   : > { %v10051_v4 = vpop.eup %10050  ;;  %v5661_v32 = vpack.c.bf16 %v5633_v56, %v5632_v5  ;;  %v5631_v15 = vsel %vm5599_vm14, %v13355_v3, %v5567_v63  ;;  %10060 = vpow2.f32 %v5496_v39  ;;  %9482 = vmatprep.subr.bf16.mxu1 %v9646_v14  ;;  %v5420_v47 = vmin.f32 %v13439_v54, 0.0 }
 0x30f   : > { %v5660_v18 = vpack.c.bf16 %v5631_v15, %v5630_v43  ;;  %v8774_v62 = vadd.f32 -1.0, %v10051_v4  ;;  %v5447_v46 = vmul.f32 10.0, %v5415_v50  ;;  %vm5604_vm15 = vcmp.gt.f32.partialorder %v13363_v53, 0.0 }
 0x310   : > { %vm5602_vm0 = vcmp.gt.f32.partialorder %v13369_v0, 0.0  ;;  %v13465_v3 = vadd.f32 %v13286_v11, %v13411_v48  ;;  %v13468_v2 = vadd.f32 %v9377_v34, %v13286_v11  ;;  %v5572_v28 = vmul.f32 0.1, %v8776_v30 }
 0x311   : > { %v9380_v42 = vpop.f32.mrb[148].mxu0  ;;  %v5492_v55 = vmul.f32 1.442695, %v5447_v46  ;;  %v5452_v10 = vmul.f32 10.0, %v5420_v47  ;;  %v13473_v20 = vadd.f32 %v13286_v11, %v5342_v16  ;;  %9402 = vmatprep.mubr.msk.bf16.mxu1 %vm2923_vm10, %v5660_v18  ;;  %9483 = vmatpush3.bf16.msra.mxu1 %v9646_v14  ;;  %vm5605_vm1 = vcmp.gt.f32.partialorder %v13386_v7, 0.0 }
 0x312   : > { %v5355_v19 = vpop.f32.mrb[149].mxu0  ;;  %v10053_v8 = vpop.eup %10052  ;;  %vm5603_vm2 = vcmp.gt.f32.partialorder %v13390_v41, 0.0  ;;  %v5418_v25 = vmin.f32 %v13465_v3, 0.0  ;;  %v5421_v27 = vmin.f32 %v13468_v2, 0.0  ;;  %9403 = vmatmul.mubr.msk.bf16.gmra.mrb[132].mxu1 %vm2923_vm10, %v5661_v32  ;;  %9484 = vmatprep.subr.bf16.mxu1 %v9647_v51  ;;  %v5570_v36 = vmul.f32 0.1, %v8774_v62 }
 0x313   : > { %v13451_v23 = vpop.f32.mrb[150].mxu0  ;;  %v10055_v58 = vpop.eup %10054  ;;  %v8777_v49 = vadd.f32 -1.0, %v10053_v8  ;;  %10062 = vpow2.f32 %v5492_v55  ;;  %v5502_v34 = vmul.f32 1.442695, %v5452_v10  ;;  %v5419_v26 = vmin.f32 %v13473_v20, 0.0 }
 0x314   : > { %v13457_v38 = vpop.f32.mrb[151].mxu0  ;;  %v10057_v21 = vpop.eup %10056  ;;  %v8775_v9 = vadd.f32 -1.0, %v10055_v58  ;;  %v5450_v61 = vmul.f32 10.0, %v5418_v25  ;;  %v5453_v13 = vmul.f32 10.0, %v5421_v27  ;;  %v5636_v35 = vsel %vm5604_vm15, %v13363_v53, %v5572_v28 }
 0x315   : > { %v5573_v16 = vmul.f32 0.1, %v8777_v49  ;;  %v8780_v52 = vadd.f32 -1.0, %v10057_v21  ;;  %10064 = vpow2.f32 %v5502_v34  ;;  %9485 = vmatpush3.bf16.msra.mxu1 %v9647_v51  ;;  %v13492_v6 = vadd.f32 %v9380_v42, %v13286_v11 }
 0x316   : > { %v5571_v12 = vmul.f32 0.1, %v8775_v9  ;;  %v5498_v37 = vmul.f32 1.442695, %v5450_v61  ;;  %v5504_v45 = vmul.f32 1.442695, %v5453_v13  ;;  %v5634_v57 = vsel %vm5602_vm0, %v13369_v0, %v5570_v36 }
 0x317   : > { %v10059_v14 = vpop.eup %10058  ;;  %v5637_v53 = vsel %vm5605_vm1, %v13386_v7, %v5573_v16  ;;  %v5451_v24 = vmul.f32 10.0, %v5419_v26  ;;  %v13501_v22 = vadd.f32 %v13286_v11, %v5355_v19  ;;  %v5576_v56 = vmul.f32 0.1, %v8780_v52 }
 0x318   : > { %v13459_v44 = vpop.f32.mrb[64].mxu1  ;;  %v10061_v63 = vpop.eup %10060  ;;  %v5663_v39 = vpack.c.bf16 %v5637_v53, %v5636_v35  ;;  %v5635_v42 = vsel %vm5603_vm2, %v13390_v41, %v5571_v12  ;;  %10066 = vpow2.f32 %v5498_v37  ;;  %v8778_v50 = vadd.f32 -1.0, %v10059_v14 }
 0x319   : > { %v13470_v31 = vpop.f32.mrb[65].mxu1  ;;  %v9384_v59 = vpop.f32.mrb[152].mxu0  ;;  %v5662_v0 = vpack.c.bf16 %v5635_v42, %v5634_v57  ;;  %v8781_v4 = vadd.f32 -1.0, %v10061_v63  ;;  %10068 = vpow2.f32 %v5504_v45  ;;  %vm5608_vm3 = vcmp.gt.f32.partialorder %v13393_v60, 0.0 }
 0x31a   : > { %v13476_v1 = vpop.f32.mrb[66].mxu1  ;;  %v13489_v29 = vpop.f32.mrb[153].mxu0  ;;  %vm5606_vm4 = vcmp.gt.f32.partialorder %v13409_v33, 0.0  ;;  %v5500_v7 = vmul.f32 1.442695, %v5451_v24  ;;  %v5424_v19 = vmin.f32 %v13492_v6, 0.0  ;;  %v13517_v32 = vadd.f32 %v13451_v23, %v13286_v11 }
 0x31b   : > { %v13483_v48 = vpop.f32.mrb[67].mxu1  ;;  %v13503_v5 = vpop.f32.mrb[154].mxu0  ;;  %v5577_v43 = vmul.f32 0.1, %v8781_v4  ;;  %vm5609_vm5 = vcmp.gt.f32.partialorder %v13414_v40, 0.0  ;;  %v5422_v41 = vmin.f32 %v13501_v22, 0.0  ;;  %9406 = vmatprep.mubr.msk.bf16.mxu1 %vm2923_vm10, %v5662_v0  ;;  %v5640_v15 = vsel %vm5608_vm3, %v13393_v60, %v5576_v56 }
 0x31c   : > { %v13508_v30 = vpop.f32.mrb[155].mxu0  ;;  %10070 = vpow2.f32 %v5500_v7  ;;  %v5456_v51 = vmul.f32 10.0, %v5424_v19  ;;  %v13523_v18 = vadd.f32 %v13286_v11, %v13457_v38  ;;  %9407 = vmatmul.mubr.msk.bf16.gmra.mrb[136].mxu1 %vm2923_vm10, %v5663_v39  ;;  %v5574_v28 = vmul.f32 0.1, %v8778_v50 }
 0x31d   : > { %v10063_v47 = vpop.eup %10062  ;;  %v5641_v23 = vsel %vm5609_vm5, %v13414_v40, %v5577_v43  ;;  %v5454_v55 = vmul.f32 10.0, %v5422_v41  ;;  %v5425_v10 = vmin.f32 %v13517_v32, 0.0  ;;  %vm5607_vm6 = vcmp.gt.f32.partialorder %v13433_v17, 0.0 }
 0x31e   : > { %v5665_v25 = vpack.c.bf16 %v5641_v23, %v5640_v15  ;;  %v8779_v27 = vadd.f32 -1.0, %v10063_v47  ;;  %v5510_v38 = vmul.f32 1.442695, %v5456_v51  ;;  %v5423_v58 = vmin.f32 %v13523_v18, 0.0 }
 0x31f   : > { %v10065_v34 = vpop.eup %10064  ;;  %v5506_v40 = vmul.f32 1.442695, %v5454_v55  ;;  %v5457_v21 = vmul.f32 10.0, %v5425_v10  ;;  %v13541_v9 = vadd.f32 %v9384_v59, %v13286_v11  ;;  %vm5612_vm7 = vcmp.gt.f32.partialorder %v13439_v54, 0.0 }
 0x320   : > { %v5575_v26 = vmul.f32 0.1, %v8779_v27  ;;  %v8784_v35 = vadd.f32 -1.0, %v10065_v34  ;;  %10072 = vpow2.f32 %v5510_v38  ;;  %v5455_v16 = vmul.f32 10.0, %v5423_v58 }
 0x321   : > { %v9388_v62 = vpop.f32.mrb[156].mxu0  ;;  %10074 = vpow2.f32 %v5506_v40  ;;  %v5512_v52 = vmul.f32 1.442695, %v5457_v21  ;;  %v5428_v12 = vmin.f32 %v13541_v9, 0.0  ;;  %v5638_v59 = vsel %vm5606_vm4, %v13409_v33, %v5574_v28 }
 0x322   : > { %v13530_v8 = vpop.f32.mrb[157].mxu0  ;;  %v10067_v37 = vpop.eup %10066  ;;  %v5639_v45 = vsel %vm5607_vm6, %v13433_v17, %v5575_v26  ;;  %v5508_v14 = vmul.f32 1.442695, %v5455_v16  ;;  %v13557_v57 = vadd.f32 %v13286_v11, %v13489_v29  ;;  %v5580_v42 = vmul.f32 0.1, %v8784_v35 }
 0x323   : > { %v13535_v36 = vpop.f32.mrb[158].mxu0  ;;  %v10069_v53 = vpop.eup %10068  ;;  %v5664_v24 = vpack.c.bf16 %v5639_v45, %v5638_v59  ;;  %v8782_v63 = vadd.f32 -1.0, %v10067_v37  ;;  %10076 = vpow2.f32 %v5512_v52  ;;  %v5460_v39 = vmul.f32 10.0, %v5428_v12 }
 0x324   : > { %v13543_v61 = vpop.f32.mrb[159].mxu0  ;;  %v8785_v56 = vadd.f32 -1.0, %v10069_v53  ;;  %10078 = vpow2.f32 %v5508_v14  ;;  %v5426_v0 = vmin.f32 %v13557_v57, 0.0  ;;  %vm5610_vm8 = vcmp.gt.f32.partialorder %v13465_v3, 0.0 }
 0x325   : > { %v5578_v50 = vmul.f32 0.1, %v8782_v63  ;;  %v5518_v17 = vmul.f32 1.442695, %v5460_v39  ;;  %v13565_v29 = vadd.f32 %v13503_v5, %v13286_v11  ;;  %9410 = vmatprep.mubr.msk.bf16.mxu1 %vm2923_vm10, %v5664_v24  ;;  %v13572_v41 = vadd.f32 %v13286_v11, %v13508_v30 }
 0x326   : > { %v10071_v7 = vpop.eup %10070  ;;  %v5581_v19 = vmul.f32 0.1, %v8785_v56  ;;  %v5458_v43 = vmul.f32 10.0, %v5426_v0  ;;  %9411 = vmatmul.mubr.msk.bf16.gmra.mrb[140].mxu1 %vm2923_vm10, %v5665_v25  ;;  %v13576_v15 = vadd.f32 %v9388_v62, %v13286_v11  ;;  %vm5613_vm9 = vcmp.gt.f32.partialorder %v13468_v2, 0.0 }
 0x327   : > { %v13526_v46 = vpop.f32.mrb[68].mxu1  ;;  %v8783_v5 = vadd.f32 -1.0, %v10071_v7  ;;  %10080 = vpow2.f32 %v5518_v17  ;;  %v5429_v47 = vmin.f32 %v13565_v29, 0.0  ;;  %v5644_v30 = vsel %vm5612_vm7, %v13439_v54, %v5580_v42 }
 0x328   : > { %v13532_v60 = vpop.f32.mrb[69].mxu1  ;;  %v5645_v23 = vsel %vm5613_vm9, %v13468_v2, %v5581_v19  ;;  %v5514_v55 = vmul.f32 1.442695, %v5458_v43  ;;  %v5427_v62 = vmin.f32 %v13572_v41, 0.0  ;;  %vm5611_vm11 = vcmp.gt.f32.partialorder %v13473_v20, 0.0 }
 0x329   : > { %v13537_v49 = vpop.f32.mrb[70].mxu1  ;;  %v5667_v10 = vpack.c.bf16 %v5645_v23, %v5644_v30  ;;  %v5579_v25 = vmul.f32 0.1, %v8783_v5  ;;  %v5461_v27 = vmul.f32 10.0, %v5429_v47  ;;  %v5642_v58 = vsel %vm5610_vm8, %v13465_v3, %v5578_v50  ;;  %v13623_v5 = vld [vmem:[%s16935_s7] ss:$0 sm:$0xff] }
 0x32a   : > { %v13545_v13 = vpop.f32.mrb[71].mxu1  ;;  %v10073_v38 = vpop.eup %10072  ;;  %10082 = vpow2.f32 %v5514_v55  ;;  %v5459_v34 = vmul.f32 10.0, %v5427_v62  ;;  %v5432_v40 = vmin.f32 %v13576_v15, 0.0  ;;  %v13599_v16 = vadd.f32 %v13286_v11, %v13530_v8 }
 0x32b   : > { %v10075_v2 = vpop.eup %10074  ;;  %v5643_v21 = vsel %vm5611_vm11, %v13473_v20, %v5579_v25  ;;  %v8788_v26 = vadd.f32 -1.0, %v10073_v38  ;;  %v5520_v35 = vmul.f32 1.442695, %v5461_v27  ;;  %vm5616_vm12 = vcmp.gt.f32.partialorder %v13492_v6, 0.0 }
 0x32c   : > { %v5666_v12 = vpack.c.bf16 %v5643_v21, %v5642_v58  ;;  %v8786_v37 = vadd.f32 -1.0, %v10075_v2  ;;  %v5516_v3 = vmul.f32 1.442695, %v5459_v34  ;;  %v5464_v59 = vmul.f32 10.0, %v5432_v40 }
 0x32d   : > { %v10077_v53 = vpop.eup %10076  ;;  %10084 = vpow2.f32 %v5520_v35  ;;  %v5430_v20 = vmin.f32 %v13599_v16, 0.0  ;;  %v5584_v39 = vmul.f32 0.1, %v8788_v26  ;;  %vm5614_vm13 = vcmp.gt.f32.partialorder %v13501_v22, 0.0 }
 0x32e   : > { %v10079_v8 = vpop.eup %10078  ;;  %v8789_v42 = vadd.f32 -1.0, %v10077_v53  ;;  %10086 = vpow2.f32 %v5516_v3  ;;  %v5526_v56 = vmul.f32 1.442695, %v5464_v59  ;;  %9414 = vmatprep.mubr.msk.bf16.mxu1 %vm2923_vm10, %v5666_v12  ;;  %v5582_v50 = vmul.f32 0.1, %v8786_v37 }
 0x32f   : > { %v8787_v17 = vadd.f32 -1.0, %v10079_v8  ;;  %v5462_v7 = vmul.f32 10.0, %v5430_v20  ;;  %9415 = vmatmul.mubr.msk.bf16.gmra.mrb[144].mxu1 %vm2923_vm10, %v5667_v10  ;;  %v13627_v47 = vadd.f32 %v13535_v36, %v13286_v11  ;;  %vm5617_vm14 = vcmp.gt.f32.partialorder %v13517_v32, 0.0  ;;  %v13656_v3 = vld [vmem:[%s16933_s5 + $0x3] ss:$0 sm:$0xff] }
 0x330   : > { %v5585_v43 = vmul.f32 0.1, %v8789_v42  ;;  %vm5615_vm15 = vcmp.gt.f32.partialorder %v13523_v18, 0.0  ;;  %10088 = vpow2.f32 %v5526_v56  ;;  %v5648_v55 = vsel %vm5616_vm12, %v13492_v6, %v5584_v39 }
 0x331   : > { %v10081_v30 = vpop.eup %10080  ;;  %v5583_v23 = vmul.f32 0.1, %v8787_v17  ;;  %v5522_v10 = vmul.f32 1.442695, %v5462_v7  ;;  %v5433_v25 = vmin.f32 %v13627_v47, 0.0  ;;  %v5646_v27 = vsel %vm5614_vm13, %v13501_v22, %v5582_v50 }
 0x332   : > { %v5649_v62 = vsel %vm5617_vm14, %v13517_v32, %v5585_v43  ;;  %v13638_v58 = vadd.f32 %v13459_v44, %v13623_v5  ;;  %v8792_v2 = vadd.f32 -1.0, %v10081_v30  ;;  %v13644_v32 = vadd.f32 %v13286_v11, %v13543_v61 }
 0x333   : > { %v13560_v33 = vpop.f32.mrb[160].mxu0  ;;  %v5669_v38 = vpack.c.bf16 %v5649_v62, %v5648_v55  ;;  %v5647_v36 = vsel %vm5615_vm15, %v13523_v18, %v5583_v23  ;;  %v5465_v21 = vmul.f32 10.0, %v5433_v25  ;;  %10090 = vpow2.f32 %v5522_v10 }
 0x334   : > { %v13568_v4 = vpop.f32.mrb[161].mxu0  ;;  %v10083_v34 = vpop.eup %10082  ;;  %v5668_v40 = vpack.c.bf16 %v5647_v36, %v5646_v27  ;;  %v3135_v12 = vmin.f32 %v13638_v58, 0.0  ;;  %v5431_v37 = vmin.f32 %v13644_v32, 0.0  ;;  %v5588_v53 = vmul.f32 0.1, %v8792_v2 }
 0x335   : > { %v13578_v51 = vpop.f32.mrb[162].mxu0  ;;  %v8790_v6 = vadd.f32 -1.0, %v10083_v34  ;;  %v5528_v22 = vmul.f32 1.442695, %v5465_v21  ;;  %vm5620_vm0 = vcmp.gt.f32.partialorder %v13541_v9, 0.0  ;;  %vm5618_vm1 = vcmp.gt.f32.partialorder %v13557_v57, 0.0 }
 0x336   : > { %v13582_v28 = vpop.f32.mrb[163].mxu0  ;;  %9418 = vmatprep.mubr.msk.bf16.mxu1 %vm2923_vm10, %v5668_v40  ;;  %v5463_v56 = vmul.f32 10.0, %v5431_v37  ;;  %vm5621_vm2 = vcmp.gt.f32.partialorder %v13565_v29, 0.0  ;;  %v13672_v7 = vadd.f32 %v13623_v5, %v13470_v31  ;;  %vm5619_vm3 = vcmp.gt.f32.partialorder %v13572_v41, 0.0 }
 0x337   : > { %v13594_v54 = vpop.f32.mrb[72].mxu1  ;;  %v10085_v44 = vpop.eup %10084  ;;  %9419 = vmatmul.mubr.msk.bf16.gmra.mrb[148].mxu1 %vm2923_vm10, %v5669_v38  ;;  %v5586_v20 = vmul.f32 0.1, %v8790_v6  ;;  %10092 = vpow2.f32 %v5528_v22  ;;  %v13679_v62 = vadd.f32 %v13560_v33, %v13656_v3  ;;  %v5652_v10 = vsel %vm5620_vm0, %v13541_v9, %v5588_v53 }
 0x338   : > { %v13601_v52 = vpop.f32.mrb[73].mxu1  ;;  %v10087_v59 = vpop.eup %10086  ;;  %v8793_v8 = vadd.f32 -1.0, %v10085_v44  ;;  %v5524_v55 = vmul.f32 1.442695, %v5463_v56  ;;  %v3167_v38 = vmul.f32 10.0, %v3135_v12  ;;  %v13689_v40 = vadd.f32 %v13623_v5, %v13483_v48 }
 0x339   : > { %v13605_v14 = vpop.f32.mrb[74].mxu1  ;;  %v8791_v42 = vadd.f32 -1.0, %v10087_v59  ;;  %v5650_v25 = vsel %vm5618_vm1, %v13557_v57, %v5586_v20  ;;  %v3133_v9 = vmin.f32 %v13672_v7, 0.0  ;;  %vm5624_vm4 = vcmp.gt.f32.partialorder %v13576_v15, 0.0 }
 0x33a   : > { %v13610_v63 = vpop.f32.mrb[75].mxu1  ;;  %v5589_v17 = vmul.f32 0.1, %v8793_v8  ;;  %v10089_v30 = vpop.eup %10088  ;;  %10094 = vpow2.f32 %v5524_v55  ;;  %vm5625_vm5 = vcmp.gt.f32.partialorder %v13627_v47, 0.0  ;;  %v13701_v22 = vmul.f32 1.442695, %v3167_v38 }
 0x33b   : > { %v13603_v45 = vpop.f32.mrb[164].mxu0  ;;  %v5587_v23 = vmul.f32 0.1, %v8791_v42  ;;  %v8796_v21 = vadd.f32 -1.0, %v10089_v30  ;;  %v13705_v48 = vadd.f32 %v13476_v1, %v13623_v5  ;;  %v13709_v44 = vadd.f32 %v13656_v3, %v13568_v4 }
 0x33c   : > { %v13608_v24 = vpop.f32.mrb[165].mxu0  ;;  %v5653_v27 = vsel %vm5621_vm2, %v13565_v29, %v5589_v17  ;;  %v6928_v29 = vmin.f32 %v13679_v62, 0.0  ;;  %v13713_v12 = vadd.f32 %v13578_v51, %v13656_v3  ;;  %v3134_v37 = vmin.f32 %v13689_v40, 0.0 }
 0x33d   : > { %v13613_v0 = vpop.f32.mrb[166].mxu0  ;;  %v5671_v36 = vpack.c.bf16 %v5653_v27, %v5652_v10  ;;  %v5651_v34 = vsel %vm5619_vm3, %v13572_v41, %v5587_v23  ;;  %v10091_v6 = vpop.eup %10090  ;;  %v13719_v53 = vadd.f32 %v13656_v3, %v13582_v28  ;;  %v13723_v1 = vadd.f32 %v13603_v45, %v13656_v3 }
 0x33e   : > { %v13616_v19 = vpop.f32.mrb[167].mxu0  ;;  %v5670_v33 = vpack.c.bf16 %v5651_v34, %v5650_v25  ;;  %v6960_v59 = vmul.f32 10.0, %v6928_v29  ;;  %v5592_v20 = vmul.f32 0.1, %v8796_v21  ;;  %v3165_v8 = vmul.f32 10.0, %v3133_v9 }
 0x33f   : > { %v6926_v51 = vmin.f32 %v13709_v44, 0.0  ;;  %v13729_v42 = vadd.f32 %v13656_v3, %v13608_v24  ;;  %v8794_v56 = vadd.f32 -1.0, %v10091_v6  ;;  %vm5622_vm6 = vcmp.gt.f32.partialorder %v13599_v16, 0.0 }
 0x340   : > { %9422 = vmatprep.mubr.msk.bf16.mxu1 %vm2923_vm10, %v5670_v33  ;;  %v6994_v17 = vmul.f32 1.442695, %v6960_v59  ;;  %v6929_v30 = vmin.f32 %v13713_v12, 0.0  ;;  %v3136_v45 = vmin.f32 %v13705_v48, 0.0  ;;  %v6927_v55 = vmin.f32 %v13719_v53, 0.0 }
 0x341   : > { %9423 = vmatmul.mubr.msk.bf16.gmra.mrb[152].mxu1 %vm2923_vm10, %v5671_v36  ;;  %v10093_v4 = vpop.eup %10092  ;;  %v6958_v23 = vmul.f32 10.0, %v6926_v51  ;;  %v6932_v10 = vmin.f32 %v13723_v1, 0.0  ;;  %v3166_v38 = vmul.f32 10.0, %v3134_v37  ;;  %v6930_v9 = vmin.f32 %v13729_v42, 0.0 }
 0x342   : > { %v8797_v28 = vadd.f32 -1.0, %v10093_v4  ;;  %10096 = vpow2.f32 %v6994_v17  ;;  %v6961_v24 = vmul.f32 10.0, %v6929_v30  ;;  %v6959_v33 = vmul.f32 10.0, %v6927_v55 }
 0x343   : > { %v13640_v26 = vpop.f32.mrb[168].mxu0  ;;  %v6990_v34 = vmul.f32 1.442695, %v6958_v23  ;;  %v6964_v21 = vmul.f32 10.0, %v6932_v10  ;;  %v5656_v59 = vsel %vm5624_vm4, %v13576_v15, %v5592_v20  ;;  %v5590_v4 = vmul.f32 0.1, %v8794_v56 }
 0x344   : > { %v13646_v35 = vpop.f32.mrb[169].mxu0  ;;  %v5593_v27 = vmul.f32 0.1, %v8797_v28  ;;  %v10095_v6 = vpop.eup %10094  ;;  %v6996_v51 = vmul.f32 1.442695, %v6961_v24  ;;  %v13757_v15 = vadd.f32 %v13526_v46, %v13623_v5  ;;  %vm5623_vm7 = vcmp.gt.f32.partialorder %v13644_v32, 0.0 }
 0x345   : > { %v13649_v18 = vpop.f32.mrb[170].mxu0  ;;  %v8795_v23 = vadd.f32 -1.0, %v10095_v6  ;;  %10098 = vpow2.f32 %v6990_v34  ;;  %v6992_v55 = vmul.f32 1.442695, %v6959_v33  ;;  %v13764_v56 = vadd.f32 %v13613_v0, %v13656_v3 }
 0x346   : > { %v13659_v11 = vpop.f32.mrb[171].mxu0  ;;  %v13661_v61 = vpop.f32.mrb[76].mxu1  ;;  %v5657_v37 = vsel %vm5625_vm5, %v13627_v47, %v5593_v27  ;;  %10100 = vpow2.f32 %v6996_v51  ;;  %v3197_v24 = vmul.f32 1.442695, %v3165_v8  ;;  %v3168_v34 = vmul.f32 10.0, %v3136_v45 }
 0x347   : > { %v13663_v39 = vpop.f32.mrb[77].mxu1  ;;  %v5673_v30 = vpack.c.bf16 %v5657_v37, %v5656_v59  ;;  %v5591_v47 = vmul.f32 0.1, %v8795_v23  ;;  %10102 = vpow2.f32 %v6992_v55  ;;  %v5654_v46 = vsel %vm5622_vm6, %v13599_v16, %v5590_v4 }
 0x348   : > { %v13666_v50 = vpop.f32.mrb[78].mxu1  ;;  %v13775_v6 = vadd.f32 %v13656_v3, %v13616_v19  ;;  %v3199_v37 = vmul.f32 1.442695, %v3166_v38  ;;  %v13791_v23 = vadd.f32 %v13640_v26, %v13656_v3  ;;  %vm7120_vm8 = vcmp.gt.f32.partialorder %v13679_v62, 0.0 }
 0x349   : > { %17455 = vst [vmem:[#allocation77_spill] sm:$0xff] %v13666_v50  ;;  %v13674_v43 = vpop.f32.mrb[79].mxu1  ;;  %v6962_v50 = vmul.f32 10.0, %v6930_v9  ;;  %v6933_v9 = vmin.f32 %v13764_v56, 0.0  ;;  %vm7118_vm9 = vcmp.gt.f32.partialorder %v13709_v44, 0.0  ;;  %vm7121_vm11 = vcmp.gt.f32.partialorder %v13713_v12, 0.0 }
 0x34a   : > { %17456 = vst [vmem:[#allocation73_spill] sm:$0xff] %v13674_v43  ;;  %v7002_v43 = vmul.f32 1.442695, %v6964_v21  ;;  %v5655_v21 = vsel %vm5623_vm7, %v13644_v32, %v5591_v47  ;;  %v6931_v32 = vmin.f32 %v13775_v6, 0.0  ;;  %v13798_v47 = vadd.f32 %v13623_v5, %v13532_v60 }
 0x34b   : > { %v13684_v31 = vpop.f32.mrb[172].mxu0  ;;  %v6998_v33 = vmul.f32 1.442695, %v6962_v50  ;;  %v5672_v59 = vpack.c.bf16 %v5655_v21, %v5654_v46  ;;  %v6965_v16 = vmul.f32 10.0, %v6933_v9  ;;  %vm7119_vm12 = vcmp.gt.f32.partialorder %v13719_v53, 0.0 }
 0x34c   : > { %v13691_v2 = vpop.f32.mrb[173].mxu0  ;;  %10104 = vpow2.f32 %v7002_v43  ;;  %v3139_v43 = vmin.f32 %v13757_v15, 0.0  ;;  %v10097_v45 = vpop.eup %10096  ;;  %v6963_v51 = vmul.f32 10.0, %v6931_v32  ;;  %vm7124_vm13 = vcmp.gt.f32.partialorder %v13723_v1, 0.0 }
 0x34d   : > { %v13694_v57 = vpop.f32.mrb[174].mxu0  ;;  %10106 = vpow2.f32 %v6998_v33  ;;  %9426 = vmatprep.mubr.msk.bf16.mxu1 %vm2923_vm10, %v5672_v59  ;;  %v8892_v4 = vadd.f32 -1.0, %v10097_v45  ;;  %v7004_v38 = vmul.f32 1.442695, %v6965_v16  ;;  %v6936_v60 = vmin.f32 %v13791_v23, 0.0 }
 0x34e   : > { %v13699_v41 = vpop.f32.mrb[175].mxu0  ;;  %10108 = vpow2.f32 %v13701_v22  ;;  %9427 = vmatmul.mubr.msk.bf16.gmra.mrb[156].mxu1 %vm2923_vm10, %v5673_v30  ;;  %v13794_v22 = vmul.f32 1.442695, %v3168_v34  ;;  %v3171_v55 = vmul.f32 10.0, %v3139_v43  ;;  %v7000_v33 = vmul.f32 1.442695, %v6963_v51 }
 0x34f   : > { %10110 = vpow2.f32 %v3197_v24  ;;  %v10099_v24 = vpop.eup %10098  ;;  %v7088_v26 = vmul.f32 0.1, %v8892_v4  ;;  %vm7122_vm14 = vcmp.gt.f32.partialorder %v13729_v42, 0.0  ;;  %v3137_v32 = vmin.f32 %v13798_v47, 0.0 }
 0x350   : > { %10112 = vpow2.f32 %v3199_v37  ;;  %v10101_v46 = vpop.eup %10100  ;;  %v8890_v21 = vadd.f32 -1.0, %v10099_v24  ;;  %v13809_v16 = vmul.f32 1.442695, %v3171_v55  ;;  %v6968_v51 = vmul.f32 10.0, %v6936_v60 }
 0x351   : > { %10114 = vpow2.f32 %v7004_v38  ;;  %v10103_v30 = vpop.eup %10102  ;;  %v8893_v34 = vadd.f32 -1.0, %v10101_v46  ;;  %v13814_v38 = vadd.f32 %v13537_v49, %v13623_v5  ;;  %vm3327_vm15 = vcmp.gt.f32.partialorder %v13638_v58, 0.0 }
 0x352   : > { %10116 = vpow2.f32 %v7000_v33  ;;  %v7086_v37 = vmul.f32 0.1, %v8890_v21  ;;  %v8891_v43 = vadd.f32 -1.0, %v10103_v30  ;;  %v7152_v33 = vsel %vm7120_vm8, %v13679_v62, %v7088_v26 }
 0x353   : > { %v13736_v25 = vpop.f32.mrb[176].mxu0  ;;  %v7089_v45 = vmul.f32 0.1, %v8893_v34  ;;  %v13822_v55 = vadd.f32 %v13623_v5, %v13545_v13  ;;  %v13826_v21 = vadd.f32 %v13656_v3, %v13646_v35  ;;  %vm7125_vm0 = vcmp.gt.f32.partialorder %v13764_v56, 0.0 }
 0x354   : > { %v13738_v36 = vpop.f32.mrb[177].mxu0  ;;  %v7087_v46 = vmul.f32 0.1, %v8891_v43  ;;  %v7150_v34 = vsel %vm7118_vm9, %v13709_v44, %v7086_v37  ;;  %vm7123_vm1 = vcmp.gt.f32.partialorder %v13775_v6, 0.0  ;;  %vm3428_vm2 = vcmask 261120  }
 0x355   : > { %v13741_v29 = vpop.f32.mrb[178].mxu0  ;;  %v7153_v62 = vsel %vm7121_vm11, %v13713_v12, %v7089_v45  ;;  %v6934_v44 = vmin.f32 %v13826_v21, 0.0  ;;  %v3169_v45 = vmul.f32 10.0, %v3137_v32  ;;  %vm3326_vm3 = vcmp.gt.f32.partialorder %v13689_v40, 0.0 }
 0x356   : > { %v13749_v28 = vpop.f32.mrb[179].mxu0  ;;  %v13751_v17 = vpop.f32.mrb[80].mxu1  ;;  %v7183_v35 = vpack.c.bf16 %v7153_v62, %v7152_v33  ;;  %v7151_v43 = vsel %vm7119_vm12, %v13719_v53, %v7087_v46  ;;  %v13851_v33 = vadd.f32 %v13649_v18, %v13656_v3  ;;  %v13855_v53 = vadd.f32 %v13656_v3, %v13659_v11 }
 0x357   : > { %17457 = vst [vmem:[#allocation76_spill] sm:$0xff] %v13751_v17  ;;  %v13753_v10 = vpop.f32.mrb[81].mxu1  ;;  %v10105_v59 = vpop.eup %10104  ;;  %v13870_v18 = vadd.f32 %v13684_v31, %v13656_v3  ;;  %vm3325_vm4 = vcmp.gt.f32.partialorder %v13672_v7, 0.0  ;;  %vm3328_vm5 = vcmp.gt.f32.partialorder %v13705_v48, 0.0  ;;  %vm7128_vm6 = vcmp.gt.f32.partialorder %v13791_v23, 0.0 }
 0x358   : > { %17458 = vst [vmem:[#allocation78_spill] sm:$0xff] %v13753_v10  ;;  %v13759_v20 = vpop.f32.mrb[82].mxu1  ;;  %v8896_v4 = vadd.f32 -1.0, %v10105_v59  ;;  %v10107_v24 = vpop.eup %10106  ;;  %v6966_v10 = vmul.f32 10.0, %v6934_v44  ;;  %vm7126_vm7 = vcmp.gt.f32.partialorder %v13826_v21, 0.0  ;;  %vm7129_vm8 = vcmp.gt.f32.partialorder %v13851_v33, 0.0 }
 0x359   : > { %17459 = vst [vmem:[#allocation79_spill] sm:$0xff] %v13759_v20  ;;  %v13766_v27 = vpop.f32.mrb[83].mxu1  ;;  %v10109_v49 = vpop.eup %10108  ;;  %v8894_v60 = vadd.f32 -1.0, %v10107_v24  ;;  %v7182_v20 = vpack.c.bf16 %v7151_v43, %v7150_v34  ;;  %v3140_v24 = vmin.f32 %v13814_v38, 0.0  ;;  %v3138_v34 = vmin.f32 %v13822_v55, 0.0 }
 0x35a   : > { %17460 = vst [vmem:[#allocation51_spill] sm:$0xff] %v13766_v27  ;;  %v7092_v26 = vmul.f32 0.1, %v8896_v4  ;;  %v13839_v59 = vpop.eup %10110  ;;  %v7010_v27 = vmul.f32 1.442695, %v6968_v51  ;;  %v8584_v62 = vadd.f32 -1.0, %v10109_v49 }
 0x35b   : > { %v13777_v0 = vpop.f32.mrb[180].mxu0  ;;  %v7090_v12 = vmul.f32 0.1, %v8894_v60  ;;  %v10113_v4 = vpop.eup %10112  ;;  %v13866_v60 = vld [vmem:[%s16936_s8] ss:$0 sm:$0xff]  ;;  %9486 = vmatprep.mubr.msk.bf16.mxu1 %vm2923_vm10, %v7182_v20  ;;  %v6937_v49 = vmin.f32 %v13851_v33, 0.0 }
 0x35c   : > { %v13780_v50 = vpop.f32.mrb[181].mxu0  ;;  %v10115_v46 = vpop.eup %10114  ;;  %v7156_v32 = vsel %vm7124_vm13, %v13723_v1, %v7092_v26  ;;  %10118 = vpow2.f32 %v7010_v27  ;;  %v7006_v1 = vmul.f32 1.442695, %v6966_v10  ;;  %9487 = vmatmul.mubr.msk.bf16.vlgmr.msra.gmra.mrb[160].mxu1 %vm2923_vm10, %v7183_v35  ;;  %v6935_v20 = vmin.f32 %v13855_v53, 0.0 }
 0x35d   : > { %v13784_v8 = vpop.f32.mrb[182].mxu0  ;;  %v8897_v44 = vadd.f32 -1.0, %v10115_v46  ;;  %v7154_v31 = vsel %vm7122_vm14, %v13729_v42, %v7090_v12  ;;  %v3295_v17 = vmul.f32 0.1, %v8584_v62  ;;  %v6969_v46 = vmul.f32 10.0, %v6937_v49 }
 0x35e   : > { %v13787_v19 = vpop.f32.mrb[183].mxu0  ;;  %10120 = vpow2.f32 %v7006_v1  ;;  %vm7127_vm9 = vcmp.gt.f32.partialorder %v13855_v53, 0.0  ;;  %vm7132_vm11 = vcmp.gt.f32.partialorder %v13870_v18, 0.0  ;;  %vm3331_vm12 = vcmp.gt.f32.partialorder %v13757_v15, 0.0 }
 0x35f   : > { %v7093_v27 = vmul.f32 0.1, %v8897_v44  ;;  %v3359_v42 = vsel %vm3327_vm15, %v13638_v58, %v3295_v17  ;;  %v7012_v1 = vmul.f32 1.442695, %v6969_v46  ;;  %v8582_v46 = vadd.f32 -1.0, %v13839_v59 }
 0x360   : > { %v3398_v49 = vmul.f32 %v13866_v60, %v3359_v42  ;;  %v13925_v59 = vadd.f32 %v13594_v54, %v13623_v5  ;;  %v13933_v54 = vadd.f32 %v13656_v3, %v13699_v41  ;;  %vm3332_vm14 = vcmp.gt.f32.partialorder %v13814_v38, 0.0 }
 0x361   : > { %v7157_v44 = vsel %vm7125_vm0, %v13764_v56, %v7093_v27  ;;  %10122 = vpow2.f32 %v7012_v1  ;;  %v3172_v27 = vmul.f32 10.0, %v3140_v24  ;;  %v3170_v24 = vmul.f32 10.0, %v3138_v34 }
 0x362   : > { %v3435_v17 = vsel %vm3428_vm2, %v3398_v49, 0.0  ;;  %v3293_v34 = vmul.f32 0.1, %v8582_v46  ;;  %vm7131_vm0 = vcmp.gt.f32.partialorder %v13933_v54, 0.0 }
 0x363   : > { %v13806_v9 = vpop.f32.mrb[184].mxu0  ;;  %3436 = vadd.xlane.f32.xlu0 %v3435_v17  ;;  %v13940_v17 = vadd.f32 %v13623_v5, %v13601_v52 }
 0x364   : > { %v13828_v30 = vpop.f32.mrb[185].mxu0 }
 0x365   : > { %v13837_v13 = vpop.f32.mrb[186].mxu0 }
 0x366   : > { %v13845_v37 = vpop.f32.mrb[187].mxu0 }
 0x367   : > { %17461 = vst [vmem:[#allocation80_spill] sm:$0xff] %v13845_v37 }
 0x36b   : > { %v13857_v51 = vpop.f32.mrb[84].mxu1  ;;  %v13873_v11 = vpop.f32.mrb[188].mxu0 }
 0x36c   : > { %17462 = vst [vmem:[#allocation81_spill] sm:$0xff] %v13857_v51  ;;  %17463 = vst [vmem:[#allocation83_spill] sm:$0xff] %v13873_v11  ;;  %v13875_v43 = vpop.f32.mrb[85].mxu1  ;;  %v13879_v26 = vpop.f32.mrb[189].mxu0  ;;  %v6940_v11 = vmin.f32 %v13870_v18, 0.0 }
 0x36d   : > { %17464 = vst [vmem:[#allocation84_spill] sm:$0xff] %v13875_v43  ;;  %17465 = vst [vmem:[#allocation85_spill] sm:$0xff] %v13879_v26  ;;  %v10117_v51 = vpop.eup %10116  ;;  %v13886_v43 = vpop.f32.mrb[190].mxu0  ;;  %v6967_v26 = vmul.f32 10.0, %v6935_v20  ;;  %v13903_v20 = vadd.f32 %v13656_v3, %v13691_v2  ;;  %v13913_v2 = vadd.f32 %v13694_v57, %v13656_v3  ;;  %v3211_v57 = vmul.f32 1.442695, %v3172_v27 }
 0x36e   : > { %17466 = vst [vmem:[#allocation86_spill] sm:$0xff] %v13886_v43  ;;  %v8895_v10 = vadd.f32 -1.0, %v10117_v51  ;;  %v13888_v37 = vpop.f32.mrb[191].mxu0  ;;  %v13890_v35 = vpop.f32.mrb[86].mxu1  ;;  %v6972_v12 = vmul.f32 10.0, %v6940_v11  ;;  %v8583_v11 = vadd.f32 -1.0, %v10113_v4 }
 0x36f   : > { %17467 = vst [vmem:[#allocation5_spill] sm:$0xff] %v13888_v37  ;;  %17468 = vst [vmem:[#allocation21_spill] sm:$0xff] %v13890_v35  ;;  %v13895_v62 = vpop.f32.mrb[87].mxu1  ;;  %v7185_v37 = vpack.c.bf16 %v7157_v44, %v7156_v32  ;;  %v7008_v43 = vmul.f32 1.442695, %v6967_v26  ;;  %v6938_v32 = vmin.f32 %v13903_v20, 0.0  ;;  %v10119_v4 = vpop.eup %10118 }
 0x370   : > { %v7091_v51 = vmul.f32 0.1, %v8895_v10  ;;  %v7018_v35 = vmul.f32 1.442695, %v6972_v12  ;;  %v3294_v26 = vmul.f32 0.1, %v8583_v11 }
 0x371   : > { %10124 = vpow2.f32 %v7008_v43  ;;  %v6970_v10 = vmul.f32 10.0, %v6938_v32  ;;  %vm7133_vm13 = vcmp.gt.f32.partialorder %v13913_v2, 0.0  ;;  %vm7130_vm15 = vcmp.gt.f32.partialorder %v13903_v20, 0.0 }
 0x372   : > { %v7155_v58 = vsel %vm7123_vm1, %v13775_v6, %v7091_v51  ;;  %10126 = vpow2.f32 %v13794_v22  ;;  %v3205_v6 = vmul.f32 1.442695, %v3169_v45  ;;  %v3358_v43 = vsel %vm3326_vm3, %v13689_v40, %v3294_v26  ;;  %v10121_v45 = vpop.eup %10120 }
 0x373   : > { %v7184_v56 = vpack.c.bf16 %v7155_v58, %v7154_v31  ;;  %10128 = vpow2.f32 %v7018_v35  ;;  %v6941_v22 = vmin.f32 %v13913_v2, 0.0  ;;  %v3397_v31 = vmul.f32 %v13866_v60, %v3358_v43  ;;  %v10123_v49 = vpop.eup %10122 }
 0x374   : > { %10130 = vpow2.f32 %v13809_v16  ;;  %v7014_v42 = vmul.f32 1.442695, %v6970_v10  ;;  %v8900_v40 = vadd.f32 -1.0, %v10119_v4  ;;  %v8898_v44 = vadd.f32 -1.0, %v10121_v45 }
 0x375   : > { %9490 = vmatprep.mubr.msk.bf16.mxu1 %vm2923_vm10, %v7184_v56  ;;  %v6973_v12 = vmul.f32 10.0, %v6941_v22  ;;  %10132 = vpow2.f32 %v3205_v6  ;;  %v3432_v35 = vsel %vm3428_vm2, %v3397_v31, 0.0  ;;  %v3357_v51 = vsel %vm3325_vm4, %v13672_v7, %v3293_v34 }
 0x376   : > { %9491 = vmatmul.mubr.msk.bf16.gmra.mrb[164].mxu1 %vm2923_vm10, %v7185_v37  ;;  %v3207_v37 = vmul.f32 1.442695, %v3170_v24  ;;  %3433 = vadd.xlane.f32.xlu1 %v3432_v35  ;;  %10134 = vpow2.f32 %v3211_v57  ;;  %v3396_v1 = vmul.f32 %v13866_v60, %v3357_v51  ;;  %v3143_v58 = vmin.f32 %v13925_v59, 0.0 }
 0x377   : > { %v7020_v16 = vmul.f32 1.442695, %v6973_v12  ;;  %10136 = vpow2.f32 %v7014_v42  ;;  %v7096_v11 = vmul.f32 0.1, %v8900_v40  ;;  %v8901_v56 = vadd.f32 -1.0, %v10123_v49 }
 0x378   : > { %v3429_v27 = vsel %vm3428_vm2, %v3396_v1, 0.0  ;;  %v7094_v32 = vmul.f32 0.1, %v8898_v44  ;;  %v6939_v6 = vmin.f32 %v13933_v54, 0.0  ;;  %v3175_v4 = vmul.f32 10.0, %v3143_v58 }
 0x379   : > { %10138 = vpow2.f32 %v7020_v16  ;;  %3430 = vadd.xlane.f32.xlu0 %v3429_v27  ;;  %v7097_v10 = vmul.f32 0.1, %v8901_v56  ;;  %v13949_v43 = vadd.f32 %v13605_v14, %v13623_v5  ;;  %v7160_v57 = vsel %vm7128_vm6, %v13791_v23, %v7096_v11 }
 0x37a   : > { %10140 = vpow2.f32 %v3207_v37  ;;  %v6971_v24 = vmul.f32 10.0, %v6939_v6  ;;  %v3141_v45 = vmin.f32 %v13940_v17, 0.0  ;;  %v7158_v12 = vsel %vm7126_vm7, %v13826_v21, %v7094_v32 }
 0x37b   : > { %v10125_v7 = vpop.eup %10124  ;;  %v7161_v31 = vsel %vm7129_vm8, %v13851_v33, %v7097_v10  ;;  %v13962_v16 = vadd.f32 %v13623_v5, %v13610_v63  ;;  %v3144_v21 = vmin.f32 %v13949_v43, 0.0  ;;  %v13970_v33 = vadd.f32 %v13736_v25, %v13656_v3 }
 0x37c   : > { %v10127_v41 = vpop.eup %10126  ;;  %v8899_v26 = vadd.f32 -1.0, %v10125_v7  ;;  %v7187_v34 = vpack.c.bf16 %v7161_v31, %v7160_v57  ;;  %v7016_v35 = vmul.f32 1.442695, %v6971_v24  ;;  %v13981_v49 = vadd.f32 %v13656_v3, %v13738_v36 }
 0x37d   : > { %v10129_v52 = vpop.eup %10128  ;;  %v8585_v42 = vadd.f32 -1.0, %v10127_v41  ;;  %v13964_v51 = vpop.f32.mrb[88].mxu1  ;;  %v13985_v58 = vadd.f32 %v13741_v29, %v13656_v3  ;;  %v13990_v11 = vmul.f32 1.442695, %v3175_v4  ;;  %v13992_v56 = vmul.f32 10.0, %v3141_v45 }
 0x37e   : > { %v7095_v46 = vmul.f32 0.1, %v8899_v26  ;;  %v10131_v22 = vpop.eup %10130  ;;  %v8904_v44 = vadd.f32 -1.0, %v10129_v52  ;;  %10142 = vpow2.f32 %v7016_v35  ;;  %v3142_v32 = vmin.f32 %v13962_v16, 0.0 }
 0x37f   : > { %v13958_v37 = vpop.eup %10132  ;;  %v3296_v23 = vmul.f32 0.1, %v8585_v42  ;;  %v6942_v26 = vmin.f32 %v13981_v49, 0.0  ;;  %v6945_v6 = vmin.f32 %v13985_v58, 0.0  ;;  %v14008_v42 = vadd.f32 %v13656_v3, %v13749_v28 }
 0x380   : > { %v7159_v40 = vsel %vm7127_vm9, %v13855_v53, %v7095_v46  ;;  %v13972_v53 = vpop.f32.mrb[89].mxu1  ;;  %v10135_v1 = vpop.eup %10134  ;;  %v7100_v29 = vmul.f32 0.1, %v8904_v44  ;;  %v3176_v46 = vmul.f32 10.0, %v3144_v21  ;;  %v14014_v35 = vadd.f32 %v13777_v0, %v13656_v3 }
 0x381   : > { %v7186_v14 = vpack.c.bf16 %v7159_v40, %v7158_v12  ;;  %v3360_v63 = vsel %vm3328_vm5, %v13705_v48, %v3296_v23  ;;  %v13988_v25 = vpop.f32.mrb[90].mxu1  ;;  %v10137_v7 = vpop.eup %10136  ;;  %v6944_v48 = vmin.f32 %v13970_v33, 0.0  ;;  %v6974_v31 = vmul.f32 10.0, %v6942_v26 }
 0x382   : > { %v3399_v27 = vmul.f32 %v13866_v60, %v3360_v63  ;;  %v13997_v36 = vpop.f32.mrb[91].mxu1  ;;  %v8902_v57 = vadd.f32 -1.0, %v10137_v7  ;;  %v6977_v45 = vmul.f32 10.0, %v6945_v6  ;;  %v8588_v40 = vadd.f32 -1.0, %v10131_v22 }
 0x383   : > { %9494 = vmatprep.mubr.msk.bf16.mxu1 %vm2923_vm10, %v7186_v14  ;;  %v10139_v41 = vpop.eup %10138  ;;  %v6976_v24 = vmul.f32 10.0, %v6944_v48  ;;  %v7164_v14 = vsel %vm7132_vm11, %v13870_v18, %v7100_v29  ;;  %v7022_v44 = vmul.f32 1.442695, %v6974_v31  ;;  %v6943_v28 = vmin.f32 %v14008_v42, 0.0 }
 0x384   : > { %9495 = vmatmul.mubr.msk.bf16.gmra.mrb[168].mxu1 %vm2923_vm10, %v7187_v34  ;;  %v14002_v10 = vpop.eup %10140  ;;  %v8905_v52 = vadd.f32 -1.0, %v10139_v41  ;;  %v3438_v4 = vsel %vm3428_vm2, %v3399_v27, 0.0  ;;  %v7028_v23 = vmul.f32 1.442695, %v6977_v45  ;;  %v3299_v63 = vmul.f32 0.1, %v8588_v40 }
 0x385   : > { %3439 = vadd.xlane.f32.xlu0 %v3438_v4  ;;  %v7026_v34 = vmul.f32 1.442695, %v6976_v24  ;;  %v6948_v22 = vmin.f32 %v14014_v35, 0.0  ;;  %v7098_v7 = vmul.f32 0.1, %v8902_v57  ;;  %v6975_v0 = vmul.f32 10.0, %v6943_v28 }
 0x386   : > { %v7101_v12 = vmul.f32 0.1, %v8905_v52  ;;  %v3363_v18 = vsel %vm3331_vm12, %v13757_v15, %v3299_v63  ;;  %v8589_v29 = vadd.f32 -1.0, %v10135_v1  ;;  %v14030_v52 = vadd.f32 %v13656_v3, %v13780_v50 }
 0x387   : > { %10144 = vpow2.f32 %v7026_v34  ;;  %v6980_v41 = vmul.f32 10.0, %v6948_v22  ;;  %v7024_v6 = vmul.f32 1.442695, %v6975_v0  ;;  %v14034_v57 = vadd.f32 %v13661_v61, %v13623_v5  ;;  %v14045_v61 = vpop.f32.mrb[92].mxu1 }
 0x388   : > { %v7165_v21 = vsel %vm7133_vm13, %v13913_v2, %v7101_v12  ;;  %10146 = vpow2.f32 %v7022_v44  ;;  %v10143_v48 = vpop.eup %10142  ;;  %v3402_v2 = vmul.f32 %v13866_v60, %v3363_v18  ;;  %v3300_v24 = vmul.f32 0.1, %v8589_v29 }
 0x389   : > { %v7189_v27 = vpack.c.bf16 %v7165_v21, %v7164_v14  ;;  %10148 = vpow2.f32 %v7028_v23  ;;  %v8903_v26 = vadd.f32 -1.0, %v10143_v48  ;;  %v7034_v4 = vmul.f32 1.442695, %v6980_v41 }
 0x38a   : > { %v14038_v31 = vadd.f32 %v13784_v8, %v13656_v3  ;;  %10150 = vpow2.f32 %v7024_v6  ;;  %v3447_v1 = vsel %vm3428_vm2, %v3402_v2, 0.0  ;;  %v6946_v45 = vmin.f32 %v14030_v52, 0.0 }
 0x38b   : > { %v7099_v15 = vmul.f32 0.1, %v8903_v26  ;;  %v3219_v12 = vmul.f32 1.442695, %v3176_v46  ;;  %v3174_v34 = vmul.f32 10.0, %v3142_v32  ;;  %3448 = vadd.xlane.f32.xlu1 %v3447_v1  ;;  %10152 = vpow2.f32 %v7034_v4  ;;  %v14054_v32 = vpop.f32.mrb[93].mxu1 }
 0x38c   : > { %v3364_v50 = vsel %vm3332_vm14, %v13814_v38, %v3300_v24  ;;  %v7162_v8 = vsel %vm7130_vm15, %v13903_v20, %v7098_v7  ;;  %v6978_v46 = vmul.f32 10.0, %v6946_v45  ;;  %v3147_v23 = vmin.f32 %v14034_v57, 0.0  ;;  %v14058_v28 = vpop.f32.mrb[94].mxu1 }
 0x38d   : > { %v7163_v40 = vsel %vm7131_vm0, %v13933_v54, %v7099_v15  ;;  %v3403_v14 = vmul.f32 %v13866_v60, %v3364_v50  ;;  %v6949_v38 = vmin.f32 %v14038_v31, 0.0  ;;  %vm3329_vm1 = vcmp.gt.f32.partialorder %v13798_v47, 0.0  ;;  %v14063_v54 = vpop.f32.mrb[95].mxu1 }
 0x38e   : > { %v7188_v44 = vpack.c.bf16 %v7163_v40, %v7162_v8  ;;  %v7030_v21 = vmul.f32 1.442695, %v6978_v46  ;;  %v8586_v63 = vadd.f32 -1.0, %v13958_v37  ;;  %10154 = vpow2.f32 %v13990_v11 }
 0x38f   : > { %v3450_v20 = vsel %vm3428_vm2, %v3403_v14, 0.0  ;;  %v3213_v7 = vmul.f32 1.442695, %v13992_v56  ;;  %v6981_v0 = vmul.f32 10.0, %v6949_v38  ;;  %v14069_v48 = vadd.f32 %v13656_v3, %v13787_v19 }
 0x390   : > { %3451 = vadd.xlane.f32.xlu0 %v3450_v20  ;;  %9498 = vmatprep.mubr.msk.bf16.mxu1 %vm2923_vm10, %v7188_v44  ;;  %10156 = vpow2.f32 %v3219_v12  ;;  %v3215_v41 = vmul.f32 1.442695, %v3174_v34  ;;  %v3297_v37 = vmul.f32 0.1, %v8586_v63  ;;  %v3179_v11 = vmul.f32 10.0, %v3147_v23  ;;  %v17469_v12 = vld [vmem:[#allocation77_spill] sm:$0xff] }
 0x391   : > { %v10145_v22 = vpop.eup %10144  ;;  %9499 = vmatmul.mubr.msk.bf16.gmra.mrb[172].mxu1 %vm2923_vm10, %v7189_v27  ;;  %v7036_v2 = vmul.f32 1.442695, %v6981_v0  ;;  %v14075_v56 = vadd.f32 %v13623_v5, %v13663_v39  ;;  %10158 = vpow2.f32 %v7030_v21  ;;  %vm7136_vm3 = vcmp.gt.f32.partialorder %v13970_v33, 0.0 }
 0x392   : > { %v10147_v18 = vpop.eup %10146  ;;  %v8908_v29 = vadd.f32 -1.0, %v10145_v22  ;;  %v3361_v24 = vsel %vm3329_vm1, %v13798_v47, %v3297_v37  ;;  %v6947_v15 = vmin.f32 %v14069_v48, 0.0  ;;  %vm7134_vm4 = vcmp.gt.f32.partialorder %v13981_v49, 0.0 }
 0x393   : > { %v10149_v26 = vpop.eup %10148  ;;  %v8906_v6 = vadd.f32 -1.0, %v10147_v18  ;;  %10160 = vpow2.f32 %v7036_v2  ;;  %v3400_v27 = vmul.f32 %v13866_v60, %v3361_v24  ;;  %v14086_v34 = vadd.f32 %v17469_v12, %v13623_v5 }
 0x394   : > { %v7104_v4 = vmul.f32 0.1, %v8908_v29  ;;  %v8909_v19 = vadd.f32 -1.0, %v10149_v26  ;;  %v10151_v1 = vpop.eup %10150  ;;  %vm7137_vm5 = vcmp.gt.f32.partialorder %v13985_v58, 0.0  ;;  %v6979_v40 = vmul.f32 10.0, %v6947_v15  ;;  %v14090_v14 = vpop.f32.mrb[96].mxu1 }
 0x395   : > { %v7102_v45 = vmul.f32 0.1, %v8906_v6  ;;  %v10153_v50 = vpop.eup %10152  ;;  %v8907_v47 = vadd.f32 -1.0, %v10151_v1  ;;  %v3441_v8 = vsel %vm3428_vm2, %v3400_v27, 0.0  ;;  %v3225_v23 = vmul.f32 1.442695, %v3179_v11 }
 0x396   : > { %v7105_v39 = vmul.f32 0.1, %v8909_v19  ;;  %v7168_v46 = vsel %vm7136_vm3, %v13970_v33, %v7104_v4  ;;  %3442 = vadd.xlane.f32.xlu1 %v3441_v8  ;;  %v3145_v38 = vmin.f32 %v14075_v56, 0.0  ;;  %v14095_v20 = vpop.f32.mrb[97].mxu1  ;;  %vm7135_vm6 = vcmp.gt.f32.partialorder %v14008_v42, 0.0  ;;  %v17470_v8 = vld [vmem:[#allocation73_spill] sm:$0xff] }
 0x397   : > { %v7103_v21 = vmul.f32 0.1, %v8907_v47  ;;  %v7032_v63 = vmul.f32 1.442695, %v6979_v40  ;;  %v14098_v22 = vpop.f32.mrb[98].mxu1  ;;  %v7166_v0 = vsel %vm7134_vm4, %v13981_v49, %v7102_v45  ;;  %v8912_v33 = vadd.f32 -1.0, %v10153_v50 }
 0x398   : > { %v7169_v44 = vsel %vm7137_vm5, %v13985_v58, %v7105_v39  ;;  %v3148_v58 = vmin.f32 %v14086_v34, 0.0  ;;  %v8587_v18 = vadd.f32 -1.0, %v14002_v10  ;;  %v14105_v29 = vpop.f32.mrb[99].mxu1  ;;  %v10155_v37 = vpop.eup %10154  ;;  %v14110_v6 = vadd.f32 %v13806_v9, %v13656_v3  ;;  %v14139_v47 = vld [vmem:[%s16935_s7] ss:$0 sm:$0xff] }
 0x399   : > { %v7191_v5 = vpack.c.bf16 %v7169_v44, %v7168_v46  ;;  %v7167_v26 = vsel %vm7135_vm6, %v14008_v42, %v7103_v21  ;;  %10162 = vpow2.f32 %v7032_v63  ;;  %v14114_v11 = vadd.f32 %v13656_v3, %v13828_v30  ;;  %v17471_v21 = vld [vmem:[#allocation80_spill] sm:$0xff] }
 0x39a   : > { %v10157_v49 = vpop.eup %10156  ;;  %10164 = vpow2.f32 %v3213_v7  ;;  %v7190_v2 = vpack.c.bf16 %v7167_v26, %v7166_v0  ;;  %v3177_v4 = vmul.f32 10.0, %v3145_v38  ;;  %v3298_v19 = vmul.f32 0.1, %v8587_v18 }
 0x39b   : > { %vm3330_vm7 = vcmp.gt.f32.partialorder %v13822_v55, 0.0  ;;  %10166 = vpow2.f32 %v3215_v41  ;;  %vm7140_vm8 = vcmp.gt.f32.partialorder %v14014_v35, 0.0  ;;  %v6952_v10 = vmin.f32 %v14110_v6, 0.0  ;;  %v10159_v42 = vpop.eup %10158 }
 0x39c   : > { %v7108_v24 = vmul.f32 0.1, %v8912_v33  ;;  %vm7141_vm9 = vcmp.gt.f32.partialorder %v14038_v31, 0.0  ;;  %v3362_v9 = vsel %vm3330_vm7, %v13822_v55, %v3298_v19  ;;  %v6950_v30 = vmin.f32 %v14114_v11, 0.0  ;;  %9502 = vmatprep.mubr.msk.bf16.mxu1 %vm2923_vm10, %v7190_v2  ;;  %v17472_v33 = vld [vmem:[#allocation83_spill] sm:$0xff]  ;;  %v14161_v18 = vpop.f32.mrb[100].mxu1 }
 0x39d   : > { %v10161_v7 = vpop.eup %10160  ;;  %vm3335_vm11 = vcmp.gt.f32.partialorder %v13925_v59, 0.0  ;;  %10168 = vpow2.f32 %v3225_v23  ;;  %v3180_v27 = vmul.f32 10.0, %v3148_v58  ;;  %v3401_v41 = vmul.f32 %v13866_v60, %v3362_v9  ;;  %9503 = vmatmul.mubr.msk.bf16.gmra.mrb[176].mxu1 %vm2923_vm10, %v7191_v5 }
 0x39e   : > { %v6984_v15 = vmul.f32 10.0, %v6952_v10  ;;  %vm3336_vm12 = vcmp.gt.f32.partialorder %v13949_v43, 0.0  ;;  %v8913_v1 = vadd.f32 -1.0, %v10161_v7  ;;  %v14127_v45 = vmul.f32 1.442695, %v3177_v4  ;;  %v14166_v4 = vpop.f32.mrb[101].mxu1 }
 0x39f   : > { %v6982_v55 = vmul.f32 10.0, %v6950_v30  ;;  %v14131_v39 = vadd.f32 %v13837_v13, %v13656_v3  ;;  %v8910_v12 = vadd.f32 -1.0, %v10159_v42  ;;  %vm7138_vm13 = vcmp.gt.f32.partialorder %v14030_v52, 0.0 }
 0x3a0   : > { %vm7139_vm14 = vcmp.gt.f32.partialorder %v14069_v48, 0.0  ;;  %v3444_v50 = vsel %vm3428_vm2, %v3401_v41, 0.0  ;;  %v14143_v40 = vadd.f32 %v14139_v47, %v17470_v8  ;;  %v7042_v46 = vmul.f32 1.442695, %v6984_v15 }
 0x3a1   : > { %v14148_v13 = vsel %vm7140_vm8, %v14014_v35, %v7108_v24  ;;  %v7109_v44 = vmul.f32 0.1, %v8913_v1  ;;  %3445 = vadd.xlane.f32.xlu0 %v3444_v50  ;;  %v7038_v23 = vmul.f32 1.442695, %v6982_v55  ;;  %v6953_v38 = vmin.f32 %v14131_v39, 0.0  ;;  %v17473_v55 = vld [vmem:[#allocation85_spill] sm:$0xff] }
 0x3a2   : > { %v14151_v5 = vmul.f32 1.442695, %v3180_v27  ;;  %v14155_v63 = vadd.f32 %v13656_v3, %v17471_v21  ;;  %v8592_v0 = vadd.f32 -1.0, %v10155_v37  ;;  %v14159_v58 = vadd.f32 %v17472_v33, %v13656_v3  ;;  %v14170_v3 = vpop.f32.mrb[102].mxu1  ;;  %v10419_v1 = vld [vmem:[%s16933_s5 + $0x3] ss:$0 sm:$0xff] }
 0x3a3   : > { %v7173_v35 = vsel %vm7141_vm9, %v14038_v31, %v7109_v44  ;;  %10170 = vpow2.f32 %v7042_v46  ;;  %v6985_v26 = vmul.f32 10.0, %v6953_v38  ;;  %v8593_v2 = vadd.f32 -1.0, %v10157_v49  ;;  %v10163_v19 = vpop.eup %10162  ;;  %v14182_v50 = vpop.f32.mrb[103].mxu1 }
 0x3a4   : > { %v7106_v10 = vmul.f32 0.1, %v8910_v12  ;;  %v7193_v42 = vpack.c.bf16 %v7173_v35, %v14148_v13  ;;  %10172 = vpow2.f32 %v7038_v23  ;;  %v6951_v37 = vmin.f32 %v14155_v63, 0.0  ;;  %v10165_v24 = vpop.eup %10164 }
 0x3a5   : > { %v8911_v9 = vadd.f32 -1.0, %v10163_v19  ;;  %v7044_v30 = vmul.f32 1.442695, %v6985_v26  ;;  %v3303_v7 = vmul.f32 0.1, %v8592_v0  ;;  %v6956_v31 = vmin.f32 %v14159_v58, 0.0  ;;  %v14173_v27 = vpop.eup %10166 }
 0x3a6   : > { %v3146_v49 = vmin.f32 %v14143_v40, 0.0  ;;  %v6983_v41 = vmul.f32 10.0, %v6951_v37  ;;  %v3304_v15 = vmul.f32 0.1, %v8593_v2  ;;  %v14180_v12 = vadd.f32 %v10419_v1, %v17473_v55 }
 0x3a7   : > { %v7107_v8 = vmul.f32 0.1, %v8911_v9  ;;  %10174 = vpow2.f32 %v7044_v30  ;;  %v3367_v46 = vsel %vm3335_vm11, %v13925_v59, %v3303_v7  ;;  %v6988_v13 = vmul.f32 10.0, %v6956_v31  ;;  %v14187_v44 = vpop.eup %10168  ;;  %v17474_v9 = vld [vmem:[#allocation76_spill] sm:$0xff]  ;;  %v17476_v31 = vld [vmem:[#allocation78_spill] sm:$0xff] }
 0x3a8   : > { %v7040_v23 = vmul.f32 1.442695, %v6983_v41  ;;  %v3406_v38 = vmul.f32 %v13866_v60, %v3367_v46  ;;  %v3368_v21 = vsel %vm3336_vm12, %v13949_v43, %v3304_v15  ;;  %v6954_v0 = vmin.f32 %v14180_v12, 0.0  ;;  %v17477_v15 = vld [vmem:[#allocation5_spill] sm:$0xff] }
 0x3a9   : > { %v7170_v33 = vsel %vm7138_vm13, %v14030_v52, %v7106_v10  ;;  %v7171_v59 = vsel %vm7139_vm14, %v14069_v48, %v7107_v8  ;;  %v7050_v35 = vmul.f32 1.442695, %v6988_v13  ;;  %v3407_v26 = vmul.f32 %v13866_v60, %v3368_v21  ;;  %v17475_v52 = vld [vmem:[#allocation86_spill] sm:$0xff]  ;;  %v14218_v8 = vpop.f32.mrb[104].mxu1 }
 0x3aa   : > { %v7192_v2 = vpack.c.bf16 %v7171_v59, %v7170_v33  ;;  %10176 = vpow2.f32 %v7040_v23  ;;  %v3459_v19 = vsel %vm3428_vm2, %v3406_v38, 0.0  ;;  %v6986_v37 = vmul.f32 10.0, %v6954_v0 }
 0x3ab   : > { %3460 = vadd.xlane.f32.xlu1 %v3459_v19  ;;  %10178 = vpow2.f32 %v7050_v35  ;;  %v3462_v43 = vsel %vm3428_vm2, %v3407_v26, 0.0  ;;  %v14205_v30 = vadd.f32 %v14139_v47, %v17474_v9  ;;  %v14208_v10 = vadd.f32 %v10419_v1, %v17475_v52 }
 0x3ac   : > { %3463 = vadd.xlane.f32.xlu0 %v3462_v43  ;;  %v7046_v48 = vmul.f32 1.442695, %v6986_v37  ;;  %v8590_v7 = vadd.f32 -1.0, %v10165_v24  ;;  %v14212_v41 = vadd.f32 %v14139_v47, %v17476_v31  ;;  %v14215_v55 = vadd.f32 %v10419_v1, %v17477_v15  ;;  %9506 = vmatprep.mubr.msk.bf16.mxu1 %vm2923_vm10, %v7192_v2  ;;  %v14224_v24 = vpop.f32.mrb[105].mxu1 }
 0x3ad   : > { %v10171_v46 = vpop.eup %10170  ;;  %vm3333_vm15 = vcmp.gt.f32.partialorder %v13940_v17, 0.0  ;;  %10180 = vpow2.f32 %v14127_v45  ;;  %v6957_v13 = vmin.f32 %v14208_v10, 0.0  ;;  %9507 = vmatmul.mubr.msk.bf16.gmra.mrb[180].mxu1 %vm2923_vm10, %v7193_v42  ;;  %v3178_v38 = vmul.f32 10.0, %v3146_v49  ;;  %v14226_v0 = vpop.f32.mrb[106].mxu1 }
 0x3ae   : > { %v10173_v23 = vpop.eup %10172  ;;  %v8916_v21 = vadd.f32 -1.0, %v10171_v46  ;;  %10182 = vpow2.f32 %v7046_v48  ;;  %v3301_v1 = vmul.f32 0.1, %v8590_v7  ;;  %v3151_v59 = vmin.f32 %v14205_v30, 0.0  ;;  %v14230_v45 = vpop.f32.mrb[107].mxu1 }
 0x3af   : > { %v8914_v33 = vadd.f32 -1.0, %v10173_v23  ;;  %v6989_v35 = vmul.f32 10.0, %v6957_v13  ;;  %v3149_v26 = vmin.f32 %v14212_v41, 0.0  ;;  %vm3334_vm0 = vcmp.gt.f32.partialorder %v13962_v16, 0.0  ;;  %v17478_v23 = vld [vmem:[#allocation79_spill] sm:$0xff] }
 0x3b0   : > { %10184 = vpow2.f32 %v14151_v5  ;;  %vm7144_vm1 = vcmp.gt.f32.partialorder %v14110_v6, 0.0  ;;  %v3365_v42 = vsel %vm3333_vm15, %v13940_v17, %v3301_v1  ;;  %v6955_v49 = vmin.f32 %v14215_v55, 0.0  ;;  %v14247_v1 = vpop.f32.mrb[108].mxu1 }
 0x3b1   : > { %v10175_v2 = vpop.eup %10174  ;;  %v7112_v19 = vmul.f32 0.1, %v8916_v21  ;;  %vm7142_vm3 = vcmp.gt.f32.partialorder %v14114_v11, 0.0  ;;  %v7052_v37 = vmul.f32 1.442695, %v6989_v35  ;;  %v3404_v43 = vmul.f32 %v13866_v60, %v3365_v42 }
 0x3b2   : > { %v3223_v9 = vmul.f32 1.442695, %v3178_v38  ;;  %v8917_v52 = vadd.f32 -1.0, %v10175_v2  ;;  %vm7145_vm4 = vcmp.gt.f32.partialorder %v14131_v39, 0.0  ;;  %v6987_v5 = vmul.f32 10.0, %v6955_v49  ;;  %v14257_v49 = vpop.f32.mrb[109].mxu1 }
 0x3b3   : > { %v7110_v48 = vmul.f32 0.1, %v8914_v33  ;;  %v3183_v7 = vmul.f32 10.0, %v3151_v59  ;;  %v3453_v31 = vsel %vm3428_vm2, %v3404_v43, 0.0  ;;  %v3181_v15 = vmul.f32 10.0, %v3149_v26  ;;  %v17479_v26 = vld [vmem:[#allocation51_spill] sm:$0xff] }
 0x3b4   : > { %v10177_v17 = vpop.eup %10176  ;;  %v7113_v46 = vmul.f32 0.1, %v8917_v52  ;;  %10186 = vpow2.f32 %v7052_v37  ;;  %3454 = vadd.xlane.f32.xlu1 %v3453_v31  ;;  %v7048_v13 = vmul.f32 1.442695, %v6987_v5  ;;  %v14245_v21 = vadd.f32 %v14139_v47, %v17478_v23  ;;  %v14263_v52 = vpop.f32.mrb[110].mxu1 }
 0x3b5   : > { %v10179_v38 = vpop.eup %10178  ;;  %v7176_v33 = vsel %vm7144_vm1, %v14110_v6, %v7112_v19  ;;  %v8915_v59 = vadd.f32 -1.0, %v10177_v17  ;;  %v8591_v35 = vadd.f32 -1.0, %v14173_v27  ;;  %v14255_v42 = vadd.f32 %v14139_v47, %v17479_v26  ;;  %v14265_v31 = vpop.f32.mrb[111].mxu1 }
 0x3b6   : > { %v7177_v2 = vsel %vm7145_vm4, %v14131_v39, %v7113_v46  ;;  %v8920_v37 = vadd.f32 -1.0, %v10179_v38  ;;  %10188 = vpow2.f32 %v7048_v13  ;;  %v3152_v43 = vmin.f32 %v14245_v21, 0.0  ;;  %17480 = vst [vmem:[#allocation7_spill] sm:$0xff] %v14265_v31 }
 0x3b7   : > { %v10181_v6 = vpop.eup %10180  ;;  %10190 = vpow2.f32 %v3223_v9  ;;  %v7195_v19 = vpack.c.bf16 %v7177_v2, %v7176_v33  ;;  %v7111_v27 = vmul.f32 0.1, %v8915_v59  ;;  %v3302_v5 = vmul.f32 0.1, %v8591_v35 }
 0x3b8   : > { %v10183_v17 = vpop.eup %10182  ;;  %vm7143_vm5 = vcmp.gt.f32.partialorder %v14155_v63, 0.0  ;;  %v3233_v23 = vmul.f32 1.442695, %v3183_v7  ;;  %v3184_v26 = vmul.f32 10.0, %v3152_v43  ;;  %v3150_v39 = vmin.f32 %v14255_v42, 0.0 }
 0x3b9   : > { %v7174_v46 = vsel %vm7142_vm3, %v14114_v11, %v7110_v48  ;;  %v7175_v13 = vsel %vm7143_vm5, %v14155_v63, %v7111_v27  ;;  %v8918_v38 = vadd.f32 -1.0, %v10183_v17  ;;  %v3366_v9 = vsel %vm3334_vm0, %v13962_v16, %v3302_v5  ;;  %v14287_v63 = vpop.f32.mrb[112].mxu1 }
 0x3ba   : > { %v10185_v33 = vpop.eup %10184  ;;  %v7194_v59 = vpack.c.bf16 %v7175_v13, %v7174_v46  ;;  %v7116_v35 = vmul.f32 0.1, %v8920_v37  ;;  %v3229_v2 = vmul.f32 1.442695, %v3181_v15  ;;  %v3405_v7 = vmul.f32 %v13866_v60, %v3366_v9  ;;  %v14291_v5 = vpop.f32.mrb[113].mxu1 }
 0x3bb   : > { %vm3339_vm6 = vcmp.gt.f32.partialorder %v14034_v57, 0.0  ;;  %vm3337_vm7 = vcmp.gt.f32.partialorder %v14075_v56, 0.0  ;;  %v3235_v43 = vmul.f32 1.442695, %v3184_v26  ;;  %v3182_v31 = vmul.f32 10.0, %v3150_v39  ;;  %v17481_v26 = vld [vmem:[#allocation81_spill] sm:$0xff] }
 0x3bc   : > { %vm3340_vm8 = vcmp.gt.f32.partialorder %v14086_v34, 0.0  ;;  %vm7148_vm9 = vcmp.gt.f32.partialorder %v14159_v58, 0.0  ;;  %vm7146_vm11 = vcmp.gt.f32.partialorder %v14180_v12, 0.0  ;;  %v3456_v16 = vsel %vm3428_vm2, %v3405_v7, 0.0  ;;  %9510 = vmatprep.mubr.msk.bf16.mxu1 %vm2923_vm10, %v7194_v59  ;;  %v14297_v46 = vpop.f32.mrb[114].mxu1 }
 0x3bd   : > { %v7114_v11 = vmul.f32 0.1, %v8918_v38  ;;  %10192 = vpow2.f32 %v3233_v23  ;;  %vm7149_vm12 = vcmp.gt.f32.partialorder %v14208_v10, 0.0  ;;  %vm7147_vm13 = vcmp.gt.f32.partialorder %v14215_v55, 0.0  ;;  %3457 = vadd.xlane.f32.xlu0 %v3456_v16  ;;  %9511 = vmatmul.mubr.msk.bf16.gmra.mrb[184].mxu1 %vm2923_vm10, %v7195_v19 }
 0x3be   : > { %v10187_v48 = vpop.eup %10186  ;;  %v7180_v15 = vsel %vm7148_vm9, %v14159_v58, %v7116_v35  ;;  %10194 = vpow2.f32 %v3229_v2  ;;  %v8596_v37 = vadd.f32 -1.0, %v14187_v44  ;;  %v8597_v27 = vadd.f32 -1.0, %v10185_v33  ;;  %v17482_v58 = vld [vmem:[#allocation84_spill] sm:$0xff]  ;;  %v14303_v44 = vpop.f32.mrb[115].mxu1 }
 0x3bf   : > { %v8921_v17 = vadd.f32 -1.0, %v10187_v48  ;;  %10196 = vpow2.f32 %v3235_v43  ;;  %v3231_v23 = vmul.f32 1.442695, %v3182_v31  ;;  %v14295_v39 = vadd.f32 %v14139_v47, %v17481_v26 }
 0x3c0   : > { %v10189_v19 = vpop.eup %10188  ;;  %v3307_v13 = vmul.f32 0.1, %v8596_v37  ;;  %v3308_v38 = vmul.f32 0.1, %v8597_v27  ;;  %v8594_v9 = vadd.f32 -1.0, %v10181_v6  ;;  %v14301_v59 = vadd.f32 %v14139_v47, %v17482_v58 }
 0x3c1   : > { %v10191_v33 = vpop.eup %10190  ;;  %v7178_v31 = vsel %vm7146_vm11, %v14180_v12, %v7114_v11  ;;  %v7117_v35 = vmul.f32 0.1, %v8921_v17  ;;  %v8919_v2 = vadd.f32 -1.0, %v10189_v19  ;;  %v3155_v7 = vmin.f32 %v14295_v39, 0.0 }
 0x3c2   : > { %v3371_v43 = vsel %vm3339_vm6, %v14034_v57, %v3307_v13  ;;  %v3372_v6 = vsel %vm3340_vm8, %v14086_v34, %v3308_v38  ;;  %v3305_v16 = vmul.f32 0.1, %v8594_v9  ;;  %v3153_v48 = vmin.f32 %v14301_v59, 0.0  ;;  %v17483_v9 = vld [vmem:[#allocation21_spill] sm:$0xff] }
 0x3c3   : > { %v7181_v37 = vsel %vm7149_vm12, %v14208_v10, %v7117_v35  ;;  %v7115_v12 = vmul.f32 0.1, %v8919_v2  ;;  %v3410_v11 = vmul.f32 %v13866_v60, %v3371_v43  ;;  %v3411_v27 = vmul.f32 %v13866_v60, %v3372_v6 }
 0x3c4   : > { %v7197_v17 = vpack.c.bf16 %v7181_v37, %v7180_v15  ;;  %10198 = vpow2.f32 %v3231_v23  ;;  %v3187_v26 = vmul.f32 10.0, %v3155_v7  ;;  %v3369_v57 = vsel %vm3337_vm7, %v14075_v56, %v3305_v16  ;;  %v14339_v7 = vpop.f32.mrb[116].mxu1 }
 0x3c5   : > { %v7179_v34 = vsel %vm7147_vm13, %v14215_v55, %v7115_v12  ;;  %v3471_v19 = vsel %vm3428_vm2, %v3410_v11, 0.0  ;;  %v3474_v10 = vsel %vm3428_vm2, %v3411_v27, 0.0  ;;  %v3408_v13 = vmul.f32 %v13866_v60, %v3369_v57  ;;  %v14344_v16 = vpop.f32.mrb[117].mxu1 }
 0x3c6   : > { %v7196_v38 = vpack.c.bf16 %v7179_v34, %v7178_v31  ;;  %3472 = vadd.xlane.f32.xlu1 %v3471_v19  ;;  %3475 = vadd.xlane.f32.xlu0 %v3474_v10  ;;  %v3185_v15 = vmul.f32 10.0, %v3153_v48  ;;  %v14332_v58 = vadd.f32 %v14139_v47, %v17483_v9  ;;  %v8595_v56 = vadd.f32 -1.0, %v10191_v33  ;;  %v14348_v48 = vpop.f32.mrb[118].mxu1 }
 0x3c7   : > { %v10193_v23 = vpop.eup %10192  ;;  %v14336_v35 = vadd.f32 %v14139_v47, %v13895_v62  ;;  %v3241_v2 = vmul.f32 1.442695, %v3187_v26  ;;  %v3465_v31 = vsel %vm3428_vm2, %v3408_v13, 0.0  ;;  %vm3338_vm14 = vcmp.gt.f32.partialorder %v14143_v40, 0.0  ;;  %v14351_v27 = vpop.f32.mrb[119].mxu1 }
 0x3c8   : > { %v10195_v55 = vpop.eup %10194  ;;  %9514 = vmatprep.mubr.msk.bf16.mxu1 %vm2923_vm10, %v7196_v38  ;;  %v3156_v43 = vmin.f32 %v14332_v58, 0.0  ;;  %v3306_v6 = vmul.f32 0.1, %v8595_v56  ;;  %v3237_v62 = vmul.f32 1.442695, %v3185_v15  ;;  %v8600_v11 = vadd.f32 -1.0, %v10193_v23 }
 0x3c9   : > { %v10197_v60 = vpop.eup %10196  ;;  %9515 = vmatmul.mubr.msk.bf16.gmra.mrb[188].mxu1 %vm2923_vm10, %v7197_v17  ;;  %v3154_v33 = vmin.f32 %v14336_v35, 0.0  ;;  %v14356_v17 = vld [vmem:[%s16936_s8] ss:$0 sm:$0xff]  ;;  %vm3343_vm10 = vcmp.gt.f32.partialorder %v14205_v30, 0.0  ;;  %10200 = vpow2.f32 %v3241_v2  ;;  %v8598_v15 = vadd.f32 -1.0, %v10195_v55 }
 0x3ca   : > { %3466 = vadd.xlane.f32.xlu1 %v3465_v31  ;;  %v3188_v37 = vmul.f32 10.0, %v3156_v43  ;;  %v3370_v12 = vsel %vm3338_vm14, %v14143_v40, %v3306_v6  ;;  %v8601_v34 = vadd.f32 -1.0, %v10197_v60  ;;  %v3311_v10 = vmul.f32 0.1, %v8600_v11 }
 0x3cb   : > { %v3409_v26 = vmul.f32 %v14356_v17, %v3370_v12  ;;  %v3186_v57 = vmul.f32 10.0, %v3154_v33  ;;  %10202 = vpow2.f32 %v3237_v62  ;;  %vm3344_vm15 = vcmp.gt.f32.partialorder %v14245_v21, 0.0  ;;  %v14377_v62 = vpop.f32.mrb[120].mxu1 }
 0x3cc   : > { %v3243_v19 = vmul.f32 1.442695, %v3188_v37  ;;  %v3312_v38 = vmul.f32 0.1, %v8601_v34  ;;  %v3375_v23 = vsel %vm3343_vm10, %v14205_v30, %v3311_v10  ;;  %v14365_v9 = vadd.f32 %v14139_v47, %v13964_v51  ;;  %v14382_v12 = vpop.f32.mrb[121].mxu1 }
 0x3cd   : > { %v3468_v40 = vsel %vm3428_vm2, %v3409_v26, 0.0  ;;  %v3239_v56 = vmul.f32 1.442695, %v3186_v57  ;;  %v3414_v2 = vmul.f32 %v14356_v17, %v3375_v23  ;;  %v3309_v31 = vmul.f32 0.1, %v8598_v15 }
 0x3ce   : > { %v10199_v13 = vpop.eup %10198  ;;  %10204 = vpow2.f32 %v3243_v19  ;;  %3469 = vadd.xlane.f32.xlu0 %v3468_v40  ;;  %v3376_v60 = vsel %vm3344_vm15, %v14245_v21, %v3312_v38  ;;  %vm3341_vm0 = vcmp.gt.f32.partialorder %v14212_v41, 0.0  ;;  %v14373_v43 = vadd.f32 %v14139_v47, %v13988_v25 }
 0x3cf   : > { %v3415_v55 = vmul.f32 %v14356_v17, %v3376_v60  ;;  %v3483_v30 = vsel %vm3428_vm2, %v3414_v2, 0.0  ;;  %v3373_v6 = vsel %vm3341_vm0, %v14212_v41, %v3309_v31  ;;  %v8599_v51 = vadd.f32 -1.0, %v10199_v13  ;;  %v14388_v41 = vpop.f32.mrb[122].mxu1 }
 0x3d0   : > { %3484 = vadd.xlane.f32.xlu1 %v3483_v30  ;;  %v3159_v21 = vmin.f32 %v14365_v9, 0.0  ;;  %v3412_v37 = vmul.f32 %v14356_v17, %v3373_v6  ;;  %10206 = vpow2.f32 %v3239_v56  ;;  %v14386_v25 = vadd.f32 %v14139_v47, %v13972_v53  ;;  %v14392_v57 = vpop.f32.mrb[123].mxu1 }
 0x3d1   : > { %v3486_v33 = vsel %vm3428_vm2, %v3415_v55, 0.0  ;;  %v3310_v11 = vmul.f32 0.1, %v8599_v51  ;;  %vm3342_vm1 = vcmp.gt.f32.partialorder %v14255_v42, 0.0  ;;  %v3160_v26 = vmin.f32 %v14373_v43, 0.0 }
 0x3d2   : > { %3487 = vadd.xlane.f32.xlu0 %v3486_v33  ;;  %v3477_v34 = vsel %vm3428_vm2, %v3412_v37, 0.0  ;;  %v3191_v13 = vmul.f32 10.0, %v3159_v21  ;;  %v3157_v38 = vmin.f32 %v14386_v25, 0.0  ;;  %v14400_v15 = vadd.f32 %v14139_v47, %v13997_v36 }
 0x3d3   : > { %v3374_v19 = vsel %vm3342_vm1, %v14255_v42, %v3310_v11  ;;  %v10201_v10 = vpop.eup %10200  ;;  %v3192_v56 = vmul.f32 10.0, %v3160_v26  ;;  %vm3347_vm3 = vcmp.gt.f32.partialorder %v14295_v39, 0.0  ;;  %v14405_v51 = vpop.f32.mrb[124].mxu1  ;;  %vm3348_vm4 = vcmp.gt.f32.partialorder %v14332_v58, 0.0 }
 0x3d4   : > { %3478 = vadd.xlane.f32.xlu1 %v3477_v34  ;;  %v3413_v40 = vmul.f32 %v14356_v17, %v3374_v19  ;;  %v8604_v60 = vadd.f32 -1.0, %v10201_v10  ;;  %v3249_v31 = vmul.f32 1.442695, %v3191_v13  ;;  %v3189_v55 = vmul.f32 10.0, %v3157_v38  ;;  %v14407_v37 = vpop.f32.mrb[125].mxu1 }
 0x3d5   : > { %v10203_v53 = vpop.eup %10202  ;;  %v3158_v30 = vmin.f32 %v14400_v15, 0.0  ;;  %v3251_v33 = vmul.f32 1.442695, %v3192_v56  ;;  %v14411_v34 = vpop.f32.mrb[126].mxu1  ;;  %vm3345_vm5 = vcmp.gt.f32.partialorder %v14301_v59, 0.0  ;;  %vm3346_vm6 = vcmp.gt.f32.partialorder %v14336_v35, 0.0 }
 0x3d6   : > { %v3480_v2 = vsel %vm3428_vm2, %v3413_v40, 0.0  ;;  %v3315_v6 = vmul.f32 0.1, %v8604_v60  ;;  %v8602_v36 = vadd.f32 -1.0, %v10203_v53  ;;  %v14416_v40 = vpop.f32.mrb[127].mxu1  ;;  %10208 = vpow2.f32 %v3249_v31 }
 0x3d7   : > { %3481 = vadd.xlane.f32.xlu0 %v3480_v2  ;;  %v3245_v53 = vmul.f32 1.442695, %v3189_v55  ;;  %v3190_v38 = vmul.f32 10.0, %v3158_v30  ;;  %10210 = vpow2.f32 %v3251_v33  ;;  %vm3351_vm7 = vcmp.gt.f32.partialorder %v14365_v9, 0.0 }
 0x3d8   : > { %v10205_v23 = vpop.eup %10204  ;;  %v3379_v26 = vsel %vm3347_vm3, %v14295_v39, %v3315_v6  ;;  %v3313_v13 = vmul.f32 0.1, %v8602_v36  ;;  %v14433_v6 = vadd.f32 %v14139_v47, %v14058_v28  ;;  %vm3352_vm8 = vcmp.gt.f32.partialorder %v14373_v43, 0.0 }
 0x3d9   : > { %v8605_v42 = vadd.f32 -1.0, %v10205_v23  ;;  %v3418_v19 = vmul.f32 %v14356_v17, %v3379_v26  ;;  %10212 = vpow2.f32 %v3245_v53  ;;  %v3247_v30 = vmul.f32 1.442695, %v3190_v38 }
 0x3da   : > { %v10207_v11 = vpop.eup %10206  ;;  %v3377_v39 = vsel %vm3345_vm5, %v14301_v59, %v3313_v13  ;;  %v14444_v26 = vadd.f32 %v14139_v47, %v14054_v32  ;;  %v14458_v32 = vadd.f32 %v14139_v47, %v14063_v54  ;;  %vm3349_vm9 = vcmp.gt.f32.partialorder %v14386_v25, 0.0 }
 0x3db   : > { %v3316_v21 = vmul.f32 0.1, %v8605_v42  ;;  %v3495_v56 = vsel %vm3428_vm2, %v3418_v19, 0.0  ;;  %v8603_v2 = vadd.f32 -1.0, %v10207_v11  ;;  %v3416_v42 = vmul.f32 %v14356_v17, %v3377_v39  ;;  %v14428_v55 = vpop.f32.mrb[128].mxu1 }
 0x3dc   : > { %3496 = vadd.xlane.f32.xlu1 %v3495_v56  ;;  %10214 = vpow2.f32 %v3247_v30  ;;  %v3161_v38 = vmin.f32 %v14444_v26, 0.0  ;;  %v3162_v54 = vmin.f32 %v14458_v32, 0.0  ;;  %vm3350_vm11 = vcmp.gt.f32.partialorder %v14400_v15, 0.0 }
 0x3dd   : > { %v3380_v10 = vsel %vm3348_vm4, %v14332_v58, %v3316_v21  ;;  %v14425_v58 = vadd.f32 %v14139_v47, %v14045_v61  ;;  %v3314_v31 = vmul.f32 0.1, %v8603_v2  ;;  %v3489_v59 = vsel %vm3428_vm2, %v3416_v42, 0.0  ;;  %v14436_v21 = vpop.f32.mrb[129].mxu1 }
 0x3de   : > { %v3419_v23 = vmul.f32 %v14356_v17, %v3380_v10  ;;  %v14439_v36 = vpop.f32.mrb[130].mxu1  ;;  %vm3353_vm13 = vcmp.gt.f32.partialorder %v14444_v26, 0.0  ;;  %vm3356_vm14 = vcmp.gt.f32.partialorder %v14433_v6, 0.0  ;;  %vm3354_vm10 = vcmp.gt.f32.partialorder %v14458_v32, 0.0 }
 0x3df   : > { %v3378_v33 = vsel %vm3346_vm6, %v14336_v35, %v3314_v31  ;;  %v3163_v11 = vmin.f32 %v14425_v58, 0.0  ;;  %v14446_v19 = vpop.f32.mrb[131].mxu1  ;;  %v3164_v35 = vmin.f32 %v14433_v6, 0.0  ;;  %vm3355_vm12 = vcmp.gt.f32.partialorder %v14425_v58, 0.0 }
 0x3e0   : > { %v3498_v60 = vsel %vm3428_vm2, %v3419_v23, 0.0  ;;  %3490 = vadd.xlane.f32.xlu1 %v3489_v59  ;;  %v3417_v61 = vmul.f32 %v14356_v17, %v3378_v33  ;;  %v10209_v10 = vpop.eup %10208  ;;  %v14454_v23 = vld [vmem:[%s16935_s7 + $0x1] ss:$0 sm:$0xff]  ;;  %v3193_v59 = vmul.f32 10.0, %v3161_v38 }
 0x3e1   : > { %3499 = vadd.xlane.f32.xlu0 %v3498_v60  ;;  %v10211_v13 = vpop.eup %10210  ;;  %v3195_v53 = vmul.f32 10.0, %v3163_v11  ;;  %v3196_v56 = vmul.f32 10.0, %v3164_v35  ;;  %v8608_v39 = vadd.f32 -1.0, %v10209_v10  ;;  %v14462_v60 = vadd.f32 %v14090_v14, %v14454_v23 }
 0x3e2   : > { %v3492_v28 = vsel %vm3428_vm2, %v3417_v61, 0.0  ;;  %v8609_v42 = vadd.f32 -1.0, %v10211_v13  ;;  %v14475_v14 = vadd.f32 %v14098_v22, %v14454_v23 }
 0x3e3   : > { %v10213_v2 = vpop.eup %10212  ;;  %v3257_v30 = vmul.f32 1.442695, %v3195_v53  ;;  %v3319_v33 = vmul.f32 0.1, %v8608_v39  ;;  %v4402_v13 = vmin.f32 %v14462_v60, 0.0  ;;  %vm4594_vm15 = vcmp.gt.f32.partialorder %v14462_v60, 0.0 }
 0x3e4   : > { %v3320_v47 = vmul.f32 0.1, %v8609_v42  ;;  %v8606_v39 = vadd.f32 -1.0, %v10213_v2  ;;  %vm4595_vm0 = vcmp.gt.f32.partialorder %v14475_v14, 0.0 }
 0x3e5   : > { %3493 = vadd.xlane.f32.xlu0 %v3492_v28  ;;  %v14464_v31 = vpop.f32.mrb[132].mxu1  ;;  %v3259_v28 = vmul.f32 1.442695, %v3196_v56  ;;  %v3383_v35 = vsel %vm3351_vm7, %v14365_v9, %v3319_v33  ;;  %10216 = vpow2.f32 %v3257_v30  ;;  %v14485_v56 = vadd.f32 %v14454_v23, %v14095_v20 }
 0x3e6   : > { %v14466_v61 = vpop.f32.mrb[133].mxu1  ;;  %v3422_v53 = vmul.f32 %v14356_v17, %v3383_v35  ;;  %v3384_v38 = vsel %vm3352_vm8, %v14373_v43, %v3320_v47  ;;  %v10215_v42 = vpop.eup %10214  ;;  %v3194_v9 = vmul.f32 10.0, %v3162_v54  ;;  %v4403_v35 = vmin.f32 %v14475_v14, 0.0 }
 0x3e7   : > { %v14470_v11 = vpop.f32.mrb[134].mxu1  ;;  %v3423_v22 = vmul.f32 %v14356_v17, %v3384_v38  ;;  %10218 = vpow2.f32 %v3259_v28  ;;  %v14493_v43 = vadd.f32 %v14454_v23, %v14105_v29  ;;  %v4434_v20 = vmul.f32 10.0, %v4402_v13 }
 0x3e8   : > { %17484 = vst [vmem:[#allocation27_spill] sm:$0xff] %v14470_v11  ;;  %v14478_v10 = vpop.f32.mrb[135].mxu1  ;;  %v3253_v11 = vmul.f32 1.442695, %v3193_v59  ;;  %v3507_v33 = vsel %vm3428_vm2, %v3422_v53, 0.0  ;;  %v8607_v59 = vadd.f32 -1.0, %v10215_v42 }
 0x3e9   : > { %17485 = vst [vmem:[#allocation88_spill] sm:$0xff] %v14478_v10  ;;  %v3317_v10 = vmul.f32 0.1, %v8606_v39  ;;  %3508 = vadd.xlane.f32.xlu1 %v3507_v33  ;;  %v3510_v2 = vsel %vm3428_vm2, %v3423_v22, 0.0  ;;  %v4400_v54 = vmin.f32 %v14485_v56, 0.0  ;;  %v4435_v38 = vmul.f32 10.0, %v4403_v35 }
 0x3ea   : > { %3511 = vadd.xlane.f32.xlu0 %v3510_v2  ;;  %10220 = vpow2.f32 %v3253_v11  ;;  %v3318_v28 = vmul.f32 0.1, %v8607_v59  ;;  %v3255_v29 = vmul.f32 1.442695, %v3194_v9  ;;  %v4401_v39 = vmin.f32 %v14493_v43, 0.0 }
 0x3eb   : > { %v3381_v30 = vsel %vm3349_vm9, %v14386_v25, %v3317_v10  ;;  %v4468_v25 = vmul.f32 1.442695, %v4434_v20  ;;  %v14508_v11 = vadd.f32 %v14161_v18, %v14454_v23  ;;  %v4432_v33 = vmul.f32 10.0, %v4400_v54 }
 0x3ec   : > { %v3420_v47 = vmul.f32 %v14356_v17, %v3381_v30  ;;  %v3382_v10 = vsel %vm3350_vm11, %v14400_v15, %v3318_v28  ;;  %v14518_v2 = vadd.f32 %v14170_v3, %v14454_v23  ;;  %10222 = vpow2.f32 %v3255_v29 }
 0x3ed   : > { %v3421_v9 = vmul.f32 %v14356_v17, %v3382_v10  ;;  %v4470_v20 = vmul.f32 1.442695, %v4435_v38  ;;  %v4433_v59 = vmul.f32 10.0, %v4401_v39  ;;  %10224 = vpow2.f32 %v4468_v25 }
 0x3ee   : > { %v3501_v13 = vsel %vm3428_vm2, %v3420_v47, 0.0  ;;  %v4406_v15 = vmin.f32 %v14508_v11, 0.0  ;;  %v14524_v54 = vadd.f32 %v14454_v23, %v14166_v4  ;;  %v4464_v28 = vmul.f32 1.442695, %v4432_v33 }
 0x3ef   : > { %v14500_v53 = vpop.f32.mrb[136].mxu1  ;;  %3502 = vadd.xlane.f32.xlu1 %v3501_v13  ;;  %v10217_v30 = vpop.eup %10216  ;;  %v3504_v18 = vsel %vm3428_vm2, %v3421_v9, 0.0  ;;  %v4407_v13 = vmin.f32 %v14518_v2, 0.0  ;;  %10226 = vpow2.f32 %v4470_v20  ;;  %v4466_v29 = vmul.f32 1.442695, %v4433_v59 }
 0x3f0   : > { %v14504_v22 = vpop.f32.mrb[137].mxu1  ;;  %3505 = vadd.xlane.f32.xlu0 %v3504_v18  ;;  %v8612_v3 = vadd.f32 -1.0, %v10217_v30  ;;  %v4438_v38 = vmul.f32 10.0, %v4406_v15  ;;  %v4404_v39 = vmin.f32 %v14524_v54, 0.0  ;;  %10228 = vpow2.f32 %v4464_v28 }
 0x3f1   : > { %v14511_v42 = vpop.f32.mrb[138].mxu1  ;;  %v10219_v47 = vpop.eup %10218  ;;  %v4439_v18 = vmul.f32 10.0, %v4407_v13  ;;  %10230 = vpow2.f32 %v4466_v29  ;;  %v14538_v20 = vadd.f32 %v14454_v23, %v14182_v50  ;;  %v14552_v50 = vadd.f32 %v14226_v0, %v14454_v23 }
 0x3f2   : > { %17486 = vst [vmem:[#allocation92_spill] sm:$0xff] %v14511_v42  ;;  %v14514_v35 = vpop.f32.mrb[139].mxu1  ;;  %v3323_v9 = vmul.f32 0.1, %v8612_v3  ;;  %v8613_v25 = vadd.f32 -1.0, %v10219_v47  ;;  %v4436_v28 = vmul.f32 10.0, %v4404_v39 }
 0x3f3   : > { %17487 = vst [vmem:[#allocation12_spill] sm:$0xff] %v14514_v35  ;;  %v4476_v47 = vmul.f32 1.442695, %v4438_v38  ;;  %v4478_v39 = vmul.f32 1.442695, %v4439_v18  ;;  %vm4592_vm1 = vcmp.gt.f32.partialorder %v14485_v56, 0.0 }
 0x3f4   : > { %v10221_v10 = vpop.eup %10220  ;;  %v3387_v33 = vsel %vm3355_vm12, %v14425_v58, %v3323_v9  ;;  %v3324_v35 = vmul.f32 0.1, %v8613_v25  ;;  %v14548_v9 = vadd.f32 %v14218_v8, %v14454_v23  ;;  %v14562_v8 = vadd.f32 %v14454_v23, %v14224_v24 }
 0x3f5   : > { %v8610_v30 = vadd.f32 -1.0, %v10221_v10  ;;  %v3426_v59 = vmul.f32 %v14356_v17, %v3387_v33  ;;  %10232 = vpow2.f32 %v4476_v47  ;;  %v14575_v47 = vld [vmem:[%s16936_s8 + $0x1] ss:$0 sm:$0xff]  ;;  %vm4593_vm3 = vcmp.gt.f32.partialorder %v14493_v43, 0.0 }
 0x3f6   : > { %v3388_v13 = vsel %vm3356_vm14, %v14433_v6, %v3324_v35  ;;  %v10223_v10 = vpop.eup %10222  ;;  %v4405_v35 = vmin.f32 %v14538_v20, 0.0  ;;  %10234 = vpow2.f32 %v4478_v39  ;;  %v14583_v39 = vadd.f32 %v14454_v23, %v14230_v45 }
 0x3f7   : > { %v3321_v58 = vmul.f32 0.1, %v8610_v30  ;;  %v3519_v29 = vsel %vm3428_vm2, %v3426_v59, 0.0  ;;  %v3427_v25 = vmul.f32 %v14356_v17, %v3388_v13  ;;  %v10225_v38 = vpop.eup %10224  ;;  %v4472_v30 = vmul.f32 1.442695, %v4436_v28 }
 0x3f8   : > { %3520 = vadd.xlane.f32.xlu1 %v3519_v29  ;;  %v8611_v59 = vadd.f32 -1.0, %v10223_v10  ;;  %v4410_v13 = vmin.f32 %v14548_v9, 0.0  ;;  %v4411_v29 = vmin.f32 %v14552_v50, 0.0  ;;  %v4437_v10 = vmul.f32 10.0, %v4405_v35 }
 0x3f9   : > { %v14530_v4 = vpop.f32.mrb[140].mxu1  ;;  %v3385_v6 = vsel %vm3353_vm13, %v14444_v26, %v3321_v58  ;;  %v3522_v0 = vsel %vm3428_vm2, %v3427_v25, 0.0  ;;  %v10227_v18 = vpop.eup %10226  ;;  %v8706_v58 = vadd.f32 -1.0, %v10225_v38  ;;  %v4408_v25 = vmin.f32 %v14562_v8, 0.0 }
 0x3fa   : > { %v14533_v42 = vpop.f32.mrb[141].mxu1  ;;  %v3424_v33 = vmul.f32 %v14356_v17, %v3385_v6  ;;  %3523 = vadd.xlane.f32.xlu0 %v3522_v0  ;;  %v3322_v24 = vmul.f32 0.1, %v8611_v59  ;;  %v10229_v28 = vpop.eup %10228  ;;  %10236 = vpow2.f32 %v4472_v30  ;;  %v14594_v30 = vadd.f32 %v14247_v1, %v14454_v23 }
 0x3fb   : > { %17488 = vst [vmem:[#allocation9_spill] sm:$0xff] %v14533_v42  ;;  %v14541_v15 = vpop.f32.mrb[142].mxu1  ;;  %v4562_v6 = vmul.f32 0.1, %v8706_v58  ;;  %vm4598_vm4 = vcmp.gt.f32.partialorder %v14508_v11, 0.0  ;;  %vm4599_vm5 = vcmp.gt.f32.partialorder %v14518_v2, 0.0 }
 0x3fc   : > { %17489 = vst [vmem:[#allocation90_spill] sm:$0xff] %v14541_v15  ;;  %v14544_v3 = vpop.f32.mrb[143].mxu1  ;;  %v3513_v26 = vsel %vm3428_vm2, %v3424_v33, 0.0  ;;  %v3386_v0 = vsel %vm3354_vm10, %v14458_v32, %v3322_v24  ;;  %v8707_v33 = vadd.f32 -1.0, %v10227_v18  ;;  %v4443_v15 = vmul.f32 10.0, %v4411_v29 }
 0x3fd   : > { %17490 = vst [vmem:[#allocation87_spill] sm:$0xff] %v14544_v3  ;;  %3514 = vadd.xlane.f32.xlu1 %v3513_v26  ;;  %v10231_v26 = vpop.eup %10230  ;;  %v3425_v35 = vmul.f32 %v14356_v17, %v3386_v0  ;;  %v4626_v42 = vsel %vm4594_vm15, %v14462_v60, %v4562_v6  ;;  %v8704_v32 = vadd.f32 -1.0, %v10229_v28  ;;  %v4474_v18 = vmul.f32 1.442695, %v4437_v10 }
 0x3fe   : > { %v4666_v45 = vmul.f32 %v14575_v47, %v4626_v42  ;;  %v4440_v24 = vmul.f32 10.0, %v4408_v25  ;;  %v4409_v17 = vmin.f32 %v14583_v39, 0.0  ;;  %v4486_v25 = vmul.f32 1.442695, %v4443_v15 }
 0x3ff   : > { %v4560_v6 = vmul.f32 0.1, %v8704_v32  ;;  %v10233_v10 = vpop.eup %10232  ;;  %v4414_v0 = vmin.f32 %v14594_v30, 0.0  ;;  %10238 = vpow2.f32 %v4474_v18  ;;  %vm4596_vm6 = vcmp.gt.f32.partialorder %v14524_v54, 0.0 }
 0x400   : > { %v4702_v60 = vsel %vm3428_vm2, %v4666_v45, 0.0  ;;  %v10235_v32 = vpop.eup %10234  ;;  %v4480_v15 = vmul.f32 1.442695, %v4440_v24  ;;  %vm4597_vm7 = vcmp.gt.f32.partialorder %v14538_v20, 0.0  ;;  %vm4602_vm8 = vcmp.gt.f32.partialorder %v14548_v9, 0.0 }
 0x401   : > { %4703 = vadd.xlane.f32.xlu1 %v4702_v60  ;;  %v4441_v60 = vmul.f32 10.0, %v4409_v17  ;;  %v17494_v17 = vld [vmem:[#allocation7_spill] sm:$0xff]  ;;  %vm4600_vm9 = vcmp.gt.f32.partialorder %v14562_v8, 0.0  ;;  %vm4603_vm11 = vcmp.gt.f32.partialorder %v14552_v50, 0.0  ;;  %vm4601_vm12 = vcmp.gt.f32.partialorder %v14583_v39, 0.0 }
 0x402   : > { %v14569_v3 = vpop.f32.mrb[144].mxu1  ;;  %vm4606_vm13 = vcmp.gt.f32.partialorder %v14594_v30, 0.0 }
 0x403   : > { %17491 = vst [vmem:[#allocation11_spill] sm:$0xff] %v14569_v3  ;;  %v14579_v38 = vpop.f32.mrb[145].mxu1  ;;  %v4442_v3 = vmul.f32 10.0, %v4410_v13  ;;  %v3516_v13 = vsel %vm3428_vm2, %v3425_v35, 0.0  ;;  %v8705_v35 = vadd.f32 -1.0, %v10231_v26 }
 0x404   : > { %17492 = vst [vmem:[#allocation15_spill] sm:$0xff] %v14579_v38  ;;  %v14586_v59 = vpop.f32.mrb[146].mxu1  ;;  %v4563_v38 = vmul.f32 0.1, %v8707_v33  ;;  %3517 = vadd.xlane.f32.xlu0 %v3516_v13  ;;  %v4624_v33 = vsel %vm4592_vm1, %v14485_v56, %v4560_v6  ;;  %v14622_v56 = vadd.f32 %v14454_v23, %v14257_v49  ;;  %v10237_v18 = vpop.eup %10236  ;;  %v4446_v6 = vmul.f32 10.0, %v4414_v0 }
 0x405   : > { %v14590_v58 = vpop.f32.mrb[147].mxu1  ;;  %v4484_v1 = vmul.f32 1.442695, %v4442_v3  ;;  %v4561_v26 = vmul.f32 0.1, %v8705_v35  ;;  %v8711_v49 = vadd.f32 -1.0, %v10235_v32 }
 0x406   : > { %v4627_v29 = vsel %vm4595_vm0, %v14475_v14, %v4563_v38  ;;  %v14612_v14 = vadd.f32 %v14263_v52, %v14454_v23  ;;  %v4664_v38 = vmul.f32 %v14575_v47, %v4624_v33  ;;  %v14629_v33 = vadd.f32 %v14454_v23, %v17494_v17 }
 0x407   : > { %v4667_v42 = vmul.f32 %v14575_v47, %v4627_v29  ;;  %10240 = vpow2.f32 %v4484_v1  ;;  %v4625_v1 = vsel %vm4593_vm3, %v14493_v43, %v4561_v26  ;;  %v8708_v17 = vadd.f32 -1.0, %v10237_v18 }
 0x408   : > { %v4696_v52 = vsel %vm3428_vm2, %v4664_v38, 0.0  ;;  %10242 = vpow2.f32 %v4486_v25  ;;  %v4415_v24 = vmin.f32 %v14612_v14, 0.0  ;;  %v4665_v35 = vmul.f32 %v14575_v47, %v4625_v1 }
 0x409   : > { %v4705_v3 = vsel %vm3428_vm2, %v4667_v42, 0.0  ;;  %4697 = vadd.xlane.f32.xlu1 %v4696_v52  ;;  %v8710_v42 = vadd.f32 -1.0, %v10233_v10  ;;  %10244 = vpow2.f32 %v4480_v15  ;;  %v4412_v25 = vmin.f32 %v14622_v56, 0.0 }
 0x40a   : > { %v14604_v28 = vpop.f32.mrb[148].mxu1  ;;  %4706 = vadd.xlane.f32.xlu0 %v4705_v3  ;;  %v4482_v3 = vmul.f32 1.442695, %v4441_v60  ;;  %v4567_v38 = vmul.f32 0.1, %v8711_v49  ;;  %v4699_v52 = vsel %vm3428_vm2, %v4665_v35, 0.0  ;;  %v14644_v15 = vadd.f32 %v14287_v63, %v14454_v23 }
 0x40b   : > { %v14608_v13 = vpop.f32.mrb[149].mxu1  ;;  %v4566_v0 = vmul.f32 0.1, %v8710_v42  ;;  %v4492_v10 = vmul.f32 1.442695, %v4446_v6  ;;  %v4413_v43 = vmin.f32 %v14629_v33, 0.0  ;;  %v14659_v63 = vadd.f32 %v14297_v46, %v14454_v23 }
 0x40c   : > { %v14616_v45 = vpop.f32.mrb[150].mxu1  ;;  %v4631_v60 = vsel %vm4599_vm5, %v14518_v2, %v4567_v38  ;;  %v4564_v1 = vmul.f32 0.1, %v8708_v17  ;;  %10246 = vpow2.f32 %v4482_v3  ;;  %v14653_v2 = vadd.f32 %v14454_v23, %v14291_v5 }
 0x40d   : > { %v14618_v29 = vpop.f32.mrb[151].mxu1  ;;  %v4630_v32 = vsel %vm4598_vm4, %v14508_v11, %v4566_v0  ;;  %v4671_v6 = vmul.f32 %v14575_v47, %v4631_v60  ;;  %v4444_v11 = vmul.f32 10.0, %v4412_v25  ;;  %10248 = vpow2.f32 %v4492_v10 }
 0x40e   : > { %17493 = vst [vmem:[#allocation93_spill] sm:$0xff] %v14618_v29  ;;  %v4447_v29 = vmul.f32 10.0, %v4415_v24  ;;  %4700 = vadd.xlane.f32.xlu0 %v4699_v52  ;;  %v4670_v42 = vmul.f32 %v14575_v47, %v4630_v32  ;;  %v10239_v24 = vpop.eup %10238  ;;  %v4628_v38 = vsel %vm4596_vm6, %v14524_v54, %v4564_v1  ;;  %v4445_v17 = vmul.f32 10.0, %v4413_v43 }
 0x40f   : > { %v4717_v0 = vsel %vm3428_vm2, %v4671_v6, 0.0  ;;  %v4668_v5 = vmul.f32 %v14575_v47, %v4628_v38  ;;  %v4418_v46 = vmin.f32 %v14644_v15, 0.0  ;;  %v8709_v60 = vadd.f32 -1.0, %v10239_v24 }
 0x410   : > { %v4714_v35 = vsel %vm3428_vm2, %v4670_v42, 0.0  ;;  %v4494_v25 = vmul.f32 1.442695, %v4447_v29  ;;  %v4488_v42 = vmul.f32 1.442695, %v4444_v11  ;;  %v4416_v54 = vmin.f32 %v14653_v2, 0.0 }
 0x411   : > { %v10241_v3 = vpop.eup %10240  ;;  %4715 = vadd.xlane.f32.xlu1 %v4714_v35  ;;  %v4419_v6 = vmin.f32 %v14659_v63, 0.0  ;;  %v4708_v29 = vsel %vm3428_vm2, %v4668_v5, 0.0  ;;  %v4565_v10 = vmul.f32 0.1, %v8709_v60  ;;  %v4490_v35 = vmul.f32 1.442695, %v4445_v17 }
 0x412   : > { %4718 = vadd.xlane.f32.xlu0 %v4717_v0  ;;  %v10243_v32 = vpop.eup %10242  ;;  %v8714_v43 = vadd.f32 -1.0, %v10241_v3  ;;  %10250 = vpow2.f32 %v4494_v25  ;;  %v14676_v24 = vadd.f32 %v14454_v23, %v14303_v44  ;;  %v4450_v0 = vmul.f32 10.0, %v4418_v46 }
 0x413   : > { %v10245_v1 = vpop.eup %10244  ;;  %v4629_v11 = vsel %vm4597_vm7, %v14538_v20, %v4565_v10  ;;  %10252 = vpow2.f32 %v4488_v42  ;;  %v4448_v5 = vmul.f32 10.0, %v4416_v54  ;;  %v4451_v60 = vmul.f32 10.0, %v4419_v6 }
 0x414   : > { %v14640_v26 = vpop.f32.mrb[152].mxu1  ;;  %v4570_v38 = vmul.f32 0.1, %v8714_v43  ;;  %v4669_v3 = vmul.f32 %v14575_v47, %v4629_v11  ;;  %v8712_v44 = vadd.f32 -1.0, %v10245_v1  ;;  %v4417_v46 = vmin.f32 %v14676_v24, 0.0 }
 0x415   : > { %v14648_v18 = vpop.f32.mrb[153].mxu1  ;;  %4709 = vadd.xlane.f32.xlu1 %v4708_v29  ;;  %v14687_v20 = vadd.f32 %v14339_v7, %v14454_v23  ;;  %10254 = vpow2.f32 %v4490_v35  ;;  %v4500_v54 = vmul.f32 1.442695, %v4450_v0  ;;  %v4496_v29 = vmul.f32 1.442695, %v4448_v5 }
 0x416   : > { %v14655_v49 = vpop.f32.mrb[154].mxu1  ;;  %v4634_v25 = vsel %vm4602_vm8, %v14548_v9, %v4570_v38  ;;  %v14696_v10 = vadd.f32 %v14348_v48, %v14454_v23  ;;  %v4502_v1 = vmul.f32 1.442695, %v4451_v60  ;;  %vm4607_vm14 = vcmp.gt.f32.partialorder %v14612_v14, 0.0 }
 0x417   : > { %17495 = vst [vmem:[#allocation17_spill] sm:$0xff] %v14655_v49  ;;  %v14664_v52 = vpop.f32.mrb[155].mxu1  ;;  %v10247_v49 = vpop.eup %10246  ;;  %v4674_v42 = vmul.f32 %v14575_v47, %v4634_v25  ;;  %v4422_v11 = vmin.f32 %v14687_v20, 0.0  ;;  %10256 = vpow2.f32 %v4500_v54  ;;  %vm4604_vm10 = vcmp.gt.f32.partialorder %v14622_v56, 0.0 }
 0x418   : > { %17496 = vst [vmem:[#allocation20_spill] sm:$0xff] %v14664_v52  ;;  %v8715_v52 = vadd.f32 -1.0, %v10243_v32  ;;  %v4711_v32 = vsel %vm3428_vm2, %v4669_v3, 0.0  ;;  %v10249_v6 = vpop.eup %10248  ;;  %v8713_v3 = vadd.f32 -1.0, %v10247_v49  ;;  %10258 = vpow2.f32 %v4496_v29 }
 0x419   : > { %4712 = vadd.xlane.f32.xlu0 %v4711_v32  ;;  %v4726_v7 = vsel %vm3428_vm2, %v4674_v42, 0.0  ;;  %v8718_v60 = vadd.f32 -1.0, %v10249_v6  ;;  %10260 = vpow2.f32 %v4502_v1  ;;  %vm4605_vm15 = vcmp.gt.f32.partialorder %v14629_v33, 0.0 }
 0x41a   : > { %v4571_v17 = vmul.f32 0.1, %v8715_v52  ;;  %v4568_v52 = vmul.f32 0.1, %v8712_v44  ;;  %4727 = vadd.xlane.f32.xlu1 %v4726_v7  ;;  %v4423_v44 = vmin.f32 %v14696_v10, 0.0  ;;  %vm4610_vm0 = vcmp.gt.f32.partialorder %v14644_v15, 0.0 }
 0x41b   : > { %v4569_v49 = vmul.f32 0.1, %v8713_v3  ;;  %vm4608_vm1 = vcmp.gt.f32.partialorder %v14653_v2, 0.0  ;;  %vm4611_vm3 = vcmp.gt.f32.partialorder %v14659_v63, 0.0  ;;  %vm4609_vm4 = vcmp.gt.f32.partialorder %v14676_v24, 0.0 }
 0x41c   : > { %v4635_v9 = vsel %vm4603_vm11, %v14552_v50, %v4571_v17  ;;  %v4632_v35 = vsel %vm4600_vm9, %v14562_v8, %v4568_v52  ;;  %v4449_v50 = vmul.f32 10.0, %v4417_v46  ;;  %v10251_v17 = vpop.eup %10250  ;;  %v14714_v8 = vadd.f32 %v14454_v23, %v14344_v16 }
 0x41d   : > { %v4675_v43 = vmul.f32 %v14575_v47, %v4635_v9  ;;  %v4672_v48 = vmul.f32 %v14575_v47, %v4632_v35  ;;  %v10253_v42 = vpop.eup %10252  ;;  %v4454_v9 = vmul.f32 10.0, %v4422_v11  ;;  %v14723_v52 = vadd.f32 %v14454_v23, %v14351_v27 }
 0x41e   : > { %v4498_v54 = vmul.f32 1.442695, %v4449_v50  ;;  %v4574_v16 = vmul.f32 0.1, %v8718_v60  ;;  %v4633_v6 = vsel %vm4601_vm12, %v14583_v39, %v4569_v49  ;;  %v8719_v29 = vadd.f32 -1.0, %v10251_v17 }
 0x41f   : > { %v4729_v38 = vsel %vm3428_vm2, %v4675_v43, 0.0  ;;  %v4720_v46 = vsel %vm3428_vm2, %v4672_v48, 0.0  ;;  %v4420_v7 = vmin.f32 %v14714_v8, 0.0  ;;  %v4455_v43 = vmul.f32 10.0, %v4423_v44  ;;  %v10255_v50 = vpop.eup %10254 }
 0x420   : > { %4730 = vadd.xlane.f32.xlu0 %v4729_v38  ;;  %4721 = vadd.xlane.f32.xlu1 %v4720_v46  ;;  %v4673_v1 = vmul.f32 %v14575_v47, %v4633_v6  ;;  %v4638_v35 = vsel %vm4606_vm13, %v14594_v30, %v4574_v16  ;;  %v14733_v27 = vadd.f32 %v14377_v62, %v14454_v23  ;;  %v4575_v38 = vmul.f32 0.1, %v8719_v29 }
 0x421   : > { %v14703_v0 = vpop.f32.mrb[156].mxu1  ;;  %v4678_v11 = vmul.f32 %v14575_v47, %v4638_v35  ;;  %v8716_v48 = vadd.f32 -1.0, %v10253_v42  ;;  %10262 = vpow2.f32 %v4498_v54  ;;  %v4508_v3 = vmul.f32 1.442695, %v4454_v9  ;;  %v10257_v54 = vpop.eup %10256 }
 0x422   : > { %v14708_v5 = vpop.f32.mrb[157].mxu1  ;;  %v4421_v39 = vmin.f32 %v14723_v52, 0.0  ;;  %v4723_v60 = vsel %vm3428_vm2, %v4673_v1, 0.0  ;;  %v14740_v17 = vadd.f32 %v14388_v41, %v14454_v23  ;;  %v4639_v62 = vsel %vm4607_vm14, %v14612_v14, %v4575_v38  ;;  %v10259_v29 = vpop.eup %10258 }
 0x423   : > { %v14710_v25 = vpop.f32.mrb[158].mxu1  ;;  %v4738_v30 = vsel %vm3428_vm2, %v4678_v11, 0.0  ;;  %v4572_v44 = vmul.f32 0.1, %v8716_v48  ;;  %v4452_v46 = vmul.f32 10.0, %v4420_v7  ;;  %v4679_v42 = vmul.f32 %v14575_v47, %v4639_v62  ;;  %v10261_v35 = vpop.eup %10260 }
 0x424   : > { %v14718_v32 = vpop.f32.mrb[159].mxu1  ;;  %4724 = vadd.xlane.f32.xlu0 %v4723_v60  ;;  %v4510_v49 = vmul.f32 1.442695, %v4455_v43  ;;  %4739 = vadd.xlane.f32.xlu1 %v4738_v30  ;;  %v4426_v9 = vmin.f32 %v14733_v27, 0.0  ;;  %v14751_v41 = vadd.f32 %v14454_v23, %v14382_v12  ;;  %v8717_v6 = vadd.f32 -1.0, %v10255_v50 }
 0x425   : > { %v4636_v16 = vsel %vm4604_vm10, %v14622_v56, %v4572_v44  ;;  %v4453_v14 = vmul.f32 10.0, %v4421_v39  ;;  %v4741_v1 = vsel %vm3428_vm2, %v4679_v42, 0.0  ;;  %10264 = vpow2.f32 %v4508_v3 }
 0x426   : > { %v4676_v7 = vmul.f32 %v14575_v47, %v4636_v16  ;;  %v4427_v11 = vmin.f32 %v14740_v17, 0.0  ;;  %v4573_v12 = vmul.f32 0.1, %v8717_v6  ;;  %v4504_v56 = vmul.f32 1.442695, %v4452_v46 }
 0x427   : > { %10266 = vpow2.f32 %v4510_v49  ;;  %v4458_v39 = vmul.f32 10.0, %v4426_v9  ;;  %v4424_v60 = vmin.f32 %v14751_v41, 0.0  ;;  %v8722_v30 = vadd.f32 -1.0, %v10257_v54 }
 0x428   : > { %4742 = vadd.xlane.f32.xlu0 %v4741_v1  ;;  %v4732_v50 = vsel %vm3428_vm2, %v4676_v7, 0.0  ;;  %v4637_v3 = vsel %vm4605_vm15, %v14629_v33, %v4573_v12  ;;  %v4506_v44 = vmul.f32 1.442695, %v4453_v14  ;;  %v14772_v42 = vadd.f32 %v14454_v23, %v14392_v57  ;;  %v14779_v33 = vpop.permute.xlu1 %2179 }
 0x429   : > { %4733 = vadd.xlane.f32.xlu1 %v4732_v50  ;;  %v4677_v46 = vmul.f32 %v14575_v47, %v4637_v3  ;;  %v8723_v49 = vadd.f32 -1.0, %v10261_v35  ;;  %v4459_v16 = vmul.f32 10.0, %v4427_v11  ;;  %v14777_v9 = vadd.f32 %v14405_v51, %v14454_v23  ;;  %17497 = vst [vmem:[#allocation94_spill] sm:$0xff] %v14779_v33 }
 0x42a   : > { %v4578_v6 = vmul.f32 0.1, %v8722_v30  ;;  %v8720_v1 = vadd.f32 -1.0, %v10259_v29  ;;  %10268 = vpow2.f32 %v4504_v56  ;;  %v4516_v14 = vmul.f32 1.442695, %v4458_v39  ;;  %v14790_v56 = vpop.permute.xlu0 %2173 }
 0x42b   : > { %v10263_v7 = vpop.eup %10262  ;;  %v4735_v54 = vsel %vm3428_vm2, %v4677_v46, 0.0  ;;  %v4579_v57 = vmul.f32 0.1, %v8723_v49  ;;  %v4456_v35 = vmul.f32 10.0, %v4424_v60  ;;  %v4425_v29 = vmin.f32 %v14772_v42, 0.0  ;;  %17498 = vst [vmem:[#allocation26_spill] sm:$0xff] %v14790_v56 }
 0x42c   : > { %4736 = vadd.xlane.f32.xlu0 %v4735_v54  ;;  %v4642_v51 = vsel %vm4610_vm0, %v14644_v15, %v4578_v6  ;;  %v4576_v50 = vmul.f32 0.1, %v8720_v1  ;;  %10270 = vpow2.f32 %v4506_v44  ;;  %v4518_v3 = vmul.f32 1.442695, %v4459_v16 }
 0x42d   : > { %v4682_v11 = vmul.f32 %v14575_v47, %v4642_v51  ;;  %v4643_v12 = vsel %vm4611_vm3, %v14659_v63, %v4579_v57  ;;  %v4430_v30 = vmin.f32 %v14777_v9, 0.0  ;;  %v14796_v60 = vadd.f32 %v14411_v34, %v14454_v23  ;;  %v14808_v34 = vpop.permute.xlu1 %2182 }
 0x42e   : > { %v4683_v39 = vmul.f32 %v14575_v47, %v4643_v12  ;;  %v4640_v46 = vsel %vm4608_vm1, %v14653_v2, %v4576_v50  ;;  %v8721_v63 = vadd.f32 -1.0, %v10263_v7  ;;  %17499 = vst [vmem:[#allocation23_spill] sm:$0xff] %v14808_v34  ;;  %10272 = vpow2.f32 %v4516_v14 }
 0x42f   : > { %v14756_v43 = vpop.f32.mrb[160].mxu1  ;;  %v4750_v15 = vsel %vm3428_vm2, %v4682_v11, 0.0  ;;  %v10265_v6 = vpop.eup %10264  ;;  %v4680_v16 = vmul.f32 %v14575_v47, %v4640_v46  ;;  %v4512_v57 = vmul.f32 1.442695, %v4456_v35  ;;  %v4457_v51 = vmul.f32 10.0, %v4425_v29 }
 0x430   : > { %v14760_v38 = vpop.f32.mrb[161].mxu1  ;;  %4751 = vadd.xlane.f32.xlu1 %v4750_v15  ;;  %v4753_v44 = vsel %vm3428_vm2, %v4683_v39, 0.0  ;;  %v4577_v11 = vmul.f32 0.1, %v8721_v63  ;;  %10274 = vpow2.f32 %v4518_v3  ;;  %v4462_v7 = vmul.f32 10.0, %v4430_v30  ;;  %v14822_v15 = vpop.permute.xlu0 %2176 }
 0x431   : > { %v14764_v48 = vpop.f32.mrb[162].mxu1  ;;  %v10267_v54 = vpop.eup %10266  ;;  %4754 = vadd.xlane.f32.xlu0 %v4753_v44  ;;  %v14815_v12 = vadd.f32 %v14454_v23, %v14407_v37  ;;  %v4431_v39 = vmin.f32 %v14796_v60, 0.0  ;;  %v4744_v14 = vsel %vm3428_vm2, %v4680_v16, 0.0  ;;  %v8726_v29 = vadd.f32 -1.0, %v10265_v6  ;;  %17500 = vst [vmem:[#allocation28_spill] sm:$0xff] %v14822_v15 }
 0x432   : > { %v14768_v62 = vpop.f32.mrb[163].mxu1  ;;  %v4641_v35 = vsel %vm4609_vm4, %v14676_v24, %v4577_v11  ;;  %vm4614_vm5 = vcmp.gt.f32.partialorder %v14687_v20, 0.0  ;;  %v14828_v3 = vld [vmem:[%s16935_s7 + $0x2] ss:$0 sm:$0xff]  ;;  %10276 = vpow2.f32 %v4512_v57  ;;  %v4514_v46 = vmul.f32 1.442695, %v4457_v51  ;;  %v14837_v15 = vpop.permute.xlu1 %2188 }
 0x433   : > { %v4681_v37 = vmul.f32 %v14575_v47, %v4641_v35  ;;  %v4582_v63 = vmul.f32 0.1, %v8726_v29  ;;  %v8727_v44 = vadd.f32 -1.0, %v10267_v54  ;;  %v4524_v16 = vmul.f32 1.442695, %v4462_v7  ;;  %17501 = vst [vmem:[#allocation59_spill] sm:$0xff] %v14837_v15 }
 0x434   : > { %4745 = vadd.xlane.f32.xlu1 %v4744_v14  ;;  %v10269_v30 = vpop.eup %10268  ;;  %v4428_v24 = vmin.f32 %v14815_v12, 0.0  ;;  %v14834_v6 = vadd.f32 %v14454_v23, %v14416_v40  ;;  %v4463_v34 = vmul.f32 10.0, %v4431_v39  ;;  %v14841_v14 = vadd.f32 %v14428_v55, %v14828_v3  ;;  %v14850_v39 = vpop.permute.xlu0 %2185 }
 0x435   : > { %v4747_v11 = vsel %vm3428_vm2, %v4681_v37, 0.0  ;;  %v4646_v54 = vsel %vm4614_vm5, %v14687_v20, %v4582_v63  ;;  %v4583_v57 = vmul.f32 0.1, %v8727_v44  ;;  %vm4615_vm6 = vcmp.gt.f32.partialorder %v14696_v10, 0.0  ;;  %17502 = vst [vmem:[#allocation32_spill] sm:$0xff] %v14850_v39 }
 0x436   : > { %4748 = vadd.xlane.f32.xlu0 %v4747_v11  ;;  %v10271_v51 = vpop.eup %10270  ;;  %v4686_v40 = vmul.f32 %v14575_v47, %v4646_v54  ;;  %v8724_v23 = vadd.f32 -1.0, %v10269_v30  ;;  %vm4612_vm7 = vcmp.gt.f32.partialorder %v14714_v8, 0.0  ;;  %10278 = vpow2.f32 %v4514_v46 }
 0x437   : > { %v4647_v7 = vsel %vm4615_vm6, %v14696_v10, %v4583_v57  ;;  %v4429_v55 = vmin.f32 %v14834_v6, 0.0  ;;  %10280 = vpow2.f32 %v4524_v16  ;;  %v4460_v63 = vmul.f32 10.0, %v4428_v24 }
 0x438   : > { %v4762_v35 = vsel %vm3428_vm2, %v4686_v40, 0.0  ;;  %v4687_v20 = vmul.f32 %v14575_v47, %v4647_v7  ;;  %v4580_v29 = vmul.f32 0.1, %v8724_v23  ;;  %v10273_v37 = vpop.eup %10272  ;;  %v4526_v44 = vmul.f32 1.442695, %v4463_v34  ;;  %v14864_v40 = vpop.permute.xlu1 %2194 }
 0x439   : > { %v5926_v30 = vmin.f32 %v14841_v14, 0.0  ;;  %4763 = vadd.xlane.f32.xlu1 %v4762_v35  ;;  %v14858_v10 = vadd.f32 %v14828_v3, %v14446_v19  ;;  %v8725_v57 = vadd.f32 -1.0, %v10271_v51  ;;  %17503 = vst [vmem:[#allocation35_spill] sm:$0xff] %v14864_v40  ;;  %v14868_v34 = vadd.f32 %v14828_v3, %v14436_v21 }
 0x43a   : > { %v10275_v11 = vpop.eup %10274  ;;  %v4765_v46 = vsel %vm3428_vm2, %v4687_v20, 0.0  ;;  %v4644_v54 = vsel %vm4612_vm7, %v14714_v8, %v4580_v29  ;;  %vm4613_vm8 = vcmp.gt.f32.partialorder %v14723_v52, 0.0  ;;  %v4461_v19 = vmul.f32 10.0, %v4429_v55  ;;  %v14874_v20 = vpop.permute.xlu0 %2191 }
 0x43b   : > { %4766 = vadd.xlane.f32.xlu0 %v4765_v46  ;;  %v4684_v16 = vmul.f32 %v14575_v47, %v4644_v54  ;;  %v4581_v24 = vmul.f32 0.1, %v8725_v57  ;;  %v8730_v23 = vadd.f32 -1.0, %v10273_v37  ;;  %vm4618_vm9 = vcmp.gt.f32.partialorder %v14733_v27, 0.0  ;;  %17504 = vst [vmem:[#allocation66_spill] sm:$0xff] %v14874_v20 }
 0x43c   : > { %v10277_v7 = vpop.eup %10276  ;;  %v4520_v35 = vmul.f32 1.442695, %v4460_v63  ;;  %v8731_v51 = vadd.f32 -1.0, %v10275_v11  ;;  %10282 = vpow2.f32 %v4526_v44  ;;  %v5958_v21 = vmul.f32 10.0, %v5926_v30 }
 0x43d   : > { %v4756_v8 = vsel %vm3428_vm2, %v4684_v16, 0.0  ;;  %v5925_v29 = vmin.f32 %v14858_v10, 0.0  ;;  %v4645_v46 = vsel %vm4613_vm8, %v14723_v52, %v4581_v24  ;;  %v5924_v55 = vmin.f32 %v14868_v34, 0.0 }
 0x43e   : > { %4757 = vadd.xlane.f32.xlu1 %v4756_v8  ;;  %v14883_v37 = vadd.f32 %v14464_v31, %v14828_v3  ;;  %v4685_v63 = vmul.f32 %v14575_v47, %v4645_v46  ;;  %v4586_v11 = vmul.f32 0.1, %v8730_v23  ;;  %vm4619_vm11 = vcmp.gt.f32.partialorder %v14740_v17, 0.0  ;;  %v14895_v8 = vpop.permute.xlu1 %2200 }
 0x43f   : > { %v4522_v44 = vmul.f32 1.442695, %v4461_v19  ;;  %v14891_v30 = vadd.f32 %v14439_v36, %v14828_v3  ;;  %v4587_v52 = vmul.f32 0.1, %v8731_v51  ;;  %17505 = vst [vmem:[#allocation39_spill] sm:$0xff] %v14895_v8  ;;  %10284 = vpow2.f32 %v4520_v35 }
 0x440   : > { %v10279_v24 = vpop.eup %10278  ;;  %v4759_v31 = vsel %vm3428_vm2, %v4685_v63, 0.0  ;;  %v4650_v23 = vsel %vm4618_vm9, %v14733_v27, %v4586_v11  ;;  %v8728_v46 = vadd.f32 -1.0, %v10277_v7  ;;  %v5992_v19 = vmul.f32 1.442695, %v5958_v21  ;;  %v14909_v27 = vpop.permute.xlu0 %2197 }
 0x441   : > { %v5957_v40 = vmul.f32 10.0, %v5925_v29  ;;  %4760 = vadd.xlane.f32.xlu0 %v4759_v31  ;;  %v4690_v36 = vmul.f32 %v14575_v47, %v4650_v23  ;;  %v4651_v51 = vsel %vm4619_vm11, %v14740_v17, %v4587_v52  ;;  %v10281_v8 = vpop.eup %10280  ;;  %v5956_v35 = vmul.f32 10.0, %v5924_v55  ;;  %17506 = vst [vmem:[#allocation50_spill] sm:$0xff] %v14909_v27  ;;  %v17507_v17 = vld [vmem:[#allocation27_spill] sm:$0xff] }
 0x442   : > { %v5930_v63 = vmin.f32 %v14883_v37, 0.0  ;;  %v4691_v39 = vmul.f32 %v14575_v47, %v4651_v51  ;;  %v4584_v20 = vmul.f32 0.1, %v8728_v46  ;;  %vm4616_vm12 = vcmp.gt.f32.partialorder %v14751_v41, 0.0  ;;  %v14925_v46 = vpop.permute.xlu1 %2206 }
 0x443   : > { %10286 = vpow2.f32 %v4522_v44  ;;  %v5927_v7 = vmin.f32 %v14891_v30, 0.0  ;;  %v4774_v21 = vsel %vm3428_vm2, %v4690_v36, 0.0  ;;  %v14916_v29 = vadd.f32 %v14828_v3, %v14466_v61  ;;  %17508 = vst [vmem:[#allocation60_spill] sm:$0xff] %v14925_v46 }
 0x444   : > { %v14920_v55 = vadd.f32 %v17507_v17, %v14828_v3  ;;  %4775 = vadd.xlane.f32.xlu1 %v4774_v21  ;;  %v4777_v11 = vsel %vm3428_vm2, %v4691_v39, 0.0  ;;  %v4648_v52 = vsel %vm4616_vm12, %v14751_v41, %v4584_v20  ;;  %10288 = vpow2.f32 %v5992_v19 }
 0x445   : > { %v5990_v31 = vmul.f32 1.442695, %v5957_v40  ;;  %4778 = vadd.xlane.f32.xlu0 %v4777_v11  ;;  %v4688_v44 = vmul.f32 %v14575_v47, %v4648_v52  ;;  %v8729_v23 = vadd.f32 -1.0, %v10279_v24  ;;  %v5988_v36 = vmul.f32 1.442695, %v5956_v35  ;;  %v14934_v24 = vpop.permute.xlu0 %2203 }
 0x446   : > { %v5962_v61 = vmul.f32 10.0, %v5930_v63  ;;  %v8734_v51 = vadd.f32 -1.0, %v10281_v8  ;;  %v10283_v27 = vpop.eup %10282  ;;  %v14929_v17 = vadd.f32 %v14500_v53, %v14828_v3  ;;  %v5959_v21 = vmul.f32 10.0, %v5927_v7  ;;  %17509 = vst [vmem:[#allocation57_spill] sm:$0xff] %v14934_v24  ;;  %v17510_v8 = vld [vmem:[#allocation88_spill] sm:$0xff] }
 0x447   : > { %v4768_v39 = vsel %vm3428_vm2, %v4688_v44, 0.0  ;;  %v5928_v41 = vmin.f32 %v14916_v29, 0.0  ;;  %v5931_v40 = vmin.f32 %v14920_v55, 0.0  ;;  %v4585_v20 = vmul.f32 0.1, %v8729_v23 }
 0x448   : > { %4769 = vadd.xlane.f32.xlu1 %v4768_v39  ;;  %vm4617_vm13 = vcmp.gt.f32.partialorder %v14772_v42, 0.0  ;;  %10290 = vpow2.f32 %v5990_v31  ;;  %v14939_v19 = vadd.f32 %v14828_v3, %v17510_v8  ;;  %v4590_v53 = vmul.f32 0.1, %v8734_v51  ;;  %v14946_v31 = vpop.permute.xlu1 %2212 }
 0x449   : > { %v14802_v49 = vpop.f32.mrb[164].mxu1  ;;  %v10285_v35 = vpop.eup %10284  ;;  %vm4622_vm14 = vcmp.gt.f32.partialorder %v14777_v9, 0.0  ;;  %10292 = vpow2.f32 %v5988_v36  ;;  %v6000_v63 = vmul.f32 1.442695, %v5962_v61  ;;  %v4649_v7 = vsel %vm4617_vm13, %v14772_v42, %v4585_v20  ;;  %17511 = vst [vmem:[#allocation75_spill] sm:$0xff] %v14946_v31 }
 0x44a   : > { %v14806_v1 = vpop.f32.mrb[165].mxu1  ;;  %v5934_v11 = vmin.f32 %v14929_v17, 0.0  ;;  %v4689_v52 = vmul.f32 %v14575_v47, %v4649_v7  ;;  %v4654_v44 = vsel %vm4622_vm14, %v14777_v9, %v4590_v53  ;;  %v8735_v23 = vadd.f32 -1.0, %v10283_v27 }
 0x44b   : > { %v14810_v2 = vpop.f32.mrb[166].mxu1  ;;  %v5994_v39 = vmul.f32 1.442695, %v5959_v21  ;;  %v5960_v8 = vmul.f32 10.0, %v5928_v41  ;;  %v5963_v46 = vmul.f32 10.0, %v5931_v40  ;;  %v4694_v51 = vmul.f32 %v14575_v47, %v4654_v44  ;;  %v14958_v41 = vpop.permute.xlu0 %2209  ;;  %v17514_v44 = vld [vmem:[#allocation92_spill] sm:$0xff] }
 0x44c   : > { %v14817_v50 = vpop.f32.mrb[167].mxu1  ;;  %v5929_v36 = vmin.f32 %v14939_v19, 0.0  ;;  %v4771_v61 = vsel %vm3428_vm2, %v4689_v52, 0.0  ;;  %v4591_v42 = vmul.f32 0.1, %v8735_v23  ;;  %v8732_v20 = vadd.f32 -1.0, %v10285_v35 }
 0x44d   : > { %v10287_v24 = vpop.eup %10286  ;;  %vm4620_vm10 = vcmp.gt.f32.partialorder %v14815_v12, 0.0  ;;  %vm4623_vm15 = vcmp.gt.f32.partialorder %v14796_v60, 0.0  ;;  %10294 = vpow2.f32 %v6000_v63  ;;  %4772 = vadd.xlane.f32.xlu0 %v4771_v61  ;;  %v4786_v9 = vsel %vm3428_vm2, %v4694_v51, 0.0  ;;  %17513 = vst [vmem:[#allocation95_spill] sm:$0xff] %v14958_v41 }
 0x44e   : > { %v10289_v21 = vpop.eup %10288  ;;  %v5966_v40 = vmul.f32 10.0, %v5934_v11  ;;  %v14962_v53 = vadd.f32 %v14828_v3, %v14504_v22  ;;  %4787 = vadd.xlane.f32.xlu1 %v4786_v9  ;;  %v4655_v35 = vsel %vm4623_vm15, %v14796_v60, %v4591_v42  ;;  %v4588_v7 = vmul.f32 0.1, %v8732_v20  ;;  %v14977_v42 = vpop.permute.xlu1 %2218 }
 0x44f   : > { %v5996_v63 = vmul.f32 1.442695, %v5960_v8  ;;  %v14969_v23 = vadd.f32 %v17514_v44, %v14828_v3  ;;  %v4695_v51 = vmul.f32 %v14575_v47, %v4655_v35  ;;  %v8733_v61 = vadd.f32 -1.0, %v10287_v24  ;;  %17515 = vst [vmem:[#allocation96_spill] sm:$0xff] %v14977_v42  ;;  %v17516_v35 = vld [vmem:[#allocation12_spill] sm:$0xff] }
 0x450   : > { %10296 = vpow2.f32 %v5994_v39  ;;  %v6002_v11 = vmul.f32 1.442695, %v5963_v46  ;;  %v5961_v22 = vmul.f32 10.0, %v5929_v36  ;;  %v4652_v60 = vsel %vm4620_vm10, %v14815_v12, %v4588_v7  ;;  %v14989_v7 = vpop.permute.xlu0 %2215 }
 0x451   : > { %v8830_v20 = vadd.f32 -1.0, %v10289_v21  ;;  %v4789_v8 = vsel %vm3428_vm2, %v4695_v51, 0.0  ;;  %v4692_v9 = vmul.f32 %v14575_v47, %v4652_v60  ;;  %v6008_v41 = vmul.f32 1.442695, %v5966_v40  ;;  %17517 = vst [vmem:[#allocation97_spill] sm:$0xff] %v14989_v7  ;;  %v17524_v7 = vld [vmem:[#allocation90_spill] sm:$0xff] }
 0x452   : > { %v10291_v44 = vpop.eup %10290  ;;  %v5932_v24 = vmin.f32 %v14962_v53, 0.0  ;;  %v14984_v39 = vadd.f32 %v14828_v3, %v17516_v35  ;;  %4790 = vadd.xlane.f32.xlu0 %v4789_v8  ;;  %v4589_v46 = vmul.f32 0.1, %v8733_v61  ;;  %vm4621_vm0 = vcmp.gt.f32.partialorder %v14834_v6, 0.0  ;;  %v15004_v35 = vpop.permute.xlu1 %2224 }
 0x453   : > { %v10293_v36 = vpop.eup %10292  ;;  %10298 = vpow2.f32 %v5996_v63  ;;  %v5935_v12 = vmin.f32 %v14969_v23, 0.0  ;;  %v4780_v21 = vsel %vm3428_vm2, %v4692_v9, 0.0  ;;  %v5998_v40 = vmul.f32 1.442695, %v5961_v22  ;;  %v15000_v63 = vld [vmem:[%s16936_s8 + $0x2] ss:$0 sm:$0xff] }
 0x454   : > { %10300 = vpow2.f32 %v6002_v11  ;;  %4781 = vadd.xlane.f32.xlu1 %v4780_v21  ;;  %v4653_v51 = vsel %vm4621_vm0, %v14834_v6, %v4589_v46  ;;  %v14994_v60 = vadd.f32 %v14530_v4, %v14828_v3  ;;  %v6086_v8 = vmul.f32 0.1, %v8830_v20  ;;  %17518 = vst [vmem:[#allocation19_spill] sm:$0xff] %v15004_v35  ;;  %v17519_v21 = vld [vmem:[#allocation9_spill] sm:$0xff] }
 0x455   : > { %v4693_v61 = vmul.f32 %v14575_v47, %v4653_v51  ;;  %v8829_v9 = vadd.f32 -1.0, %v10291_v44  ;;  %vm6118_vm1 = vcmp.gt.f32.partialorder %v14841_v14, 0.0  ;;  %10302 = vpow2.f32 %v6008_v41 }
 0x456   : > { %v5964_v11 = vmul.f32 10.0, %v5932_v24  ;;  %v5933_v22 = vmin.f32 %v14984_v39, 0.0  ;;  %v8828_v4 = vadd.f32 -1.0, %v10293_v36  ;;  %v5967_v46 = vmul.f32 10.0, %v5935_v12  ;;  %v15017_v12 = vpop.permute.xlu0 %2221  ;;  %v15034_v33 = vpop.permute.xlu1 %2230 }
 0x457   : > { %v14878_v54 = vpop.f32.mrb[168].mxu1  ;;  %v10295_v6 = vpop.eup %10294  ;;  %v4783_v47 = vsel %vm3428_vm2, %v4693_v61, 0.0  ;;  %v6150_v20 = vsel %vm6118_vm1, %v14841_v14, %v6086_v8  ;;  %10304 = vpow2.f32 %v5998_v40  ;;  %v15010_v51 = vadd.f32 %v14828_v3, %v17519_v21  ;;  %17521 = vst [vmem:[#allocation6_spill] sm:$0xff] %v15017_v12  ;;  %17526 = vst [vmem:[#allocation24_spill] sm:$0xff] %v15034_v33 }
 0x458   : > { %v14886_v57 = vpop.f32.mrb[169].mxu1  ;;  %4784 = vadd.xlane.f32.xlu0 %v4783_v47  ;;  %v6190_v41 = vmul.f32 %v15000_v63, %v6150_v20  ;;  %v6085_v44 = vmul.f32 0.1, %v8829_v9  ;;  %vm6117_vm3 = vcmp.gt.f32.partialorder %v14858_v10, 0.0  ;;  %v5938_v24 = vmin.f32 %v14994_v60, 0.0 }
 0x459   : > { %v14893_v16 = vpop.f32.mrb[170].mxu1  ;;  %v6004_v61 = vmul.f32 1.442695, %v5964_v11  ;;  %v5965_v14 = vmul.f32 10.0, %v5933_v22  ;;  %vm6116_vm4 = vcmp.gt.f32.partialorder %v14868_v34, 0.0  ;;  %v5936_v42 = vmin.f32 %v15010_v51, 0.0 }
 0x45a   : > { %v14901_v15 = vpop.f32.mrb[171].mxu1  ;;  %v10297_v36 = vpop.eup %10296  ;;  %v6149_v40 = vsel %vm6117_vm3, %v14858_v10, %v6085_v44  ;;  %v6010_v47 = vmul.f32 1.442695, %v5967_v46  ;;  %v6226_v9 = vsel %vm3428_vm2, %v6190_v41, 0.0  ;;  %v15030_v12 = vadd.f32 %v17524_v7, %v14828_v3  ;;  %v17527_v7 = vld [vmem:[#allocation11_spill] sm:$0xff] }
 0x45b   : > { %v6189_v20 = vmul.f32 %v15000_v63, %v6149_v40  ;;  %v6084_v11 = vmul.f32 0.1, %v8828_v4  ;;  %v8834_v10 = vadd.f32 -1.0, %v10295_v6  ;;  %v8831_v46 = vadd.f32 -1.0, %v10297_v36  ;;  %v15048_v36 = vpop.permute.xlu0 %2227 }
 0x45c   : > { %6227 = vadd.xlane.f32.xlu0 %v6226_v9  ;;  %vm6119_vm5 = vcmp.gt.f32.partialorder %v14891_v30, 0.0  ;;  %v5970_v41 = vmul.f32 10.0, %v5938_v24  ;;  %10306 = vpow2.f32 %v6004_v61  ;;  %v15040_v9 = vadd.f32 %v17527_v7, %v14828_v3  ;;  %17528 = vst [vmem:[#allocation25_spill] sm:$0xff] %v15048_v36 }
 0x45d   : > { %v10299_v44 = vpop.eup %10298  ;;  %v6223_v40 = vsel %vm3428_vm2, %v6189_v20, 0.0  ;;  %v6148_v6 = vsel %vm6116_vm4, %v14868_v34, %v6084_v11  ;;  %vm6122_vm6 = vcmp.gt.f32.partialorder %v14883_v37, 0.0  ;;  %vm6120_vm7 = vcmp.gt.f32.partialorder %v14916_v29, 0.0 }
 0x45e   : > { %6224 = vadd.xlane.f32.xlu1 %v6223_v40  ;;  %10308 = vpow2.f32 %v6010_v47  ;;  %v6188_v4 = vmul.f32 %v15000_v63, %v6148_v6  ;;  %v8832_v61 = vadd.f32 -1.0, %v10299_v44  ;;  %v5939_v20 = vmin.f32 %v15030_v12, 0.0  ;;  %v15060_v44 = vpop.permute.xlu1 %2236 }
 0x45f   : > { %v6090_v40 = vmul.f32 0.1, %v8834_v10  ;;  %v6016_v33 = vmul.f32 1.442695, %v5970_v41  ;;  %v6087_v34 = vmul.f32 0.1, %v8831_v46 }
 0x460   : > { %v5942_v6 = vmin.f32 %v15040_v9, 0.0  ;;  %17530 = vst [vmem:[#allocation10_spill] sm:$0xff] %v15060_v44  ;;  %v17531_v10 = vld [vmem:[#allocation15_spill] sm:$0xff]  ;;  %v6088_v36 = vmul.f32 0.1, %v8832_v61  ;;  %vm6123_vm8 = vcmp.gt.f32.partialorder %v14920_v55, 0.0  ;;  %v15100_v44 = vadd.f32 %v14604_v28, %v14828_v3 }
 0x461   : > { %v15064_v41 = vadd.f32 %v14828_v3, %v17531_v10  ;;  %vm6126_vm9 = vcmp.gt.f32.partialorder %v14929_v17, 0.0  ;;  %vm6121_vm11 = vcmp.gt.f32.partialorder %v14939_v19, 0.0  ;;  %vm6124_vm12 = vcmp.gt.f32.partialorder %v14962_v53, 0.0 }
 0x462   : > { %v5974_v10 = vmul.f32 10.0, %v5942_v6  ;;  %v6152_v61 = vsel %vm6120_vm7, %v14916_v29, %v6088_v36  ;;  %vm6127_vm13 = vcmp.gt.f32.partialorder %v14969_v23, 0.0  ;;  %vm6125_vm14 = vcmp.gt.f32.partialorder %v14984_v39, 0.0 }
 0x463   : > { %vm6130_vm10 = vcmp.gt.f32.partialorder %v14994_v60, 0.0  ;;  %vm6128_vm15 = vcmp.gt.f32.partialorder %v15010_v51, 0.0  ;;  %vm6131_vm0 = vcmp.gt.f32.partialorder %v15030_v12, 0.0  ;;  %vm6134_vm1 = vcmp.gt.f32.partialorder %v15040_v9, 0.0 }
 0x464   : > { %v14951_v56 = vpop.f32.mrb[172].mxu1  ;;  %vm6132_vm4 = vcmp.gt.f32.partialorder %v15064_v41, 0.0  ;;  %vm6138_vm7 = vcmp.gt.f32.partialorder %v15100_v44, 0.0 }
 0x465   : > { %v14956_v27 = vpop.f32.mrb[173].mxu1 }
 0x466   : > { %17512 = vst [vmem:[#allocation82_spill] sm:$0xff] %v14956_v27  ;;  %v14965_v52 = vpop.f32.mrb[174].mxu1 }
 0x467   : > { %v14972_v31 = vpop.f32.mrb[175].mxu1 }
 0x470   : > { %v15015_v35 = vpop.f32.mrb[176].mxu1 }
 0x471   : > { %17520 = vst [vmem:[#allocation4_spill] sm:$0xff] %v15015_v35  ;;  %v15020_v8 = vpop.f32.mrb[177].mxu1  ;;  %v6006_v35 = vmul.f32 1.442695, %v5965_v14  ;;  %v5968_v14 = vmul.f32 10.0, %v5936_v42  ;;  %v6154_v42 = vsel %vm6122_vm6, %v14883_v37, %v6090_v40  ;;  %v15073_v37 = vadd.f32 %v14586_v59, %v14828_v3  ;;  %v15076_v40 = vpop.permute.xlu0 %2233 }
 0x472   : > { %17522 = vst [vmem:[#allocation8_spill] sm:$0xff] %v15020_v8  ;;  %v15025_v21 = vpop.f32.mrb[178].mxu1  ;;  %v10301_v8 = vpop.eup %10300  ;;  %17532 = vst [vmem:[#allocation14_spill] sm:$0xff] %v15076_v40  ;;  %v6192_v59 = vmul.f32 %v15000_v63, %v6152_v61 }
 0x473   : > { %17523 = vst [vmem:[#allocation13_spill] sm:$0xff] %v15025_v21  ;;  %v15032_v22 = vpop.f32.mrb[179].mxu1  ;;  %v10303_v24 = vpop.eup %10302  ;;  %v8835_v7 = vadd.f32 -1.0, %v10301_v8  ;;  %10310 = vpow2.f32 %v6006_v35  ;;  %v17529_v21 = vld [vmem:[#allocation87_spill] sm:$0xff]  ;;  %v6194_v35 = vmul.f32 %v15000_v63, %v6154_v42  ;;  %v6012_v46 = vmul.f32 1.442695, %v5968_v14 }
 0x474   : > { %17525 = vst [vmem:[#allocation49_spill] sm:$0xff] %v15032_v22  ;;  %v6220_v22 = vsel %vm3428_vm2, %v6188_v4, 0.0  ;;  %v10305_v11 = vpop.eup %10304  ;;  %v15054_v47 = vadd.f32 %v14828_v3, %v17529_v21  ;;  %v8838_v8 = vadd.f32 -1.0, %v10303_v24  ;;  %v6151_v21 = vsel %vm6119_vm5, %v14891_v30, %v6087_v34 }
 0x475   : > { %6221 = vadd.xlane.f32.xlu0 %v6220_v22  ;;  %v5971_v4 = vmul.f32 10.0, %v5939_v20  ;;  %v6191_v22 = vmul.f32 %v15000_v63, %v6151_v21  ;;  %v8833_v27 = vadd.f32 -1.0, %v10305_v11  ;;  %10312 = vpow2.f32 %v6016_v33  ;;  %v10307_v20 = vpop.eup %10306  ;;  %v15087_v21 = vpop.permute.xlu1 %2242 }
 0x476   : > { %v6238_v24 = vsel %vm3428_vm2, %v6194_v35, 0.0  ;;  %v5937_v42 = vmin.f32 %v15054_v47, 0.0  ;;  %v5940_v33 = vmin.f32 %v15064_v41, 0.0  ;;  %v6091_v14 = vmul.f32 0.1, %v8835_v7  ;;  %v10309_v6 = vpop.eup %10308  ;;  %17533 = vst [vmem:[#allocation3_spill] sm:$0xff] %v15087_v21  ;;  %v15105_v40 = vpop.permute.xlu0 %2239 }
 0x477   : > { %6239 = vadd.xlane.f32.xlu1 %v6238_v24  ;;  %v6229_v30 = vsel %vm3428_vm2, %v6191_v22, 0.0  ;;  %10314 = vpow2.f32 %v6012_v46  ;;  %v6018_v34 = vmul.f32 1.442695, %v5971_v4  ;;  %v6094_v11 = vmul.f32 0.1, %v8838_v8  ;;  %17534 = vst [vmem:[#allocation2_spill] sm:$0xff] %v15105_v40 }
 0x478   : > { %v5943_v22 = vmin.f32 %v15073_v37, 0.0  ;;  %v6232_v29 = vsel %vm3428_vm2, %v6192_v59, 0.0  ;;  %v6089_v36 = vmul.f32 0.1, %v8833_v27  ;;  %v5969_v7 = vmul.f32 10.0, %v5937_v42 }
 0x479   : > { %6230 = vadd.xlane.f32.xlu0 %v6229_v30  ;;  %v6024_v46 = vmul.f32 1.442695, %v5974_v10  ;;  %v6155_v8 = vsel %vm6123_vm8, %v14920_v55, %v6091_v14  ;;  %v8836_v30 = vadd.f32 -1.0, %v10307_v20  ;;  %v5972_v61 = vmul.f32 10.0, %v5940_v33 }
 0x47a   : > { %v6195_v59 = vmul.f32 %v15000_v63, %v6155_v8  ;;  %v8839_v42 = vadd.f32 -1.0, %v10309_v6  ;;  %10316 = vpow2.f32 %v6018_v34  ;;  %v6158_v55 = vsel %vm6126_vm9, %v14929_v17, %v6094_v11  ;;  %v15119_v8 = vpop.permute.xlu1 %2248 }
 0x47b   : > { %6233 = vadd.xlane.f32.xlu1 %v6232_v29  ;;  %v5975_v10 = vmul.f32 10.0, %v5943_v22  ;;  %v6198_v28 = vmul.f32 %v15000_v63, %v6158_v55  ;;  %v6153_v14 = vsel %vm6121_vm11, %v14939_v19, %v6089_v36  ;;  %v6014_v20 = vmul.f32 1.442695, %v5969_v7  ;;  %17535 = vst [vmem:[#allocation30_spill] sm:$0xff] %v15119_v8 }
 0x47c   : > { %v6241_v33 = vsel %vm3428_vm2, %v6195_v59, 0.0  ;;  %10318 = vpow2.f32 %v6024_v46  ;;  %v15116_v29 = vadd.f32 %v14828_v3, %v14590_v58  ;;  %v6193_v34 = vmul.f32 %v15000_v63, %v6153_v14 }
 0x47d   : > { %v10311_v21 = vpop.eup %10310  ;;  %6242 = vadd.xlane.f32.xlu0 %v6241_v33  ;;  %v6020_v17 = vmul.f32 1.442695, %v5972_v61  ;;  %v5946_v11 = vmin.f32 %v15100_v44, 0.0  ;;  %v6250_v22 = vsel %vm3428_vm2, %v6198_v28, 0.0  ;;  %v6092_v59 = vmul.f32 0.1, %v8836_v30  ;;  %v15131_v61 = vpop.permute.xlu0 %2245 }
 0x47e   : > { %v15126_v19 = vadd.f32 %v14828_v3, %v14608_v13  ;;  %v6026_v58 = vmul.f32 1.442695, %v5975_v10  ;;  %v6235_v36 = vsel %vm3428_vm2, %v6193_v34, 0.0  ;;  %17536 = vst [vmem:[#allocation61_spill] sm:$0xff] %v15131_v61  ;;  %10320 = vpow2.f32 %v6014_v20 }
 0x47f   : > { %v10313_v6 = vpop.eup %10312  ;;  %6251 = vadd.xlane.f32.xlu1 %v6250_v22  ;;  %v6156_v7 = vsel %vm6124_vm12, %v14962_v53, %v6092_v59  ;;  %v5941_v30 = vmin.f32 %v15116_v29, 0.0  ;;  %v6095_v33 = vmul.f32 0.1, %v8839_v42  ;;  %v8837_v13 = vadd.f32 -1.0, %v10311_v21  ;;  %v15144_v22 = vpop.permute.xlu1 %2254 }
 0x480   : > { %v15085_v35 = vpop.f32.mrb[180].mxu1  ;;  %v6196_v55 = vmul.f32 %v15000_v63, %v6156_v7  ;;  %v8842_v28 = vadd.f32 -1.0, %v10313_v6  ;;  %10322 = vpow2.f32 %v6020_v17  ;;  %v5978_v14 = vmul.f32 10.0, %v5946_v11  ;;  %17537 = vst [vmem:[#allocation16_spill] sm:$0xff] %v15144_v22  ;;  %v17538_v17 = vld [vmem:[#allocation93_spill] sm:$0xff] }
 0x481   : > { %v15092_v24 = vpop.f32.mrb[181].mxu1  ;;  %v10315_v46 = vpop.eup %10314  ;;  %6236 = vadd.xlane.f32.xlu0 %v6235_v36  ;;  %v5944_v10 = vmin.f32 %v15126_v19, 0.0  ;;  %v15138_v34 = vadd.f32 %v14616_v45, %v14828_v3  ;;  %v6159_v20 = vsel %vm6127_vm13, %v14969_v23, %v6095_v33  ;;  %10324 = vpow2.f32 %v6026_v58 }
 0x482   : > { %v15096_v4 = vpop.f32.mrb[182].mxu1  ;;  %v6244_v53 = vsel %vm3428_vm2, %v6196_v55, 0.0  ;;  %v8840_v59 = vadd.f32 -1.0, %v10315_v46  ;;  %v15148_v21 = vadd.f32 %v14640_v26, %v14828_v3  ;;  %v6199_v42 = vmul.f32 %v15000_v63, %v6159_v20  ;;  %v15158_v7 = vpop.permute.xlu0 %2251 }
 0x483   : > { %v15103_v27 = vpop.f32.mrb[183].mxu1  ;;  %6245 = vadd.xlane.f32.xlu1 %v6244_v53  ;;  %v5973_v45 = vmul.f32 10.0, %v5941_v30  ;;  %v15153_v11 = vadd.f32 %v14828_v3, %v17538_v17  ;;  %v6032_v23 = vmul.f32 1.442695, %v5978_v14  ;;  %17539 = vst [vmem:[#allocation18_spill] sm:$0xff] %v15158_v7  ;;  %v5976_v26 = vmul.f32 10.0, %v5944_v10 }
 0x484   : > { %v10317_v6 = vpop.eup %10316  ;;  %v6253_v58 = vsel %vm3428_vm2, %v6199_v42, 0.0  ;;  %v5947_v46 = vmin.f32 %v15138_v34, 0.0  ;;  %v6098_v55 = vmul.f32 0.1, %v8842_v28  ;;  %v6093_v30 = vmul.f32 0.1, %v8837_v13 }
 0x485   : > { %6254 = vadd.xlane.f32.xlu0 %v6253_v58  ;;  %v8843_v33 = vadd.f32 -1.0, %v10317_v6  ;;  %v5950_v53 = vmin.f32 %v15148_v21, 0.0  ;;  %v6096_v20 = vmul.f32 0.1, %v8840_v59  ;;  %v6022_v14 = vmul.f32 1.442695, %v5973_v45  ;;  %v15174_v58 = vpop.permute.xlu1 %2260 }
 0x486   : > { %v10319_v36 = vpop.eup %10318  ;;  %v5945_v42 = vmin.f32 %v15153_v11, 0.0  ;;  %v6162_v10 = vsel %vm6130_vm10, %v14994_v60, %v6098_v55  ;;  %v6157_v28 = vsel %vm6125_vm14, %v14984_v39, %v6093_v30  ;;  %17542 = vst [vmem:[#allocation31_spill] sm:$0xff] %v15174_v58  ;;  %v15178_v59 = vadd.f32 %v14828_v3, %v14648_v18  ;;  %v15192_v7 = vpop.permute.xlu0 %2257 }
 0x487   : > { %v8846_v6 = vadd.f32 -1.0, %v10319_v36  ;;  %v6202_v45 = vmul.f32 %v15000_v63, %v6162_v10  ;;  %v6197_v8 = vmul.f32 %v15000_v63, %v6157_v28  ;;  %10326 = vpow2.f32 %v6032_v23  ;;  %17543 = vst [vmem:[#allocation33_spill] sm:$0xff] %v15192_v7 }
 0x488   : > { %v10321_v60 = vpop.eup %10320  ;;  %v6028_v55 = vmul.f32 1.442695, %v5976_v26  ;;  %v5979_v61 = vmul.f32 10.0, %v5947_v46  ;;  %v6160_v39 = vsel %vm6128_vm15, %v15010_v51, %v6096_v20  ;;  %v5982_v58 = vmul.f32 10.0, %v5950_v53 }
 0x489   : > { %v6262_v18 = vsel %vm3428_vm2, %v6202_v45, 0.0  ;;  %v6247_v10 = vsel %vm3428_vm2, %v6197_v8, 0.0  ;;  %v6200_v28 = vmul.f32 %v15000_v63, %v6160_v39  ;;  %10328 = vpow2.f32 %v6022_v14  ;;  %v17544_v8 = vld [vmem:[#allocation17_spill] sm:$0xff] }
 0x48a   : > { %v10323_v36 = vpop.eup %10322  ;;  %v5977_v23 = vmul.f32 10.0, %v5945_v42  ;;  %6263 = vadd.xlane.f32.xlu1 %v6262_v18  ;;  %6248 = vadd.xlane.f32.xlu0 %v6247_v10  ;;  %v6099_v26 = vmul.f32 0.1, %v8843_v33  ;;  %v8841_v51 = vadd.f32 -1.0, %v10321_v60  ;;  %v5948_v53 = vmin.f32 %v15178_v59, 0.0  ;;  %v15202_v42 = vpop.permute.xlu1 %2266 }
 0x48b   : > { %v10325_v46 = vpop.eup %10324  ;;  %v6034_v20 = vmul.f32 1.442695, %v5979_v61  ;;  %v15199_v45 = vadd.f32 %v17544_v8, %v14828_v3  ;;  %v6102_v14 = vmul.f32 0.1, %v8846_v6  ;;  %10330 = vpow2.f32 %v6028_v55  ;;  %v17545_v8 = vld [vmem:[#allocation20_spill] sm:$0xff] }
 0x48c   : > { %v6163_v39 = vsel %vm6131_vm0, %v15030_v12, %v6099_v26  ;;  %v6040_v33 = vmul.f32 1.442695, %v5982_v58  ;;  %v6256_v18 = vsel %vm3428_vm2, %v6200_v28, 0.0  ;;  %v8844_v10 = vadd.f32 -1.0, %v10323_v36  ;;  %v15213_v58 = vpop.permute.xlu0 %2263 }
 0x48d   : > { %v6203_v60 = vmul.f32 %v15000_v63, %v6163_v39  ;;  %v8847_v7 = vadd.f32 -1.0, %v10325_v46  ;;  %v6030_v40 = vmul.f32 1.442695, %v5977_v23  ;;  %v6166_v61 = vsel %vm6134_vm1, %v15040_v9, %v6102_v14 }
 0x48e   : > { %6257 = vadd.xlane.f32.xlu1 %v6256_v18  ;;  %v6206_v6 = vmul.f32 %v15000_v63, %v6166_v61  ;;  %10332 = vpow2.f32 %v6034_v20  ;;  %v5951_v55 = vmin.f32 %v15199_v45, 0.0  ;;  %v15218_v36 = vadd.f32 %v14703_v0, %v14828_v3  ;;  %v15222_v23 = vpop.xlane.xlu1 %3433 }
 0x48f   : > { %v6265_v12 = vsel %vm3428_vm2, %v6203_v60, 0.0  ;;  %v6097_v9 = vmul.f32 0.1, %v8841_v51  ;;  %17546 = vst [vmem:[#allocation34_spill] sm:$0xff] %v15222_v23  ;;  %vm6129_vm3 = vcmp.gt.f32.partialorder %v15054_v47, 0.0  ;;  %10334 = vpow2.f32 %v6040_v33 }
 0x490   : > { %v15163_v17 = vpop.f32.mrb[184].mxu1  ;;  %6266 = vadd.xlane.f32.xlu0 %v6265_v12  ;;  %v6274_v26 = vsel %vm3428_vm2, %v6206_v6, 0.0  ;;  %10336 = vpow2.f32 %v6030_v40  ;;  %v6100_v18 = vmul.f32 0.1, %v8844_v10  ;;  %v5983_v61 = vmul.f32 10.0, %v5951_v55 }
 0x491   : > { %17540 = vst [vmem:[#allocation22_spill] sm:$0xff] %v15163_v17  ;;  %v15172_v13 = vpop.f32.mrb[185].mxu1  ;;  %v15209_v17 = vadd.f32 %v14828_v3, %v17545_v8  ;;  %v6161_v20 = vsel %vm6129_vm3, %v15054_v47, %v6097_v9  ;;  %v5954_v8 = vmin.f32 %v15218_v36, 0.0  ;;  %v6103_v40 = vmul.f32 0.1, %v8847_v7 }
 0x492   : > { %17541 = vst [vmem:[#allocation29_spill] sm:$0xff] %v15172_v13  ;;  %v15182_v22 = vpop.f32.mrb[186].mxu1  ;;  %v5980_v13 = vmul.f32 10.0, %v5948_v53  ;;  %v10327_v53 = vpop.eup %10326  ;;  %6275 = vadd.xlane.f32.xlu1 %v6274_v26  ;;  %v6201_v14 = vmul.f32 %v15000_v63, %v6161_v20  ;;  %v15241_v47 = vadd.f32 %v14828_v3, %v14708_v5  ;;  %v6164_v6 = vsel %vm6132_vm4, %v15064_v41, %v6100_v18 }
 0x493   : > { %v15187_v30 = vpop.f32.mrb[187].mxu1  ;;  %v5949_v51 = vmin.f32 %v15209_v17, 0.0  ;;  %v10329_v33 = vpop.eup %10328  ;;  %vm6135_vm5 = vcmp.gt.f32.partialorder %v15073_v37, 0.0  ;;  %v8850_v10 = vadd.f32 -1.0, %v10327_v53  ;;  %v15248_v9 = vadd.f32 %v14710_v25, %v14828_v3 }
 0x494   : > { %v6036_v39 = vmul.f32 1.442695, %v5980_v13  ;;  %v15237_v12 = vpop.xlane.xlu1 %3448  ;;  %v6259_v13 = vsel %vm3428_vm2, %v6201_v14, 0.0  ;;  %v6204_v7 = vmul.f32 %v15000_v63, %v6164_v6  ;;  %v15251_v26 = vpop.xlane.xlu0 %3436  ;;  %v8845_v20 = vadd.f32 -1.0, %v10329_v33  ;;  %v15262_v33 = vld [vmem:[%s16935_s7 + $0x3] ss:$0 sm:$0xff] }
 0x495   : > { %17547 = vst [vmem:[#allocation63_spill] sm:$0xff] %v15237_v12  ;;  %6260 = vadd.xlane.f32.xlu0 %v6259_v13  ;;  %v10331_v55 = vpop.eup %10330  ;;  %17548 = vst [vmem:[#allocation65_spill] sm:$0xff] %v15251_v26  ;;  %v5981_v5 = vmul.f32 10.0, %v5949_v51  ;;  %v6167_v14 = vsel %vm6135_vm5, %v15073_v37, %v6103_v40  ;;  %v6042_v23 = vmul.f32 1.442695, %v5983_v61  ;;  %v5986_v41 = vmul.f32 10.0, %v5954_v8 }
 0x496   : > { %10338 = vpow2.f32 %v6036_v39  ;;  %v6268_v18 = vsel %vm3428_vm2, %v6204_v7, 0.0  ;;  %v6207_v53 = vmul.f32 %v15000_v63, %v6167_v14  ;;  %vm6133_vm6 = vcmp.gt.f32.partialorder %v15116_v29, 0.0 }
 0x497   : > { %v5952_v25 = vmin.f32 %v15241_v47, 0.0  ;;  %6269 = vadd.xlane.f32.xlu1 %v6268_v18  ;;  %v8848_v37 = vadd.f32 -1.0, %v10331_v55  ;;  %v5955_v51 = vmin.f32 %v15248_v9, 0.0  ;;  %v6106_v8 = vmul.f32 0.1, %v8850_v10 }
 0x498   : > { %v10333_v39 = vpop.eup %10332  ;;  %v6277_v61 = vsel %vm3428_vm2, %v6207_v53, 0.0  ;;  %v15266_v13 = vpop.xlane.xlu1 %3442  ;;  %vm6136_vm8 = vcmp.gt.f32.partialorder %v15126_v19, 0.0  ;;  %v6038_v6 = vmul.f32 1.442695, %v5981_v5  ;;  %v15271_v7 = vadd.f32 %v14828_v3, %v14718_v32 }
 0x499   : > { %v10335_v40 = vpop.eup %10334  ;;  %17549 = vst [vmem:[#allocation36_spill] sm:$0xff] %v15266_v13  ;;  %6278 = vadd.xlane.f32.xlu0 %v6277_v61  ;;  %v6101_v14 = vmul.f32 0.1, %v8845_v20  ;;  %10340 = vpow2.f32 %v6042_v23  ;;  %v6048_v55 = vmul.f32 1.442695, %v5986_v41  ;;  %v15275_v12 = vadd.f32 %v15262_v33, %v14768_v62  ;;  %v15280_v53 = vpop.xlane.xlu0 %3430 }
 0x49a   : > { %v10337_v18 = vpop.eup %10336  ;;  %v6170_v10 = vsel %vm6138_vm7, %v15100_v44, %v6106_v8  ;;  %17550 = vst [vmem:[#allocation38_spill] sm:$0xff] %v15280_v53  ;;  %v8851_v5 = vadd.f32 -1.0, %v10333_v39  ;;  %v5984_v13 = vmul.f32 10.0, %v5952_v25  ;;  %v8854_v23 = vadd.f32 -1.0, %v10335_v40 }
 0x49b   : > { %v6210_v32 = vmul.f32 %v15000_v63, %v6170_v10  ;;  %v6165_v3 = vsel %vm6133_vm6, %v15116_v29, %v6101_v14  ;;  %v5987_v20 = vmul.f32 10.0, %v5955_v51  ;;  %v6104_v62 = vmul.f32 0.1, %v8848_v37 }
 0x49c   : > { %v15220_v28 = vpop.f32.mrb[188].mxu1  ;;  %v6205_v41 = vmul.f32 %v15000_v63, %v6165_v3  ;;  %v15287_v61 = vpop.xlane.xlu1 %3460  ;;  %v8849_v26 = vadd.f32 -1.0, %v10337_v18  ;;  %10342 = vpow2.f32 %v6038_v6  ;;  %v5953_v44 = vmin.f32 %v15271_v7, 0.0 }
 0x49d   : > { %v15226_v46 = vpop.f32.mrb[189].mxu1  ;;  %17551 = vst [vmem:[#allocation64_spill] sm:$0xff] %v15287_v61  ;;  %v6286_v39 = vsel %vm3428_vm2, %v6210_v32, 0.0  ;;  %10344 = vpow2.f32 %v6048_v55  ;;  %v7449_v25 = vmin.f32 %v15275_v12, 0.0  ;;  %v6168_v29 = vsel %vm6136_vm8, %v15126_v19, %v6104_v62  ;;  %v15301_v10 = vpop.xlane.xlu0 %3439 }
 0x49e   : > { %v15229_v0 = vpop.f32.mrb[190].mxu1  ;;  %6287 = vadd.xlane.f32.xlu1 %v6286_v39  ;;  %v6271_v8 = vsel %vm3428_vm2, %v6205_v41, 0.0  ;;  %v6044_v37 = vmul.f32 1.442695, %v5984_v13  ;;  %v15298_v40 = vadd.f32 %v14756_v43, %v15262_v33  ;;  %v6208_v6 = vmul.f32 %v15000_v63, %v6168_v29  ;;  %17552 = vst [vmem:[#allocation91_spill] sm:$0xff] %v15301_v10 }
 0x49f   : > { %v15233_v60 = vpop.f32.mrb[191].mxu1  ;;  %6272 = vadd.xlane.f32.xlu0 %v6271_v8  ;;  %v6107_v14 = vmul.f32 0.1, %v8851_v5  ;;  %v6050_v18 = vmul.f32 1.442695, %v5987_v20  ;;  %vm6139_vm9 = vcmp.gt.f32.partialorder %v15138_v34, 0.0  ;;  %v15306_v19 = vadd.f32 %v14802_v49, %v15262_v33 }
 0x4a0   : > { %v10339_v51 = vpop.eup %10338  ;;  %v6110_v55 = vmul.f32 0.1, %v8854_v23  ;;  %v5985_v32 = vmul.f32 10.0, %v5953_v44  ;;  %v6280_v13 = vsel %vm3428_vm2, %v6208_v6, 0.0  ;;  %v7481_v43 = vmul.f32 10.0, %v7449_v25  ;;  %v15310_v5 = vpop.xlane.xlu1 %3454 }
 0x4a1   : > { %v8852_v3 = vadd.f32 -1.0, %v10339_v51  ;;  %v6171_v41 = vsel %vm6139_vm9, %v15138_v34, %v6107_v14  ;;  %v6105_v62 = vmul.f32 0.1, %v8849_v26  ;;  %17553 = vst [vmem:[#allocation89_spill] sm:$0xff] %v15310_v5  ;;  %vm6142_vm11 = vcmp.gt.f32.partialorder %v15148_v21, 0.0  ;;  %v15317_v39 = vpop.xlane.xlu0 %3451 }
 0x4a2   : > { %6281 = vadd.xlane.f32.xlu1 %v6280_v13  ;;  %10346 = vpow2.f32 %v6044_v37  ;;  %v7450_v23 = vmin.f32 %v15298_v40, 0.0  ;;  %v6211_v20 = vmul.f32 %v15000_v63, %v6171_v41  ;;  %vm6137_vm12 = vcmp.gt.f32.partialorder %v15153_v11, 0.0  ;;  %17554 = vst [vmem:[#allocation43_spill] sm:$0xff] %v15317_v39 }
 0x4a3   : > { %v10341_v44 = vpop.eup %10340  ;;  %10348 = vpow2.f32 %v6050_v18  ;;  %v6174_v49 = vsel %vm6142_vm11, %v15148_v21, %v6110_v55  ;;  %v6046_v25 = vmul.f32 1.442695, %v5985_v32  ;;  %v7454_v34 = vmin.f32 %v15306_v19, 0.0 }
 0x4a4   : > { %v6289_v26 = vsel %vm3428_vm2, %v6211_v20, 0.0  ;;  %v6214_v8 = vmul.f32 %v15000_v63, %v6174_v49  ;;  %v15324_v29 = vadd.f32 %v15262_v33, %v14760_v38  ;;  %v7514_v51 = vmul.f32 1.442695, %v7481_v43  ;;  %v15327_v21 = vpop.xlane.xlu1 %3472 }
 0x4a5   : > { %6290 = vadd.xlane.f32.xlu0 %v6289_v26  ;;  %v6169_v37 = vsel %vm6137_vm12, %v15153_v11, %v6105_v62  ;;  %v6108_v6 = vmul.f32 0.1, %v8852_v3  ;;  %17555 = vst [vmem:[#allocation68_spill] sm:$0xff] %v15327_v21  ;;  %v8855_v18 = vadd.f32 -1.0, %v10341_v44  ;;  %v7482_v55 = vmul.f32 10.0, %v7450_v23  ;;  %v15344_v44 = vpop.xlane.xlu0 %3445 }
 0x4a6   : > { %v10343_v14 = vpop.eup %10342  ;;  %v6298_v32 = vsel %vm3428_vm2, %v6214_v8, 0.0  ;;  %v6209_v13 = vmul.f32 %v15000_v63, %v6169_v37  ;;  %vm6140_vm13 = vcmp.gt.f32.partialorder %v15178_v59, 0.0  ;;  %v15334_v38 = vadd.f32 %v15262_v33, %v14806_v1  ;;  %17556 = vst [vmem:[#allocation47_spill] sm:$0xff] %v15344_v44 }
 0x4a7   : > { %v10345_v41 = vpop.eup %10344  ;;  %6299 = vadd.xlane.f32.xlu1 %v6298_v32  ;;  %10350 = vpow2.f32 %v6046_v25  ;;  %v7486_v11 = vmul.f32 10.0, %v7454_v34  ;;  %v6172_v43 = vsel %vm6140_vm13, %v15178_v59, %v6108_v6  ;;  %v7448_v62 = vmin.f32 %v15324_v29, 0.0 }
 0x4a8   : > { %v6283_v3 = vsel %vm3428_vm2, %v6209_v13, 0.0  ;;  %v15341_v23 = vadd.f32 %v14764_v48, %v15262_v33  ;;  %10352 = vpow2.f32 %v7514_v51  ;;  %v6212_v20 = vmul.f32 %v15000_v63, %v6172_v43  ;;  %v15349_v37 = vpop.xlane.xlu1 %3466 }
 0x4a9   : > { %6284 = vadd.xlane.f32.xlu0 %v6283_v3  ;;  %v8858_v1 = vadd.f32 -1.0, %v10345_v41  ;;  %v7516_v49 = vmul.f32 1.442695, %v7482_v55  ;;  %v6111_v25 = vmul.f32 0.1, %v8855_v18  ;;  %vm6143_vm14 = vcmp.gt.f32.partialorder %v15199_v45, 0.0  ;;  %v15354_v55 = vpop.xlane.xlu0 %3463 }
 0x4aa   : > { %v8853_v34 = vadd.f32 -1.0, %v10343_v14  ;;  %v7452_v59 = vmin.f32 %v15334_v38, 0.0  ;;  %v6292_v26 = vsel %vm3428_vm2, %v6212_v20, 0.0  ;;  %17557 = vst [vmem:[#allocation45_spill] sm:$0xff] %v15349_v37  ;;  %v7524_v48 = vmul.f32 1.442695, %v7486_v11 }
 0x4ab   : > { %6293 = vadd.xlane.f32.xlu1 %v6292_v26  ;;  %v6175_v51 = vsel %vm6143_vm14, %v15199_v45, %v6111_v25  ;;  %v7480_v32 = vmul.f32 10.0, %v7448_v62  ;;  %v7451_v13 = vmin.f32 %v15341_v23, 0.0  ;;  %17558 = vst [vmem:[#allocation37_spill] sm:$0xff] %v15354_v55  ;;  %vm6141_vm10 = vcmp.gt.f32.partialorder %v15209_v17, 0.0 }
 0x4ac   : > { %v10347_v8 = vpop.eup %10346  ;;  %v6215_v18 = vmul.f32 %v15000_v63, %v6175_v51  ;;  %vm6146_vm15 = vcmp.gt.f32.partialorder %v15218_v36, 0.0  ;;  %10354 = vpow2.f32 %v7516_v49  ;;  %v6114_v14 = vmul.f32 0.1, %v8858_v1  ;;  %v15359_v45 = vpop.xlane.xlu1 %3484 }
 0x4ad   : > { %v10349_v6 = vpop.eup %10348  ;;  %v8856_v41 = vadd.f32 -1.0, %v10347_v8  ;;  %v7484_v3 = vmul.f32 10.0, %v7452_v59  ;;  %v6109_v43 = vmul.f32 0.1, %v8853_v34  ;;  %17559 = vst [vmem:[#allocation42_spill] sm:$0xff] %v15359_v45  ;;  %10356 = vpow2.f32 %v7524_v48 }
 0x4ae   : > { %v6301_v11 = vsel %vm3428_vm2, %v6215_v18, 0.0  ;;  %v8859_v62 = vadd.f32 -1.0, %v10349_v6  ;;  %v15363_v20 = vadd.f32 %v14810_v2, %v15262_v33  ;;  %v6178_v25 = vsel %vm6146_vm15, %v15218_v36, %v6114_v14  ;;  %v15373_v18 = vpop.xlane.xlu0 %3457 }
 0x4af   : > { %6302 = vadd.xlane.f32.xlu0 %v6301_v11  ;;  %v7512_v26 = vmul.f32 1.442695, %v7480_v32  ;;  %v7483_v51 = vmul.f32 10.0, %v7451_v13  ;;  %v6218_v1 = vmul.f32 %v15000_v63, %v6178_v25  ;;  %v6173_v49 = vsel %vm6141_vm10, %v15209_v17, %v6109_v43  ;;  %17560 = vst [vmem:[#allocation52_spill] sm:$0xff] %v15373_v18 }
 0x4b0   : > { %v6213_v59 = vmul.f32 %v15000_v63, %v6173_v49  ;;  %vm6144_vm0 = vcmp.gt.f32.partialorder %v15241_v47, 0.0  ;;  %v7520_v48 = vmul.f32 1.442695, %v7484_v3  ;;  %v6112_v6 = vmul.f32 0.1, %v8856_v41  ;;  %v15382_v11 = vpop.xlane.xlu1 %3478 }
 0x4b1   : > { %v10351_v34 = vpop.eup %10350  ;;  %v6310_v2 = vsel %vm3428_vm2, %v6218_v1, 0.0  ;;  %v7455_v36 = vmin.f32 %v15363_v20, 0.0  ;;  %v15378_v32 = vadd.f32 %v15262_v33, %v14817_v50  ;;  %v6115_v13 = vmul.f32 0.1, %v8859_v62  ;;  %17561 = vst [vmem:[#allocation40_spill] sm:$0xff] %v15382_v11 }
 0x4b2   : > { %v10353_v8 = vpop.eup %10352  ;;  %6311 = vadd.xlane.f32.xlu1 %v6310_v2  ;;  %v6295_v17 = vsel %vm3428_vm2, %v6213_v59, 0.0  ;;  %10358 = vpow2.f32 %v7512_v26  ;;  %v7518_v14 = vmul.f32 1.442695, %v7483_v51  ;;  %v6176_v3 = vsel %vm6144_vm0, %v15241_v47, %v6112_v6  ;;  %v15387_v49 = vpop.xlane.xlu0 %3475 }
 0x4b3   : > { %6296 = vadd.xlane.f32.xlu0 %v6295_v17  ;;  %vm6147_vm1 = vcmp.gt.f32.partialorder %v15248_v9, 0.0  ;;  %v8857_v41 = vadd.f32 -1.0, %v10351_v34  ;;  %v8953_v43 = vadd.f32 -1.0, %v10353_v8  ;;  %v6216_v25 = vmul.f32 %v15000_v63, %v6176_v3  ;;  %17562 = vst [vmem:[#allocation67_spill] sm:$0xff] %v15387_v49 }
 0x4b4   : > { %10360 = vpow2.f32 %v7520_v48  ;;  %v6179_v50 = vsel %vm6147_vm1, %v15248_v9, %v6115_v13  ;;  %v7487_v62 = vmul.f32 10.0, %v7455_v36  ;;  %v7453_v26 = vmin.f32 %v15378_v32, 0.0  ;;  %v15392_v34 = vpop.xlane.xlu1 %3496 }
 0x4b5   : > { %v6304_v51 = vsel %vm3428_vm2, %v6216_v25, 0.0  ;;  %10362 = vpow2.f32 %v7518_v14  ;;  %v6219_v47 = vmul.f32 %v15000_v63, %v6179_v50  ;;  %17563 = vst [vmem:[#allocation41_spill] sm:$0xff] %v15392_v34  ;;  %v15396_v8 = vadd.f32 %v14893_v16, %v15262_v33  ;;  %v15406_v16 = vld [vmem:[%s16936_s8 + $0x3] ss:$0 sm:$0xff] }
 0x4b6   : > { %v10355_v1 = vpop.eup %10354  ;;  %6305 = vadd.xlane.f32.xlu1 %v6304_v51  ;;  %v6113_v9 = vmul.f32 0.1, %v8857_v41  ;;  %v7609_v48 = vmul.f32 0.1, %v8953_v43  ;;  %vm6145_vm3 = vcmp.gt.f32.partialorder %v15271_v7, 0.0  ;;  %vm7641_vm4 = vcmp.gt.f32.partialorder %v15275_v12, 0.0  ;;  %v15410_v25 = vpop.xlane.xlu0 %3469 }
 0x4b7   : > { %v10357_v59 = vpop.eup %10356  ;;  %v8954_v2 = vadd.f32 -1.0, %v10355_v1  ;;  %v6313_v6 = vsel %vm3428_vm2, %v6219_v47, 0.0  ;;  %v7526_v36 = vmul.f32 1.442695, %v7487_v62  ;;  %v7485_v17 = vmul.f32 10.0, %v7453_v26  ;;  %17564 = vst [vmem:[#allocation44_spill] sm:$0xff] %v15410_v25 }
 0x4b8   : > { %6314 = vadd.xlane.f32.xlu0 %v6313_v6  ;;  %v6177_v13 = vsel %vm6145_vm3, %v15271_v7, %v6113_v9  ;;  %v7673_v14 = vsel %vm7641_vm4, %v15275_v12, %v7609_v48  ;;  %v8958_v3 = vadd.f32 -1.0, %v10357_v59  ;;  %v7459_v50 = vmin.f32 %v15396_v8, 0.0  ;;  %v15415_v12 = vpop.xlane.xlu1 %3490 }
 0x4b9   : > { %v6217_v41 = vmul.f32 %v15000_v63, %v6177_v13  ;;  %v7713_v43 = vmul.f32 %v15406_v16, %v7673_v14  ;;  %17565 = vst [vmem:[#allocation46_spill] sm:$0xff] %v15415_v12  ;;  %10364 = vpow2.f32 %v7526_v36  ;;  %v7522_v26 = vmul.f32 1.442695, %v7485_v17 }
 0x4ba   : > { %v7610_v51 = vmul.f32 0.1, %v8954_v2  ;;  %vm7642_vm5 = vcmp.gt.f32.partialorder %v15298_v40, 0.0  ;;  %v7614_v63 = vmul.f32 0.1, %v8958_v3  ;;  %v15418_v59 = vpop.xlane.xlu0 %3487  ;;  %v7491_v48 = vmul.f32 10.0, %v7459_v50 }
 0x4bb   : > { %v6307_v62 = vsel %vm3428_vm2, %v6217_v41, 0.0  ;;  %v7747_v7 = vsel %vm3428_vm2, %v7713_v43, 0.0  ;;  %17566 = vst [vmem:[#allocation48_spill] sm:$0xff] %v15418_v59  ;;  %vm7646_vm6 = vcmp.gt.f32.partialorder %v15306_v19, 0.0  ;;  %10366 = vpow2.f32 %v7522_v26 }
 0x4bc   : > { %v10359_v1 = vpop.eup %10358  ;;  %6308 = vadd.xlane.f32.xlu0 %v6307_v62  ;;  %7748 = vadd.xlane.f32.xlu1 %v7747_v7  ;;  %v7674_v6 = vsel %vm7642_vm5, %v15298_v40, %v7610_v51  ;;  %v15423_v17 = vpop.xlane.xlu1 %3508  ;;  %v7678_v2 = vsel %vm7646_vm6, %v15306_v19, %v7614_v63  ;;  %vm7640_vm7 = vcmp.gt.f32.partialorder %v15324_v29, 0.0  ;;  %vm7644_vm8 = vcmp.gt.f32.partialorder %v15334_v38, 0.0 }
 0x4bd   : > { %v8952_v9 = vadd.f32 -1.0, %v10359_v1  ;;  %v7714_v14 = vmul.f32 %v15406_v16, %v7674_v6  ;;  %17567 = vst [vmem:[#allocation74_spill] sm:$0xff] %v15423_v17  ;;  %v7718_v3 = vmul.f32 %v15406_v16, %v7678_v2  ;;  %v7534_v1 = vmul.f32 1.442695, %v7491_v48 }
 0x4be   : > { %v10361_v47 = vpop.eup %10360  ;;  %v15430_v62 = vpop.xlane.xlu0 %3481  ;;  %vm7643_vm9 = vcmp.gt.f32.partialorder %v15341_v23, 0.0  ;;  %vm7647_vm11 = vcmp.gt.f32.partialorder %v15363_v20, 0.0  ;;  %vm7645_vm12 = vcmp.gt.f32.partialorder %v15378_v32, 0.0  ;;  %vm7651_vm13 = vcmp.gt.f32.partialorder %v15396_v8, 0.0 }
 0x4bf   : > { %v10363_v13 = vpop.eup %10362  ;;  %v8956_v36 = vadd.f32 -1.0, %v10361_v47  ;;  %v7750_v41 = vsel %vm3428_vm2, %v7714_v14, 0.0  ;;  %v7608_v50 = vmul.f32 0.1, %v8952_v9  ;;  %v7762_v40 = vsel %vm3428_vm2, %v7718_v3, 0.0  ;;  %17568 = vst [vmem:[#allocation54_spill] sm:$0xff] %v15430_v62 }
 0x4c0   : > { %v8955_v43 = vadd.f32 -1.0, %v10363_v13  ;;  %7751 = vadd.xlane.f32.xlu0 %v7750_v41  ;;  %7763 = vadd.xlane.f32.xlu1 %v7762_v40  ;;  %10368 = vpow2.f32 %v7534_v1  ;;  %v15435_v47 = vpop.xlane.xlu1 %3502 }
 0x4c1   : > { %v7672_v7 = vsel %vm7640_vm7, %v15324_v29, %v7608_v50  ;;  %v7612_v26 = vmul.f32 0.1, %v8956_v36  ;;  %17569 = vst [vmem:[#allocation53_spill] sm:$0xff] %v15435_v47 }
 0x4c2   : > { %v7712_v19 = vmul.f32 %v15406_v16, %v7672_v7  ;;  %v7611_v9 = vmul.f32 0.1, %v8955_v43  ;;  %v15441_v13 = vpop.xlane.xlu0 %3499 }
 0x4c3   : > { %v10365_v51 = vpop.eup %10364  ;;  %v7676_v63 = vsel %vm7644_vm8, %v15334_v38, %v7612_v26  ;;  %17570 = vst [vmem:[#allocation56_spill] sm:$0xff] %v15441_v13 }
 0x4c4   : > { %v7744_v48 = vsel %vm3428_vm2, %v7712_v19, 0.0  ;;  %v7716_v6 = vmul.f32 %v15406_v16, %v7676_v63  ;;  %v7675_v29 = vsel %vm7643_vm9, %v15341_v23, %v7611_v9  ;;  %v8959_v14 = vadd.f32 -1.0, %v10365_v51  ;;  %v15446_v3 = vpop.xlane.xlu1 %3520 }
 0x4c5   : > { %7745 = vadd.xlane.f32.xlu0 %v7744_v48  ;;  %v7715_v2 = vmul.f32 %v15406_v16, %v7675_v29  ;;  %v10367_v41 = vpop.eup %10366  ;;  %17571 = vst [vmem:[#allocation55_spill] sm:$0xff] %v15446_v3  ;;  %v7362_v51 = vadd.f32 %v14878_v54, %v15262_v33 }
 0x4c6   : > { %v7756_v36 = vsel %vm3428_vm2, %v7716_v6, 0.0  ;;  %v8957_v43 = vadd.f32 -1.0, %v10367_v41  ;;  %v7615_v1 = vmul.f32 0.1, %v8959_v14  ;;  %v15449_v50 = vpop.xlane.xlu0 %3493  ;;  %v15467_v14 = vld [vmem:[%s16937_s9 + $0x1] ss:$0 sm:$0xff] }
 0x4c7   : > { %7757 = vadd.xlane.f32.xlu1 %v7756_v36  ;;  %v7753_v38 = vsel %vm3428_vm2, %v7715_v2, 0.0  ;;  %17572 = vst [vmem:[#allocation62_spill] sm:$0xff] %v15449_v50  ;;  %v7458_v29 = vmin.f32 %v7362_v51, 0.0  ;;  %vm7650_vm14 = vcmp.gt.f32.partialorder %v7362_v51, 0.0 }
 0x4c8   : > { %v7679_v23 = vsel %vm7647_vm11, %v15363_v20, %v7615_v1  ;;  %v15453_v7 = vpop.xlane.xlu1 %3514  ;;  %v7613_v19 = vmul.f32 0.1, %v8957_v43 }
 0x4c9   : > { %7754 = vadd.xlane.f32.xlu0 %v7753_v38  ;;  %17573 = vst [vmem:[#allocation69_spill] sm:$0xff] %v15453_v7  ;;  %v7719_v26 = vmul.f32 %v15406_v16, %v7679_v23  ;;  %v7490_v43 = vmul.f32 10.0, %v7458_v29 }
 0x4ca   : > { %v10369_v40 = vpop.eup %10368  ;;  %v15459_v63 = vpop.xlane.xlu0 %3511  ;;  %v7677_v6 = vsel %vm7645_vm12, %v15378_v32, %v7613_v19 }
 0x4cb   : > { %17574 = vst [vmem:[#allocation70_spill] sm:$0xff] %v15459_v63  ;;  %v7765_v9 = vsel %vm3428_vm2, %v7719_v26, 0.0  ;;  %v8963_v48 = vadd.f32 -1.0, %v10369_v40  ;;  %v7717_v20 = vmul.f32 %v15406_v16, %v7677_v6  ;;  %v7532_v26 = vmul.f32 1.442695, %v7490_v43 }
 0x4cc   : > { %v4704_v36 = vpop.xlane.xlu1 %4703 }
 0x4cd   : > { %7766 = vadd.xlane.f32.xlu0 %v7765_v9  ;;  %v7759_v2 = vsel %vm3428_vm2, %v7717_v20, 0.0  ;;  %v7619_v54 = vmul.f32 0.1, %v8963_v48  ;;  %v4802_v38 = vadd.f32 %v15467_v14, %v4704_v36  ;;  %10370 = vpow2.f32 %v7532_v26 }
 0x4ce   : > { %v15471_v41 = vpop.xlane.xlu0 %3505  ;;  %v7357_v9 = vadd.f32 %v15262_v33, %v14901_v15 }
 0x4cf   : > { %17575 = vst [vmem:[#allocation72_spill] sm:$0xff] %v15471_v41  ;;  %v7683_v32 = vsel %vm7651_vm13, %v15396_v8, %v7619_v54 }
 0x4d0   : > { %v7723_v1 = vmul.f32 %v15406_v16, %v7683_v32  ;;  %v7457_v8 = vmin.f32 %v7357_v9, 0.0  ;;  %vm7649_vm10 = vcmp.gt.f32.partialorder %v7357_v9, 0.0 }
 0x4d1   : > { %7760 = vadd.xlane.f32.xlu0 %v7759_v2 }
 0x4d2   : > { %v15477_v23 = vpop.xlane.xlu0 %3523  ;;  %v7777_v40 = vsel %vm3428_vm2, %v7723_v1, 0.0  ;;  %v7489_v20 = vmul.f32 10.0, %v7457_v8  ;;  %v7354_v8 = vadd.f32 %v15262_v33, %v14886_v57 }
 0x4d3   : > { %17576 = vst [vmem:[#allocation58_spill] sm:$0xff] %v15477_v23 }
 0x4d4   : > { %v7530_v2 = vmul.f32 1.442695, %v7489_v20  ;;  %v7456_v20 = vmin.f32 %v7354_v8, 0.0  ;;  %vm7648_vm15 = vcmp.gt.f32.partialorder %v7354_v8, 0.0 }
 0x4d5   : > { %7778 = vadd.xlane.f32.xlu0 %v7777_v40 }
 0x4d6   : > { %v15480_v19 = vpop.xlane.xlu0 %3517  ;;  %10372 = vpow2.f32 %v7530_v2 }
 0x4d7   : > { %17577 = vst [vmem:[#allocation71_spill] sm:$0xff] %v15480_v19  ;;  %v10371_v6 = vpop.eup %10370 }
 0x4d8   : > { %4868 = vrot.lane.b32.xlu1 %v4802_v38, %s10431_s29  ;;  %v8962_v36 = vadd.f32 -1.0, %v10371_v6 }
 0x4da   : > { %v15484_v48 = vpop.xlane.xlu0 %4706  ;;  %v7618_v38 = vmul.f32 0.1, %v8962_v36 }
 0x4dc   : > { %v7682_v32 = vsel %vm7650_vm14, %v7362_v51, %v7618_v38  ;;  %v7488_v51 = vmul.f32 10.0, %v7456_v20 }
 0x4dd   : > { %v7722_v43 = vmul.f32 %v15406_v16, %v7682_v32  ;;  %v7381_v32 = vadd.f32 %v14965_v52, %v15262_v33 }
 0x4de   : > { %v4701_v29 = vpop.xlane.xlu0 %4700  ;;  %v7528_v38 = vmul.f32 1.442695, %v7488_v51 }
 0x4df   : > { %v4801_v54 = vadd.f32 %v15467_v14, %v4701_v29  ;;  %v7774_v15 = vsel %vm3428_vm2, %v7722_v43, 0.0  ;;  %v4698_v29 = vpop.xlane.xlu1 %4697  ;;  %vm7655_vm0 = vcmp.gt.f32.partialorder %v7381_v32, 0.0 }
 0x4e0   : > { %v10373_v1 = vpop.eup %10372  ;;  %v4800_v2 = vadd.f32 %v15467_v14, %v4698_v29  ;;  %10374 = vpow2.f32 %v7528_v38 }
 0x4e1   : > { %v8961_v40 = vadd.f32 -1.0, %v10373_v1 }
 0x4e3   : > { %v7617_v26 = vmul.f32 0.1, %v8961_v40  ;;  %v4716_v43 = vpop.xlane.xlu1 %4715 }
 0x4e5   : > { %v7681_v6 = vsel %vm7649_vm10, %v7357_v9, %v7617_v26  ;;  %v7463_v9 = vmin.f32 %v7381_v32, 0.0 }
 0x4e6   : > { %v7721_v36 = vmul.f32 %v15406_v16, %v7681_v6  ;;  %v4806_v6 = vadd.f32 %v15467_v14, %v4716_v43 }
 0x4e7   : > { %v7495_v40 = vmul.f32 10.0, %v7463_v9  ;;  %v4710_v20 = vpop.xlane.xlu1 %4709 }
 0x4e8   : > { %v4804_v51 = vadd.f32 %v15467_v14, %v4710_v20  ;;  %v17578_v20 = vld [vmem:[#allocation82_spill] sm:$0xff] }
 0x4ea   : > { %v10375_v57 = vpop.eup %10374 }
 0x4eb   : > { %4866 = vrot.lane.b32.xlu0 %v4801_v54, %s10431_s29  ;;  %v7771_v54 = vsel %vm3428_vm2, %v7721_v36, 0.0  ;;  %v8960_v1 = vadd.f32 -1.0, %v10375_v57  ;;  %v7542_v36 = vmul.f32 1.442695, %v7495_v40 }
 0x4ed   : > { %v7616_v29 = vmul.f32 0.1, %v8960_v1  ;;  %10376 = vpow2.f32 %v7542_v36  ;;  %v7378_v1 = vadd.f32 %v14951_v56, %v15262_v33 }
 0x4ef   : > { %v7680_v52 = vsel %vm7648_vm15, %v7354_v8, %v7616_v29  ;;  %v7370_v8 = vadd.f32 %v15262_v33, %v17578_v20  ;;  %v4803_v29 = vadd.f32 %v15467_v14, %v15484_v48  ;;  %vm7654_vm3 = vcmp.gt.f32.partialorder %v7378_v1, 0.0 }
 0x4f1   : > { %vm7652_vm4 = vcmp.gt.f32.partialorder %v7370_v8, 0.0 }
 0x4f7   : > { %v10377_v57 = vpop.eup %10376 }
 0x4f8   : > { %v8967_v43 = vadd.f32 -1.0, %v10377_v57 }
 0x4fc   : > { %7775 = vadd.xlane.f32.xlu1 %v7774_v15  ;;  %v7373_v15 = vadd.f32 %v15262_v33, %v14972_v31  ;;  %v7720_v31 = vmul.f32 %v15406_v16, %v7680_v52  ;;  %v7460_v52 = vmin.f32 %v7370_v8, 0.0 }
 0x4fe   : > { %v7461_v26 = vmin.f32 %v7373_v15, 0.0  ;;  %v7768_v38 = vsel %vm3428_vm2, %v7720_v31, 0.0  ;;  %vm7653_vm1 = vcmp.gt.f32.partialorder %v7373_v15, 0.0 }
 0x50a   : > { %7772 = vadd.xlane.f32.xlu0 %v7771_v54 }
 0x50d   : > { %4864 = vrot.lane.b32.xlu1 %v4800_v2, %s10431_s29  ;;  %v7493_v2 = vmul.f32 10.0, %v7461_v26  ;;  %v7623_v26 = vmul.f32 0.1, %v8967_v43 }
 0x50f   : > { %v7538_v54 = vmul.f32 1.442695, %v7493_v2  ;;  %v7687_v36 = vsel %vm7655_vm0, %v7381_v32, %v7623_v26 }
 0x511   : > { %10378 = vpow2.f32 %v7538_v54  ;;  %v7727_v54 = vmul.f32 %v15406_v16, %v7687_v36  ;;  %v4728_v36 = vpop.xlane.xlu1 %4727 }
 0x513   : > { %v7789_v57 = vsel %vm3428_vm2, %v7727_v54, 0.0 }
 0x51b   : > { %v10379_v9 = vpop.eup %10378 }
 0x51c   : > { %v8965_v40 = vadd.f32 -1.0, %v10379_v9 }
 0x51e   : > { %v7621_v2 = vmul.f32 0.1, %v8965_v40 }
 0x520   : > { %4876 = vrot.lane.b32.xlu0 %v4806_v6, %s10431_s29  ;;  %v7462_v6 = vmin.f32 %v7378_v1, 0.0  ;;  %v7685_v56 = vsel %vm7653_vm1, %v7373_v15, %v7621_v2 }
 0x521   : > { %v7725_v43 = vmul.f32 %v15406_v16, %v7685_v56 }
 0x523   : > { %v7783_v48 = vsel %vm3428_vm2, %v7725_v43, 0.0  ;;  %v4722_v43 = vpop.xlane.xlu1 %4721 }
 0x524   : > { %4872 = vrot.lane.b32.xlu0 %v4804_v51, %s10431_s29  ;;  %v7494_v51 = vmul.f32 10.0, %v7462_v6  ;;  %v17579_v6 = vld [vmem:[#allocation13_spill] sm:$0xff] }
 0x525   : > { %v7397_v20 = vadd.f32 %v17579_v6, %v15262_v33 }
 0x526   : > { %v7540_v31 = vmul.f32 1.442695, %v7494_v51  ;;  %v17580_v51 = vld [vmem:[#allocation49_spill] sm:$0xff] }
 0x527   : > { %v7467_v2 = vmin.f32 %v7397_v20, 0.0  ;;  %vm7659_vm5 = vcmp.gt.f32.partialorder %v7397_v20, 0.0 }
 0x528   : > { %10380 = vpow2.f32 %v7540_v31 }
 0x529   : > { %v7499_v31 = vmul.f32 10.0, %v7467_v2  ;;  %v4719_v2 = vpop.xlane.xlu0 %4718 }
 0x531   : > { %7769 = vadd.xlane.f32.xlu1 %v7768_v38  ;;  %v7492_v38 = vmul.f32 10.0, %v7460_v52  ;;  %v7389_v52 = vadd.f32 %v15262_v33, %v17580_v51 }
 0x532   : > { %v10381_v32 = vpop.eup %10380 }
 0x533   : > { %v7536_v9 = vmul.f32 1.442695, %v7492_v38  ;;  %v8966_v40 = vadd.f32 -1.0, %v10381_v32  ;;  %v7465_v38 = vmin.f32 %v7389_v52, 0.0  ;;  %v7550_v32 = vmul.f32 1.442695, %v7499_v31 }
 0x534   : > { %vm7657_vm6 = vcmp.gt.f32.partialorder %v7389_v52, 0.0 }
 0x535   : > { %10382 = vpow2.f32 %v7536_v9 }
 0x536   : > { %10384 = vpow2.f32 %v7550_v32  ;;  %v4713_v32 = vpop.xlane.xlu0 %4712 }
 0x53f   : > { %v10383_v26 = vpop.eup %10382 }
 0x540   : > { %v8964_v15 = vadd.f32 -1.0, %v10383_v26  ;;  %v4808_v26 = vadd.f32 %v15467_v14, %v4722_v43 }
 0x542   : > { %4870 = vrot.lane.b32.xlu1 %v4803_v29, %s10431_s29  ;;  %v7622_v29 = vmul.f32 0.1, %v8966_v40  ;;  %v7620_v56 = vmul.f32 0.1, %v8964_v15  ;;  %v7497_v40 = vmul.f32 10.0, %v7465_v38  ;;  %v4807_v38 = vadd.f32 %v15467_v14, %v4719_v2 }
 0x543   : > { %7790 = vadd.xlane.f32.xlu0 %v7789_v57  ;;  %v4810_v57 = vadd.f32 %v15467_v14, %v4728_v36  ;;  %v10385_v36 = vpop.eup %10384 }
 0x544   : > { %v7686_v54 = vsel %vm7654_vm3, %v7378_v1, %v7622_v29  ;;  %v7546_v15 = vmul.f32 1.442695, %v7497_v40  ;;  %v4805_v40 = vadd.f32 %v15467_v14, %v4713_v32 }
 0x545   : > { %v7726_v9 = vmul.f32 %v15406_v16, %v7686_v54  ;;  %v17581_v54 = vld [vmem:[#allocation4_spill] sm:$0xff] }
 0x546   : > { %10386 = vpow2.f32 %v7546_v15 }
 0x547   : > { %7784 = vadd.xlane.f32.xlu0 %v7783_v48  ;;  %v7684_v48 = vsel %vm7652_vm4, %v7370_v8, %v7620_v56  ;;  %v7786_v6 = vsel %vm3428_vm2, %v7726_v9, 0.0  ;;  %v8971_v8 = vadd.f32 -1.0, %v10385_v36  ;;  %v7394_v56 = vadd.f32 %v17581_v54, %v15262_v33  ;;  %v17582_v9 = vld [vmem:[#allocation8_spill] sm:$0xff] }
 0x548   : > { %v7724_v1 = vmul.f32 %v15406_v16, %v7684_v48  ;;  %v7386_v48 = vadd.f32 %v15262_v33, %v17582_v9 }
 0x549   : > { %v7466_v43 = vmin.f32 %v7394_v56, 0.0  ;;  %vm7658_vm7 = vcmp.gt.f32.partialorder %v7394_v56, 0.0 }
 0x54a   : > { %v7780_v29 = vsel %vm3428_vm2, %v7724_v1, 0.0  ;;  %v7464_v15 = vmin.f32 %v7386_v48, 0.0  ;;  %vm7656_vm8 = vcmp.gt.f32.partialorder %v7386_v48, 0.0 }
 0x54b   : > { %v7498_v1 = vmul.f32 10.0, %v7466_v43 }
 0x54d   : > { %v7548_v2 = vmul.f32 1.442695, %v7498_v1  ;;  %v4740_v1 = vpop.xlane.xlu1 %4739 }
 0x54f   : > { %10388 = vpow2.f32 %v7548_v2 }
 0x550   : > { %v10387_v51 = vpop.eup %10386 }
 0x551   : > { %v8969_v31 = vadd.f32 -1.0, %v10387_v51 }
 0x55d   : > { %4884 = vrot.lane.b32.xlu0 %v4810_v57, %s10431_s29  ;;  %v7627_v57 = vmul.f32 0.1, %v8971_v8  ;;  %v7496_v8 = vmul.f32 10.0, %v7464_v15 }
 0x561   : > { %4880 = vrot.lane.b32.xlu0 %v4808_v26, %s10431_s29  ;;  %v7691_v26 = vsel %vm7659_vm5, %v7397_v20, %v7627_v57  ;;  %v10389_v57 = vpop.eup %10388 }
 0x562   : > { %v8970_v9 = vadd.f32 -1.0, %v10389_v57 }
 0x566   : > { %7787 = vadd.xlane.f32.xlu1 %v7786_v6  ;;  %v7625_v6 = vmul.f32 0.1, %v8969_v31  ;;  %v4731_v31 = vpop.xlane.xlu0 %4730 }
 0x568   : > { %v7689_v36 = vsel %vm7657_vm6, %v7389_v52, %v7625_v6  ;;  %v7413_v52 = vadd.f32 %v15096_v4, %v15262_v33  ;;  %v7626_v6 = vmul.f32 0.1, %v8970_v9  ;;  %v4734_v4 = vpop.xlane.xlu1 %4733 }
 0x569   : > { %v7729_v54 = vmul.f32 %v15406_v16, %v7689_v36 }
 0x56a   : > { %7781 = vadd.xlane.f32.xlu1 %v7780_v29  ;;  %v7731_v29 = vmul.f32 %v15406_v16, %v7691_v26  ;;  %v4725_v43 = vpop.xlane.xlu0 %4724  ;;  %v7471_v15 = vmin.f32 %v7413_v52, 0.0  ;;  %v7690_v36 = vsel %vm7658_vm7, %v7394_v56, %v7626_v6  ;;  %vm7663_vm9 = vcmp.gt.f32.partialorder %v7413_v52, 0.0 }
 0x56b   : > { %v7795_v20 = vsel %vm3428_vm2, %v7729_v54, 0.0  ;;  %v4814_v54 = vadd.f32 %v15467_v14, %v4740_v1 }
 0x56c   : > { %v7801_v51 = vsel %vm3428_vm2, %v7731_v29, 0.0  ;;  %v7405_v29 = vadd.f32 %v15262_v33, %v15103_v27  ;;  %v4812_v27 = vadd.f32 %v15467_v14, %v4734_v4 }
 0x56e   : > { %v15543_v26 = vpop.xlane.xlu0 %4742  ;;  %vm7661_vm11 = vcmp.gt.f32.partialorder %v7405_v29, 0.0 }
 0x57b   : > { %4878 = vrot.lane.b32.xlu1 %v4807_v38, %s10431_s29  ;;  %v7544_v38 = vmul.f32 1.442695, %v7496_v8  ;;  %v7503_v8 = vmul.f32 10.0, %v7471_v15 }
 0x57d   : > { %10390 = vpow2.f32 %v7544_v38  ;;  %v15548_v38 = vpop.xlane.xlu0 %4736  ;;  %v7558_v9 = vmul.f32 1.442695, %v7503_v8 }
 0x57f   : > { %4874 = vrot.lane.b32.xlu1 %v4805_v40, %s10431_s29  ;;  %10392 = vpow2.f32 %v7558_v9 }
 0x580   : > { %7802 = vadd.xlane.f32.xlu0 %v7801_v51  ;;  %v7469_v51 = vmin.f32 %v7405_v29, 0.0 }
 0x581   : > { %v15555_v6 = vpop.xlane.xlu0 %4754 }
 0x584   : > { %7796 = vadd.xlane.f32.xlu0 %v7795_v20  ;;  %v7730_v20 = vmul.f32 %v15406_v16, %v7690_v36 }
 0x586   : > { %v7798_v56 = vsel %vm3428_vm2, %v7730_v20, 0.0 }
 0x587   : > { %v10391_v32 = vpop.eup %10390 }
 0x588   : > { %v8968_v40 = vadd.f32 -1.0, %v10391_v32  ;;  %v7501_v32 = vmul.f32 10.0, %v7469_v51 }
 0x589   : > { %v10393_v36 = vpop.eup %10392 }
 0x58a   : > { %v7624_v2 = vmul.f32 0.1, %v8968_v40  ;;  %v7554_v1 = vmul.f32 1.442695, %v7501_v32  ;;  %v8975_v8 = vadd.f32 -1.0, %v10393_v36 }
 0x58c   : > { %v7688_v57 = vsel %vm7656_vm8, %v7386_v48, %v7624_v2  ;;  %10394 = vpow2.f32 %v7554_v1  ;;  %v15559_v48 = vpop.xlane.xlu0 %4748  ;;  %v7631_v9 = vmul.f32 0.1, %v8975_v8 }
 0x58d   : > { %v7728_v40 = vmul.f32 %v15406_v16, %v7688_v57  ;;  %v4811_v57 = vadd.f32 %v15467_v14, %v4731_v31 }
 0x58f   : > { %v7792_v15 = vsel %vm3428_vm2, %v7728_v40, 0.0  ;;  %v7695_v40 = vsel %vm7663_vm9, %v7413_v52, %v7631_v9 }
 0x590   : > { %v15561_v2 = vpop.xlane.xlu0 %4766  ;;  %v7735_v31 = vmul.f32 %v15406_v16, %v7695_v40 }
 0x594   : > { %v15565_v4 = vpop.xlane.xlu0 %4760 }
 0x596   : > { %v10395_v51 = vpop.eup %10394 }
 0x597   : > { %v8973_v20 = vadd.f32 -1.0, %v10395_v51 }
 0x599   : > { %v7629_v1 = vmul.f32 0.1, %v8973_v20 }
 0x59a   : > { %4892 = vrot.lane.b32.xlu0 %v4814_v54, %s10431_s29  ;;  %v7410_v54 = vadd.f32 %v15085_v35, %v15262_v33  ;;  %v15572_v35 = vpop.xlane.xlu0 %4778 }
 0x59b   : > { %v7693_v8 = vsel %vm7661_vm11, %v7405_v29, %v7629_v1  ;;  %v7429_v1 = vadd.f32 %v15182_v22, %v15262_v33 }
 0x59c   : > { %v7470_v32 = vmin.f32 %v7410_v54, 0.0  ;;  %vm7662_vm12 = vcmp.gt.f32.partialorder %v7410_v54, 0.0 }
 0x59d   : > { %vm7667_vm14 = vcmp.gt.f32.partialorder %v7429_v1, 0.0 }
 0x59e   : > { %4888 = vrot.lane.b32.xlu0 %v4812_v27, %s10431_s29  ;;  %v7402_v27 = vadd.f32 %v15262_v33, %v15092_v24  ;;  %v15576_v24 = vpop.xlane.xlu0 %4772 }
 0x5a0   : > { %v7468_v36 = vmin.f32 %v7402_v27, 0.0  ;;  %vm7660_vm13 = vcmp.gt.f32.partialorder %v7402_v27, 0.0 }
 0x5a2   : > { %v7500_v19 = vmul.f32 10.0, %v7468_v36  ;;  %v15581_v9 = vpop.xlane.xlu0 %4790 }
 0x5a3   : > { %7799 = vadd.xlane.f32.xlu1 %v7798_v56  ;;  %v4809_v56 = vadd.f32 %v15467_v14, %v4725_v43  ;;  %v7733_v43 = vmul.f32 %v15406_v16, %v7693_v8  ;;  %v4752_v8 = vpop.xlane.xlu1 %4751 }
 0x5a4   : > { %v7552_v52 = vmul.f32 1.442695, %v7500_v19  ;;  %v7475_v19 = vmin.f32 %v7429_v1, 0.0  ;;  %v4818_v41 = vadd.f32 %v15467_v14, %v4752_v8 }
 0x5a5   : > { %v7807_v20 = vsel %vm3428_vm2, %v7733_v43, 0.0 }
 0x5a7   : > { %7793 = vadd.xlane.f32.xlu1 %v7792_v15  ;;  %v7502_v15 = vmul.f32 10.0, %v7470_v32  ;;  %v4746_v22 = vpop.xlane.xlu1 %4745 }
 0x5a9   : > { %v7556_v51 = vmul.f32 1.442695, %v7502_v15 }
 0x5ab   : > { %10396 = vpow2.f32 %v7556_v51  ;;  %v7421_v51 = vadd.f32 %v15262_v33, %v15187_v30  ;;  %v4816_v30 = vadd.f32 %v15467_v14, %v4746_v22 }
 0x5ac   : > { %10398 = vpow2.f32 %v7552_v52 }
 0x5ad   : > { %vm7665_vm10 = vcmp.gt.f32.partialorder %v7421_v51, 0.0 }
 0x5b5   : > { %v10397_v32 = vpop.eup %10396 }
 0x5b6   : > { %v8974_v29 = vadd.f32 -1.0, %v10397_v32  ;;  %v10399_v40 = vpop.eup %10398  ;;  %v7473_v32 = vmin.f32 %v7421_v51, 0.0 }
 0x5b7   : > { %v8972_v36 = vadd.f32 -1.0, %v10399_v40 }
 0x5b8   : > { %4886 = vrot.lane.b32.xlu1 %v4811_v57, %s10431_s29  ;;  %v7813_v57 = vsel %vm3428_vm2, %v7735_v31, 0.0  ;;  %v7630_v31 = vmul.f32 0.1, %v8974_v29  ;;  %v7505_v50 = vmul.f32 10.0, %v7473_v32  ;;  %v17583_v32 = vld [vmem:[#allocation22_spill] sm:$0xff] }
 0x5b9   : > { %v7628_v43 = vmul.f32 0.1, %v8972_v36 }
 0x5bb   : > { %v7692_v29 = vsel %vm7660_vm13, %v7402_v27, %v7628_v43  ;;  %v4764_v27 = vpop.xlane.xlu1 %4763 }
 0x5bc   : > { %4882 = vrot.lane.b32.xlu1 %v4809_v56, %s10431_s29  ;;  %v15583_v56 = vpop.xlane.xlu0 %4784  ;;  %v7732_v36 = vmul.f32 %v15406_v16, %v7692_v29  ;;  %v4822_v10 = vadd.f32 %v15467_v14, %v4764_v27 }
 0x5bd   : > { %7814 = vadd.xlane.f32.xlu0 %v7813_v57  ;;  %v7694_v57 = vsel %vm7662_vm12, %v7410_v54, %v7630_v31  ;;  %v7562_v31 = vmul.f32 1.442695, %v7505_v50 }
 0x5be   : > { %v7734_v63 = vmul.f32 %v15406_v16, %v7694_v57  ;;  %v7804_v8 = vsel %vm3428_vm2, %v7732_v36, 0.0 }
 0x5bf   : > { %v4758_v22 = vpop.xlane.xlu1 %4757 }
 0x5c0   : > { %v15587_v15 = vpop.xlane.xlu0 %6227  ;;  %v7810_v54 = vsel %vm3428_vm2, %v7734_v63, 0.0  ;;  %v15610_v63 = vld [vmem:[%s16935_s7 + $0x3] ss:$0 sm:$0xff]  ;;  %v4820_v23 = vadd.f32 %v15467_v14, %v4758_v22 }
 0x5c1   : > { %7808 = vadd.xlane.f32.xlu0 %v7807_v20  ;;  %v7507_v20 = vmul.f32 10.0, %v7475_v19  ;;  %v7426_v50 = vadd.f32 %v15610_v63, %v17583_v32 }
 0x5c3   : > { %v7566_v40 = vmul.f32 1.442695, %v7507_v20  ;;  %v7474_v36 = vmin.f32 %v7426_v50, 0.0  ;;  %v15623_v13 = vpop.xlane.xlu1 %4775  ;;  %vm7666_vm15 = vcmp.gt.f32.partialorder %v7426_v50, 0.0 }
 0x5c4   : > { %v15591_v52 = vpop.xlane.xlu0 %6221 }
 0x5c5   : > { %10400 = vpow2.f32 %v7566_v40  ;;  %v7506_v59 = vmul.f32 10.0, %v7474_v36 }
 0x5c6   : > { %10402 = vpow2.f32 %v7562_v31  ;;  %v17584_v31 = vld [vmem:[#allocation29_spill] sm:$0xff] }
 0x5c7   : > { %v15629_v49 = vpop.xlane.xlu1 %4769 }
 0x5c8   : > { %v15597_v33 = vpop.xlane.xlu0 %6230 }
 0x5cf   : > { %v10401_v57 = vpop.eup %10400 }
 0x5d0   : > { %v8979_v43 = vadd.f32 -1.0, %v10401_v57  ;;  %v10403_v20 = vpop.eup %10402  ;;  %v4813_v57 = vadd.f32 %v15467_v14, %v15548_v38 }
 0x5d1   : > { %v8977_v40 = vadd.f32 -1.0, %v10403_v20 }
 0x5d3   : > { %v7633_v20 = vmul.f32 0.1, %v8977_v40 }
 0x5d7   : > { %4900 = vrot.lane.b32.xlu0 %v4818_v41, %s10431_s29  ;;  %v15603_v41 = vpop.xlane.xlu0 %6242 }
 0x5db   : > { %4896 = vrot.lane.b32.xlu0 %v4816_v30, %s10431_s29  ;;  %v15605_v19 = vpop.xlane.xlu0 %6236  ;;  %v4815_v30 = vadd.f32 %v15467_v14, %v15543_v26 }
 0x5df   : > { %v15614_v29 = vpop.xlane.xlu0 %6254 }
 0x5e0   : > { %7811 = vadd.xlane.f32.xlu1 %v7810_v54  ;;  %v7635_v54 = vmul.f32 0.1, %v8979_v43  ;;  %v7697_v43 = vsel %vm7665_vm10, %v7421_v51, %v7633_v20 }
 0x5e1   : > { %v7737_v55 = vmul.f32 %v15406_v16, %v7697_v43 }
 0x5e2   : > { %v7699_v62 = vsel %vm7667_vm14, %v7429_v1, %v7635_v54  ;;  %v15636_v54 = vpop.xlane.xlu1 %4787 }
 0x5e3   : > { %v15625_v32 = vpop.xlane.xlu0 %6248  ;;  %v7739_v26 = vmul.f32 %v15406_v16, %v7699_v62  ;;  %v7819_v40 = vsel %vm3428_vm2, %v7737_v55, 0.0 }
 0x5e4   : > { %7805 = vadd.xlane.f32.xlu1 %v7804_v8  ;;  %v7418_v8 = vadd.f32 %v15610_v63, %v17584_v31  ;;  %v7564_v31 = vmul.f32 1.442695, %v7506_v59 }
 0x5e5   : > { %v7825_v38 = vsel %vm3428_vm2, %v7739_v26, 0.0  ;;  %v7445_v26 = vadd.f32 %v15610_v63, %v15229_v0 }
 0x5e6   : > { %v7472_v25 = vmin.f32 %v7418_v8, 0.0  ;;  %10404 = vpow2.f32 %v7564_v31  ;;  %vm7664_vm0 = vcmp.gt.f32.partialorder %v7418_v8, 0.0 }
 0x5e7   : > { %v15631_v18 = vpop.xlane.xlu0 %6266  ;;  %vm7671_vm1 = vcmp.gt.f32.partialorder %v7445_v26, 0.0 }
 0x5eb   : > { %v15638_v36 = vpop.xlane.xlu0 %6260 }
 0x5ef   : > { %v15642_v59 = vpop.xlane.xlu0 %6278 }
 0x5f0   : > { %v10405_v62 = vpop.eup %10404 }
 0x5f1   : > { %v8978_v51 = vadd.f32 -1.0, %v10405_v62 }
 0x5f3   : > { %v15648_v43 = vpop.xlane.xlu0 %6272  ;;  %v7634_v31 = vmul.f32 0.1, %v8978_v51 }
 0x5f5   : > { %4894 = vrot.lane.b32.xlu1 %v4815_v30, %s10431_s29  ;;  %v7504_v30 = vmul.f32 10.0, %v7472_v25  ;;  %v15640_v25 = vpop.xlane.xlu1 %4781  ;;  %v7698_v62 = vsel %vm7666_vm15, %v7426_v50, %v7634_v31 }
 0x5f6   : > { %v7738_v0 = vmul.f32 %v15406_v16, %v7698_v62 }
 0x5f7   : > { %v7560_v1 = vmul.f32 1.442695, %v7504_v30  ;;  %v7479_v30 = vmin.f32 %v7445_v26, 0.0 }
 0x5f8   : > { %v7822_v50 = vsel %vm3428_vm2, %v7738_v0, 0.0 }
 0x5f9   : > { %4890 = vrot.lane.b32.xlu1 %v4813_v57, %s10431_s29  ;;  %10406 = vpow2.f32 %v7560_v1  ;;  %v15644_v57 = vpop.xlane.xlu1 %6224  ;;  %v7511_v39 = vmul.f32 10.0, %v7479_v30 }
 0x5fa   : > { %7826 = vadd.xlane.f32.xlu0 %v7825_v38  ;;  %v7437_v38 = vadd.f32 %v15610_v63, %v15233_v60 }
 0x5fb   : > { %v7574_v60 = vmul.f32 1.442695, %v7511_v39 }
 0x5fc   : > { %v7477_v7 = vmin.f32 %v7437_v38, 0.0  ;;  %vm7669_vm3 = vcmp.gt.f32.partialorder %v7437_v38, 0.0 }
 0x5fd   : > { %v15652_v1 = vpop.xlane.xlu1 %6239  ;;  %10408 = vpow2.f32 %v7574_v60 }
 0x5fe   : > { %7820 = vadd.xlane.f32.xlu0 %v7819_v40  ;;  %v15654_v40 = vpop.xlane.xlu0 %6290  ;;  %v7509_v47 = vmul.f32 10.0, %v7477_v7 }
 0x600   : > { %v7570_v27 = vmul.f32 1.442695, %v7509_v47  ;;  %v7442_v47 = vadd.f32 %v15610_v63, %v15220_v28  ;;  %v4817_v28 = vadd.f32 %v15467_v14, %v15559_v48 }
 0x602   : > { %v15662_v17 = vpop.xlane.xlu0 %6284  ;;  %10410 = vpow2.f32 %v7570_v27  ;;  %vm7670_vm4 = vcmp.gt.f32.partialorder %v7442_v47, 0.0 }
 0x603   : > { %v10407_v20 = vpop.eup %10406 }
 0x604   : > { %v8976_v55 = vadd.f32 -1.0, %v10407_v20  ;;  %v15658_v20 = vpop.xlane.xlu1 %6233 }
 0x606   : > { %v7632_v44 = vmul.f32 0.1, %v8976_v55 }
 0x607   : > { %v10409_v22 = vpop.eup %10408 }
 0x608   : > { %v7696_v51 = vsel %vm7664_vm0, %v7418_v8, %v7632_v44  ;;  %v15667_v31 = vpop.xlane.xlu1 %6251  ;;  %v15670_v44 = vpop.xlane.xlu0 %6302  ;;  %v8983_v30 = vadd.f32 -1.0, %v10409_v22 }
 0x609   : > { %v7736_v55 = vmul.f32 %v15406_v16, %v7696_v51  ;;  %v4819_v51 = vadd.f32 %v15467_v14, %v15555_v6 }
 0x60a   : > { %v7639_v60 = vmul.f32 0.1, %v8983_v30 }
 0x60c   : > { %v15672_v39 = vpop.xlane.xlu1 %6245  ;;  %v15674_v7 = vpop.xlane.xlu0 %6296  ;;  %v7703_v22 = vsel %vm7671_vm1, %v7445_v26, %v7639_v60 }
 0x610   : > { %v15676_v8 = vpop.xlane.xlu1 %6263  ;;  %v15680_v62 = vpop.xlane.xlu0 %6314 }
 0x614   : > { %4908 = vrot.lane.b32.xlu0 %v4822_v10, %s10431_s29  ;;  %v7816_v10 = vsel %vm3428_vm2, %v7736_v55, 0.0  ;;  %v7434_v55 = vadd.f32 %v15610_v63, %v15226_v46  ;;  %v15686_v27 = vpop.xlane.xlu1 %6257  ;;  %v7743_v46 = vmul.f32 %v15406_v16, %v7703_v22 }
 0x616   : > { %v7476_v34 = vmin.f32 %v7434_v55, 0.0  ;;  %v7837_v45 = vsel %vm3428_vm2, %v7743_v46, 0.0  ;;  %vm7668_vm5 = vcmp.gt.f32.partialorder %v7434_v55, 0.0 }
 0x618   : > { %4904 = vrot.lane.b32.xlu0 %v4820_v23, %s10431_s29  ;;  %v10411_v23 = vpop.eup %10410  ;;  %v15694_v6 = vpop.xlane.xlu1 %6275 }
 0x619   : > { %v8981_v0 = vadd.f32 -1.0, %v10411_v23 }
 0x61b   : > { %v7637_v23 = vmul.f32 0.1, %v8981_v0 }
 0x61c   : > { %v15701_v0 = vpop.xlane.xlu1 %6269 }
 0x61d   : > { %7823 = vadd.xlane.f32.xlu1 %v7822_v50  ;;  %v7478_v50 = vmin.f32 %v7442_v47, 0.0  ;;  %v7701_v63 = vsel %vm7669_vm3, %v7437_v38, %v7637_v23 }
 0x61e   : > { %v7741_v48 = vmul.f32 %v15406_v16, %v7701_v63 }
 0x61f   : > { %v7510_v12 = vmul.f32 10.0, %v7478_v50 }
 0x620   : > { %v7831_v50 = vsel %vm3428_vm2, %v7741_v48, 0.0  ;;  %v15706_v38 = vpop.xlane.xlu1 %6287 }
 0x621   : > { %7817 = vadd.xlane.f32.xlu1 %v7816_v10  ;;  %v15689_v10 = vpop.xlane.xlu0 %6308  ;;  %v7572_v30 = vmul.f32 1.442695, %v7510_v12 }
 0x623   : > { %10412 = vpow2.f32 %v7572_v30 }
 0x625   : > { %v15697_v11 = vpop.xlane.xlu0 %7751 }
 0x629   : > { %v15703_v60 = vpop.xlane.xlu0 %7745 }
 0x62d   : > { %v10413_v12 = vpop.eup %10412 }
 0x62e   : > { %v8982_v22 = vadd.f32 -1.0, %v10413_v12 }
 0x630   : > { %v7638_v63 = vmul.f32 0.1, %v8982_v22  ;;  %v4824_v22 = vadd.f32 %v15467_v14, %v15629_v49  ;;  %v4828_v49 = vadd.f32 %v15467_v14, %v15640_v25 }
 0x632   : > { %4902 = vrot.lane.b32.xlu1 %v4819_v51, %s10431_s29  ;;  %v7508_v51 = vmul.f32 10.0, %v7476_v34  ;;  %v15708_v34 = vpop.xlane.xlu0 %7754  ;;  %v7702_v48 = vsel %vm7670_vm4, %v7442_v47, %v7638_v63 }
 0x633   : > { %v7742_v12 = vmul.f32 %v15406_v16, %v7702_v48 }
 0x634   : > { %v7568_v26 = vmul.f32 1.442695, %v7508_v51 }
 0x635   : > { %v7834_v5 = vsel %vm3428_vm2, %v7742_v12, 0.0 }
 0x636   : > { %4898 = vrot.lane.b32.xlu1 %v4817_v28, %s10431_s29  ;;  %10414 = vpow2.f32 %v7568_v26  ;;  %v15710_v28 = vpop.xlane.xlu1 %6281 }
 0x637   : > { %7838 = vadd.xlane.f32.xlu0 %v7837_v45  ;;  %v15712_v45 = vpop.xlane.xlu0 %7766 }
 0x63a   : > { %v15714_v30 = vpop.xlane.xlu1 %6299 }
 0x63b   : > { %7832 = vadd.xlane.f32.xlu0 %v7831_v50  ;;  %v15716_v51 = vpop.xlane.xlu0 %7760  ;;  %v4826_v50 = vadd.f32 %v15467_v14, %v15623_v13 }
 0x63e   : > { %v15720_v37 = vpop.xlane.xlu1 %6293 }
 0x640   : > { %v10415_v23 = vpop.eup %10414 }
 0x641   : > { %v8980_v46 = vadd.f32 -1.0, %v10415_v23  ;;  %v15724_v23 = vpop.xlane.xlu0 %7778 }
 0x642   : > { %v15731_v13 = vpop.xlane.xlu1 %6311 }
 0x643   : > { %v7636_v26 = vmul.f32 0.1, %v8980_v46  ;;  %v4830_v46 = vadd.f32 %v15467_v14, %v15636_v54 }
 0x645   : > { %v7700_v21 = vsel %vm7668_vm5, %v7434_v55, %v7636_v26  ;;  %v15735_v63 = vpop.permute.xlu0 %4866 }
 0x646   : > { %v7740_v47 = vmul.f32 %v15406_v16, %v7700_v21  ;;  %v15744_v21 = vld [vmem:[%s16937_s9 + $0x2] ss:$0 sm:$0xff] }
 0x647   : > { %v6325_v54 = vadd.f32 %v15744_v21, %v15644_v57  ;;  %v6330_v26 = vadd.f32 %v15744_v21, %v15652_v1  ;;  %v6328_v12 = vadd.f32 %v15744_v21, %v15658_v20  ;;  %v4823_v57 = vadd.f32 %v15467_v14, %v15561_v2 }
 0x648   : > { %v7828_v55 = vsel %vm3428_vm2, %v7740_v47, 0.0  ;;  %v6334_v47 = vadd.f32 %v15744_v21, %v15667_v31  ;;  %v4821_v1 = vadd.f32 %v15467_v14, %v15565_v4  ;;  %v6332_v2 = vadd.f32 %v15744_v21, %v15672_v39 }
 0x649   : > { %v15748_v16 = vpop.xlane.xlu0 %7772  ;;  %v4827_v20 = vadd.f32 %v15467_v14, %v15572_v35  ;;  %v6338_v4 = vadd.f32 %v15744_v21, %v15676_v8  ;;  %v6336_v35 = vadd.f32 %v15744_v21, %v15686_v27  ;;  %v4831_v39 = vadd.f32 %v15467_v14, %v15581_v9 }
 0x64a   : > { %v4829_v8 = vadd.f32 %v15467_v14, %v15583_v56  ;;  %v6340_v9 = vadd.f32 %v15744_v21, %v15701_v0  ;;  %v6326_v27 = vadd.f32 %v15744_v21, %v15587_v15  ;;  %v6324_v56 = vadd.f32 %v15744_v21, %v15591_v52 }
 0x64b   : > { %v6344_v15 = vadd.f32 %v15744_v21, %v15710_v28  ;;  %v17585_v52 = vlaneseq  ;;  %v6331_v28 = vadd.f32 %v15744_v21, %v15603_v41  ;;  %v17087_v41 = vmov 0.0  }
 0x64d   : > { %v15756_v25 = vpop.permute.xlu0 %4876 }
 0x651   : > { %4916 = vrot.lane.b32.xlu0 %v4826_v50, %s10431_s29 }
 0x655   : > { %4912 = vrot.lane.b32.xlu0 %v4824_v22, %s10431_s29  ;;  %v15767_v22 = vpop.permute.xlu0 %4872 }
 0x659   : > { %4924 = vrot.lane.b32.xlu0 %v4830_v46, %s10431_s29 }
 0x65a   : > { %7835 = vadd.xlane.f32.xlu1 %v7834_v5  ;;  %v15746_v5 = vpop.xlane.xlu1 %6305 }
 0x65d   : > { %4920 = vrot.lane.b32.xlu0 %v4828_v49, %s10431_s29 }
 0x65e   : > { %7829 = vadd.xlane.f32.xlu1 %v7828_v55  ;;  %v15753_v48 = vpop.xlane.xlu1 %7748  ;;  %v15777_v55 = vpop.xlane.xlu0 %7790 }
 0x661   : > { %6390 = vrot.lane.b32.xlu0 %v6325_v54, %s10432_s16  ;;  %v4825_v54 = vadd.f32 %v15467_v14, %v15576_v24  ;;  %v6342_v24 = vadd.f32 %v15744_v21, %v15694_v6  ;;  %v6346_v14 = vadd.f32 %v15744_v21, %v15706_v38 }
 0x662   : > { %v15761_v50 = vpop.xlane.xlu1 %7763  ;;  %v15786_v49 = vpop.xlane.xlu0 %7784 }
 0x665   : > { %6400 = vrot.lane.b32.xlu0 %v6330_v26, %s10432_s16 }
 0x666   : > { %v15775_v46 = vpop.xlane.xlu1 %7757 }
 0x669   : > { %6396 = vrot.lane.b32.xlu0 %v6328_v12, %s10432_s16  ;;  %v15801_v12 = vpop.permute.xlu0 %4884 }
 0x66a   : > { %v4869_v31 = vpop.permute.xlu1 %4868 }
 0x66d   : > { %6408 = vrot.lane.b32.xlu0 %v6334_v47, %s10432_s16  ;;  %v15810_v47 = vpop.permute.xlu0 %4880 }
 0x66e   : > { %v15794_v26 = vpop.xlane.xlu1 %7775 }
 0x66f   : > { %4910 = vrot.lane.b32.xlu1 %v4823_v57, %s10431_s29 }
 0x671   : > { %6404 = vrot.lane.b32.xlu0 %v6332_v2, %s10432_s16  ;;  %v15820_v6 = vpop.xlane.xlu0 %7802  ;;  %v6327_v2 = vadd.f32 %v15744_v21, %v15597_v33 }
 0x672   : > { %v4865_v57 = vpop.permute.xlu1 %4864 }
 0x673   : > { %4906 = vrot.lane.b32.xlu1 %v4821_v1, %s10431_s29 }
 0x675   : > { %6416 = vrot.lane.b32.xlu0 %v6338_v4, %s10432_s16  ;;  %v15842_v4 = vand.u32 127, %v17585_v52  ;;  %v6339_v52 = vadd.f32 %v15744_v21, %v15631_v18 }
 0x676   : > { %v15817_v1 = vpop.xlane.xlu1 %7769 }
 0x677   : > { %4918 = vrot.lane.b32.xlu1 %v4827_v20, %s10431_s29  ;;  %v15835_v20 = vpop.xlane.xlu0 %7796 }
 0x679   : > { %6412 = vrot.lane.b32.xlu0 %v6336_v35, %s10432_s16  ;;  %v17586_v35 = vld [vmem:[#allocation94_spill] sm:$0xff] }
 0x67a   : > { %v15828_v0 = vpop.permute.xlu1 %4870  ;;  %vm2270_vm2 = vcmp.eq.s32.totalorder %v17586_v35, %v15842_v4 }
 0x67b   : > { %4914 = vrot.lane.b32.xlu1 %v4825_v54, %s10431_s29  ;;  %v6350_v54 = vadd.f32 %v15744_v21, %v15714_v30  ;;  %v15849_v33 = vpop.permute.xlu0 %4892  ;;  %v15862_v30 = vsel %vm2270_vm2, 1.0, %v17087_v41 }
 0x67d   : > { %6424 = vrot.lane.b32.xlu0 %v6342_v24, %s10432_s16  ;;  %v6329_v24 = vadd.f32 %v15744_v21, %v15605_v19 }
 0x67e   : > { %v15838_v38 = vpop.xlane.xlu1 %7787 }
 0x67f   : > { %4926 = vrot.lane.b32.xlu1 %v4831_v39, %s10431_s29  ;;  %v6348_v39 = vadd.f32 %v15744_v21, %v15720_v37  ;;  %v6335_v37 = vadd.f32 %v15744_v21, %v15614_v29  ;;  %v6354_v29 = vadd.f32 %v15744_v21, %v15731_v13  ;;  %v6337_v13 = vadd.f32 %v15744_v21, %v15638_v36 }
 0x681   : > { %6420 = vrot.lane.b32.xlu0 %v6340_v9, %s10432_s16  ;;  %v17587_v9 = vld [vmem:[#allocation26_spill] sm:$0xff] }
 0x682   : > { %vm2268_vm6 = vcmp.eq.s32.totalorder %v17587_v9, %v15842_v4 }
 0x683   : > { %4922 = vrot.lane.b32.xlu1 %v4829_v8, %s10431_s29  ;;  %v15858_v8 = vpop.xlane.xlu1 %7781  ;;  %v15874_v19 = vsel %vm2268_vm6, 1.0, %v17087_v41 }
 0x685   : > { %6432 = vrot.lane.b32.xlu0 %v6346_v14, %s10432_s16  ;;  %v15870_v14 = vpop.permute.xlu0 %4888 }
 0x687   : > { %6392 = vrot.lane.b32.xlu1 %v6326_v27, %s10432_s16  ;;  %v4962_v27 = vmul.f32 %v15862_v30, %v4869_v31  ;;  %v6333_v31 = vadd.f32 %v15744_v21, %v15625_v32  ;;  %v17588_v32 = vld [vmem:[#allocation66_spill] sm:$0xff] }
 0x688   : > { %vm2274_vm7 = vcmp.eq.s32.totalorder %v17588_v32, %v15842_v4 }
 0x689   : > { %6428 = vrot.lane.b32.xlu0 %v6344_v15, %s10432_s16  ;;  %v4960_v15 = vmul.f32 %v15874_v19, %v4865_v57  ;;  %v15906_v18 = vsel %vm2274_vm7, 1.0, %v17087_v41 }
 0x68b   : > { %6388 = vrot.lane.b32.xlu1 %v6324_v56, %s10432_s16  ;;  %v15876_v56 = vpop.permute.xlu1 %4878 }
 0x68d   : > { %6440 = vrot.lane.b32.xlu0 %v6350_v54, %s10432_s16 }
 0x68f   : > { %6394 = vrot.lane.b32.xlu1 %v6327_v2, %s10432_s16  ;;  %v15882_v2 = vpop.xlane.xlu0 %7814  ;;  %v15890_v54 = vpop.permute.xlu1 %4874 }
 0x691   : > { %6436 = vrot.lane.b32.xlu0 %v6348_v39, %s10432_s16  ;;  %v17589_v39 = vld [vmem:[#allocation32_spill] sm:$0xff] }
 0x692   : > { %vm2272_vm8 = vcmp.eq.s32.totalorder %v17589_v39, %v15842_v4 }
 0x693   : > { %6402 = vrot.lane.b32.xlu1 %v6331_v28, %s10432_s16  ;;  %v15893_v57 = vpop.xlane.xlu0 %7808  ;;  %v6352_v28 = vadd.f32 %v15744_v21, %v15746_v5  ;;  %v15902_v35 = vpop.xlane.xlu1 %7799  ;;  %v6343_v5 = vadd.f32 %v15744_v21, %v15642_v59  ;;  %v15919_v36 = vsel %vm2272_vm8, 1.0, %v17087_v41  ;;  %v15931_v59 = vld [vmem:[%s16937_s9 + $0x3] ss:$0 sm:$0xff] }
 0x695   : > { %5028 = vrot.lane.b32.xlu0 %v4962_v27, %s10434_s18 }
 0x697   : > { %6398 = vrot.lane.b32.xlu1 %v6329_v24, %s10432_s16  ;;  %v4966_v24 = vmul.f32 %v15906_v18, %v15756_v25  ;;  %v15915_v9 = vpop.permute.xlu0 %4900  ;;  %v15921_v27 = vpop.xlane.xlu1 %7793  ;;  %v6341_v25 = vadd.f32 %v15744_v21, %v15648_v43  ;;  %v6347_v43 = vadd.f32 %v15744_v21, %v15654_v40  ;;  %v6345_v40 = vadd.f32 %v15744_v21, %v15662_v17 }
 0x699   : > { %5024 = vrot.lane.b32.xlu0 %v4960_v15, %s10434_s18 }
 0x69b   : > { %6410 = vrot.lane.b32.xlu1 %v6335_v37, %s10432_s16  ;;  %v4964_v37 = vmul.f32 %v15919_v36, %v15767_v22  ;;  %v15934_v15 = vpop.permute.xlu0 %4896  ;;  %v7849_v22 = vadd.f32 %v15931_v59, %v15753_v48 }
 0x69d   : > { %6448 = vrot.lane.b32.xlu0 %v6354_v29, %s10432_s16  ;;  %v15943_v29 = vpop.permute.xlu1 %4886 }
 0x69f   : > { %6406 = vrot.lane.b32.xlu1 %v6333_v31, %s10432_s16  ;;  %v17590_v31 = vld [vmem:[#allocation57_spill] sm:$0xff]  ;;  %v15949_v32 = vpop.xlane.xlu0 %7826 }
 0x6a0   : > { %vm2278_vm9 = vcmp.eq.s32.totalorder %v17590_v31, %v15842_v4 }
 0x6a1   : > { %6444 = vrot.lane.b32.xlu0 %v6352_v28, %s10432_s16  ;;  %v17591_v28 = vld [vmem:[#allocation50_spill] sm:$0xff]  ;;  %v15962_v39 = vpop.permute.xlu1 %4882 }
 0x6a2   : > { %vm2276_vm11 = vcmp.eq.s32.totalorder %v17591_v28, %v15842_v4 }
 0x6a3   : > { %6418 = vrot.lane.b32.xlu1 %v6339_v52, %s10432_s16  ;;  %v15947_v52 = vsel %vm2278_vm9, 1.0, %v17087_v41 }
 0x6a4   : > { %v4970_v48 = vmul.f32 %v15947_v52, %v15801_v12  ;;  %v7854_v12 = vadd.f32 %v15931_v59, %v15761_v50  ;;  %v7852_v50 = vadd.f32 %v15931_v59, %v15775_v46  ;;  %v17595_v46 = vld [vmem:[#allocation95_spill] sm:$0xff] }
 0x6a5   : > { %5036 = vrot.lane.b32.xlu0 %v4966_v24, %s10434_s18  ;;  %v15972_v17 = vpop.xlane.xlu1 %7811  ;;  %vm2280_vm10 = vcmp.eq.s32.totalorder %v17595_v46, %v15842_v4  ;;  %v17597_v46 = vld [vmem:[#allocation25_spill] sm:$0xff] }
 0x6a6   : > { %vm2286_vm0 = vcmp.eq.s32.totalorder %v17597_v46, %v15842_v4 }
 0x6a7   : > { %6414 = vrot.lane.b32.xlu1 %v6337_v13, %s10432_s16  ;;  %v15960_v13 = vsel %vm2276_vm11, 1.0, %v17087_v41 }
 0x6a8   : > { %v4968_v24 = vmul.f32 %v15960_v13, %v15810_v47  ;;  %v6349_v47 = vadd.f32 %v15744_v21, %v15674_v7 }
 0x6a9   : > { %5032 = vrot.lane.b32.xlu0 %v4964_v37, %s10434_s18  ;;  %v15969_v37 = vpop.xlane.xlu0 %7820  ;;  %v15996_v28 = vpop.xlane.xlu1 %7805 }
 0x6ab   : > { %6426 = vrot.lane.b32.xlu1 %v6343_v5, %s10432_s16  ;;  %v6351_v5 = vadd.f32 %v15744_v21, %v15670_v44 }
 0x6ad   : > { %7914 = vrot.lane.b32.xlu0 %v7849_v22, %s10435_s21  ;;  %v15982_v44 = vpop.permute.xlu0 %4908  ;;  %v17593_v22 = vld [vmem:[#allocation97_spill] sm:$0xff] }
 0x6ae   : > { %vm2282_vm13 = vcmp.eq.s32.totalorder %v17593_v22, %v15842_v4 }
 0x6af   : > { %6422 = vrot.lane.b32.xlu1 %v6341_v25, %s10432_s16  ;;  %v17592_v25 = vld [vmem:[#allocation23_spill] sm:$0xff] }
 0x6b0   : > { %vm2271_vm12 = vcmp.eq.s32.totalorder %v17592_v25, %v15842_v4  ;;  %v16018_v25 = vpop.permute.xlu1 %4894 }
 0x6b1   : > { %5044 = vrot.lane.b32.xlu0 %v4970_v48, %s10434_s18  ;;  %v15986_v31 = vsel %vm2271_vm12, 1.0, %v17087_v41  ;;  %v16000_v48 = vsel %vm2282_vm13, 1.0, %v17087_v41  ;;  %vm2298_vm12 = vcmp.eq.s32.totalorder %v15213_v58, %v15842_v4 }
 0x6b2   : > { %v4963_v7 = vmul.f32 %v15986_v31, %v15828_v0 }
 0x6b3   : > { %6434 = vrot.lane.b32.xlu1 %v6347_v43, %s10432_s16  ;;  %v17594_v43 = vld [vmem:[#allocation28_spill] sm:$0xff] }
 0x6b4   : > { %vm2269_vm14 = vcmp.eq.s32.totalorder %v17594_v43, %v15842_v4  ;;  %v6353_v43 = vadd.f32 %v15744_v21, %v15689_v10 }
 0x6b5   : > { %5040 = vrot.lane.b32.xlu0 %v4968_v24, %s10434_s18  ;;  %v4974_v24 = vmul.f32 %v16000_v48, %v15849_v33  ;;  %v6355_v33 = vadd.f32 %v15744_v21, %v15680_v62 }
 0x6b7   : > { %6430 = vrot.lane.b32.xlu1 %v6345_v40, %s10432_s16  ;;  %v16004_v40 = vsel %vm2269_vm14, 1.0, %v17087_v41 }
 0x6b8   : > { %v4961_v0 = vmul.f32 %v16004_v40, %v15735_v63  ;;  %v7858_v63 = vadd.f32 %v15931_v59, %v15794_v26  ;;  %v7856_v26 = vadd.f32 %v15931_v59, %v15817_v1  ;;  %v17600_v1 = vld [vmem:[#allocation6_spill] sm:$0xff] }
 0x6b9   : > { %7924 = vrot.lane.b32.xlu0 %v7854_v12, %s10435_s21  ;;  %v16016_v12 = vsel %vm2280_vm10, 1.0, %v17087_v41  ;;  %vm2284_vm3 = vcmp.eq.s32.totalorder %v17600_v1, %v15842_v4 }
 0x6bb   : > { %6442 = vrot.lane.b32.xlu1 %v6351_v5, %s10432_s16  ;;  %v16012_v5 = vpop.permute.xlu0 %4904 }
 0x6bd   : > { %7920 = vrot.lane.b32.xlu0 %v7852_v50, %s10435_s21  ;;  %v17596_v50 = vld [vmem:[#allocation35_spill] sm:$0xff] }
 0x6be   : > { %vm2275_vm15 = vcmp.eq.s32.totalorder %v17596_v50, %v15842_v4 }
 0x6bf   : > { %6438 = vrot.lane.b32.xlu1 %v6349_v47, %s10432_s16  ;;  %v4972_v47 = vmul.f32 %v16016_v12, %v15870_v14  ;;  %v16042_v62 = vsel %vm2275_vm15, 1.0, %v17087_v41 }
 0x6c0   : > { %v4967_v10 = vmul.f32 %v16042_v62, %v15876_v56 }
 0x6c1   : > { %5052 = vrot.lane.b32.xlu0 %v4974_v24, %s10434_s18  ;;  %v17598_v24 = vld [vmem:[#allocation59_spill] sm:$0xff] }
 0x6c2   : > { %vm2273_vm1 = vcmp.eq.s32.totalorder %v17598_v24, %v15842_v4 }
 0x6c3   : > { %5030 = vrot.lane.b32.xlu1 %v4963_v7, %s10434_s18  ;;  %v16035_v7 = vpop.permute.xlu1 %4890 }
 0x6c4   : > { %v16025_v22 = vpop.xlane.xlu0 %7838 }
 0x6c5   : > { %5048 = vrot.lane.b32.xlu0 %v4972_v47, %s10434_s18  ;;  %v16058_v47 = vsel %vm2286_vm0, 1.0, %v17087_v41 }
 0x6c6   : > { %v4978_v56 = vmul.f32 %v16058_v47, %v15915_v9  ;;  %v7850_v9 = vadd.f32 %v15931_v59, %v15697_v11  ;;  %v17601_v11 = vld [vmem:[#allocation2_spill] sm:$0xff] }
 0x6c7   : > { %5026 = vrot.lane.b32.xlu1 %v4961_v0, %s10434_s18  ;;  %v16052_v21 = vpop.xlane.xlu1 %7823  ;;  %vm2290_vm4 = vcmp.eq.s32.totalorder %v17601_v11, %v15842_v4 }
 0x6c8   : > { %v16037_v14 = vpop.xlane.xlu0 %7832 }
 0x6c9   : > { %7932 = vrot.lane.b32.xlu0 %v7858_v63, %s10435_s21 }
 0x6cb   : > { %6450 = vrot.lane.b32.xlu1 %v6355_v33, %s10432_s16  ;;  %v16062_v33 = vsel %vm2273_vm1, 1.0, %v17087_v41  ;;  %v16076_v46 = vpop.xlane.xlu1 %7817 }
 0x6cc   : > { %v16054_v0 = vpop.permute.xlu0 %4916  ;;  %17599 = vst [vmem:[#allocation77_spill] sm:$0xff] %v16062_v33  ;;  %v4965_v63 = vmul.f32 %v16062_v33, %v15890_v54  ;;  %v7862_v54 = vadd.f32 %v15931_v59, %v15838_v38 }
 0x6cd   : > { %7928 = vrot.lane.b32.xlu0 %v7856_v26, %s10435_s21 }
 0x6cf   : > { %6446 = vrot.lane.b32.xlu1 %v6353_v43, %s10432_s16  ;;  %v16074_v43 = vsel %vm2284_vm3, 1.0, %v17087_v41  ;;  %v16091_v1 = vpop.permute.xlu1 %4902 }
 0x6d0   : > { %v16070_v50 = vpop.permute.xlu0 %4912  ;;  %v4976_v26 = vmul.f32 %v16074_v43, %v15934_v15  ;;  %v7860_v15 = vadd.f32 %v15931_v59, %v15858_v8  ;;  %v17604_v8 = vld [vmem:[#allocation14_spill] sm:$0xff] }
 0x6d1   : > { %5060 = vrot.lane.b32.xlu0 %v4978_v56, %s10434_s18  ;;  %vm2288_vm2 = vcmp.eq.s32.totalorder %v17604_v8, %v15842_v4 }
 0x6d3   : > { %5038 = vrot.lane.b32.xlu1 %v4967_v10, %s10434_s18  ;;  %v7848_v10 = vadd.f32 %v15931_v59, %v15703_v60  ;;  %v7851_v60 = vadd.f32 %v15931_v59, %v15708_v34 }
 0x6d4   : > { %v16083_v24 = vpop.permute.xlu0 %4924 }
 0x6d5   : > { %5056 = vrot.lane.b32.xlu0 %v4976_v26, %s10434_s18  ;;  %v16109_v26 = vsel %vm2290_vm4, 1.0, %v17087_v41  ;;  %vm2299_vm4 = vcmp.eq.s32.totalorder %v15202_v42, %v15842_v4 }
 0x6d6   : > { %v4982_v34 = vmul.f32 %v16109_v26, %v15982_v44 }
 0x6d7   : > { %5034 = vrot.lane.b32.xlu1 %v4965_v63, %s10434_s18  ;;  %v17602_v63 = vld [vmem:[#allocation60_spill] sm:$0xff] }
 0x6d8   : > { %v16093_v56 = vpop.permute.xlu0 %4920  ;;  %vm2279_vm5 = vcmp.eq.s32.totalorder %v17602_v63, %v15842_v4  ;;  %v16129_v63 = vsel %vm2288_vm2, 1.0, %v17087_v41  ;;  %vm8200_vm2 = vcmask 7168  }
 0x6d9   : > { %7940 = vrot.lane.b32.xlu0 %v7862_v54, %s10435_s21  ;;  %v16115_v54 = vsel %vm2279_vm5, 1.0, %v17087_v41  ;;  %v4980_v44 = vmul.f32 %v16129_v63, %v16012_v5 }
 0x6da   : > { %17603 = vst [vmem:[#allocation73_spill] sm:$0xff] %v16115_v54  ;;  %v4971_v11 = vmul.f32 %v16115_v54, %v15943_v29 }
 0x6db   : > { %7916 = vrot.lane.b32.xlu1 %v7850_v9, %s10435_s21  ;;  %v16111_v9 = vpop.permute.xlu1 %4898 }
 0x6dc   : > { %v16105_v38 = vpop.permute.xlu0 %6390 }
 0x6dd   : > { %7936 = vrot.lane.b32.xlu0 %v7860_v15, %s10435_s21 }
 0x6df   : > { %7912 = vrot.lane.b32.xlu1 %v7848_v10, %s10435_s21  ;;  %v17605_v10 = vld [vmem:[#allocation39_spill] sm:$0xff] }
 0x6e0   : > { %vm2277_vm6 = vcmp.eq.s32.totalorder %v17605_v10, %v15842_v4  ;;  %v16125_v15 = vpop.permute.xlu0 %6400 }
 0x6e1   : > { %5068 = vrot.lane.b32.xlu0 %v4982_v34, %s10434_s18  ;;  %v16135_v8 = vsel %vm2277_vm6, 1.0, %v17087_v41  ;;  %v7855_v41 = vadd.f32 %v15931_v59, %v15712_v45  ;;  %v7853_v45 = vadd.f32 %v15931_v59, %v15716_v51 }
 0x6e2   : > { %17606 = vst [vmem:[#allocation80_spill] sm:$0xff] %v16135_v8  ;;  %v4969_v29 = vmul.f32 %v16135_v8, %v15962_v39  ;;  %v17607_v39 = vld [vmem:[#allocation18_spill] sm:$0xff] }
 0x6e3   : > { %7918 = vrot.lane.b32.xlu1 %v7851_v60, %s10435_s21  ;;  %vm2294_vm7 = vcmp.eq.s32.totalorder %v17607_v39, %v15842_v4 }
 0x6e4   : > { %v16141_v10 = vpop.permute.xlu0 %6396 }
 0x6e5   : > { %5064 = vrot.lane.b32.xlu0 %v4980_v44, %s10434_s18  ;;  %v7864_v44 = vadd.f32 %v15931_v59, %v15921_v27  ;;  %v17611_v27 = vld [vmem:[#allocation61_spill] sm:$0xff] }
 0x6e6   : > { %vm2292_vm9 = vcmp.eq.s32.totalorder %v17611_v27, %v15842_v4 }
 0x6e7   : > { %v16131_v60 = vpop.xlane.xlu1 %7835  ;;  %5046 = vrot.lane.b32.xlu1 %v4971_v11, %s10434_s18  ;;  %v7866_v11 = vadd.f32 %v15931_v59, %v15902_v35 }
 0x6e8   : > { %v16151_v61 = vpop.permute.xlu0 %6408 }
 0x6e9   : > { %7948 = vrot.lane.b32.xlu0 %v7866_v11, %s10435_s21  ;;  %v17609_v11 = vmov 0.0  }
 0x6ea   : > { %v16169_v53 = vsel %vm2294_vm7, 1.0, %v17609_v11 }
 0x6eb   : > { %v16144_v34 = vpop.xlane.xlu1 %7829  ;;  %5042 = vrot.lane.b32.xlu1 %v4969_v29, %s10434_s18  ;;  %v17608_v29 = vld [vmem:[#allocation96_spill] sm:$0xff]  ;;  %v4986_v51 = vmul.f32 %v16169_v53, %v16054_v0 }
 0x6ec   : > { %vm2283_vm8 = vcmp.eq.s32.totalorder %v17608_v29, %v15842_v4  ;;  %v16165_v35 = vpop.permute.xlu0 %6404  ;;  %v17612_v29 = vld [vmem:[#allocation75_spill] sm:$0xff] }
 0x6ed   : > { %7944 = vrot.lane.b32.xlu0 %v7864_v44, %s10435_s21  ;;  %v16175_v39 = vsel %vm2283_vm8, 1.0, %v17609_v11  ;;  %vm2281_vm11 = vcmp.eq.s32.totalorder %v17612_v29, %v15842_v4 }
 0x6ee   : > { %17610 = vst [vmem:[#allocation83_spill] sm:$0xff] %v16175_v39  ;;  %v4975_v44 = vmul.f32 %v16175_v39, %v16018_v25  ;;  %v16195_v27 = vsel %vm2281_vm11, 1.0, %v17609_v11  ;;  %v7859_v39 = vadd.f32 %v15931_v59, %v15724_v23  ;;  %v7857_v23 = vadd.f32 %v15931_v59, %v15748_v16 }
 0x6ef   : > { %v16154_v5 = vpop.permute.xlu1 %4910  ;;  %7926 = vrot.lane.b32.xlu1 %v7855_v41, %s10435_s21  ;;  %17613 = vst [vmem:[#allocation85_spill] sm:$0xff] %v16195_v27  ;;  %v4973_v25 = vmul.f32 %v16195_v27, %v16035_v7  ;;  %v7868_v7 = vadd.f32 %v15931_v59, %v15996_v28  ;;  %v17616_v28 = vld [vmem:[#allocation33_spill] sm:$0xff] }
 0x6f0   : > { %v16185_v3 = vpop.permute.xlu0 %6416  ;;  %vm2296_vm14 = vcmp.eq.s32.totalorder %v17616_v28, %v15842_v4 }
 0x6f1   : > { %5076 = vrot.lane.b32.xlu0 %v4986_v51, %s10434_s18 }
 0x6f3   : > { %v16171_v41 = vpop.permute.xlu1 %4906  ;;  %7922 = vrot.lane.b32.xlu1 %v7853_v45, %s10435_s21  ;;  %v16189_v45 = vsel %vm2292_vm9, 1.0, %v17609_v11 }
 0x6f4   : > { %v4984_v0 = vmul.f32 %v16189_v45, %v16070_v50  ;;  %v16201_v29 = vpop.permute.xlu0 %6412 }
 0x6f6   : > { %5072 = vrot.lane.b32.xlu0 %v4984_v0, %s10434_s18  ;;  %v17614_v0 = vld [vmem:[#allocation24_spill] sm:$0xff] }
 0x6f7   : > { %v16191_v8 = vpop.permute.xlu1 %4918  ;;  %5054 = vrot.lane.b32.xlu1 %v4975_v44, %s10434_s18  ;;  %v7870_v44 = vadd.f32 %v15931_v59, %v15972_v17  ;;  %vm2287_vm13 = vcmp.eq.s32.totalorder %v17614_v0, %v15842_v4 }
 0x6f8   : > { %v16211_v54 = vpop.permute.xlu0 %6424  ;;  %v16235_v58 = vsel %vm2287_vm13, 1.0, %v17609_v11 }
 0x6f9   : > { %17615 = vst [vmem:[#allocation76_spill] sm:$0xff] %v16235_v58 }
 0x6fa   : > { %7956 = vrot.lane.b32.xlu0 %v7870_v44, %s10435_s21  ;;  %v17617_v44 = vld [vmem:[#allocation19_spill] sm:$0xff] }
 0x6fb   : > { %v16204_v51 = vpop.permute.xlu1 %4914  ;;  %5050 = vrot.lane.b32.xlu1 %v4973_v25, %s10434_s18  ;;  %v16229_v25 = vsel %vm2298_vm12, 1.0, %v17609_v11  ;;  %vm2285_vm10 = vcmp.eq.s32.totalorder %v17617_v44, %v15842_v4 }
 0x6fc   : > { %v16225_v17 = vpop.permute.xlu0 %6420  ;;  %v4990_v16 = vmul.f32 %v16229_v25, %v16083_v24  ;;  %v16253_v28 = vsel %vm2285_vm10, 1.0, %v17609_v11 }
 0x6fd   : > { %17618 = vst [vmem:[#allocation86_spill] sm:$0xff] %v16253_v28  ;;  %v4977_v44 = vmul.f32 %v16253_v28, %v16111_v9  ;;  %v7872_v9 = vadd.f32 %v15931_v59, %v16076_v46  ;;  %v17621_v46 = vld [vmem:[#allocation10_spill] sm:$0xff] }
 0x6fe   : > { %7952 = vrot.lane.b32.xlu0 %v7868_v7, %s10435_s21  ;;  %v4979_v7 = vmul.f32 %v16235_v58, %v16091_v1  ;;  %v7874_v58 = vadd.f32 %v15931_v59, %v16052_v21  ;;  %v7861_v21 = vadd.f32 %v15931_v59, %v15786_v49  ;;  %vm2289_vm0 = vcmp.eq.s32.totalorder %v17621_v46, %v15842_v4 }
 0x6ff   : > { %v16214_v50 = vpop.permute.xlu1 %4926  ;;  %7934 = vrot.lane.b32.xlu1 %v7859_v39, %s10435_s21 }
 0x700   : > { %v16245_v0 = vpop.permute.xlu0 %6432 }
 0x702   : > { %5084 = vrot.lane.b32.xlu0 %v4990_v16, %s10434_s18 }
 0x703   : > { %v16231_v39 = vpop.permute.xlu1 %4922  ;;  %7930 = vrot.lane.b32.xlu1 %v7857_v23, %s10435_s21  ;;  %v16249_v23 = vsel %vm2296_vm14, 1.0, %v17609_v11 }
 0x704   : > { %v4988_v24 = vmul.f32 %v16249_v23, %v16093_v56  ;;  %v16259_v1 = vpop.permute.xlu0 %6428 }
 0x706   : > { %5080 = vrot.lane.b32.xlu0 %v4988_v24, %s10434_s18  ;;  %v17619_v24 = vld [vmem:[#allocation3_spill] sm:$0xff] }
 0x707   : > { %v6393_v27 = vpop.permute.xlu1 %6392  ;;  %5062 = vrot.lane.b32.xlu1 %v4979_v7, %s10434_s18  ;;  %v7863_v7 = vadd.f32 %v15931_v59, %v15777_v55  ;;  %vm2291_vm15 = vcmp.eq.s32.totalorder %v17619_v24, %v15842_v4 }
 0x708   : > { %v16267_v33 = vpop.permute.xlu0 %6440 }
 0x70a   : > { %7964 = vrot.lane.b32.xlu0 %v7874_v58, %s10435_s21  ;;  %v16286_v58 = vsel %vm2291_vm15, 1.0, %v17609_v11 }
 0x70b   : > { %v6389_v16 = vpop.permute.xlu1 %6388  ;;  %5058 = vrot.lane.b32.xlu1 %v4977_v44, %s10434_s18  ;;  %17620 = vst [vmem:[#allocation78_spill] sm:$0xff] %v16286_v58  ;;  %v4983_v24 = vmul.f32 %v16286_v58, %v16154_v5 }
 0x70c   : > { %v16279_v44 = vpop.permute.xlu0 %6436 }
 0x70e   : > { %7960 = vrot.lane.b32.xlu0 %v7872_v9, %s10435_s21 }
 0x70f   : > { %v16270_v56 = vpop.permute.xlu1 %6394  ;;  %7942 = vrot.lane.b32.xlu1 %v7863_v7, %s10435_s21  ;;  %v6486_v7 = vmul.f32 %v15862_v30, %v6393_v27  ;;  %v6484_v27 = vmul.f32 %v15874_v19, %v6389_v16 }
 0x710   : > { %v16293_v49 = vpop.permute.xlu0 %5028 }
 0x711   : > { %17622 = vst [vmem:[#allocation5_spill] sm:$0xff] %v16293_v49 }
 0x712   : > { %6552 = vrot.lane.b32.xlu0 %v6486_v7, %s10436_s22  ;;  %v7878_v7 = vadd.f32 %v15931_v59, %v16131_v60  ;;  %v7865_v60 = vadd.f32 %v15931_v59, %v15835_v20 }
 0x713   : > { %v16282_v55 = vpop.permute.xlu1 %6402  ;;  %7938 = vrot.lane.b32.xlu1 %v7861_v21, %s10435_s21  ;;  %v16300_v21 = vsel %vm2289_vm0, 1.0, %v17609_v11 }
 0x714   : > { %17623 = vst [vmem:[#allocation79_spill] sm:$0xff] %v16300_v21  ;;  %v4981_v46 = vmul.f32 %v16300_v21, %v16171_v41  ;;  %v16305_v28 = vpop.permute.xlu0 %5024  ;;  %v7876_v41 = vadd.f32 %v15931_v59, %v16144_v34  ;;  %v6490_v34 = vmul.f32 %v15906_v18, %v16125_v15  ;;  %v6488_v15 = vmul.f32 %v15919_v36, %v16141_v10 }
 0x715   : > { %17624 = vst [vmem:[#allocation51_spill] sm:$0xff] %v16305_v28 }
 0x716   : > { %6548 = vrot.lane.b32.xlu0 %v6484_v27, %s10436_s22  ;;  %v17625_v27 = vld [vmem:[#allocation16_spill] sm:$0xff] }
 0x717   : > { %v16296_v9 = vpop.permute.xlu1 %6398  ;;  %5070 = vrot.lane.b32.xlu1 %v4983_v24, %s10434_s18  ;;  %v7867_v24 = vadd.f32 %v15931_v59, %v15820_v6  ;;  %vm2295_vm1 = vcmp.eq.s32.totalorder %v17625_v27, %v15842_v4 }
 0x718   : > { %v16315_v49 = vpop.permute.xlu0 %6448 }
 0x71a   : > { %7972 = vrot.lane.b32.xlu0 %v7878_v7, %s10435_s21  ;;  %v16334_v7 = vsel %vm2295_vm1, 1.0, %v17609_v11 }
 0x71b   : > { %v16308_v5 = vpop.permute.xlu1 %6410  ;;  %5066 = vrot.lane.b32.xlu1 %v4981_v46, %s10434_s18  ;;  %17626 = vst [vmem:[#allocation81_spill] sm:$0xff] %v16334_v7  ;;  %v4987_v20 = vmul.f32 %v16334_v7, %v16191_v8 }
 0x71c   : > { %v16327_v46 = vpop.permute.xlu0 %6444 }
 0x71e   : > { %7968 = vrot.lane.b32.xlu0 %v7876_v41, %s10435_s21 }
 0x71f   : > { %v16318_v16 = vpop.permute.xlu1 %6406  ;;  %7950 = vrot.lane.b32.xlu1 %v7867_v24, %s10435_s21  ;;  %v17627_v24 = vld [vmem:[#allocation30_spill] sm:$0xff] }
 0x720   : > { %vm2293_vm3 = vcmp.eq.s32.totalorder %v17627_v24, %v15842_v4  ;;  %v16342_v27 = vpop.permute.xlu0 %5036 }
 0x721   : > { %17628 = vst [vmem:[#allocation84_spill] sm:$0xff] %v16342_v27 }
 0x722   : > { %6560 = vrot.lane.b32.xlu0 %v6490_v34, %s10436_s22  ;;  %v6494_v34 = vmul.f32 %v15947_v52, %v16151_v61  ;;  %v7869_v61 = vadd.f32 %v15931_v59, %v15893_v57 }
 0x723   : > { %v16330_v6 = vpop.permute.xlu1 %6418  ;;  %7946 = vrot.lane.b32.xlu1 %v7865_v60, %s10435_s21  ;;  %v16349_v60 = vsel %vm2293_vm3, 1.0, %v17609_v11 }
 0x724   : > { %17629 = vst [vmem:[#allocation21_spill] sm:$0xff] %v16349_v60  ;;  %v4985_v24 = vmul.f32 %v16349_v60, %v16204_v51  ;;  %v16355_v28 = vpop.permute.xlu0 %5032  ;;  %v6492_v51 = vmul.f32 %v15960_v13, %v16165_v35  ;;  %v6498_v35 = vmul.f32 %v16000_v48, %v16185_v3  ;;  %v6496_v3 = vmul.f32 %v16016_v12, %v16201_v29 }
 0x726   : > { %6556 = vrot.lane.b32.xlu0 %v6488_v15, %s10436_s22 }
 0x727   : > { %v16345_v41 = vpop.permute.xlu1 %6414  ;;  %5078 = vrot.lane.b32.xlu1 %v4987_v20, %s10434_s18  ;;  %v7871_v20 = vadd.f32 %v15931_v59, %v15882_v2 }
 0x728   : > { %v16365_v27 = vpop.permute.xlu0 %7914 }
 0x72a   : > { %6568 = vrot.lane.b32.xlu0 %v6494_v34, %s10436_s22  ;;  %v17630_v34 = vld [vmem:[#allocation31_spill] sm:$0xff] }
 0x72b   : > { %v16358_v8 = vpop.permute.xlu1 %6426  ;;  %5074 = vrot.lane.b32.xlu1 %v4985_v24, %s10434_s18  ;;  %v16384_v24 = vsel %vm2299_vm4, 1.0, %v17609_v11  ;;  %vm2297_vm5 = vcmp.eq.s32.totalorder %v17630_v34, %v15842_v4 }
 0x72c   : > { %v16377_v15 = vpop.permute.xlu0 %5044  ;;  %v4991_v42 = vmul.f32 %v16384_v24, %v16214_v50 }
 0x72e   : > { %6564 = vrot.lane.b32.xlu0 %v6492_v51, %s10436_s22  ;;  %v16399_v51 = vsel %vm2297_vm5, 1.0, %v17609_v11  ;;  %v7875_v11 = vadd.f32 %v15931_v59, %v15949_v32  ;;  %v6506_v32 = vmul.f32 %v16109_v26, %v16245_v0 }
 0x72f   : > { %v16368_v10 = vpop.permute.xlu1 %6422  ;;  %7958 = vrot.lane.b32.xlu1 %v7871_v20, %s10435_s21  ;;  %17631 = vst [vmem:[#allocation7_spill] sm:$0xff] %v16399_v51  ;;  %v4989_v4 = vmul.f32 %v16399_v51, %v16231_v39  ;;  %v6500_v39 = vmul.f32 %v16074_v43, %v16225_v17 }
 0x730   : > { %v16392_v57 = vpop.permute.xlu0 %5040 }
 0x732   : > { %6576 = vrot.lane.b32.xlu0 %v6498_v35, %s10436_s22  ;;  %v6502_v35 = vmul.f32 %v16058_v47, %v16211_v54 }
 0x733   : > { %v16380_v2 = vpop.permute.xlu1 %6434  ;;  %7954 = vrot.lane.b32.xlu1 %v7869_v61, %s10435_s21 }
 0x734   : > { %v16405_v61 = vpop.permute.xlu0 %7924 }
 0x736   : > { %6572 = vrot.lane.b32.xlu0 %v6496_v3, %s10436_s22 }
 0x737   : > { %v16395_v20 = vpop.permute.xlu1 %6430  ;;  %5086 = vrot.lane.b32.xlu1 %v4991_v42, %s10434_s18  ;;  %v7873_v42 = vadd.f32 %v15931_v59, %v15969_v37  ;;  %v6504_v37 = vmul.f32 %v16129_v63, %v16259_v1 }
 0x738   : > { %v16415_v34 = vpop.permute.xlu0 %7920 }
 0x73a   : > { %6584 = vrot.lane.b32.xlu0 %v6502_v35, %s10436_s22 }
 0x73b   : > { %v16408_v50 = vpop.permute.xlu1 %6442  ;;  %5082 = vrot.lane.b32.xlu1 %v4989_v4, %s10434_s18  ;;  %v6487_v4 = vmul.f32 %v15986_v31, %v16270_v56  ;;  %v6510_v56 = vmul.f32 %v16169_v53, %v16267_v33 }
 0x73c   : > { %v16425_v3 = vpop.permute.xlu0 %5052 }
 0x73e   : > { %6580 = vrot.lane.b32.xlu0 %v6500_v39, %s10436_s22 }
 0x73f   : > { %v16418_v29 = vpop.permute.xlu1 %6438  ;;  %7966 = vrot.lane.b32.xlu1 %v7875_v11, %s10435_s21  ;;  %v6485_v11 = vmul.f32 %v16004_v40, %v16105_v38  ;;  %v6508_v38 = vmul.f32 %v16189_v45, %v16279_v44 }
 0x740   : > { %v16435_v35 = vpop.permute.xlu0 %5048 }
 0x742   : > { %6592 = vrot.lane.b32.xlu0 %v6506_v32, %s10436_s22 }
 0x743   : > { %v16428_v54 = vpop.permute.xlu1 %5030  ;;  %7962 = vrot.lane.b32.xlu1 %v7873_v42, %s10435_s21  ;;  %v7879_v42 = vadd.f32 %v15931_v59, %v16025_v22  ;;  %v6514_v22 = vmul.f32 %v16229_v25, %v16315_v49 }
 0x744   : > { %17632 = vst [vmem:[#allocation27_spill] sm:$0xff] %v16428_v54  ;;  %v7933_v39 = vpop.permute.xlu0 %7932 }
 0x746   : > { %6588 = vrot.lane.b32.xlu0 %v6504_v37, %s10436_s22 }
 0x747   : > { %v16438_v17 = vpop.permute.xlu1 %5026  ;;  %6554 = vrot.lane.b32.xlu1 %v6487_v4, %s10436_s22  ;;  %v7877_v4 = vadd.f32 %v15931_v59, %v16037_v14  ;;  %v6512_v59 = vmul.f32 %v16249_v23, %v16327_v46  ;;  %v17636_v14 = vld [vmem:[#allocation77_spill] sm:$0xff]  ;;  %v17638_v46 = vld [vmem:[#allocation80_spill] sm:$0xff] }
 0x748   : > { %17633 = vst [vmem:[#allocation88_spill] sm:$0xff] %v16438_v17  ;;  %v7929_v32 = vpop.permute.xlu0 %7928 }
 0x74a   : > { %6600 = vrot.lane.b32.xlu0 %v6510_v56, %s10436_s22 }
 0x74b   : > { %v16446_v0 = vpop.permute.xlu1 %6450  ;;  %6550 = vrot.lane.b32.xlu1 %v6485_v11, %s10436_s22  ;;  %v6491_v11 = vmul.f32 %v16042_v62, %v16282_v55 }
 0x74c   : > { %v16461_v37 = vpop.permute.xlu0 %5060 }
 0x74e   : > { %6596 = vrot.lane.b32.xlu0 %v6508_v38, %s10436_s22 }
 0x74f   : > { %v16454_v1 = vpop.permute.xlu1 %6446  ;;  %7974 = vrot.lane.b32.xlu1 %v7879_v42, %s10435_s21  ;;  %v6489_v42 = vmul.f32 %v17636_v14, %v16296_v9 }
 0x750   : > { %v16471_v56 = vpop.permute.xlu0 %5056 }
 0x752   : > { %6608 = vrot.lane.b32.xlu0 %v6514_v22, %s10436_s22 }
 0x753   : > { %v16464_v33 = vpop.permute.xlu1 %5038  ;;  %7970 = vrot.lane.b32.xlu1 %v7877_v4, %s10435_s21  ;;  %v17637_v4 = vld [vmem:[#allocation73_spill] sm:$0xff] }
 0x754   : > { %17634 = vst [vmem:[#allocation92_spill] sm:$0xff] %v16464_v33  ;;  %v7941_v38 = vpop.permute.xlu0 %7940  ;;  %v6495_v22 = vmul.f32 %v17637_v4, %v16308_v5  ;;  %v8014_v5 = vmul.f32 %v15906_v18, %v16405_v61 }
 0x756   : > { %6604 = vrot.lane.b32.xlu0 %v6512_v59, %s10436_s22  ;;  %v6493_v59 = vmul.f32 %v17638_v46, %v16318_v16  ;;  %v8012_v16 = vmul.f32 %v15919_v36, %v16415_v34  ;;  %v17645_v34 = vld [vmem:[#allocation86_spill] sm:$0xff] }
 0x757   : > { %v16474_v44 = vpop.permute.xlu1 %5034  ;;  %6562 = vrot.lane.b32.xlu1 %v6491_v11, %s10436_s22 }
 0x758   : > { %17635 = vst [vmem:[#allocation12_spill] sm:$0xff] %v16474_v44  ;;  %v7937_v44 = vpop.permute.xlu0 %7936 }
 0x75b   : > { %v7917_v49 = vpop.permute.xlu1 %7916  ;;  %6558 = vrot.lane.b32.xlu1 %v6489_v42, %s10436_s22 }
 0x75c   : > { %v8010_v55 = vmul.f32 %v15862_v30, %v7917_v49  ;;  %v16491_v33 = vpop.permute.xlu0 %5068  ;;  %v17639_v49 = vld [vmem:[#allocation83_spill] sm:$0xff] }
 0x75e   : > { %8076 = vrot.lane.b32.xlu0 %v8010_v55, %s10437_s23  ;;  %v6499_v55 = vmul.f32 %v17639_v49, %v16330_v6  ;;  %v8018_v6 = vmul.f32 %v15947_v52, %v7933_v39  ;;  %v6507_v39 = vmul.f32 %v16286_v58, %v16380_v2 }
 0x75f   : > { %v7913_v11 = vpop.permute.xlu1 %7912  ;;  %6570 = vrot.lane.b32.xlu1 %v6495_v22, %s10436_s22 }
 0x760   : > { %v8008_v9 = vmul.f32 %v15874_v19, %v7913_v11  ;;  %v16501_v22 = vpop.permute.xlu0 %5064 }
 0x761   : > { %17640 = vst [vmem:[#allocation9_spill] sm:$0xff] %v16501_v22 }
 0x762   : > { %8072 = vrot.lane.b32.xlu0 %v8008_v9, %s10437_s23  ;;  %v17642_v9 = vld [vmem:[#allocation85_spill] sm:$0xff] }
 0x763   : > { %v16494_v42 = vpop.permute.xlu1 %7918  ;;  %6566 = vrot.lane.b32.xlu1 %v6493_v59, %s10436_s22  ;;  %v6497_v59 = vmul.f32 %v17642_v9, %v16345_v41  ;;  %v8016_v41 = vmul.f32 %v15960_v13, %v7929_v32 }
 0x764   : > { %v7949_v17 = vpop.permute.xlu0 %7948 }
 0x765   : > { %v8026_v2 = vmul.f32 %v16058_v47, %v7949_v17  ;;  %v6515_v17 = vmul.f32 %v16384_v24, %v16446_v0 }
 0x766   : > { %8084 = vrot.lane.b32.xlu0 %v8014_v5, %s10437_s23  ;;  %v17644_v5 = vld [vmem:[#allocation76_spill] sm:$0xff] }
 0x767   : > { %v16504_v11 = vpop.permute.xlu1 %5046  ;;  %6578 = vrot.lane.b32.xlu1 %v6499_v55, %s10436_s22 }
 0x768   : > { %17641 = vst [vmem:[#allocation90_spill] sm:$0xff] %v16504_v11  ;;  %v6503_v11 = vmul.f32 %v17644_v5, %v16358_v8  ;;  %v7945_v54 = vpop.permute.xlu0 %7944  ;;  %v8022_v8 = vmul.f32 %v16000_v48, %v7941_v38 }
 0x76a   : > { %8080 = vrot.lane.b32.xlu0 %v8012_v16, %s10437_s23  ;;  %v6501_v16 = vmul.f32 %v17645_v34, %v16368_v10  ;;  %v8020_v10 = vmul.f32 %v16016_v12, %v7937_v44  ;;  %v6509_v44 = vmul.f32 %v16349_v60, %v16418_v29 }
 0x76b   : > { %v16512_v61 = vpop.permute.xlu1 %5042  ;;  %6574 = vrot.lane.b32.xlu1 %v6497_v59, %s10436_s22 }
 0x76c   : > { %17643 = vst [vmem:[#allocation11_spill] sm:$0xff] %v16512_v61  ;;  %v16523_v22 = vpop.permute.xlu0 %5076 }
 0x76e   : > { %8092 = vrot.lane.b32.xlu0 %v8018_v6, %s10437_s23 }
 0x76f   : > { %v7927_v55 = vpop.permute.xlu1 %7926  ;;  %6586 = vrot.lane.b32.xlu1 %v6503_v11, %s10436_s22  ;;  %v6505_v11 = vmul.f32 %v16300_v21, %v16395_v20  ;;  %v8024_v20 = vmul.f32 %v16074_v43, %v7945_v54 }
 0x770   : > { %v16530_v6 = vpop.permute.xlu0 %5072 }
 0x772   : > { %8088 = vrot.lane.b32.xlu0 %v8016_v41, %s10437_s23 }
 0x773   : > { %v7923_v59 = vpop.permute.xlu1 %7922  ;;  %6582 = vrot.lane.b32.xlu1 %v6501_v16, %s10436_s22  ;;  %v6511_v16 = vmul.f32 %v16334_v7, %v16408_v50 }
 0x774   : > { %v7957_v41 = vpop.permute.xlu0 %7956 }
 0x775   : > { %v8030_v50 = vmul.f32 %v16109_v26, %v7957_v41 }
 0x776   : > { %8100 = vrot.lane.b32.xlu0 %v8022_v8, %s10437_s23 }
 0x777   : > { %v16533_v32 = vpop.permute.xlu1 %5054  ;;  %6594 = vrot.lane.b32.xlu1 %v6507_v39, %s10436_s22 }
 0x778   : > { %17646 = vst [vmem:[#allocation87_spill] sm:$0xff] %v16533_v32  ;;  %v7953_v8 = vpop.permute.xlu0 %7952 }
 0x779   : > { %v8028_v29 = vmul.f32 %v16129_v63, %v7953_v8  ;;  %v8009_v8 = vmul.f32 %v16004_v40, %v16365_v27 }
 0x77a   : > { %8096 = vrot.lane.b32.xlu0 %v8020_v10, %s10437_s23 }
 0x77b   : > { %v16540_v38 = vpop.permute.xlu1 %5050  ;;  %6590 = vrot.lane.b32.xlu1 %v6505_v11, %s10436_s22 }
 0x77c   : > { %17647 = vst [vmem:[#allocation15_spill] sm:$0xff] %v16540_v38  ;;  %v16551_v10 = vpop.permute.xlu0 %5084 }
 0x77e   : > { %8108 = vrot.lane.b32.xlu0 %v8026_v2, %s10437_s23 }
 0x77f   : > { %v7935_v39 = vpop.permute.xlu1 %7934  ;;  %6602 = vrot.lane.b32.xlu1 %v6511_v16, %s10436_s22  ;;  %v6513_v16 = vmul.f32 %v16399_v51, %v16454_v1 }
 0x780   : > { %v16558_v2 = vpop.permute.xlu0 %5080  ;;  %v8019_v27 = vmul.f32 %v17637_v4, %v7935_v39 }
 0x782   : > { %8104 = vrot.lane.b32.xlu0 %v8024_v20, %s10437_s23 }
 0x783   : > { %v7931_v11 = vpop.permute.xlu1 %7930  ;;  %6598 = vrot.lane.b32.xlu1 %v6509_v44, %s10436_s22  ;;  %v8011_v44 = vmul.f32 %v15986_v31, %v16494_v42  ;;  %v8015_v42 = vmul.f32 %v16042_v62, %v7927_v55 }
 0x784   : > { %v7965_v20 = vpop.permute.xlu0 %7964  ;;  %v8017_v55 = vmul.f32 %v17638_v46, %v7931_v11  ;;  %v17658_v46 = vld [vmem:[#allocation38_spill] sm:$0xff] }
 0x785   : > { %v8034_v0 = vmul.f32 %v16169_v53, %v7965_v20 }
 0x786   : > { %8116 = vrot.lane.b32.xlu0 %v8030_v50, %s10437_s23 }
 0x787   : > { %v16561_v54 = vpop.permute.xlu1 %5062  ;;  %6610 = vrot.lane.b32.xlu1 %v6515_v17, %s10436_s22 }
 0x788   : > { %17648 = vst [vmem:[#allocation93_spill] sm:$0xff] %v16561_v54  ;;  %v7961_v50 = vpop.permute.xlu0 %7960 }
 0x789   : > { %v8032_v1 = vmul.f32 %v16189_v45, %v7961_v50 }
 0x78a   : > { %8112 = vrot.lane.b32.xlu0 %v8028_v29, %s10437_s23 }
 0x78b   : > { %v16568_v41 = vpop.permute.xlu1 %5058  ;;  %6606 = vrot.lane.b32.xlu1 %v6513_v16, %s10436_s22 }
 0x78c   : > { %17649 = vst [vmem:[#allocation17_spill] sm:$0xff] %v16568_v41  ;;  %v16579_v29 = vpop.permute.xlu0 %6552 }
 0x78e   : > { %8124 = vrot.lane.b32.xlu0 %v8034_v0, %s10437_s23 }
 0x78f   : > { %v7943_v17 = vpop.permute.xlu1 %7942  ;;  %8078 = vrot.lane.b32.xlu1 %v8011_v44, %s10437_s23  ;;  %v8013_v44 = vmul.f32 %v17636_v14, %v7923_v59 }
 0x790   : > { %v16584_v20 = vpop.permute.xlu0 %6548  ;;  %v8023_v39 = vmul.f32 %v17639_v49, %v7943_v17 }
 0x792   : > { %8120 = vrot.lane.b32.xlu0 %v8032_v1, %s10437_s23 }
 0x793   : > { %v7939_v16 = vpop.permute.xlu1 %7938  ;;  %8074 = vrot.lane.b32.xlu1 %v8009_v8, %s10437_s23 }
 0x794   : > { %v7973_v50 = vpop.permute.xlu0 %7972 }
 0x795   : > { %v8038_v59 = vmul.f32 %v16229_v25, %v7973_v50 }
 0x797   : > { %v16586_v0 = vpop.permute.xlu1 %5070  ;;  %8086 = vrot.lane.b32.xlu1 %v8015_v42, %s10437_s23 }
 0x798   : > { %17650 = vst [vmem:[#allocation20_spill] sm:$0xff] %v16586_v0  ;;  %v7969_v1 = vpop.permute.xlu0 %7968 }
 0x799   : > { %v8036_v8 = vmul.f32 %v16249_v23, %v7969_v1 }
 0x79b   : > { %v16590_v41 = vpop.permute.xlu1 %5066  ;;  %8082 = vrot.lane.b32.xlu1 %v8013_v44, %s10437_s23  ;;  %8128 = vrot.lane.b32.xlu0 %v8036_v8, %s10437_s23 }
 0x79c   : > { %17651 = vst [vmem:[#allocation82_spill] sm:$0xff] %v16590_v41  ;;  %v16598_v42 = vpop.permute.xlu0 %6560 }
 0x79f   : > { %v7951_v54 = vpop.permute.xlu1 %7950  ;;  %8094 = vrot.lane.b32.xlu1 %v8019_v27, %s10437_s23  ;;  %8132 = vrot.lane.b32.xlu0 %v8038_v59, %s10437_s23  ;;  %v8021_v27 = vmul.f32 %v17642_v9, %v7939_v16 }
 0x7a0   : > { %v16604_v44 = vpop.permute.xlu0 %6556  ;;  %v8027_v50 = vmul.f32 %v17644_v5, %v7951_v54 }
 0x7a3   : > { %v7947_v0 = vpop.permute.xlu1 %7946  ;;  %8090 = vrot.lane.b32.xlu1 %v8017_v55, %s10437_s23 }
 0x7a4   : > { %v16610_v11 = vpop.permute.xlu0 %6568  ;;  %v8025_v17 = vmul.f32 %v17645_v34, %v7947_v0 }
 0x7a7   : > { %v16606_v1 = vpop.permute.xlu1 %5078  ;;  %8102 = vrot.lane.b32.xlu1 %v8023_v39, %s10437_s23 }
 0x7a8   : > { %17652 = vst [vmem:[#allocation13_spill] sm:$0xff] %v16606_v1  ;;  %v16616_v55 = vpop.permute.xlu0 %6564 }
 0x7ab   : > { %v16612_v8 = vpop.permute.xlu1 %5074  ;;  %8098 = vrot.lane.b32.xlu1 %v8021_v27, %s10437_s23 }
 0x7ac   : > { %17653 = vst [vmem:[#allocation49_spill] sm:$0xff] %v16612_v8  ;;  %v16620_v1 = vpop.permute.xlu0 %6576 }
 0x7af   : > { %v7959_v59 = vpop.permute.xlu1 %7958  ;;  %8110 = vrot.lane.b32.xlu1 %v8027_v50, %s10437_s23 }
 0x7b0   : > { %v8031_v16 = vmul.f32 %v16286_v58, %v7959_v59  ;;  %v16624_v41 = vpop.permute.xlu0 %6572 }
 0x7b3   : > { %v7955_v39 = vpop.permute.xlu1 %7954  ;;  %8106 = vrot.lane.b32.xlu1 %v8025_v17, %s10437_s23 }
 0x7b4   : > { %v8029_v54 = vmul.f32 %v16300_v21, %v7955_v39  ;;  %v16630_v27 = vpop.permute.xlu0 %6584 }
 0x7b7   : > { %v16626_v8 = vpop.permute.xlu1 %5086  ;;  %8118 = vrot.lane.b32.xlu1 %v8031_v16, %s10437_s23 }
 0x7b8   : > { %v16635_v0 = vpop.permute.xlu0 %6580 }
 0x7bb   : > { %v16632_v50 = vpop.permute.xlu1 %5082  ;;  %8114 = vrot.lane.b32.xlu1 %v8029_v54, %s10437_s23  ;;  %v16650_v54 = vld [vmem:[%s16937_s9] ss:$0 sm:$0xff] }
 0x7bc   : > { %17654 = vst [vmem:[#allocation4_spill] sm:$0xff] %v16632_v50  ;;  %v16638_v59 = vpop.permute.xlu0 %6592 }
 0x7bf   : > { %v7967_v34 = vpop.permute.xlu1 %7966 }
 0x7c0   : > { %v8035_v17 = vmul.f32 %v16334_v7, %v7967_v34  ;;  %v16642_v5 = vpop.permute.xlu0 %6588  ;;  %v17655_v34 = vld [vmem:[#allocation55_spill] sm:$0xff] }
 0x7c1   : > { %v3562_v7 = vadd.f32 %v16650_v54, %v17655_v34  ;;  %v3532_v34 = vadd.f32 %v16650_v54, %v17658_v46 }
 0x7c2   : > { %8126 = vrot.lane.b32.xlu1 %v8035_v17, %s10437_s23 }
 0x7c3   : > { %v7963_v58 = vpop.permute.xlu1 %7962 }
 0x7c4   : > { %v8033_v16 = vmul.f32 %v16349_v60, %v7963_v58  ;;  %v16652_v50 = vpop.permute.xlu0 %6600  ;;  %v3594_v58 = vmul.f32 %v16229_v25, %v3562_v7  ;;  %v17659_v25 = vld [vmem:[#allocation5_spill] sm:$0xff] }
 0x7c6   : > { %8122 = vrot.lane.b32.xlu1 %v8033_v16, %s10437_s23  ;;  %v17657_v16 = vld [vmem:[#allocation65_spill] sm:$0xff]  ;;  %v5150_v9 = vadd.f32 %v16551_v10, %v3594_v58  ;;  %v17660_v10 = vld [vmem:[#allocation63_spill] sm:$0xff] }
 0x7c7   : > { %v16645_v39 = vpop.permute.xlu1 %6554  ;;  %v3534_v38 = vadd.f32 %v16650_v54, %v17657_v16 }
 0x7c8   : > { %v16658_v21 = vpop.permute.xlu0 %6596 }
 0x7c9   : > { %v3566_v4 = vmul.f32 %v15862_v30, %v3534_v38  ;;  %v17662_v38 = vld [vmem:[#allocation36_spill] sm:$0xff] }
 0x7cb   : > { %v16656_v17 = vpop.permute.xlu1 %6550  ;;  %v5122_v7 = vadd.f32 %v17659_v25, %v3566_v4 }
 0x7cc   : > { %17656 = vst [vmem:[#allocation8_spill] sm:$0xff] %v16656_v17  ;;  %v6609_v32 = vpop.permute.xlu0 %6608 }
 0x7cd   : > { %v16664_v49 = vadd.f32 %v6609_v32, %v5150_v9  ;;  %v3538_v9 = vadd.f32 %v16650_v54, %v17660_v10  ;;  %v3564_v32 = vmul.f32 %v15874_v19, %v3532_v34  ;;  %v6646_v58 = vadd.f32 %v16579_v29, %v5122_v7  ;;  %v17663_v7 = vld [vmem:[#allocation84_spill] sm:$0xff] }
 0x7cf   : > { %v7975_v60 = vpop.permute.xlu1 %7974  ;;  %v3570_v29 = vmul.f32 %v15906_v18, %v3538_v9 }
 0x7d0   : > { %v16670_v17 = vpop.permute.xlu0 %6604  ;;  %v8039_v46 = vmul.f32 %v16384_v24, %v7975_v60  ;;  %v3536_v60 = vadd.f32 %v16650_v54, %v17662_v38 }
 0x7d1   : > { %v5126_v10 = vadd.f32 %v17663_v7, %v3570_v29 }
 0x7d3   : > { %v7971_v61 = vpop.permute.xlu1 %7970 }
 0x7d4   : > { %v8037_v14 = vmul.f32 %v16399_v51, %v7971_v61  ;;  %v8077_v30 = vpop.permute.xlu0 %8076 }
 0x7d5   : > { %v8170_v61 = vadd.f32 %v8077_v30, %v6646_v58  ;;  %v17664_v58 = vld [vmem:[#allocation64_spill] sm:$0xff]  ;;  %v3568_v30 = vmul.f32 %v15919_v36, %v3536_v60 }
 0x7d6   : > { %8130 = vrot.lane.b32.xlu1 %v8037_v14, %s10437_s23  ;;  %v17661_v14 = vld [vmem:[#allocation51_spill] sm:$0xff] }
 0x7d7   : > { %v16674_v16 = vpop.permute.xlu1 %6562  ;;  %v5120_v4 = vadd.f32 %v17661_v14, %v3564_v32  ;;  %8203 = vst.msk [vmem:[%s16686_s28 + $0x10] sm:$0xff] %vm8200_vm2, %v8170_v61  ;;  %v6650_v14 = vadd.f32 %v16598_v42, %v5126_v10  ;;  %v17665_v61 = vld [vmem:[#allocation89_spill] sm:$0xff] }
 0x7d8   : > { %v8073_v25 = vpop.permute.xlu0 %8072  ;;  %v3540_v38 = vadd.f32 %v16650_v54, %v17665_v61 }
 0x7d9   : > { %v6644_v34 = vadd.f32 %v16584_v20, %v5120_v4  ;;  %v5124_v20 = vadd.f32 %v16355_v28, %v3568_v30  ;;  %v17666_v28 = vld [vmem:[#allocation68_spill] sm:$0xff] }
 0x7da   : > { %8134 = vrot.lane.b32.xlu1 %v8039_v46, %s10437_s23  ;;  %v3542_v46 = vadd.f32 %v16650_v54, %v17664_v58  ;;  %v3572_v7 = vmul.f32 %v15960_v13, %v3540_v38 }
 0x7db   : > { %v16690_v19 = vpop.permute.xlu1 %6558  ;;  %v8168_v51 = vadd.f32 %v8073_v25, %v6644_v34  ;;  %v6648_v34 = vadd.f32 %v16604_v44, %v5124_v20  ;;  %v3546_v25 = vadd.f32 %v16650_v54, %v17666_v28 }
 0x7dc   : > { %v8085_v18 = vpop.permute.xlu0 %8084  ;;  %v3574_v29 = vmul.f32 %v15947_v52, %v3542_v46  ;;  %v5128_v44 = vadd.f32 %v16392_v57, %v3572_v7  ;;  %v17668_v57 = vld [vmem:[#allocation42_spill] sm:$0xff] }
 0x7dd   : > { %8201 = vst.msk [vmem:[%s16686_s28] sm:$0xff] %vm8200_vm2, %v8168_v51  ;;  %v8174_v9 = vadd.f32 %v8085_v18, %v6650_v14  ;;  %v3578_v14 = vmul.f32 %v16000_v48, %v3546_v25  ;;  %v3550_v61 = vadd.f32 %v16650_v54, %v17668_v57  ;;  %v17673_v57 = vld [vmem:[#allocation58_spill] sm:$0xff] }
 0x7de   : > { %v5130_v51 = vadd.f32 %v16377_v15, %v3574_v29  ;;  %v17667_v15 = vld [vmem:[#allocation45_spill] sm:$0xff]  ;;  %v6652_v18 = vadd.f32 %v16616_v55, %v5128_v44 }
 0x7df   : > { %v16699_v32 = vpop.permute.xlu1 %6570  ;;  %8207 = vst.msk [vmem:[%s16686_s28 + $0x30] sm:$0xff] %vm8200_vm2, %v8174_v9  ;;  %v3544_v30 = vadd.f32 %v16650_v54, %v17667_v15 }
 0x7e0   : > { %v8081_v36 = vpop.permute.xlu0 %8080  ;;  %v6654_v10 = vadd.f32 %v16610_v11, %v5130_v51  ;;  %v5134_v11 = vadd.f32 %v16425_v3, %v3578_v14  ;;  %v17669_v3 = vld [vmem:[#allocation40_spill] sm:$0xff] }
 0x7e1   : > { %v8172_v42 = vadd.f32 %v8081_v36, %v6648_v34  ;;  %v3576_v38 = vmul.f32 %v16016_v12, %v3544_v30  ;;  %v3548_v51 = vadd.f32 %v16650_v54, %v17669_v3 }
 0x7e2   : > { %v6658_v29 = vadd.f32 %v16620_v1, %v5134_v11 }
 0x7e3   : > { %v16708_v4 = vpop.permute.xlu1 %6566  ;;  %8205 = vst.msk [vmem:[%s16686_s28 + $0x20] sm:$0xff] %vm8200_vm2, %v8172_v42  ;;  %v5132_v55 = vadd.f32 %v16435_v35, %v3576_v38  ;;  %v3582_v42 = vmul.f32 %v16058_v47, %v3550_v61  ;;  %v17670_v35 = vld [vmem:[#allocation41_spill] sm:$0xff]  ;;  %v3563_v61 = vadd.f32 %v16650_v54, %v17673_v57 }
 0x7e4   : > { %v8093_v52 = vpop.permute.xlu0 %8092 }
 0x7e5   : > { %v8178_v58 = vadd.f32 %v8093_v52, %v6654_v10  ;;  %v6656_v28 = vadd.f32 %v16624_v41, %v5132_v55  ;;  %v5138_v1 = vadd.f32 %v16461_v37, %v3582_v42  ;;  %v3554_v10 = vadd.f32 %v16650_v54, %v17670_v35  ;;  %v17671_v37 = vld [vmem:[#allocation46_spill] sm:$0xff] }
 0x7e6   : > { %v3580_v52 = vmul.f32 %v16074_v43, %v3548_v51  ;;  %v3552_v30 = vadd.f32 %v16650_v54, %v17671_v37  ;;  %v3595_v42 = vmul.f32 %v16384_v24, %v3563_v61  ;;  %v17681_v61 = vld [vmem:[#allocation88_spill] sm:$0xff] }
 0x7e7   : > { %v16717_v60 = vpop.permute.xlu1 %6578  ;;  %8211 = vst.msk [vmem:[%s16686_s28 + $0x50] sm:$0xff] %vm8200_vm2, %v8178_v58  ;;  %v6662_v44 = vadd.f32 %v16630_v27, %v5138_v1  ;;  %v3586_v14 = vmul.f32 %v16109_v26, %v3554_v10 }
 0x7e8   : > { %v8089_v13 = vpop.permute.xlu0 %8088  ;;  %v5136_v41 = vadd.f32 %v16471_v56, %v3580_v52  ;;  %v17672_v56 = vld [vmem:[#allocation74_spill] sm:$0xff]  ;;  %v3584_v38 = vmul.f32 %v16129_v63, %v3552_v30 }
 0x7e9   : > { %v8176_v20 = vadd.f32 %v8089_v13, %v6652_v18  ;;  %v5142_v27 = vadd.f32 %v16491_v33, %v3586_v14 }
 0x7ea   : > { %v6660_v18 = vadd.f32 %v16635_v0, %v5136_v41  ;;  %v17678_v41 = vld [vmem:[#allocation34_spill] sm:$0xff] }
 0x7eb   : > { %v16726_v46 = vpop.permute.xlu1 %6574  ;;  %8209 = vst.msk [vmem:[%s16686_s28 + $0x40] sm:$0xff] %vm8200_vm2, %v8176_v20  ;;  %v3558_v20 = vadd.f32 %v16650_v54, %v17672_v56  ;;  %v6666_v26 = vadd.f32 %v16638_v59, %v5142_v27  ;;  %v17680_v27 = vld [vmem:[#allocation43_spill] sm:$0xff] }
 0x7ec   : > { %v8101_v48 = vpop.permute.xlu0 %8100 }
 0x7ed   : > { %v8182_v34 = vadd.f32 %v8101_v48, %v6658_v29  ;;  %v17674_v29 = vld [vmem:[#allocation9_spill] sm:$0xff]  ;;  %v3590_v51 = vmul.f32 %v16169_v53, %v3558_v20 }
 0x7ee   : > { %v5140_v48 = vadd.f32 %v17674_v29, %v3584_v38  ;;  %v17683_v29 = vld [vmem:[#allocation8_spill] sm:$0xff] }
 0x7ef   : > { %v16735_v9 = vpop.permute.xlu1 %6586  ;;  %8215 = vst.msk [vmem:[%s16686_s28 + $0x70] sm:$0xff] %vm8200_vm2, %v8182_v34  ;;  %v17675_v34 = vld [vmem:[#allocation53_spill] sm:$0xff]  ;;  %v5146_v1 = vadd.f32 %v16523_v22, %v3590_v51  ;;  %v3533_v22 = vadd.f32 %v16650_v54, %v17678_v41  ;;  %v17690_v41 = vld [vmem:[#allocation90_spill] sm:$0xff] }
 0x7f0   : > { %v8097_v12 = vpop.permute.xlu0 %8096  ;;  %v3556_v3 = vadd.f32 %v16650_v54, %v17675_v34  ;;  %v6664_v63 = vadd.f32 %v16642_v5, %v5140_v48  ;;  %v17677_v5 = vld [vmem:[#allocation69_spill] sm:$0xff]  ;;  %v17684_v34 = vld [vmem:[#allocation92_spill] sm:$0xff] }
 0x7f1   : > { %v8180_v25 = vadd.f32 %v8097_v12, %v6656_v28  ;;  %v17676_v28 = vld [vmem:[#allocation91_spill] sm:$0xff]  ;;  %v6670_v53 = vadd.f32 %v16652_v50, %v5146_v1 }
 0x7f2   : > { %v3535_v12 = vadd.f32 %v16650_v54, %v17676_v28  ;;  %v3588_v52 = vmul.f32 %v16189_v45, %v3556_v3  ;;  %v17679_v50 = vld [vmem:[#allocation27_spill] sm:$0xff] }
 0x7f3   : > { %v16744_v36 = vpop.permute.xlu1 %6582  ;;  %8213 = vst.msk [vmem:[%s16686_s28 + $0x60] sm:$0xff] %vm8200_vm2, %v8180_v25  ;;  %v5151_v25 = vadd.f32 %v16626_v8, %v3595_v42 }
 0x7f4   : > { %v8109_v47 = vpop.permute.xlu0 %8108  ;;  %v3567_v8 = vmul.f32 %v15986_v31, %v3535_v12  ;;  %v3565_v31 = vmul.f32 %v16004_v40, %v3533_v22 }
 0x7f5   : > { %v8186_v58 = vadd.f32 %v8109_v47, %v6662_v44  ;;  %v3560_v44 = vadd.f32 %v16650_v54, %v17677_v5  ;;  %v17689_v5 = vld [vmem:[#allocation73_spill] sm:$0xff] }
 0x7f6   : > { %v5123_v30 = vadd.f32 %v17679_v50, %v3567_v8  ;;  %v17691_v8 = vld [vmem:[#allocation67_spill] sm:$0xff] }
 0x7f7   : > { %v16753_v7 = vpop.permute.xlu1 %6594  ;;  %8219 = vst.msk [vmem:[%s16686_s28 + $0x90] sm:$0xff] %vm8200_vm2, %v8186_v58  ;;  %v5144_v58 = vadd.f32 %v16530_v6, %v3588_v52  ;;  %v17688_v52 = vld [vmem:[#allocation52_spill] sm:$0xff] }
 0x7f8   : > { %v8105_v43 = vpop.permute.xlu0 %8104  ;;  %v6647_v6 = vadd.f32 %v16645_v39, %v5123_v30 }
 0x7f9   : > { %v8184_v13 = vadd.f32 %v8105_v43, %v6660_v18  ;;  %v6668_v14 = vadd.f32 %v16658_v21, %v5144_v58  ;;  %v3592_v18 = vmul.f32 %v16249_v23, %v3560_v44  ;;  %v5121_v21 = vadd.f32 %v17681_v61, %v3565_v31  ;;  %v17695_v31 = vld [vmem:[#allocation83_spill] sm:$0xff] }
 0x7fa   : > { %v3547_v58 = vadd.f32 %v16650_v54, %v17691_v8  ;;  %v17710_v8 = vld [vmem:[#allocation79_spill] sm:$0xff] }
 0x7fb   : > { %v16762_v15 = vpop.permute.xlu1 %6590  ;;  %8217 = vst.msk [vmem:[%s16686_s28 + $0x80] sm:$0xff] %vm8200_vm2, %v8184_v13  ;;  %v3539_v13 = vadd.f32 %v16650_v54, %v17680_v27  ;;  %v5148_v20 = vadd.f32 %v16558_v2, %v3592_v18  ;;  %v6645_v39 = vadd.f32 %v17683_v29, %v5121_v21  ;;  %v17693_v18 = vld [vmem:[#allocation11_spill] sm:$0xff]  ;;  %v17694_v27 = vld [vmem:[#allocation44_spill] sm:$0xff] }
 0x7fc   : > { %v8117_v0 = vpop.permute.xlu0 %8116  ;;  %v17697_v21 = vld [vmem:[#allocation48_spill] sm:$0xff]  ;;  %v17699_v29 = vld [vmem:[#allocation15_spill] sm:$0xff] }
 0x7fd   : > { %v8190_v33 = vadd.f32 %v8117_v0, %v6666_v26  ;;  %v6672_v23 = vadd.f32 %v16670_v17, %v5148_v20  ;;  %v17682_v26 = vld [vmem:[#allocation47_spill] sm:$0xff]  ;;  %v3571_v40 = vmul.f32 %v16042_v62, %v3539_v13  ;;  %v17685_v17 = vld [vmem:[#allocation37_spill] sm:$0xff]  ;;  %v3545_v13 = vadd.f32 %v16650_v54, %v17694_v27 }
 0x7fe   : > { %v3537_v0 = vadd.f32 %v16650_v54, %v17682_v26  ;;  %v3543_v42 = vadd.f32 %v16650_v54, %v17685_v17  ;;  %v17702_v17 = vld [vmem:[#allocation93_spill] sm:$0xff] }
 0x7ff   : > { %v16771_v11 = vpop.permute.xlu1 %6602  ;;  %8223 = vst.msk [vmem:[%s16686_s28 + $0xb0] sm:$0xff] %vm8200_vm2, %v8190_v33  ;;  %v5127_v3 = vadd.f32 %v17684_v34, %v3571_v40 }
 0x800   : > { %v8113_v59 = vpop.permute.xlu0 %8112  ;;  %v3575_v44 = vmul.f32 %v17689_v5, %v3543_v42 }
 0x801   : > { %v8188_v35 = vadd.f32 %v8113_v59, %v6664_v63  ;;  %v17686_v63 = vld [vmem:[#allocation77_spill] sm:$0xff]  ;;  %v6651_v62 = vadd.f32 %v16674_v16, %v5127_v3 }
 0x802   : > { %v3569_v59 = vmul.f32 %v17686_v63, %v3537_v0  ;;  %v5131_v22 = vadd.f32 %v17690_v41, %v3575_v44  ;;  %v17703_v63 = vld [vmem:[#allocation56_spill] sm:$0xff] }
 0x803   : > { %v16782_v55 = vpop.permute.xlu1 %6598  ;;  %8221 = vst.msk [vmem:[%s16686_s28 + $0xa0] sm:$0xff] %vm8200_vm2, %v8188_v35 }
 0x804   : > { %v8125_v47 = vpop.permute.xlu0 %8124  ;;  %v6655_v30 = vadd.f32 %v16699_v32, %v5131_v22  ;;  %v17709_v22 = vld [vmem:[#allocation70_spill] sm:$0xff] }
 0x805   : > { %v8194_v37 = vadd.f32 %v8125_v47, %v6670_v53  ;;  %v3541_v53 = vadd.f32 %v16650_v54, %v17688_v52 }
 0x807   : > { %v6611_v10 = vpop.permute.xlu1 %6610  ;;  %8227 = vst.msk [vmem:[%s16686_s28 + $0xd0] sm:$0xff] %vm8200_vm2, %v8194_v37  ;;  %v17692_v37 = vld [vmem:[#allocation80_spill] sm:$0xff] }
 0x808   : > { %v16799_v24 = vadd.f32 %v6611_v10, %v5151_v25  ;;  %v8121_v43 = vpop.permute.xlu0 %8120  ;;  %v17687_v25 = vld [vmem:[#allocation12_spill] sm:$0xff]  ;;  %v3573_v50 = vmul.f32 %v17692_v37, %v3541_v53  ;;  %v17707_v53 = vld [vmem:[#allocation78_spill] sm:$0xff] }
 0x809   : > { %v8192_v56 = vadd.f32 %v8121_v43, %v6668_v14  ;;  %v5125_v35 = vadd.f32 %v17687_v25, %v3569_v59  ;;  %v3555_v59 = vadd.f32 %v16650_v54, %v17703_v63  ;;  %v17705_v25 = vld [vmem:[#allocation17_spill] sm:$0xff] }
 0x80a   : > { %v5129_v43 = vadd.f32 %v17693_v18, %v3573_v50  ;;  %v17712_v18 = vld [vmem:[#allocation72_spill] sm:$0xff] }
 0x80b   : > { %v16807_v45 = vpop.permute.xlu1 %6606  ;;  %8225 = vst.msk [vmem:[%s16686_s28 + $0xc0] sm:$0xff] %vm8200_vm2, %v8192_v56  ;;  %v6649_v16 = vadd.f32 %v16690_v19, %v5125_v35  ;;  %v3587_v5 = vmul.f32 %v17707_v53, %v3555_v59 }
 0x80c   : > { %v6653_v56 = vadd.f32 %v16708_v4, %v5129_v43  ;;  %v3557_v43 = vadd.f32 %v16650_v54, %v17712_v18 }
 0x80d   : > { %v8129_v48 = vpop.permute.xlu0 %8128 }
 0x80e   : > { %v8196_v2 = vadd.f32 %v8129_v48, %v6672_v23  ;;  %v17698_v23 = vld [vmem:[#allocation85_spill] sm:$0xff]  ;;  %v17700_v48 = vld [vmem:[#allocation54_spill] sm:$0xff] }
 0x80f   : > { %v8079_v57 = vpop.permute.xlu1 %8078  ;;  %v3577_v26 = vmul.f32 %v17698_v23, %v3545_v13  ;;  %v17717_v23 = vld [vmem:[#allocation49_spill] sm:$0xff] }
 0x810   : > { %v8171_v38 = vadd.f32 %v8079_v57, %v6647_v6  ;;  %8229 = vst.msk [vmem:[%s16686_s28 + $0xe0] sm:$0xff] %vm8200_vm2, %v8196_v2  ;;  %v3579_v6 = vmul.f32 %v17695_v31, %v3547_v58  ;;  %v17696_v57 = vld [vmem:[#allocation87_spill] sm:$0xff]  ;;  %v3549_v2 = vadd.f32 %v16650_v54, %v17700_v48 }
 0x811   : > { %v8133_v28 = vpop.permute.xlu0 %8132 }
 0x812   : > { %8204 = vst.msk [vmem:[%s16686_s28 + $0x18] sm:$0xff] %vm8200_vm2, %v8171_v38  ;;  %v8198_v12 = vadd.f32 %v8133_v28, %v16664_v49  ;;  %v5135_v61 = vadd.f32 %v17696_v57, %v3579_v6  ;;  %v3551_v38 = vadd.f32 %v16650_v54, %v17697_v21  ;;  %v17714_v6 = vld [vmem:[#allocation13_spill] sm:$0xff] }
 0x813   : > { %v8075_v33 = vpop.permute.xlu1 %8074 }
 0x814   : > { %v8169_v51 = vadd.f32 %v8075_v33, %v6645_v39  ;;  %8231 = vst.msk [vmem:[%s16686_s28 + $0xf0] sm:$0xff] %vm8200_vm2, %v8198_v12  ;;  %v6659_v0 = vadd.f32 %v16717_v60, %v5135_v61  ;;  %v5133_v39 = vadd.f32 %v17699_v29, %v3577_v26  ;;  %v17701_v33 = vld [vmem:[#allocation76_spill] sm:$0xff] }
 0x815   : > { %v3583_v34 = vmul.f32 %v17701_v33, %v3551_v38 }
 0x816   : > { %8202 = vst.msk [vmem:[%s16686_s28 + $0x8] sm:$0xff] %vm8200_vm2, %v8169_v51  ;;  %v6657_v3 = vadd.f32 %v16726_v46, %v5133_v39 }
 0x817   : > { %v8087_v1 = vpop.permute.xlu1 %8086  ;;  %v5139_v42 = vadd.f32 %v17702_v17, %v3583_v34 }
 0x818   : > { %v8175_v10 = vadd.f32 %v8087_v1, %v6651_v62  ;;  %v17704_v62 = vld [vmem:[#allocation86_spill] sm:$0xff] }
 0x819   : > { %v3581_v28 = vmul.f32 %v17704_v62, %v3549_v2  ;;  %v6663_v12 = vadd.f32 %v16735_v9, %v5139_v42 }
 0x81a   : > { %8208 = vst.msk [vmem:[%s16686_s28 + $0x38] sm:$0xff] %vm8200_vm2, %v8175_v10  ;;  %v17706_v10 = vld [vmem:[#allocation62_spill] sm:$0xff] }
 0x81b   : > { %v8083_v47 = vpop.permute.xlu1 %8082  ;;  %v5137_v35 = vadd.f32 %v17705_v25, %v3581_v28  ;;  %v3553_v52 = vadd.f32 %v16650_v54, %v17706_v10 }
 0x81c   : > { %v8173_v49 = vadd.f32 %v8083_v47, %v6649_v16  ;;  %v17708_v47 = vld [vmem:[#allocation20_spill] sm:$0xff] }
 0x81d   : > { %v6661_v44 = vadd.f32 %v16744_v36, %v5137_v35  ;;  %v5143_v41 = vadd.f32 %v17708_v47, %v3587_v5  ;;  %v3585_v58 = vmul.f32 %v17710_v8, %v3553_v52 }
 0x81e   : > { %8206 = vst.msk [vmem:[%s16686_s28 + $0x28] sm:$0xff] %vm8200_vm2, %v8173_v49  ;;  %v3559_v49 = vadd.f32 %v16650_v54, %v17709_v22 }
 0x81f   : > { %v8095_v14 = vpop.permute.xlu1 %8094  ;;  %v6667_v37 = vadd.f32 %v16753_v7, %v5143_v41 }
 0x820   : > { %v8179_v19 = vadd.f32 %v8095_v14, %v6655_v30  ;;  %v17711_v30 = vld [vmem:[#allocation82_spill] sm:$0xff] }
 0x821   : > { %v5141_v14 = vadd.f32 %v17711_v30, %v3585_v58 }
 0x822   : > { %8212 = vst.msk [vmem:[%s16686_s28 + $0x58] sm:$0xff] %vm8200_vm2, %v8179_v19  ;;  %v17713_v19 = vld [vmem:[#allocation81_spill] sm:$0xff] }
 0x823   : > { %v8091_v20 = vpop.permute.xlu1 %8090  ;;  %v3591_v27 = vmul.f32 %v17713_v19, %v3559_v49  ;;  %v6665_v13 = vadd.f32 %v16762_v15, %v5141_v14 }
 0x824   : > { %v8177_v32 = vadd.f32 %v8091_v20, %v6653_v56  ;;  %v17715_v20 = vld [vmem:[#allocation21_spill] sm:$0xff] }
 0x825   : > { %v5147_v7 = vadd.f32 %v17714_v6, %v3591_v27  ;;  %v3589_v57 = vmul.f32 %v17715_v20, %v3557_v43 }
 0x826   : > { %8210 = vst.msk [vmem:[%s16686_s28 + $0x48] sm:$0xff] %vm8200_vm2, %v8177_v32  ;;  %v17716_v32 = vld [vmem:[#allocation71_spill] sm:$0xff] }
 0x827   : > { %v8103_v40 = vpop.permute.xlu1 %8102  ;;  %v6671_v61 = vadd.f32 %v16771_v11, %v5147_v7  ;;  %v3561_v21 = vadd.f32 %v16650_v54, %v17716_v32  ;;  %v5145_v15 = vadd.f32 %v17717_v23, %v3589_v57  ;;  %v17719_v11 = vld [vmem:[#allocation4_spill] sm:$0xff] }
 0x828   : > { %v8183_v4 = vadd.f32 %v8103_v40, %v6659_v0  ;;  %v17718_v40 = vld [vmem:[#allocation7_spill] sm:$0xff] }
 0x829   : > { %v6669_v0 = vadd.f32 %v16782_v55, %v5145_v15  ;;  %v3593_v29 = vmul.f32 %v17718_v40, %v3561_v21 }
 0x82a   : > { %8216 = vst.msk [vmem:[%s16686_s28 + $0x78] sm:$0xff] %vm8200_vm2, %v8183_v4 }
 0x82b   : > { %v8099_v51 = vpop.permute.xlu1 %8098  ;;  %v5149_v48 = vadd.f32 %v17719_v11, %v3593_v29 }
 0x82c   : > { %v8181_v60 = vadd.f32 %v8099_v51, %v6657_v3 }
 0x82d   : > { %v6673_v2 = vadd.f32 %v16807_v45, %v5149_v48 }
 0x82e   : > { %8214 = vst.msk [vmem:[%s16686_s28 + $0x68] sm:$0xff] %vm8200_vm2, %v8181_v60 }
 0x82f   : > { %v8111_v1 = vpop.permute.xlu1 %8110 }
 0x830   : > { %v8187_v46 = vadd.f32 %v8111_v1, %v6663_v12 }
 0x832   : > { %8220 = vst.msk [vmem:[%s16686_s28 + $0x98] sm:$0xff] %vm8200_vm2, %v8187_v46 }
 0x833   : > { %v8107_v16 = vpop.permute.xlu1 %8106 }
 0x834   : > { %v8185_v9 = vadd.f32 %v8107_v16, %v6661_v44 }
 0x836   : > { %8218 = vst.msk [vmem:[%s16686_s28 + $0x88] sm:$0xff] %vm8200_vm2, %v8185_v9 }
 0x837   : > { %v8119_v50 = vpop.permute.xlu1 %8118 }
 0x838   : > { %v8191_v36 = vadd.f32 %v8119_v50, %v6667_v37 }
 0x83a   : > { %8224 = vst.msk [vmem:[%s16686_s28 + $0xb8] sm:$0xff] %vm8200_vm2, %v8191_v36 }
 0x83b   : > { %v8115_v31 = vpop.permute.xlu1 %8114 }
 0x83c   : > { %v8189_v56 = vadd.f32 %v8115_v31, %v6665_v13 }
 0x83e   : > { %8222 = vst.msk [vmem:[%s16686_s28 + $0xa8] sm:$0xff] %vm8200_vm2, %v8189_v56 }
 0x83f   : > { %v8127_v38 = vpop.permute.xlu1 %8126 }
 0x840   : > { %v8195_v26 = vadd.f32 %v8127_v38, %v6671_v61 }
 0x842   : > { %8228 = vst.msk [vmem:[%s16686_s28 + $0xd8] sm:$0xff] %vm8200_vm2, %v8195_v26 }
 0x843   : > { %v8123_v39 = vpop.permute.xlu1 %8122 }
 0x844   : > { %v8193_v4 = vadd.f32 %v8123_v39, %v6669_v0 }
 0x846   : > { %8226 = vst.msk [vmem:[%s16686_s28 + $0xc8] sm:$0xff] %vm8200_vm2, %v8193_v4 }
 0x848   : > { %v8131_v54 = vpop.permute.xlu1 %8130 }
 0x849   : > { %v8197_v33 = vadd.f32 %v8131_v54, %v6673_v2 }
 0x84b   : > { %8230 = vst.msk [vmem:[%s16686_s28 + $0xe8] sm:$0xff] %vm8200_vm2, %v8197_v33 }
 0x84c   : > { %v8135_v34 = vpop.permute.xlu1 %8134 }
 0x84d   : > { %v8199_v3 = vadd.f32 %v8135_v34, %v16799_v24 }
 0x84f   : > { %8232 = vst.msk [vmem:[%s16686_s28 + $0xf8] sm:$0xff] %vm8200_vm2, %v8199_v3 }
 0x850 PF: > { %s20_s13 = sadd.s32 1, %s10428_s13  }
 0x851   : > { %p17_p4 = scmp.ge.s32.totalorder %s20_s13, 4  }
 0x853   :  { %19 = sbr.rel (!%p17_p4) target bundleno = 1 (0x1), region = 111 }

</bundles_post_ra>
